<compile_context>
chip_gen: v6e
topology: v6e:2x2x1
jax: 0.10.0
libtpu: 0.0.40
codegen_flags: <defaults>
</compile_context>

<pallas_src>
import jax
import jax.numpy as jnp
from jax import lax
from jax.experimental import pallas as pl
from jax.experimental.pallas import tpu as pltpu


# ----------------------------- fused whole-network kernel -----------------------------

def _make_msrresnet_kernel(P_pad, Wp, in_nc, out_nc, nf, nb):
    def lrelu(a):
        return jnp.where(a >= 0, a, 0.1 * a)                 # LeakyReLU(0.1)

    def conv3x3(src, w, b):
        """3x3 'same' conv in channels-first padded-flat coordinates.

        src: (cin, P_pad) fp32 with a zero halo (and zero pad lanes).
        w  : (9, cout, cin) bf16, tap-major (dy, dx).
        b  : (cout, 1) fp32.
        Returns (cout, P_pad) fp32.  Halo / pad lanes contain garbage (wrapped rolls) and
        must be masked by the caller; interior lanes are exact 'same'-padded conv outputs.
        """
        total = None
        for dy in range(3):
            for dx in range(3):
                tap = dy * 3 + dx
                # Output flat position q reads input q - s, s = (1-dy)*Wp + (1-dx).
                # Implemented as a lane roll by s (mod P_pad); wrapped lanes only ever land
                # on masked halo outputs.  Roll is fp32 (32-bit lane rotate), cast to bf16
                # right at the MXU.
                s = ((1 - dy) * Wp + (1 - dx)) % P_pad
                shifted = src if s == 0 else pltpu.roll(src, shift=s, axis=1)
                d = jnp.dot(w[tap], shifted.astype(jnp.bfloat16),
                            preferred_element_type=jnp.float32)
                total = d if total is None else total + d
        return total + b

    def kernel(mask_ref, x_ref,
               wf_ref, bf_ref,
               w1_ref, b1_ref, w2_ref, b2_ref,
               whr_ref, bhr_ref, wl_ref, bl_ref,
               y_ref, fea_ref):
        interior = mask_ref[...] != 0.0                      # (1, P_pad): True on real pixels

        # --- fea = lrelu(conv_first(x)) ---
        a = conv3x3(x_ref[...], wf_ref[...], bf_ref[...])
        fea_ref[...] = jnp.where(interior, lrelu(a), 0.0)    # keep the halo exactly zero

        # --- recon_trunk: nb x (fea = fea + conv2(relu(conv1(fea)))) ---
        def block(i, carry):
            a1 = conv3x3(fea_ref[...], w1_ref[i], b1_ref[i])
            h = jnp.where(interior, jnp.maximum(a1, 0.0), 0.0)
            a2 = conv3x3(h, w2_ref[i], b2_ref[i])
            fea_ref[...] = fea_ref[...] + jnp.where(interior, a2, 0.0)
            return carry
        lax.fori_loop(0, nb, block, 0)

        # --- out = conv_last(lrelu(HRconv(fea))) ---
        a = conv3x3(fea_ref[...], whr_ref[...], bhr_ref[...])
        hr = jnp.where(interior, lrelu(a), 0.0)
        y = conv3x3(hr, wl_ref[...], bl_ref[...])
        y_ref[...] = jnp.where(interior, y, 0.0).astype(y_ref.dtype)

    return kernel


def _vmem_capacity_bytes():
    try:
        cap = getattr(pltpu.get_tpu_info(), "vmem_capacity_bytes", None)
        if cap:
            return int(cap)
    except Exception:
        pass
    return 64 * 1024 * 1024          # conservative fallback (v7x per-TC size)


def msrresnet_forward(params, x_nchw):
    """Forward pass of the given MSRResNet (no upsampling path). NCHW in / NCHW out."""
    N, in_nc, H, W = x_nchw.shape
    nf = params["w_hr"].shape[1]
    out_nc = params["w_last"].shape[1]
    nb = params["w1"].shape[0]
    Hp, Wp = H + 2, W + 2
    P = Hp * Wp
    P_pad = ((P + 127) // 128) * 128                 # lane-dense flat spatial extent

    # Generation-aware VMEM limit + residency guard for the fully-fused, trunk-resident plan.
    vmem_cap = _vmem_capacity_bytes()
    vmem_limit = max(min((vmem_cap * 3) // 4, 100 * 1024 * 1024), 32 * 1024 * 1024)
    f32 = 4
    weight_bytes = 2 * 9 * (nf * in_nc + 2 * nb * nf * nf + nf * nf + out_nc * nf)   # bf16
    bias_bytes = f32 * (nf * (2 * nb + 2) + out_nc)
    act_bytes = f32 * nf * P_pad                      # resident fea scratch
    temp_bytes = 5 * f32 * nf * P_pad                 # per-conv src/rolled/acc/h temporaries
    io_bytes = 2 * f32 * P_pad * (in_nc + out_nc + 1)
    est = act_bytes + temp_bytes + 2 * (weight_bytes + bias_bytes) + io_bytes
    if est > (vmem_limit * 8) // 10:
        # TODO(synk): spatial row-slab grid axis with 1-row halo exchange for large images.
        raise ValueError(
            f"image too large for the fully VMEM-resident plan (~{est >> 20} MiB needed, "
            f"limit {vmem_limit >> 20} MiB); needs spatial row-slab tiling")

    # Host-side prep: pad the tiny in_nc-channel input spatially, flatten to channels-first
    # padded-flat, and zero-pad the flat axis to a multiple of 128 lanes.
    x_pad = jnp.pad(x_nchw, ((0, 0), (0, 0), (1, 1), (1, 1))).reshape(N, in_nc, P)
    x_pad = jnp.pad(x_pad, ((0, 0), (0, 0), (0, P_pad - P)))

    # 0/1 interior mask over padded-flat lane positions.
    q = jnp.arange(P_pad, dtype=jnp.int32)
    r, c = q // Wp, q % Wp
    mask = (((q < P) & (r >= 1) & (r <= H) & (c >= 1) & (c <= W))
            .astype(jnp.float32).reshape(1, P_pad))

    kernel = _make_msrresnet_kernel(P_pad, Wp, in_nc, out_nc, nf, nb)

    y_pad = pl.pallas_call(
        kernel,
        out_shape=jax.ShapeDtypeStruct((N, out_nc, P_pad), jnp.float32),
        grid=(N,),
        in_specs=[
            pl.BlockSpec((1, P_pad), lambda n: (0, 0)),                 # interior mask
            pl.BlockSpec((None, in_nc, P_pad), lambda n: (n, 0, 0)),    # padded input image
            pl.BlockSpec((9, nf, in_nc), lambda n: (0, 0, 0)),          # conv_first W (bf16)
            pl.BlockSpec((nf, 1), lambda n: (0, 0)),                    # conv_first b
            pl.BlockSpec((nb, 9, nf, nf), lambda n: (0, 0, 0, 0)),      # block conv1 W (pinned)
            pl.BlockSpec((nb, nf, 1), lambda n: (0, 0, 0)),             # block conv1 b
            pl.BlockSpec((nb, 9, nf, nf), lambda n: (0, 0, 0, 0)),      # block conv2 W (pinned)
            pl.BlockSpec((nb, nf, 1), lambda n: (0, 0, 0)),             # block conv2 b
            pl.BlockSpec((9, nf, nf), lambda n: (0, 0, 0)),             # HRconv      W
            pl.BlockSpec((nf, 1), lambda n: (0, 0)),                    # HRconv      b
            pl.BlockSpec((9, out_nc, nf), lambda n: (0, 0, 0)),         # conv_last   W
            pl.BlockSpec((out_nc, 1), lambda n: (0, 0)),                # conv_last   b
        ],
        out_specs=pl.BlockSpec((None, out_nc, P_pad), lambda n: (n, 0, 0)),
        scratch_shapes=[
            pltpu.VMEM((nf, P_pad), jnp.float32),   # fea: resident fp32 residual stream
        ],
        compiler_params=pltpu.CompilerParams(
            dimension_semantics=("parallel",),
            vmem_limit_bytes=int(vmem_limit),
        ),
    )(mask, x_pad,
      params["w_first"], params["b_first"],
      params["w1"], params["b1"], params["w2"], params["b2"],
      params["w_hr"], params["b_hr"],
      params["w_last"], params["b_last"])

    # channels-first padded-flat -> NCHW interior (cheap reshape + tiny slice on out_nc chans)
    return y_pad[:, :, :P].reshape(N, out_nc, Hp, Wp)[:, :, 1:H + 1, 1:W + 1]


# ----------------------------- parameter init (deterministic) -----------------------------

def _conv3x3_params(key, cin, cout, scale):
    """Kaiming-normal (fan_in) * scale weights, zero bias — mirrors mutil.initialize_weights.

    Weights are stored tap-major as (9, cout, cin) bf16 — exactly the per-tap lhs layout the
    kernel's accumulated MXU dots expect.  Biases are (cout, 1) fp32.
    """
    fan_in = 9 * cin
    w = jax.random.normal(key, (3, 3, cin, cout), jnp.float32) * (scale * jnp.sqrt(2.0 / fan_in))
    w9 = jnp.transpose(w, (0, 1, 3, 2)).reshape(9, cout, cin).astype(jnp.bfloat16)
    b = jnp.zeros((cout, 1), jnp.float32)
    return w9, b


def init_msrresnet_params(key, in_nc=3, out_nc=3, nf=64, nb=16):
    keys = jax.random.split(key, 2 * nb + 3)
    wf, bf = _conv3x3_params(keys[0], in_nc, nf, 0.1)
    w1s, b1s, w2s, b2s = [], [], [], []
    for i in range(nb):
        w1, b1 = _conv3x3_params(keys[1 + 2 * i], nf, nf, 0.1)
        w2, b2 = _conv3x3_params(keys[2 + 2 * i], nf, nf, 0.1)
        w1s.append(w1); b1s.append(b1); w2s.append(w2); b2s.append(b2)
    whr, bhr = _conv3x3_params(keys[2 * nb + 1], nf, nf, 0.1)
    wl, bl = _conv3x3_params(keys[2 * nb + 2], nf, out_nc, 0.1)
    return {
        "w_first": wf, "b_first": bf,
        "w1": jnp.stack(w1s), "b1": jnp.stack(b1s),       # (nb, 9, nf, nf) / (nb, nf, 1)
        "w2": jnp.stack(w2s), "b2": jnp.stack(b2s),
        "w_hr": whr, "b_hr": bhr,
        "w_last": wl, "b_last": bl,
    }


# ----------------------------- pure-JAX fp32 reference (NCHW) -----------------------------

def _conv3x3_ref(x, w9, b):
    cout, cin = w9.shape[1], w9.shape[2]
    w = jnp.transpose(w9.astype(jnp.float32).reshape(3, 3, cout, cin), (0, 1, 3, 2))  # HWIO
    y = lax.conv_general_dilated(x, w, (1, 1), "SAME",
                                 dimension_numbers=("NCHW", "HWIO", "NCHW"))
    return y + b.astype(jnp.float32).reshape(1, cout, 1, 1)


def msrresnet_ref(params, x):
    lrelu = lambda t: jnp.where(t >= 0, t, 0.1 * t)
    fea = lrelu(_conv3x3_ref(x, params["w_first"], params["b_first"]))
    out = fea
    for i in range(params["w1"].shape[0]):
        h = jnp.maximum(_conv3x3_ref(out, params["w1"][i], params["b1"][i]), 0.0)
        out = out + _conv3x3_ref(h, params["w2"][i], params["b2"][i])
    out = lrelu(_conv3x3_ref(out, params["w_hr"], params["b_hr"]))
    return _conv3x3_ref(out, params["w_last"], params["b_last"])


# ----------------------------- main -----------------------------

if __name__ == "__main__":
    key = jax.random.PRNGKey(0)
    k_params, k_x = jax.random.split(key)

    # Small, module-consistent configuration.
    in_nc, out_nc, nf, nb = 3, 3, 32, 4
    N, H, W = 2, 16, 16

    params = init_msrresnet_params(k_params, in_nc=in_nc, out_nc=out_nc, nf=nf, nb=nb)
    x = jax.random.normal(k_x, (N, in_nc, H, W), jnp.float32)   # NCHW, like the PyTorch module

    y = jax.block_until_ready(jax.jit(msrresnet_forward)(params, x))
    assert y.shape == (N, out_nc, H, W), y.shape

    y_ref = jax.block_until_ready(msrresnet_ref(params, x))
    max_ref = float(jnp.max(jnp.abs(y_ref)))
    max_err = float(jnp.max(jnp.abs(y - y_ref)))
    # bf16 MXU operands vs the fp32 reference -> small relative tolerance (not a bug).
    assert max_err <= 5e-2 * max_ref + 1e-5, f"max_err={max_err} max_ref={max_ref}"

    print("KERNEL_OK")
</pallas_src>

<mosaic_0001>
module attributes {stable_mosaic.version = 11 : i64} {
  func.func @kernel(%arg0: i32, %arg1: memref<1x384xf32, #tpu.memory_space<vmem>>, %arg2: memref<1x3x384xf32, #tpu.memory_space<vmem>>, %arg3: memref<9x32x3xbf16, #tpu.memory_space<vmem>>, %arg4: memref<32x1xf32, #tpu.memory_space<vmem>>, %arg5: memref<4x9x32x32xbf16, #tpu.memory_space<vmem>>, %arg6: memref<4x32x1xf32, #tpu.memory_space<vmem>>, %arg7: memref<4x9x32x32xbf16, #tpu.memory_space<vmem>>, %arg8: memref<4x32x1xf32, #tpu.memory_space<vmem>>, %arg9: memref<9x32x32xbf16, #tpu.memory_space<vmem>>, %arg10: memref<32x1xf32, #tpu.memory_space<vmem>>, %arg11: memref<9x3x32xbf16, #tpu.memory_space<vmem>>, %arg12: memref<3x1xf32, #tpu.memory_space<vmem>>, %arg13: memref<1x3x384xf32, #tpu.memory_space<vmem>>, %arg14: memref<32x384xf32, #tpu.memory_space<vmem>>) attributes {dimension_semantics = [#tpu.dimension_semantics<parallel>], iteration_bounds = array<i64: 2>, scalar_prefetch = 0 : i64, scratch_operands = 1 : i64, tpu.core_type = #tpu.core_type<tc>, window_params = [{pipeline_mode = #tpu.pipeline_mode<synchronous>, transform_indices = @transform_0, window_bounds = array<i64: 1, 384>}, {transform_indices = @transform_1, window_bounds = array<i64: 1, 3, 384>}, {pipeline_mode = #tpu.pipeline_mode<synchronous>, transform_indices = @transform_2, window_bounds = array<i64: 9, 32, 3>}, {pipeline_mode = #tpu.pipeline_mode<synchronous>, transform_indices = @transform_3, window_bounds = array<i64: 32, 1>}, {pipeline_mode = #tpu.pipeline_mode<synchronous>, transform_indices = @transform_4, window_bounds = array<i64: 4, 9, 32, 32>}, {pipeline_mode = #tpu.pipeline_mode<synchronous>, transform_indices = @transform_5, window_bounds = array<i64: 4, 32, 1>}, {pipeline_mode = #tpu.pipeline_mode<synchronous>, transform_indices = @transform_6, window_bounds = array<i64: 4, 9, 32, 32>}, {pipeline_mode = #tpu.pipeline_mode<synchronous>, transform_indices = @transform_7, window_bounds = array<i64: 4, 32, 1>}, {pipeline_mode = #tpu.pipeline_mode<synchronous>, transform_indices = @transform_8, window_bounds = array<i64: 9, 32, 32>}, {pipeline_mode = #tpu.pipeline_mode<synchronous>, transform_indices = @transform_9, window_bounds = array<i64: 32, 1>}, {pipeline_mode = #tpu.pipeline_mode<synchronous>, transform_indices = @transform_10, window_bounds = array<i64: 9, 3, 32>}, {pipeline_mode = #tpu.pipeline_mode<synchronous>, transform_indices = @transform_11, window_bounds = array<i64: 3, 1>}, {transform_indices = @transform_12, window_bounds = array<i64: 1, 3, 384>}]} {
    %c0 = arith.constant 0 : index
    %c0_0 = arith.constant 0 : index
    %0 = vector.load %arg1[%c0, %c0_0] : memref<1x384xf32, #tpu.memory_space<vmem>>, vector<1x384xf32>
    %cst = arith.constant 0.000000e+00 : f32
    %1 = vector.broadcast %cst : f32 to vector<1x384xf32>
    %2 = arith.cmpf one, %0, %1 : vector<1x384xf32>
    %c0_1 = arith.constant 0 : index
    %c0_2 = arith.constant 0 : index
    %c0_3 = arith.constant 0 : index
    %3 = vector.load %arg2[%c0_1, %c0_2, %c0_3] : memref<1x3x384xf32, #tpu.memory_space<vmem>>, vector<1x3x384xf32>
    %4 = vector.shape_cast %3 : vector<1x3x384xf32> to vector<3x384xf32>
    %c0_4 = arith.constant 0 : index
    %c0_5 = arith.constant 0 : index
    %c0_6 = arith.constant 0 : index
    %5 = vector.load %arg3[%c0_4, %c0_5, %c0_6] : memref<9x32x3xbf16, #tpu.memory_space<vmem>>, vector<9x32x3xbf16>
    %c0_7 = arith.constant 0 : index
    %c0_8 = arith.constant 0 : index
    %6 = vector.load %arg4[%c0_7, %c0_8] : memref<32x1xf32, #tpu.memory_space<vmem>>, vector<32x1xf32>
    %c19_i32 = arith.constant 19 : i32
    %7 = tpu.dynamic_rotate %4 by %c19_i32 dim 1 : vector<3x384xf32>, i32 -> vector<3x384xf32>
    %8 = vector.extract_strided_slice %5 {offsets = [0, 0, 0], sizes = [1, 32, 3], strides = [1, 1, 1]} : vector<9x32x3xbf16> to vector<1x32x3xbf16>
    %9 = vector.shape_cast %8 : vector<1x32x3xbf16> to vector<32x3xbf16>
    %10 = arith.truncf %7 : vector<3x384xf32> to vector<3x384xbf16>
    %cst_9 = arith.constant dense<0.000000e+00> : vector<32x384xf32>
    %11 = tpu.matmul %9, %10, %cst_9 {dimension_numbers = #tpu.dot_dimension_numbers<[1], [0], [0], [1], [0, 0, 1, 1], [], []>} : vector<32x3xbf16>, vector<3x384xbf16>, vector<32x384xf32> -> vector<32x384xf32>
    %c18_i32 = arith.constant 18 : i32
    %12 = tpu.dynamic_rotate %4 by %c18_i32 dim 1 : vector<3x384xf32>, i32 -> vector<3x384xf32>
    %13 = vector.extract_strided_slice %5 {offsets = [1, 0, 0], sizes = [1, 32, 3], strides = [1, 1, 1]} : vector<9x32x3xbf16> to vector<1x32x3xbf16>
    %14 = vector.shape_cast %13 : vector<1x32x3xbf16> to vector<32x3xbf16>
    %15 = arith.truncf %12 : vector<3x384xf32> to vector<3x384xbf16>
    %cst_10 = arith.constant dense<0.000000e+00> : vector<32x384xf32>
    %16 = tpu.matmul %14, %15, %cst_10 {dimension_numbers = #tpu.dot_dimension_numbers<[1], [0], [0], [1], [0, 0, 1, 1], [], []>} : vector<32x3xbf16>, vector<3x384xbf16>, vector<32x384xf32> -> vector<32x384xf32>
    %17 = arith.addf %11, %16 : vector<32x384xf32>
    %c17_i32 = arith.constant 17 : i32
    %18 = tpu.dynamic_rotate %4 by %c17_i32 dim 1 : vector<3x384xf32>, i32 -> vector<3x384xf32>
    %19 = vector.extract_strided_slice %5 {offsets = [2, 0, 0], sizes = [1, 32, 3], strides = [1, 1, 1]} : vector<9x32x3xbf16> to vector<1x32x3xbf16>
    %20 = vector.shape_cast %19 : vector<1x32x3xbf16> to vector<32x3xbf16>
    %21 = arith.truncf %18 : vector<3x384xf32> to vector<3x384xbf16>
    %cst_11 = arith.constant dense<0.000000e+00> : vector<32x384xf32>
    %22 = tpu.matmul %20, %21, %cst_11 {dimension_numbers = #tpu.dot_dimension_numbers<[1], [0], [0], [1], [0, 0, 1, 1], [], []>} : vector<32x3xbf16>, vector<3x384xbf16>, vector<32x384xf32> -> vector<32x384xf32>
    %23 = arith.addf %17, %22 : vector<32x384xf32>
    %c1_i32 = arith.constant 1 : i32
    %24 = tpu.dynamic_rotate %4 by %c1_i32 dim 1 : vector<3x384xf32>, i32 -> vector<3x384xf32>
    %25 = vector.extract_strided_slice %5 {offsets = [3, 0, 0], sizes = [1, 32, 3], strides = [1, 1, 1]} : vector<9x32x3xbf16> to vector<1x32x3xbf16>
    %26 = vector.shape_cast %25 : vector<1x32x3xbf16> to vector<32x3xbf16>
    %27 = arith.truncf %24 : vector<3x384xf32> to vector<3x384xbf16>
    %cst_12 = arith.constant dense<0.000000e+00> : vector<32x384xf32>
    %28 = tpu.matmul %26, %27, %cst_12 {dimension_numbers = #tpu.dot_dimension_numbers<[1], [0], [0], [1], [0, 0, 1, 1], [], []>} : vector<32x3xbf16>, vector<3x384xbf16>, vector<32x384xf32> -> vector<32x384xf32>
    %29 = arith.addf %23, %28 : vector<32x384xf32>
    %30 = vector.extract_strided_slice %5 {offsets = [4, 0, 0], sizes = [1, 32, 3], strides = [1, 1, 1]} : vector<9x32x3xbf16> to vector<1x32x3xbf16>
    %31 = vector.shape_cast %30 : vector<1x32x3xbf16> to vector<32x3xbf16>
    %32 = arith.truncf %4 : vector<3x384xf32> to vector<3x384xbf16>
    %cst_13 = arith.constant dense<0.000000e+00> : vector<32x384xf32>
    %33 = tpu.matmul %31, %32, %cst_13 {dimension_numbers = #tpu.dot_dimension_numbers<[1], [0], [0], [1], [0, 0, 1, 1], [], []>} : vector<32x3xbf16>, vector<3x384xbf16>, vector<32x384xf32> -> vector<32x384xf32>
    %34 = arith.addf %29, %33 : vector<32x384xf32>
    %c383_i32 = arith.constant 383 : i32
    %35 = tpu.dynamic_rotate %4 by %c383_i32 dim 1 : vector<3x384xf32>, i32 -> vector<3x384xf32>
    %36 = vector.extract_strided_slice %5 {offsets = [5, 0, 0], sizes = [1, 32, 3], strides = [1, 1, 1]} : vector<9x32x3xbf16> to vector<1x32x3xbf16>
    %37 = vector.shape_cast %36 : vector<1x32x3xbf16> to vector<32x3xbf16>
    %38 = arith.truncf %35 : vector<3x384xf32> to vector<3x384xbf16>
    %cst_14 = arith.constant dense<0.000000e+00> : vector<32x384xf32>
    %39 = tpu.matmul %37, %38, %cst_14 {dimension_numbers = #tpu.dot_dimension_numbers<[1], [0], [0], [1], [0, 0, 1, 1], [], []>} : vector<32x3xbf16>, vector<3x384xbf16>, vector<32x384xf32> -> vector<32x384xf32>
    %40 = arith.addf %34, %39 : vector<32x384xf32>
    %c367_i32 = arith.constant 367 : i32
    %41 = tpu.dynamic_rotate %4 by %c367_i32 dim 1 : vector<3x384xf32>, i32 -> vector<3x384xf32>
    %42 = vector.extract_strided_slice %5 {offsets = [6, 0, 0], sizes = [1, 32, 3], strides = [1, 1, 1]} : vector<9x32x3xbf16> to vector<1x32x3xbf16>
    %43 = vector.shape_cast %42 : vector<1x32x3xbf16> to vector<32x3xbf16>
    %44 = arith.truncf %41 : vector<3x384xf32> to vector<3x384xbf16>
    %cst_15 = arith.constant dense<0.000000e+00> : vector<32x384xf32>
    %45 = tpu.matmul %43, %44, %cst_15 {dimension_numbers = #tpu.dot_dimension_numbers<[1], [0], [0], [1], [0, 0, 1, 1], [], []>} : vector<32x3xbf16>, vector<3x384xbf16>, vector<32x384xf32> -> vector<32x384xf32>
    %46 = arith.addf %40, %45 : vector<32x384xf32>
    %c366_i32 = arith.constant 366 : i32
    %47 = tpu.dynamic_rotate %4 by %c366_i32 dim 1 : vector<3x384xf32>, i32 -> vector<3x384xf32>
    %48 = vector.extract_strided_slice %5 {offsets = [7, 0, 0], sizes = [1, 32, 3], strides = [1, 1, 1]} : vector<9x32x3xbf16> to vector<1x32x3xbf16>
    %49 = vector.shape_cast %48 : vector<1x32x3xbf16> to vector<32x3xbf16>
    %50 = arith.truncf %47 : vector<3x384xf32> to vector<3x384xbf16>
    %cst_16 = arith.constant dense<0.000000e+00> : vector<32x384xf32>
    %51 = tpu.matmul %49, %50, %cst_16 {dimension_numbers = #tpu.dot_dimension_numbers<[1], [0], [0], [1], [0, 0, 1, 1], [], []>} : vector<32x3xbf16>, vector<3x384xbf16>, vector<32x384xf32> -> vector<32x384xf32>
    %52 = arith.addf %46, %51 : vector<32x384xf32>
    %c365_i32 = arith.constant 365 : i32
    %53 = tpu.dynamic_rotate %4 by %c365_i32 dim 1 : vector<3x384xf32>, i32 -> vector<3x384xf32>
    %54 = vector.extract_strided_slice %5 {offsets = [8, 0, 0], sizes = [1, 32, 3], strides = [1, 1, 1]} : vector<9x32x3xbf16> to vector<1x32x3xbf16>
    %55 = vector.shape_cast %54 : vector<1x32x3xbf16> to vector<32x3xbf16>
    %56 = arith.truncf %53 : vector<3x384xf32> to vector<3x384xbf16>
    %cst_17 = arith.constant dense<0.000000e+00> : vector<32x384xf32>
    %57 = tpu.matmul %55, %56, %cst_17 {dimension_numbers = #tpu.dot_dimension_numbers<[1], [0], [0], [1], [0, 0, 1, 1], [], []>} : vector<32x3xbf16>, vector<3x384xbf16>, vector<32x384xf32> -> vector<32x384xf32>
    %58 = arith.addf %52, %57 : vector<32x384xf32>
    %59 = vector.broadcast %6 : vector<32x1xf32> to vector<32x384xf32>
    %60 = arith.addf %58, %59 : vector<32x384xf32>
    %cst_18 = arith.constant 0.000000e+00 : f32
    %61 = vector.broadcast %cst_18 : f32 to vector<32x384xf32>
    %62 = arith.cmpf oge, %60, %61 : vector<32x384xf32>
    %cst_19 = arith.constant 1.000000e-01 : f32
    %63 = vector.broadcast %cst_19 : f32 to vector<32x384xf32>
    %64 = arith.mulf %63, %60 : vector<32x384xf32>
    %65 = arith.select %62, %60, %64 : vector<32x384xi1>, vector<32x384xf32>
    %cst_20 = arith.constant 0.000000e+00 : f32
    %66 = vector.shape_cast %2 : vector<1x384xi1> to vector<1x384xi1>
    %67 = vector.broadcast %66 : vector<1x384xi1> to vector<32x384xi1>
    %68 = vector.broadcast %cst_20 : f32 to vector<32x384xf32>
    %69 = arith.select %67, %65, %68 : vector<32x384xi1>, vector<32x384xf32>
    %c0_21 = arith.constant 0 : index
    %c0_22 = arith.constant 0 : index
    %70 = vector.load %arg14[%c0_21, %c0_22] : memref<32x384xf32, #tpu.memory_space<vmem>>, vector<32x384xf32>
    tpu.vector_store %arg14[%c0_21, %c0_22], %69 {strides = array<i32>} : memref<32x384xf32, #tpu.memory_space<vmem>>, vector<32x384xf32>,
    %c0_i32 = arith.constant 0 : i32
    %c4_i32 = arith.constant 4 : i32
    %71 = arith.addi %c0_i32, %c4_i32 : i32
    %c1_i32_23 = arith.constant 1 : i32
    scf.for %arg15 = %c0_i32 to %71 step %c1_i32_23  : i32 {
      %c0_78 = arith.constant 0 : index
      %c0_79 = arith.constant 0 : index
      %201 = vector.load %arg14[%c0_78, %c0_79] : memref<32x384xf32, #tpu.memory_space<vmem>>, vector<32x384xf32>
      %202 = arith.index_cast %arg15 : i32 to index
      %c0_80 = arith.constant 0 : index
      %c0_81 = arith.constant 0 : index
      %c0_82 = arith.constant 0 : index
      %203 = vector.load %arg5[%202, %c0_80, %c0_81, %c0_82] : memref<4x9x32x32xbf16, #tpu.memory_space<vmem>>, vector<1x9x32x32xbf16>
      %204 = vector.shape_cast %203 : vector<1x9x32x32xbf16> to vector<9x32x32xbf16>
      %205 = arith.index_cast %arg15 : i32 to index
      %c0_83 = arith.constant 0 : index
      %c0_84 = arith.constant 0 : index
      %206 = vector.load %arg6[%205, %c0_83, %c0_84] : memref<4x32x1xf32, #tpu.memory_space<vmem>>, vector<1x32x1xf32>
      %207 = vector.shape_cast %206 : vector<1x32x1xf32> to vector<32x1xf32>
      %c19_i32_85 = arith.constant 19 : i32
      %208 = tpu.dynamic_rotate %201 by %c19_i32_85 dim 1 : vector<32x384xf32>, i32 -> vector<32x384xf32>
      %209 = vector.extract_strided_slice %204 {offsets = [0, 0, 0], sizes = [1, 32, 32], strides = [1, 1, 1]} : vector<9x32x32xbf16> to vector<1x32x32xbf16>
      %210 = vector.shape_cast %209 : vector<1x32x32xbf16> to vector<32x32xbf16>
      %211 = arith.truncf %208 : vector<32x384xf32> to vector<32x384xbf16>
      %cst_86 = arith.constant dense<0.000000e+00> : vector<32x384xf32>
      %212 = tpu.matmul %210, %211, %cst_86 {dimension_numbers = #tpu.dot_dimension_numbers<[1], [0], [0], [1], [0, 0, 1, 1], [], []>} : vector<32x32xbf16>, vector<32x384xbf16>, vector<32x384xf32> -> vector<32x384xf32>
      %c18_i32_87 = arith.constant 18 : i32
      %213 = tpu.dynamic_rotate %201 by %c18_i32_87 dim 1 : vector<32x384xf32>, i32 -> vector<32x384xf32>
      %214 = vector.extract_strided_slice %204 {offsets = [1, 0, 0], sizes = [1, 32, 32], strides = [1, 1, 1]} : vector<9x32x32xbf16> to vector<1x32x32xbf16>
      %215 = vector.shape_cast %214 : vector<1x32x32xbf16> to vector<32x32xbf16>
      %216 = arith.truncf %213 : vector<32x384xf32> to vector<32x384xbf16>
      %cst_88 = arith.constant dense<0.000000e+00> : vector<32x384xf32>
      %217 = tpu.matmul %215, %216, %cst_88 {dimension_numbers = #tpu.dot_dimension_numbers<[1], [0], [0], [1], [0, 0, 1, 1], [], []>} : vector<32x32xbf16>, vector<32x384xbf16>, vector<32x384xf32> -> vector<32x384xf32>
      %218 = arith.addf %212, %217 : vector<32x384xf32>
      %c17_i32_89 = arith.constant 17 : i32
      %219 = tpu.dynamic_rotate %201 by %c17_i32_89 dim 1 : vector<32x384xf32>, i32 -> vector<32x384xf32>
      %220 = vector.extract_strided_slice %204 {offsets = [2, 0, 0], sizes = [1, 32, 32], strides = [1, 1, 1]} : vector<9x32x32xbf16> to vector<1x32x32xbf16>
      %221 = vector.shape_cast %220 : vector<1x32x32xbf16> to vector<32x32xbf16>
      %222 = arith.truncf %219 : vector<32x384xf32> to vector<32x384xbf16>
      %cst_90 = arith.constant dense<0.000000e+00> : vector<32x384xf32>
      %223 = tpu.matmul %221, %222, %cst_90 {dimension_numbers = #tpu.dot_dimension_numbers<[1], [0], [0], [1], [0, 0, 1, 1], [], []>} : vector<32x32xbf16>, vector<32x384xbf16>, vector<32x384xf32> -> vector<32x384xf32>
      %224 = arith.addf %218, %223 : vector<32x384xf32>
      %c1_i32_91 = arith.constant 1 : i32
      %225 = tpu.dynamic_rotate %201 by %c1_i32_91 dim 1 : vector<32x384xf32>, i32 -> vector<32x384xf32>
      %226 = vector.extract_strided_slice %204 {offsets = [3, 0, 0], sizes = [1, 32, 32], strides = [1, 1, 1]} : vector<9x32x32xbf16> to vector<1x32x32xbf16>
      %227 = vector.shape_cast %226 : vector<1x32x32xbf16> to vector<32x32xbf16>
      %228 = arith.truncf %225 : vector<32x384xf32> to vector<32x384xbf16>
      %cst_92 = arith.constant dense<0.000000e+00> : vector<32x384xf32>
      %229 = tpu.matmul %227, %228, %cst_92 {dimension_numbers = #tpu.dot_dimension_numbers<[1], [0], [0], [1], [0, 0, 1, 1], [], []>} : vector<32x32xbf16>, vector<32x384xbf16>, vector<32x384xf32> -> vector<32x384xf32>
      %230 = arith.addf %224, %229 : vector<32x384xf32>
      %231 = vector.extract_strided_slice %204 {offsets = [4, 0, 0], sizes = [1, 32, 32], strides = [1, 1, 1]} : vector<9x32x32xbf16> to vector<1x32x32xbf16>
      %232 = vector.shape_cast %231 : vector<1x32x32xbf16> to vector<32x32xbf16>
      %233 = arith.truncf %201 : vector<32x384xf32> to vector<32x384xbf16>
      %cst_93 = arith.constant dense<0.000000e+00> : vector<32x384xf32>
      %234 = tpu.matmul %232, %233, %cst_93 {dimension_numbers = #tpu.dot_dimension_numbers<[1], [0], [0], [1], [0, 0, 1, 1], [], []>} : vector<32x32xbf16>, vector<32x384xbf16>, vector<32x384xf32> -> vector<32x384xf32>
      %235 = arith.addf %230, %234 : vector<32x384xf32>
      %c383_i32_94 = arith.constant 383 : i32
      %236 = tpu.dynamic_rotate %201 by %c383_i32_94 dim 1 : vector<32x384xf32>, i32 -> vector<32x384xf32>
      %237 = vector.extract_strided_slice %204 {offsets = [5, 0, 0], sizes = [1, 32, 32], strides = [1, 1, 1]} : vector<9x32x32xbf16> to vector<1x32x32xbf16>
      %238 = vector.shape_cast %237 : vector<1x32x32xbf16> to vector<32x32xbf16>
      %239 = arith.truncf %236 : vector<32x384xf32> to vector<32x384xbf16>
      %cst_95 = arith.constant dense<0.000000e+00> : vector<32x384xf32>
      %240 = tpu.matmul %238, %239, %cst_95 {dimension_numbers = #tpu.dot_dimension_numbers<[1], [0], [0], [1], [0, 0, 1, 1], [], []>} : vector<32x32xbf16>, vector<32x384xbf16>, vector<32x384xf32> -> vector<32x384xf32>
      %241 = arith.addf %235, %240 : vector<32x384xf32>
      %c367_i32_96 = arith.constant 367 : i32
      %242 = tpu.dynamic_rotate %201 by %c367_i32_96 dim 1 : vector<32x384xf32>, i32 -> vector<32x384xf32>
      %243 = vector.extract_strided_slice %204 {offsets = [6, 0, 0], sizes = [1, 32, 32], strides = [1, 1, 1]} : vector<9x32x32xbf16> to vector<1x32x32xbf16>
      %244 = vector.shape_cast %243 : vector<1x32x32xbf16> to vector<32x32xbf16>
      %245 = arith.truncf %242 : vector<32x384xf32> to vector<32x384xbf16>
      %cst_97 = arith.constant dense<0.000000e+00> : vector<32x384xf32>
      %246 = tpu.matmul %244, %245, %cst_97 {dimension_numbers = #tpu.dot_dimension_numbers<[1], [0], [0], [1], [0, 0, 1, 1], [], []>} : vector<32x32xbf16>, vector<32x384xbf16>, vector<32x384xf32> -> vector<32x384xf32>
      %247 = arith.addf %241, %246 : vector<32x384xf32>
      %c366_i32_98 = arith.constant 366 : i32
      %248 = tpu.dynamic_rotate %201 by %c366_i32_98 dim 1 : vector<32x384xf32>, i32 -> vector<32x384xf32>
      %249 = vector.extract_strided_slice %204 {offsets = [7, 0, 0], sizes = [1, 32, 32], strides = [1, 1, 1]} : vector<9x32x32xbf16> to vector<1x32x32xbf16>
      %250 = vector.shape_cast %249 : vector<1x32x32xbf16> to vector<32x32xbf16>
      %251 = arith.truncf %248 : vector<32x384xf32> to vector<32x384xbf16>
      %cst_99 = arith.constant dense<0.000000e+00> : vector<32x384xf32>
      %252 = tpu.matmul %250, %251, %cst_99 {dimension_numbers = #tpu.dot_dimension_numbers<[1], [0], [0], [1], [0, 0, 1, 1], [], []>} : vector<32x32xbf16>, vector<32x384xbf16>, vector<32x384xf32> -> vector<32x384xf32>
      %253 = arith.addf %247, %252 : vector<32x384xf32>
      %c365_i32_100 = arith.constant 365 : i32
      %254 = tpu.dynamic_rotate %201 by %c365_i32_100 dim 1 : vector<32x384xf32>, i32 -> vector<32x384xf32>
      %255 = vector.extract_strided_slice %204 {offsets = [8, 0, 0], sizes = [1, 32, 32], strides = [1, 1, 1]} : vector<9x32x32xbf16> to vector<1x32x32xbf16>
      %256 = vector.shape_cast %255 : vector<1x32x32xbf16> to vector<32x32xbf16>
      %257 = arith.truncf %254 : vector<32x384xf32> to vector<32x384xbf16>
      %cst_101 = arith.constant dense<0.000000e+00> : vector<32x384xf32>
      %258 = tpu.matmul %256, %257, %cst_101 {dimension_numbers = #tpu.dot_dimension_numbers<[1], [0], [0], [1], [0, 0, 1, 1], [], []>} : vector<32x32xbf16>, vector<32x384xbf16>, vector<32x384xf32> -> vector<32x384xf32>
      %259 = arith.addf %253, %258 : vector<32x384xf32>
      %260 = vector.broadcast %207 : vector<32x1xf32> to vector<32x384xf32>
      %261 = arith.addf %259, %260 : vector<32x384xf32>
      %cst_102 = arith.constant 0.000000e+00 : f32
      %262 = vector.broadcast %cst_102 : f32 to vector<32x384xf32>
      %263 = arith.maximumf %261, %262 : vector<32x384xf32>
      %cst_103 = arith.constant 0.000000e+00 : f32
      %264 = vector.shape_cast %2 : vector<1x384xi1> to vector<1x384xi1>
      %265 = vector.broadcast %264 : vector<1x384xi1> to vector<32x384xi1>
      %266 = vector.broadcast %cst_103 : f32 to vector<32x384xf32>
      %267 = arith.select %265, %263, %266 : vector<32x384xi1>, vector<32x384xf32>
      %268 = arith.index_cast %arg15 : i32 to index
      %c0_104 = arith.constant 0 : index
      %c0_105 = arith.constant 0 : index
      %c0_106 = arith.constant 0 : index
      %269 = vector.load %arg7[%268, %c0_104, %c0_105, %c0_106] : memref<4x9x32x32xbf16, #tpu.memory_space<vmem>>, vector<1x9x32x32xbf16>
      %270 = vector.shape_cast %269 : vector<1x9x32x32xbf16> to vector<9x32x32xbf16>
      %271 = arith.index_cast %arg15 : i32 to index
      %c0_107 = arith.constant 0 : index
      %c0_108 = arith.constant 0 : index
      %272 = vector.load %arg8[%271, %c0_107, %c0_108] : memref<4x32x1xf32, #tpu.memory_space<vmem>>, vector<1x32x1xf32>
      %273 = vector.shape_cast %272 : vector<1x32x1xf32> to vector<32x1xf32>
      %c19_i32_109 = arith.constant 19 : i32
      %274 = tpu.dynamic_rotate %267 by %c19_i32_109 dim 1 : vector<32x384xf32>, i32 -> vector<32x384xf32>
      %275 = vector.extract_strided_slice %270 {offsets = [0, 0, 0], sizes = [1, 32, 32], strides = [1, 1, 1]} : vector<9x32x32xbf16> to vector<1x32x32xbf16>
      %276 = vector.shape_cast %275 : vector<1x32x32xbf16> to vector<32x32xbf16>
      %277 = arith.truncf %274 : vector<32x384xf32> to vector<32x384xbf16>
      %cst_110 = arith.constant dense<0.000000e+00> : vector<32x384xf32>
      %278 = tpu.matmul %276, %277, %cst_110 {dimension_numbers = #tpu.dot_dimension_numbers<[1], [0], [0], [1], [0, 0, 1, 1], [], []>} : vector<32x32xbf16>, vector<32x384xbf16>, vector<32x384xf32> -> vector<32x384xf32>
      %c18_i32_111 = arith.constant 18 : i32
      %279 = tpu.dynamic_rotate %267 by %c18_i32_111 dim 1 : vector<32x384xf32>, i32 -> vector<32x384xf32>
      %280 = vector.extract_strided_slice %270 {offsets = [1, 0, 0], sizes = [1, 32, 32], strides = [1, 1, 1]} : vector<9x32x32xbf16> to vector<1x32x32xbf16>
      %281 = vector.shape_cast %280 : vector<1x32x32xbf16> to vector<32x32xbf16>
      %282 = arith.truncf %279 : vector<32x384xf32> to vector<32x384xbf16>
      %cst_112 = arith.constant dense<0.000000e+00> : vector<32x384xf32>
      %283 = tpu.matmul %281, %282, %cst_112 {dimension_numbers = #tpu.dot_dimension_numbers<[1], [0], [0], [1], [0, 0, 1, 1], [], []>} : vector<32x32xbf16>, vector<32x384xbf16>, vector<32x384xf32> -> vector<32x384xf32>
      %284 = arith.addf %278, %283 : vector<32x384xf32>
      %c17_i32_113 = arith.constant 17 : i32
      %285 = tpu.dynamic_rotate %267 by %c17_i32_113 dim 1 : vector<32x384xf32>, i32 -> vector<32x384xf32>
      %286 = vector.extract_strided_slice %270 {offsets = [2, 0, 0], sizes = [1, 32, 32], strides = [1, 1, 1]} : vector<9x32x32xbf16> to vector<1x32x32xbf16>
      %287 = vector.shape_cast %286 : vector<1x32x32xbf16> to vector<32x32xbf16>
      %288 = arith.truncf %285 : vector<32x384xf32> to vector<32x384xbf16>
      %cst_114 = arith.constant dense<0.000000e+00> : vector<32x384xf32>
      %289 = tpu.matmul %287, %288, %cst_114 {dimension_numbers = #tpu.dot_dimension_numbers<[1], [0], [0], [1], [0, 0, 1, 1], [], []>} : vector<32x32xbf16>, vector<32x384xbf16>, vector<32x384xf32> -> vector<32x384xf32>
      %290 = arith.addf %284, %289 : vector<32x384xf32>
      %c1_i32_115 = arith.constant 1 : i32
      %291 = tpu.dynamic_rotate %267 by %c1_i32_115 dim 1 : vector<32x384xf32>, i32 -> vector<32x384xf32>
      %292 = vector.extract_strided_slice %270 {offsets = [3, 0, 0], sizes = [1, 32, 32], strides = [1, 1, 1]} : vector<9x32x32xbf16> to vector<1x32x32xbf16>
      %293 = vector.shape_cast %292 : vector<1x32x32xbf16> to vector<32x32xbf16>
      %294 = arith.truncf %291 : vector<32x384xf32> to vector<32x384xbf16>
      %cst_116 = arith.constant dense<0.000000e+00> : vector<32x384xf32>
      %295 = tpu.matmul %293, %294, %cst_116 {dimension_numbers = #tpu.dot_dimension_numbers<[1], [0], [0], [1], [0, 0, 1, 1], [], []>} : vector<32x32xbf16>, vector<32x384xbf16>, vector<32x384xf32> -> vector<32x384xf32>
      %296 = arith.addf %290, %295 : vector<32x384xf32>
      %297 = vector.extract_strided_slice %270 {offsets = [4, 0, 0], sizes = [1, 32, 32], strides = [1, 1, 1]} : vector<9x32x32xbf16> to vector<1x32x32xbf16>
      %298 = vector.shape_cast %297 : vector<1x32x32xbf16> to vector<32x32xbf16>
      %299 = arith.truncf %267 : vector<32x384xf32> to vector<32x384xbf16>
      %cst_117 = arith.constant dense<0.000000e+00> : vector<32x384xf32>
      %300 = tpu.matmul %298, %299, %cst_117 {dimension_numbers = #tpu.dot_dimension_numbers<[1], [0], [0], [1], [0, 0, 1, 1], [], []>} : vector<32x32xbf16>, vector<32x384xbf16>, vector<32x384xf32> -> vector<32x384xf32>
      %301 = arith.addf %296, %300 : vector<32x384xf32>
      %c383_i32_118 = arith.constant 383 : i32
      %302 = tpu.dynamic_rotate %267 by %c383_i32_118 dim 1 : vector<32x384xf32>, i32 -> vector<32x384xf32>
      %303 = vector.extract_strided_slice %270 {offsets = [5, 0, 0], sizes = [1, 32, 32], strides = [1, 1, 1]} : vector<9x32x32xbf16> to vector<1x32x32xbf16>
      %304 = vector.shape_cast %303 : vector<1x32x32xbf16> to vector<32x32xbf16>
      %305 = arith.truncf %302 : vector<32x384xf32> to vector<32x384xbf16>
      %cst_119 = arith.constant dense<0.000000e+00> : vector<32x384xf32>
      %306 = tpu.matmul %304, %305, %cst_119 {dimension_numbers = #tpu.dot_dimension_numbers<[1], [0], [0], [1], [0, 0, 1, 1], [], []>} : vector<32x32xbf16>, vector<32x384xbf16>, vector<32x384xf32> -> vector<32x384xf32>
      %307 = arith.addf %301, %306 : vector<32x384xf32>
      %c367_i32_120 = arith.constant 367 : i32
      %308 = tpu.dynamic_rotate %267 by %c367_i32_120 dim 1 : vector<32x384xf32>, i32 -> vector<32x384xf32>
      %309 = vector.extract_strided_slice %270 {offsets = [6, 0, 0], sizes = [1, 32, 32], strides = [1, 1, 1]} : vector<9x32x32xbf16> to vector<1x32x32xbf16>
      %310 = vector.shape_cast %309 : vector<1x32x32xbf16> to vector<32x32xbf16>
      %311 = arith.truncf %308 : vector<32x384xf32> to vector<32x384xbf16>
      %cst_121 = arith.constant dense<0.000000e+00> : vector<32x384xf32>
      %312 = tpu.matmul %310, %311, %cst_121 {dimension_numbers = #tpu.dot_dimension_numbers<[1], [0], [0], [1], [0, 0, 1, 1], [], []>} : vector<32x32xbf16>, vector<32x384xbf16>, vector<32x384xf32> -> vector<32x384xf32>
      %313 = arith.addf %307, %312 : vector<32x384xf32>
      %c366_i32_122 = arith.constant 366 : i32
      %314 = tpu.dynamic_rotate %267 by %c366_i32_122 dim 1 : vector<32x384xf32>, i32 -> vector<32x384xf32>
      %315 = vector.extract_strided_slice %270 {offsets = [7, 0, 0], sizes = [1, 32, 32], strides = [1, 1, 1]} : vector<9x32x32xbf16> to vector<1x32x32xbf16>
      %316 = vector.shape_cast %315 : vector<1x32x32xbf16> to vector<32x32xbf16>
      %317 = arith.truncf %314 : vector<32x384xf32> to vector<32x384xbf16>
      %cst_123 = arith.constant dense<0.000000e+00> : vector<32x384xf32>
      %318 = tpu.matmul %316, %317, %cst_123 {dimension_numbers = #tpu.dot_dimension_numbers<[1], [0], [0], [1], [0, 0, 1, 1], [], []>} : vector<32x32xbf16>, vector<32x384xbf16>, vector<32x384xf32> -> vector<32x384xf32>
      %319 = arith.addf %313, %318 : vector<32x384xf32>
      %c365_i32_124 = arith.constant 365 : i32
      %320 = tpu.dynamic_rotate %267 by %c365_i32_124 dim 1 : vector<32x384xf32>, i32 -> vector<32x384xf32>
      %321 = vector.extract_strided_slice %270 {offsets = [8, 0, 0], sizes = [1, 32, 32], strides = [1, 1, 1]} : vector<9x32x32xbf16> to vector<1x32x32xbf16>
      %322 = vector.shape_cast %321 : vector<1x32x32xbf16> to vector<32x32xbf16>
      %323 = arith.truncf %320 : vector<32x384xf32> to vector<32x384xbf16>
      %cst_125 = arith.constant dense<0.000000e+00> : vector<32x384xf32>
      %324 = tpu.matmul %322, %323, %cst_125 {dimension_numbers = #tpu.dot_dimension_numbers<[1], [0], [0], [1], [0, 0, 1, 1], [], []>} : vector<32x32xbf16>, vector<32x384xbf16>, vector<32x384xf32> -> vector<32x384xf32>
      %325 = arith.addf %319, %324 : vector<32x384xf32>
      %326 = vector.broadcast %273 : vector<32x1xf32> to vector<32x384xf32>
      %327 = arith.addf %325, %326 : vector<32x384xf32>
      %c0_126 = arith.constant 0 : index
      %c0_127 = arith.constant 0 : index
      %328 = vector.load %arg14[%c0_126, %c0_127] : memref<32x384xf32, #tpu.memory_space<vmem>>, vector<32x384xf32>
      %cst_128 = arith.constant 0.000000e+00 : f32
      %329 = vector.shape_cast %2 : vector<1x384xi1> to vector<1x384xi1>
      %330 = vector.broadcast %329 : vector<1x384xi1> to vector<32x384xi1>
      %331 = vector.broadcast %cst_128 : f32 to vector<32x384xf32>
      %332 = arith.select %330, %327, %331 : vector<32x384xi1>, vector<32x384xf32>
      %333 = arith.addf %328, %332 : vector<32x384xf32>
      %c0_129 = arith.constant 0 : index
      %c0_130 = arith.constant 0 : index
      %334 = vector.load %arg14[%c0_129, %c0_130] : memref<32x384xf32, #tpu.memory_space<vmem>>, vector<32x384xf32>
      tpu.vector_store %arg14[%c0_129, %c0_130], %333 {strides = array<i32>} : memref<32x384xf32, #tpu.memory_space<vmem>>, vector<32x384xf32>,
    }
    %c4_i32_24 = arith.constant 4 : i32
    %c0_25 = arith.constant 0 : index
    %c0_26 = arith.constant 0 : index
    %72 = vector.load %arg14[%c0_25, %c0_26] : memref<32x384xf32, #tpu.memory_space<vmem>>, vector<32x384xf32>
    %c0_27 = arith.constant 0 : index
    %c0_28 = arith.constant 0 : index
    %c0_29 = arith.constant 0 : index
    %73 = vector.load %arg9[%c0_27, %c0_28, %c0_29] : memref<9x32x32xbf16, #tpu.memory_space<vmem>>, vector<9x32x32xbf16>
    %c0_30 = arith.constant 0 : index
    %c0_31 = arith.constant 0 : index
    %74 = vector.load %arg10[%c0_30, %c0_31] : memref<32x1xf32, #tpu.memory_space<vmem>>, vector<32x1xf32>
    %c19_i32_32 = arith.constant 19 : i32
    %75 = tpu.dynamic_rotate %72 by %c19_i32_32 dim 1 : vector<32x384xf32>, i32 -> vector<32x384xf32>
    %76 = vector.extract_strided_slice %73 {offsets = [0, 0, 0], sizes = [1, 32, 32], strides = [1, 1, 1]} : vector<9x32x32xbf16> to vector<1x32x32xbf16>
    %77 = vector.shape_cast %76 : vector<1x32x32xbf16> to vector<32x32xbf16>
    %78 = arith.truncf %75 : vector<32x384xf32> to vector<32x384xbf16>
    %cst_33 = arith.constant dense<0.000000e+00> : vector<32x384xf32>
    %79 = tpu.matmul %77, %78, %cst_33 {dimension_numbers = #tpu.dot_dimension_numbers<[1], [0], [0], [1], [0, 0, 1, 1], [], []>} : vector<32x32xbf16>, vector<32x384xbf16>, vector<32x384xf32> -> vector<32x384xf32>
    %c18_i32_34 = arith.constant 18 : i32
    %80 = tpu.dynamic_rotate %72 by %c18_i32_34 dim 1 : vector<32x384xf32>, i32 -> vector<32x384xf32>
    %81 = vector.extract_strided_slice %73 {offsets = [1, 0, 0], sizes = [1, 32, 32], strides = [1, 1, 1]} : vector<9x32x32xbf16> to vector<1x32x32xbf16>
    %82 = vector.shape_cast %81 : vector<1x32x32xbf16> to vector<32x32xbf16>
    %83 = arith.truncf %80 : vector<32x384xf32> to vector<32x384xbf16>
    %cst_35 = arith.constant dense<0.000000e+00> : vector<32x384xf32>
    %84 = tpu.matmul %82, %83, %cst_35 {dimension_numbers = #tpu.dot_dimension_numbers<[1], [0], [0], [1], [0, 0, 1, 1], [], []>} : vector<32x32xbf16>, vector<32x384xbf16>, vector<32x384xf32> -> vector<32x384xf32>
    %85 = arith.addf %79, %84 : vector<32x384xf32>
    %c17_i32_36 = arith.constant 17 : i32
    %86 = tpu.dynamic_rotate %72 by %c17_i32_36 dim 1 : vector<32x384xf32>, i32 -> vector<32x384xf32>
    %87 = vector.extract_strided_slice %73 {offsets = [2, 0, 0], sizes = [1, 32, 32], strides = [1, 1, 1]} : vector<9x32x32xbf16> to vector<1x32x32xbf16>
    %88 = vector.shape_cast %87 : vector<1x32x32xbf16> to vector<32x32xbf16>
    %89 = arith.truncf %86 : vector<32x384xf32> to vector<32x384xbf16>
    %cst_37 = arith.constant dense<0.000000e+00> : vector<32x384xf32>
    %90 = tpu.matmul %88, %89, %cst_37 {dimension_numbers = #tpu.dot_dimension_numbers<[1], [0], [0], [1], [0, 0, 1, 1], [], []>} : vector<32x32xbf16>, vector<32x384xbf16>, vector<32x384xf32> -> vector<32x384xf32>
    %91 = arith.addf %85, %90 : vector<32x384xf32>
    %c1_i32_38 = arith.constant 1 : i32
    %92 = tpu.dynamic_rotate %72 by %c1_i32_38 dim 1 : vector<32x384xf32>, i32 -> vector<32x384xf32>
    %93 = vector.extract_strided_slice %73 {offsets = [3, 0, 0], sizes = [1, 32, 32], strides = [1, 1, 1]} : vector<9x32x32xbf16> to vector<1x32x32xbf16>
    %94 = vector.shape_cast %93 : vector<1x32x32xbf16> to vector<32x32xbf16>
    %95 = arith.truncf %92 : vector<32x384xf32> to vector<32x384xbf16>
    %cst_39 = arith.constant dense<0.000000e+00> : vector<32x384xf32>
    %96 = tpu.matmul %94, %95, %cst_39 {dimension_numbers = #tpu.dot_dimension_numbers<[1], [0], [0], [1], [0, 0, 1, 1], [], []>} : vector<32x32xbf16>, vector<32x384xbf16>, vector<32x384xf32> -> vector<32x384xf32>
    %97 = arith.addf %91, %96 : vector<32x384xf32>
    %98 = vector.extract_strided_slice %73 {offsets = [4, 0, 0], sizes = [1, 32, 32], strides = [1, 1, 1]} : vector<9x32x32xbf16> to vector<1x32x32xbf16>
    %99 = vector.shape_cast %98 : vector<1x32x32xbf16> to vector<32x32xbf16>
    %100 = arith.truncf %72 : vector<32x384xf32> to vector<32x384xbf16>
    %cst_40 = arith.constant dense<0.000000e+00> : vector<32x384xf32>
    %101 = tpu.matmul %99, %100, %cst_40 {dimension_numbers = #tpu.dot_dimension_numbers<[1], [0], [0], [1], [0, 0, 1, 1], [], []>} : vector<32x32xbf16>, vector<32x384xbf16>, vector<32x384xf32> -> vector<32x384xf32>
    %102 = arith.addf %97, %101 : vector<32x384xf32>
    %c383_i32_41 = arith.constant 383 : i32
    %103 = tpu.dynamic_rotate %72 by %c383_i32_41 dim 1 : vector<32x384xf32>, i32 -> vector<32x384xf32>
    %104 = vector.extract_strided_slice %73 {offsets = [5, 0, 0], sizes = [1, 32, 32], strides = [1, 1, 1]} : vector<9x32x32xbf16> to vector<1x32x32xbf16>
    %105 = vector.shape_cast %104 : vector<1x32x32xbf16> to vector<32x32xbf16>
    %106 = arith.truncf %103 : vector<32x384xf32> to vector<32x384xbf16>
    %cst_42 = arith.constant dense<0.000000e+00> : vector<32x384xf32>
    %107 = tpu.matmul %105, %106, %cst_42 {dimension_numbers = #tpu.dot_dimension_numbers<[1], [0], [0], [1], [0, 0, 1, 1], [], []>} : vector<32x32xbf16>, vector<32x384xbf16>, vector<32x384xf32> -> vector<32x384xf32>
    %108 = arith.addf %102, %107 : vector<32x384xf32>
    %c367_i32_43 = arith.constant 367 : i32
    %109 = tpu.dynamic_rotate %72 by %c367_i32_43 dim 1 : vector<32x384xf32>, i32 -> vector<32x384xf32>
    %110 = vector.extract_strided_slice %73 {offsets = [6, 0, 0], sizes = [1, 32, 32], strides = [1, 1, 1]} : vector<9x32x32xbf16> to vector<1x32x32xbf16>
    %111 = vector.shape_cast %110 : vector<1x32x32xbf16> to vector<32x32xbf16>
    %112 = arith.truncf %109 : vector<32x384xf32> to vector<32x384xbf16>
    %cst_44 = arith.constant dense<0.000000e+00> : vector<32x384xf32>
    %113 = tpu.matmul %111, %112, %cst_44 {dimension_numbers = #tpu.dot_dimension_numbers<[1], [0], [0], [1], [0, 0, 1, 1], [], []>} : vector<32x32xbf16>, vector<32x384xbf16>, vector<32x384xf32> -> vector<32x384xf32>
    %114 = arith.addf %108, %113 : vector<32x384xf32>
    %c366_i32_45 = arith.constant 366 : i32
    %115 = tpu.dynamic_rotate %72 by %c366_i32_45 dim 1 : vector<32x384xf32>, i32 -> vector<32x384xf32>
    %116 = vector.extract_strided_slice %73 {offsets = [7, 0, 0], sizes = [1, 32, 32], strides = [1, 1, 1]} : vector<9x32x32xbf16> to vector<1x32x32xbf16>
    %117 = vector.shape_cast %116 : vector<1x32x32xbf16> to vector<32x32xbf16>
    %118 = arith.truncf %115 : vector<32x384xf32> to vector<32x384xbf16>
    %cst_46 = arith.constant dense<0.000000e+00> : vector<32x384xf32>
    %119 = tpu.matmul %117, %118, %cst_46 {dimension_numbers = #tpu.dot_dimension_numbers<[1], [0], [0], [1], [0, 0, 1, 1], [], []>} : vector<32x32xbf16>, vector<32x384xbf16>, vector<32x384xf32> -> vector<32x384xf32>
    %120 = arith.addf %114, %119 : vector<32x384xf32>
    %c365_i32_47 = arith.constant 365 : i32
    %121 = tpu.dynamic_rotate %72 by %c365_i32_47 dim 1 : vector<32x384xf32>, i32 -> vector<32x384xf32>
    %122 = vector.extract_strided_slice %73 {offsets = [8, 0, 0], sizes = [1, 32, 32], strides = [1, 1, 1]} : vector<9x32x32xbf16> to vector<1x32x32xbf16>
    %123 = vector.shape_cast %122 : vector<1x32x32xbf16> to vector<32x32xbf16>
    %124 = arith.truncf %121 : vector<32x384xf32> to vector<32x384xbf16>
    %cst_48 = arith.constant dense<0.000000e+00> : vector<32x384xf32>
    %125 = tpu.matmul %123, %124, %cst_48 {dimension_numbers = #tpu.dot_dimension_numbers<[1], [0], [0], [1], [0, 0, 1, 1], [], []>} : vector<32x32xbf16>, vector<32x384xbf16>, vector<32x384xf32> -> vector<32x384xf32>
    %126 = arith.addf %120, %125 : vector<32x384xf32>
    %127 = vector.broadcast %74 : vector<32x1xf32> to vector<32x384xf32>
    %128 = arith.addf %126, %127 : vector<32x384xf32>
    %cst_49 = arith.constant 0.000000e+00 : f32
    %129 = vector.broadcast %cst_49 : f32 to vector<32x384xf32>
    %130 = arith.cmpf oge, %128, %129 : vector<32x384xf32>
    %cst_50 = arith.constant 1.000000e-01 : f32
    %131 = vector.broadcast %cst_50 : f32 to vector<32x384xf32>
    %132 = arith.mulf %131, %128 : vector<32x384xf32>
    %133 = arith.select %130, %128, %132 : vector<32x384xi1>, vector<32x384xf32>
    %cst_51 = arith.constant 0.000000e+00 : f32
    %134 = vector.shape_cast %2 : vector<1x384xi1> to vector<1x384xi1>
    %135 = vector.broadcast %134 : vector<1x384xi1> to vector<32x384xi1>
    %136 = vector.broadcast %cst_51 : f32 to vector<32x384xf32>
    %137 = arith.select %135, %133, %136 : vector<32x384xi1>, vector<32x384xf32>
    %c0_52 = arith.constant 0 : index
    %c0_53 = arith.constant 0 : index
    %c0_54 = arith.constant 0 : index
    %138 = vector.load %arg11[%c0_52, %c0_53, %c0_54] : memref<9x3x32xbf16, #tpu.memory_space<vmem>>, vector<9x3x32xbf16>
    %c0_55 = arith.constant 0 : index
    %c0_56 = arith.constant 0 : index
    %139 = vector.load %arg12[%c0_55, %c0_56] : memref<3x1xf32, #tpu.memory_space<vmem>>, vector<3x1xf32>
    %c19_i32_57 = arith.constant 19 : i32
    %140 = tpu.dynamic_rotate %137 by %c19_i32_57 dim 1 : vector<32x384xf32>, i32 -> vector<32x384xf32>
    %141 = vector.extract_strided_slice %138 {offsets = [0, 0, 0], sizes = [1, 3, 32], strides = [1, 1, 1]} : vector<9x3x32xbf16> to vector<1x3x32xbf16>
    %142 = vector.shape_cast %141 : vector<1x3x32xbf16> to vector<3x32xbf16>
    %143 = arith.truncf %140 : vector<32x384xf32> to vector<32x384xbf16>
    %cst_58 = arith.constant dense<0.000000e+00> : vector<3x384xf32>
    %144 = tpu.matmul %142, %143, %cst_58 {dimension_numbers = #tpu.dot_dimension_numbers<[1], [0], [0], [1], [0, 0, 1, 1], [], []>} : vector<3x32xbf16>, vector<32x384xbf16>, vector<3x384xf32> -> vector<3x384xf32>
    %c18_i32_59 = arith.constant 18 : i32
    %145 = tpu.dynamic_rotate %137 by %c18_i32_59 dim 1 : vector<32x384xf32>, i32 -> vector<32x384xf32>
    %146 = vector.extract_strided_slice %138 {offsets = [1, 0, 0], sizes = [1, 3, 32], strides = [1, 1, 1]} : vector<9x3x32xbf16> to vector<1x3x32xbf16>
    %147 = vector.shape_cast %146 : vector<1x3x32xbf16> to vector<3x32xbf16>
    %148 = arith.truncf %145 : vector<32x384xf32> to vector<32x384xbf16>
    %cst_60 = arith.constant dense<0.000000e+00> : vector<3x384xf32>
    %149 = tpu.matmul %147, %148, %cst_60 {dimension_numbers = #tpu.dot_dimension_numbers<[1], [0], [0], [1], [0, 0, 1, 1], [], []>} : vector<3x32xbf16>, vector<32x384xbf16>, vector<3x384xf32> -> vector<3x384xf32>
    %150 = arith.addf %144, %149 : vector<3x384xf32>
    %c17_i32_61 = arith.constant 17 : i32
    %151 = tpu.dynamic_rotate %137 by %c17_i32_61 dim 1 : vector<32x384xf32>, i32 -> vector<32x384xf32>
    %152 = vector.extract_strided_slice %138 {offsets = [2, 0, 0], sizes = [1, 3, 32], strides = [1, 1, 1]} : vector<9x3x32xbf16> to vector<1x3x32xbf16>
    %153 = vector.shape_cast %152 : vector<1x3x32xbf16> to vector<3x32xbf16>
    %154 = arith.truncf %151 : vector<32x384xf32> to vector<32x384xbf16>
    %cst_62 = arith.constant dense<0.000000e+00> : vector<3x384xf32>
    %155 = tpu.matmul %153, %154, %cst_62 {dimension_numbers = #tpu.dot_dimension_numbers<[1], [0], [0], [1], [0, 0, 1, 1], [], []>} : vector<3x32xbf16>, vector<32x384xbf16>, vector<3x384xf32> -> vector<3x384xf32>
    %156 = arith.addf %150, %155 : vector<3x384xf32>
    %c1_i32_63 = arith.constant 1 : i32
    %157 = tpu.dynamic_rotate %137 by %c1_i32_63 dim 1 : vector<32x384xf32>, i32 -> vector<32x384xf32>
    %158 = vector.extract_strided_slice %138 {offsets = [3, 0, 0], sizes = [1, 3, 32], strides = [1, 1, 1]} : vector<9x3x32xbf16> to vector<1x3x32xbf16>
    %159 = vector.shape_cast %158 : vector<1x3x32xbf16> to vector<3x32xbf16>
    %160 = arith.truncf %157 : vector<32x384xf32> to vector<32x384xbf16>
    %cst_64 = arith.constant dense<0.000000e+00> : vector<3x384xf32>
    %161 = tpu.matmul %159, %160, %cst_64 {dimension_numbers = #tpu.dot_dimension_numbers<[1], [0], [0], [1], [0, 0, 1, 1], [], []>} : vector<3x32xbf16>, vector<32x384xbf16>, vector<3x384xf32> -> vector<3x384xf32>
    %162 = arith.addf %156, %161 : vector<3x384xf32>
    %163 = vector.extract_strided_slice %138 {offsets = [4, 0, 0], sizes = [1, 3, 32], strides = [1, 1, 1]} : vector<9x3x32xbf16> to vector<1x3x32xbf16>
    %164 = vector.shape_cast %163 : vector<1x3x32xbf16> to vector<3x32xbf16>
    %165 = arith.truncf %137 : vector<32x384xf32> to vector<32x384xbf16>
    %cst_65 = arith.constant dense<0.000000e+00> : vector<3x384xf32>
    %166 = tpu.matmul %164, %165, %cst_65 {dimension_numbers = #tpu.dot_dimension_numbers<[1], [0], [0], [1], [0, 0, 1, 1], [], []>} : vector<3x32xbf16>, vector<32x384xbf16>, vector<3x384xf32> -> vector<3x384xf32>
    %167 = arith.addf %162, %166 : vector<3x384xf32>
    %c383_i32_66 = arith.constant 383 : i32
    %168 = tpu.dynamic_rotate %137 by %c383_i32_66 dim 1 : vector<32x384xf32>, i32 -> vector<32x384xf32>
    %169 = vector.extract_strided_slice %138 {offsets = [5, 0, 0], sizes = [1, 3, 32], strides = [1, 1, 1]} : vector<9x3x32xbf16> to vector<1x3x32xbf16>
    %170 = vector.shape_cast %169 : vector<1x3x32xbf16> to vector<3x32xbf16>
    %171 = arith.truncf %168 : vector<32x384xf32> to vector<32x384xbf16>
    %cst_67 = arith.constant dense<0.000000e+00> : vector<3x384xf32>
    %172 = tpu.matmul %170, %171, %cst_67 {dimension_numbers = #tpu.dot_dimension_numbers<[1], [0], [0], [1], [0, 0, 1, 1], [], []>} : vector<3x32xbf16>, vector<32x384xbf16>, vector<3x384xf32> -> vector<3x384xf32>
    %173 = arith.addf %167, %172 : vector<3x384xf32>
    %c367_i32_68 = arith.constant 367 : i32
    %174 = tpu.dynamic_rotate %137 by %c367_i32_68 dim 1 : vector<32x384xf32>, i32 -> vector<32x384xf32>
    %175 = vector.extract_strided_slice %138 {offsets = [6, 0, 0], sizes = [1, 3, 32], strides = [1, 1, 1]} : vector<9x3x32xbf16> to vector<1x3x32xbf16>
    %176 = vector.shape_cast %175 : vector<1x3x32xbf16> to vector<3x32xbf16>
    %177 = arith.truncf %174 : vector<32x384xf32> to vector<32x384xbf16>
    %cst_69 = arith.constant dense<0.000000e+00> : vector<3x384xf32>
    %178 = tpu.matmul %176, %177, %cst_69 {dimension_numbers = #tpu.dot_dimension_numbers<[1], [0], [0], [1], [0, 0, 1, 1], [], []>} : vector<3x32xbf16>, vector<32x384xbf16>, vector<3x384xf32> -> vector<3x384xf32>
    %179 = arith.addf %173, %178 : vector<3x384xf32>
    %c366_i32_70 = arith.constant 366 : i32
    %180 = tpu.dynamic_rotate %137 by %c366_i32_70 dim 1 : vector<32x384xf32>, i32 -> vector<32x384xf32>
    %181 = vector.extract_strided_slice %138 {offsets = [7, 0, 0], sizes = [1, 3, 32], strides = [1, 1, 1]} : vector<9x3x32xbf16> to vector<1x3x32xbf16>
    %182 = vector.shape_cast %181 : vector<1x3x32xbf16> to vector<3x32xbf16>
    %183 = arith.truncf %180 : vector<32x384xf32> to vector<32x384xbf16>
    %cst_71 = arith.constant dense<0.000000e+00> : vector<3x384xf32>
    %184 = tpu.matmul %182, %183, %cst_71 {dimension_numbers = #tpu.dot_dimension_numbers<[1], [0], [0], [1], [0, 0, 1, 1], [], []>} : vector<3x32xbf16>, vector<32x384xbf16>, vector<3x384xf32> -> vector<3x384xf32>
    %185 = arith.addf %179, %184 : vector<3x384xf32>
    %c365_i32_72 = arith.constant 365 : i32
    %186 = tpu.dynamic_rotate %137 by %c365_i32_72 dim 1 : vector<32x384xf32>, i32 -> vector<32x384xf32>
    %187 = vector.extract_strided_slice %138 {offsets = [8, 0, 0], sizes = [1, 3, 32], strides = [1, 1, 1]} : vector<9x3x32xbf16> to vector<1x3x32xbf16>
    %188 = vector.shape_cast %187 : vector<1x3x32xbf16> to vector<3x32xbf16>
    %189 = arith.truncf %186 : vector<32x384xf32> to vector<32x384xbf16>
    %cst_73 = arith.constant dense<0.000000e+00> : vector<3x384xf32>
    %190 = tpu.matmul %188, %189, %cst_73 {dimension_numbers = #tpu.dot_dimension_numbers<[1], [0], [0], [1], [0, 0, 1, 1], [], []>} : vector<3x32xbf16>, vector<32x384xbf16>, vector<3x384xf32> -> vector<3x384xf32>
    %191 = arith.addf %185, %190 : vector<3x384xf32>
    %192 = vector.broadcast %139 : vector<3x1xf32> to vector<3x384xf32>
    %193 = arith.addf %191, %192 : vector<3x384xf32>
    %cst_74 = arith.constant 0.000000e+00 : f32
    %194 = vector.shape_cast %2 : vector<1x384xi1> to vector<1x384xi1>
    %195 = vector.broadcast %194 : vector<1x384xi1> to vector<3x384xi1>
    %196 = vector.broadcast %cst_74 : f32 to vector<3x384xf32>
    %197 = arith.select %195, %193, %196 : vector<3x384xi1>, vector<3x384xf32>
    %c0_75 = arith.constant 0 : index
    %c0_76 = arith.constant 0 : index
    %c0_77 = arith.constant 0 : index
    %198 = vector.load %arg13[%c0_75, %c0_76, %c0_77] : memref<1x3x384xf32, #tpu.memory_space<vmem>>, vector<1x3x384xf32>
    %199 = vector.shape_cast %198 : vector<1x3x384xf32> to vector<3x384xf32>
    %200 = vector.shape_cast %197 : vector<3x384xf32> to vector<1x3x384xf32>
    tpu.vector_store %arg13[%c0_75, %c0_76, %c0_77], %200 {strides = array<i32>} : memref<1x3x384xf32, #tpu.memory_space<vmem>>, vector<1x3x384xf32>,
    return
  }
  func.func @transform_0(%arg0: i32) -> (i32, i32) {
    %c0_i32 = arith.constant 0 : i32
    %c0_i32_0 = arith.constant 0 : i32
    %c0_i32_1 = arith.constant 0 : i32
    return %c0_i32, %c0_i32_0 : i32, i32
  }
  func.func @transform_1(%arg0: i32) -> (i32, i32, i32) {
    %c0_i32 = arith.constant 0 : i32
    %c0_i32_0 = arith.constant 0 : i32
    %c0_i32_1 = arith.constant 0 : i32
    return %arg0, %c0_i32, %c0_i32_0 : i32, i32, i32
  }
  func.func @transform_2(%arg0: i32) -> (i32, i32, i32) {
    %c0_i32 = arith.constant 0 : i32
    %c0_i32_0 = arith.constant 0 : i32
    %c0_i32_1 = arith.constant 0 : i32
    %c0_i32_2 = arith.constant 0 : i32
    return %c0_i32, %c0_i32_0, %c0_i32_1 : i32, i32, i32
  }
  func.func @transform_3(%arg0: i32) -> (i32, i32) {
    %c0_i32 = arith.constant 0 : i32
    %c0_i32_0 = arith.constant 0 : i32
    %c0_i32_1 = arith.constant 0 : i32
    return %c0_i32, %c0_i32_0 : i32, i32
  }
  func.func @transform_4(%arg0: i32) -> (i32, i32, i32, i32) {
    %c0_i32 = arith.constant 0 : i32
    %c0_i32_0 = arith.constant 0 : i32
    %c0_i32_1 = arith.constant 0 : i32
    %c0_i32_2 = arith.constant 0 : i32
    %c0_i32_3 = arith.constant 0 : i32
    return %c0_i32, %c0_i32_0, %c0_i32_1, %c0_i32_2 : i32, i32, i32, i32
  }
  func.func @transform_5(%arg0: i32) -> (i32, i32, i32) {
    %c0_i32 = arith.constant 0 : i32
    %c0_i32_0 = arith.constant 0 : i32
    %c0_i32_1 = arith.constant 0 : i32
    %c0_i32_2 = arith.constant 0 : i32
    return %c0_i32, %c0_i32_0, %c0_i32_1 : i32, i32, i32
  }
  func.func @transform_6(%arg0: i32) -> (i32, i32, i32, i32) {
    %c0_i32 = arith.constant 0 : i32
    %c0_i32_0 = arith.constant 0 : i32
    %c0_i32_1 = arith.constant 0 : i32
    %c0_i32_2 = arith.constant 0 : i32
    %c0_i32_3 = arith.constant 0 : i32
    return %c0_i32, %c0_i32_0, %c0_i32_1, %c0_i32_2 : i32, i32, i32, i32
  }
  func.func @transform_7(%arg0: i32) -> (i32, i32, i32) {
    %c0_i32 = arith.constant 0 : i32
    %c0_i32_0 = arith.constant 0 : i32
    %c0_i32_1 = arith.constant 0 : i32
    %c0_i32_2 = arith.constant 0 : i32
    return %c0_i32, %c0_i32_0, %c0_i32_1 : i32, i32, i32
  }
  func.func @transform_8(%arg0: i32) -> (i32, i32, i32) {
    %c0_i32 = arith.constant 0 : i32
    %c0_i32_0 = arith.constant 0 : i32
    %c0_i32_1 = arith.constant 0 : i32
    %c0_i32_2 = arith.constant 0 : i32
    return %c0_i32, %c0_i32_0, %c0_i32_1 : i32, i32, i32
  }
  func.func @transform_9(%arg0: i32) -> (i32, i32) {
    %c0_i32 = arith.constant 0 : i32
    %c0_i32_0 = arith.constant 0 : i32
    %c0_i32_1 = arith.constant 0 : i32
    return %c0_i32, %c0_i32_0 : i32, i32
  }
  func.func @transform_10(%arg0: i32) -> (i32, i32, i32) {
    %c0_i32 = arith.constant 0 : i32
    %c0_i32_0 = arith.constant 0 : i32
    %c0_i32_1 = arith.constant 0 : i32
    %c0_i32_2 = arith.constant 0 : i32
    return %c0_i32, %c0_i32_0, %c0_i32_1 : i32, i32, i32
  }
  func.func @transform_11(%arg0: i32) -> (i32, i32) {
    %c0_i32 = arith.constant 0 : i32
    %c0_i32_0 = arith.constant 0 : i32
    %c0_i32_1 = arith.constant 0 : i32
    return %c0_i32, %c0_i32_0 : i32, i32
  }
  func.func @transform_12(%arg0: i32) -> (i32, i32, i32) {
    %c0_i32 = arith.constant 0 : i32
    %c0_i32_0 = arith.constant 0 : i32
    %c0_i32_1 = arith.constant 0 : i32
    return %arg0, %c0_i32, %c0_i32_0 : i32, i32, i32
  }
}

</mosaic_0001>

<bundles_post_ra>
// kernel: msrresnet_forward.1
= control target key start
LH: loop header
LB: loop body
LE: loop exit
PB: predicated region body
PF: predicated region fallthrough
CT: control target
= control target key end

     0   :  { %17 = vsyncpa [#allocation4], 0  ;;  %s10047_s21 = smov 0   ;;  %s12946_s0 = inlined_call_operand.vmem [shape: f32[1,384], index: 0, kind: input, shape index: {}]   ;;  %s12947_s1 = inlined_call_operand.vmem [shape: f32[2,3,384], index: 1, kind: input, shape index: {}]   ;;  %s12948_s2 = inlined_call_operand.vmem [shape: bf16[9,32,3], index: 2, kind: input, shape index: {}]   ;;  %s12949_s3 = inlined_call_operand.vmem [shape: f32[32,1], index: 3, kind: input, shape index: {}]   ;;  %s12950_s4 = inlined_call_operand.vmem [shape: bf16[4,9,32,32], index: 4, kind: input, shape index: {}]   ;;  %s12951_s5 = inlined_call_operand.vmem [shape: f32[4,32,1], index: 5, kind: input, shape index: {}]   ;;  %s12952_s6 = inlined_call_operand.hbm [shape: bf16[4,9,32,32], index: 6, kind: input, shape index: {}]   ;;  %s12953_s7 = inlined_call_operand.vmem [shape: f32[4,32,1], index: 7, kind: input, shape index: {}]   ;;  %s12954_s8 = inlined_call_operand.vmem [shape: bf16[9,32,32], index: 8, kind: input, shape index: {}]   ;;  %s12955_s9 = inlined_call_operand.vmem [shape: f32[32,1], index: 9, kind: input, shape index: {}]   ;;  %s12956_s10 = inlined_call_operand.vmem [shape: bf16[9,3,32], index: 10, kind: input, shape index: {}]   ;;  %s12957_s11 = inlined_call_operand.vmem [shape: f32[3,1], index: 11, kind: input, shape index: {}]   ;;  %s12958_s12 = inlined_call_operand.vmem [shape: f32[2,3,384], index: 12, kind: output, shape index: {}]  }
   0x1 LB: > { %s7980_s22 = sadd.s32 4294967295, %s9952_s21   ;;  %p7982_p0 = scmp.ge.s32.totalorder %s9952_s21, 1  ;;  %s9952_s21 = sphi %s10047_s21, %s23_s21  }
   0x2   : > { %p311_p1 = scmp.lt.s32.totalorder %s9952_s21, 3  ;;  %s9958_s23 = smov [#allocation3]  }
   0x3   : > { %s338_s24 = sshll.u32 %s9958_s23, 4  ;;  %p8779_p3 = scmp.eq.s32.totalorder %s7980_s22, 0  ;;  %s339_s24 = int_to_ptr.vmem [resolvable:$true] %s338_s24 }
   0x4   : > { %p10055_p2 = pnand %p7982_p0, %p311_p1  ;;  %s9923_s26 = scalar_lea.vmem %s339_s24, 9216 }
   0x5   : > { %p9924_p7 = scmp.ne.s32.totalorder %s339_s24, %s9923_s26  ;;  %p9931_p10 = scmp.lt.s32.totalorder %s339_s24, %s339_s24 }
   0x6   : > { %p8775_p4 = pneg %p10055_p2  ;;  %p9932_p11 = scmp.lt.s32.totalorder %s9923_s26, %s9923_s26 }
   0x8   : > { %p8776_p5 = pnand %p8779_p3, %p8775_p4  ;;  %p9933_p12 = por %p9932_p11, %p9931_p10 }
   0xa   : > { %p9914_p6 = pneg %p8776_p5 }
   0xc   : > { %p9926_p8 = pnand %p9924_p7, %p9914_p6 }
   0xe   : > { %p9927_p9 = pneg %p9926_p8 }
  0x10   : > { %p9934_p13 = pnand %p9933_p12, %p9927_p9 }
  0x12   : > { %9937 = shalt.err (!%p9934_p13)
}
  0x13   : > { %s9959_s27 = smov 64   ;;  %s9960_s28 = smov 4  }
  0x14   : > { %8778 = dma.hbm_to_vmem [thread:$0]  (!%p8776_p5), %s12952_s6, 9216, %s339_s24, [#allocation4], %s9959_s27, %s9959_s27, %s9960_s28  }
  0x15   : > { %377 = sbr.rel (%p10055_p2) target bundleno = 2243 (0x8c3), region = 68 }
  0x1a   : > { %9947 = dma.done.wait (%p8779_p3), [#allocation4], 9216  }
  0x1b   : > { %9949 = vsyncadd (%p8779_p3), [#allocation4], 4294958080  ;;  %p419_p0 = scmp.lt.s32.totalorder %s7980_s22, 1  ;;  %v12959_v3 = vmov 0   ;;  %v10089_v4 = vld [vmem:[%s12948_s2 + $0x10] sm:$0xff]   ;;  %s9962_s23 = smov 18   ;;  %v12961_v11 = vlaneseq }
  0x1c   : > { %567 = vmatprep.mubr.bf16.mxu0 %v12959_v3  ;;  %8862 = vset.pattern.permute.xlu1 %v12959_v3  ;;  %s12977_s24 = smov 19   ;;  %vm515_vm0 = vcmask 23552   ;;  %s12975_s25 = smov 17   ;;  %v471_v7 = vld [vmem:[%s12949_s3 + $0x8] sm:$0xff]  ;;  %v470_v8 = vld [vmem:[%s12949_s3] sm:$0xff]  ;;  %v472_v9 = vld [vmem:[%s12949_s3 + $0x10] sm:$0xff] }
  0x1d   : > { %s13182_s22 = smov (!%p419_p0, %s7980_s22), 1  ;;  %8430 = vmatprep.mubr.msk.bf16.mxu1 %vm515_vm0, %v10089_v4  ;;  %8861 = vset.pattern.permute.xlu0 %v12959_v3  ;;  %s12973_s26 = smov 1   ;;  %v473_v10 = vld [vmem:[%s12949_s3 + $0x18] sm:$0xff]  ;;  %v10136_v12 = vand.u32 127, %v12961_v11  ;;  %vm522_vm1 = vcmask 1040384   ;;  %vm523_vm4 = vcmask 1041408  }
  0x1e   : > { %s8770_s13 = smul.u32 12, %s13182_s22  ;;  %s12971_s27 = smov 127   ;;  %v9970_v15 = vmov 65535   ;;  %v8865_v45 = vld [vmem:[%s12948_s2 + $0x18] sm:$0xff]   ;;  %v8866_v58 = vld [vmem:[%s12948_s2] sm:$0xff]  }
  0x1f   : > { %s12969_s28 = smov 111   ;;  %s12967_s29 = smov 110   ;;  %13006 = vst [vmem:[#allocation6_spill] sm:$0xff] %v10136_v12  ;;  %vm498_vm2 = vcmp.lt.s32.totalorder %v10136_v12, 18  ;;  %vm485_vm3 = vcmp.lt.s32.totalorder %v10136_v12, 19  ;;  %v524_v16 = vsel %vm522_vm1, 4294967295, %v9970_v15 }
  0x20   : > { %s423_s16 = scalar_lea.vmem %s12947_s1, %s8770_s13  ;;  %s10075_s19 = scalar_lea.vmem %s12958_s12, %s8770_s13  ;;  %v10144_v24 = vsel %vm523_vm4, %v524_v16, 0  ;;  %vm770_vm5 = vcmp.lt.s32.totalorder %v10136_v12, 17  ;;  %vm922_vm6 = vcmp.lt.s32.totalorder %v10136_v12, 1  ;;  %vm1216_vm7 = vcmp.lt.s32.totalorder %v10136_v12, 127 }
  0x21   : > { %v10077_v0 = vld [vmem:[%s423_s16] sm:$0x77]  ;;  %v10091_v5 = vld [vmem:[%s423_s16 + $0x8] sm:$0x7]  ;;  %s12965_s30 = smov 109   ;;  %vm13004_vm8 = vcmp.lt.s32.totalorder %v10136_v12, 111 }
  0x22   : > { %v10081_v1 = vcombine.high %v10077_v0, %v10077_v0  ;;  %v1070_v16 = vpack.c.bf16 %v10091_v5, %v10091_v5  ;;  %vm13003_vm9 = vcmp.lt.s32.totalorder %v10136_v12, 110  ;;  %vm13002_vm10 = vcmp.lt.s32.totalorder %v10136_v12, 109  ;;  %s10606_s17 = smov 0  }
  0x23   : > { %v13020_v12 = vlaneseq }
  0x24   : > { %v8821_v2 = vpack.i.bf16 %v10081_v1, %v10077_v0  ;;  %v8846_v6 = vpack.i.bf16 %v10091_v5, %v10081_v1 }
  0x26   : > { %8822 = vrot.lane.b32.xlu0 %v8821_v2, %s9962_s23  ;;  %8827 = vrot.lane.b32.xlu1 %v8821_v2, %s12977_s24 }
  0x2a   : > { %496 = vrot.lane.b32.xlu0 %v10091_v5, %s9962_s23  ;;  %481 = vrot.lane.b32.xlu1 %v10091_v5, %s12977_s24 }
  0x2e   : > { %8832 = vrot.lane.b32.xlu0 %v8821_v2, %s12975_s25  ;;  %768 = vrot.lane.b32.xlu1 %v10091_v5, %s12975_s25 }
  0x32   : > { %8837 = vrot.lane.b32.xlu0 %v8821_v2, %s12973_s26  ;;  %920 = vrot.lane.b32.xlu1 %v10091_v5, %s12973_s26 }
  0x36   : > { %8842 = vrot.lane.b32.xlu0 %v8821_v2, %s12971_s27  ;;  %1214 = vrot.lane.b32.xlu1 %v10091_v5, %s12971_s27 }
  0x3a   : > { %8847 = vrot.lane.b32.xlu0 %v8846_v6, %s12969_s28  ;;  %1362 = vrot.lane.b32.xlu1 %v10077_v0, %s12969_s28 }
  0x3e   : > { %8852 = vrot.lane.b32.xlu0 %v8821_v2, %s12967_s29  ;;  %1518 = vrot.lane.b32.xlu1 %v10091_v5, %s12967_s29 }
  0x42   : > { %8857 = vrot.lane.b32.xlu0 %v8846_v6, %s12965_s30  ;;  %1666 = vrot.lane.b32.xlu1 %v10077_v0, %s12965_s30 }
  0x46   : > { %1825 = vperm.xlu1 %8862, %v471_v7   ;;  %1820 = vperm.xlu0 %8861, %v470_v8  }
  0x4a   : > { %1830 = vperm.xlu1 %8862, %v472_v9   ;;  %1835 = vperm.xlu0 %8861, %v473_v10   ;;  %v8868_v9 = vld [vmem:[%s12948_s2 + $0x20] sm:$0xff]  }
  0x98   : > { %v8823_v13 = vpop.permute.xlu0 %8822  ;;  %v8828_v14 = vpop.permute.xlu1 %8827 }
  0x99   : > { %v8825_v17 = vunpack.i.h.bf16 %v8823_v13  ;;  %v8824_v18 = vunpack.i.l.bf16 %v8823_v13  ;;  %v8830_v19 = vunpack.i.h.bf16 %v8828_v14  ;;  %v8829_v20 = vunpack.i.l.bf16 %v8828_v14 }
  0x9a   : > { %v1069_v14 = vpack.c.bf16 %v10081_v1, %v10081_v1 }
  0x9b   : > { %v500_v21 = vsel %vm498_vm2, %v8824_v18, %v8825_v17  ;;  %v487_v22 = vsel %vm485_vm3, %v8829_v20, %v8830_v19 }
  0x9c   : > { %v497_v23 = vpop.permute.xlu0 %496  ;;  %v482_v25 = vpop.permute.xlu1 %481  ;;  %v503_v26 = vpack.c.bf16 %v500_v21, %v500_v21  ;;  %v490_v27 = vpack.c.bf16 %v487_v22, %v487_v22  ;;  %v1094_v21 = vand.u32 %v1070_v16, %v10144_v24  ;;  %v8870_v22 = vld [vmem:[%s12948_s2 + $0x30] sm:$0xff]  }
  0x9d   : > { %v499_v28 = vsel %vm498_vm2, %v8825_v17, %v497_v23  ;;  %v501_v29 = vsel %vm498_vm2, %v497_v23, %v8824_v18  ;;  %v486_v30 = vsel %vm485_vm3, %v8830_v19, %v482_v25  ;;  %v488_v31 = vsel %vm485_vm3, %v482_v25, %v8829_v20  ;;  %v8869_v17 = vld [vmem:[%s12948_s2 + $0x28] sm:$0xff]  }
  0x9e   : > { %v502_v32 = vpack.c.bf16 %v501_v29, %v501_v29  ;;  %v504_v33 = vpack.c.bf16 %v499_v28, %v499_v28  ;;  %v491_v34 = vpack.c.bf16 %v486_v30, %v486_v30  ;;  %v489_v35 = vpack.c.bf16 %v488_v31, %v488_v31  ;;  %v8871_v30 = vld [vmem:[%s12948_s2 + $0x38] sm:$0xff]  }
  0x9f   : > { %v530_v36 = vand.u32 %v10144_v24, %v503_v26  ;;  %v657_v40 = vand.u32 %v10144_v24, %v490_v27  ;;  %v1091_v20 = vand.u32 %v1069_v14, %v10144_v24  ;;  %v1068_v27 = vpack.c.bf16 %v10077_v0, %v10077_v0  ;;  %v8877_v14 = vld [vmem:[%s12948_s2 + $0x68] sm:$0xff]  }
  0xa0   : > { %v527_v37 = vand.u32 %v10144_v24, %v502_v32  ;;  %v533_v38 = vand.u32 %v10144_v24, %v504_v33  ;;  %v660_v39 = vand.u32 %v10144_v24, %v491_v34  ;;  %v8833_v41 = vpop.permute.xlu0 %8832  ;;  %v769_v42 = vpop.permute.xlu1 %768  ;;  %v654_v46 = vand.u32 %v10144_v24, %v489_v35 }
  0xa1   : > { %549 = vmatprep.subr.bf16.mxu0 %v530_v36  ;;  %v8835_v43 = vunpack.i.h.bf16 %v8833_v41  ;;  %v8834_v44 = vunpack.i.l.bf16 %v8833_v41  ;;  %v1088_v33 = vand.u32 %v1068_v27, %v10144_v24  ;;  %v8872_v36 = vld [vmem:[%s12948_s2 + $0x40] sm:$0xff]  }
  0xa2   : > { %550 = vmatpush1.bf16.msra.mxu0 %v527_v37  ;;  %8428 = vmatprep.subr.bf16.mxu1 %v533_v38 }
  0xa3   : > { %8429 = vmatpush3.bf16.msra.mxu1 %v533_v38  ;;  %8434 = vmatprep.subr.bf16.mxu0 %v660_v39  ;;  %v771_v47 = vsel %vm770_vm5, %v8835_v43, %v769_v42  ;;  %v772_v48 = vsel %vm770_vm5, %v8834_v44, %v8835_v43  ;;  %v773_v59 = vsel %vm770_vm5, %v769_v42, %v8834_v44  ;;  %v8873_v44 = vld [vmem:[%s12948_s2 + $0x48] sm:$0xff]  }
  0xa4   : > { %676 = vmatprep.subr.bf16.mxu1 %v657_v40  ;;  %v776_v49 = vpack.c.bf16 %v771_v47, %v771_v47  ;;  %v8838_v50 = vpop.permute.xlu0 %8837  ;;  %v775_v51 = vpack.c.bf16 %v772_v48, %v772_v48  ;;  %v921_v60 = vpop.permute.xlu1 %920  ;;  %v774_v63 = vpack.c.bf16 %v773_v59, %v773_v59  ;;  %v8875_v59 = vld [vmem:[%s12948_s2 + $0x58] sm:$0xff]  }
  0xa5   : > { %7991 = vmatmul.mubr.msk.bf16.vlgmr.msra.gmra.mxu0 %vm515_vm0, %v10089_v4  ;;  %v8840_v52 = vunpack.i.h.bf16 %v8838_v50  ;;  %v8839_v53 = vunpack.i.l.bf16 %v8838_v50  ;;  %v8867_v4 = vld [vmem:[%s12948_s2 + $0x8] sm:$0xff]  }
  0xa6   : > { %8431 = vmatmul.mubr.msk.bf16.vlgmr.msra.gmra.mxu1 %vm515_vm0, %v8865_v45  ;;  %8435 = vmatpush3.bf16.msra.mxu0 %v660_v39  ;;  %v797_v54 = vand.u32 %v775_v51, %v10144_v24  ;;  %v800_v55 = vand.u32 %v776_v49, %v10144_v24  ;;  %v794_v6 = vand.u32 %v774_v63, %v10144_v24  ;;  %v8874_v51 = vld [vmem:[%s12948_s2 + $0x50] sm:$0xff]  }
  0xa7   : > { %677 = vmatpush1.bf16.msra.mxu1 %v654_v46  ;;  %577 = vmatprep.mubr.bf16.mxu0 %v12959_v3  ;;  %v924_v56 = vsel %vm922_vm6, %v8839_v53, %v8840_v52  ;;  %v923_v61 = vsel %vm922_vm6, %v8840_v52, %v921_v60  ;;  %v925_v8 = vsel %vm922_vm6, %v921_v60, %v8839_v53 }
  0xa8   : > { %694 = vmatprep.mubr.bf16.mxu1 %v12959_v3  ;;  %816 = vmatprep.subr.bf16.mxu0 %v797_v54  ;;  %v927_v57 = vpack.c.bf16 %v924_v56, %v924_v56  ;;  %v928_v2 = vpack.c.bf16 %v923_v61, %v923_v61  ;;  %v8843_v10 = vpop.permute.xlu0 %8842  ;;  %v926_v13 = vpack.c.bf16 %v925_v8, %v925_v8  ;;  %v1215_v18 = vpop.permute.xlu1 %1214 }
  0xa9   : > { %8440 = vmatprep.subr.bf16.mxu1 %v800_v55  ;;  %v8845_v15 = vunpack.i.h.bf16 %v8843_v10  ;;  %v8844_v23 = vunpack.i.l.bf16 %v8843_v10 }
  0xaa   : > { %v949_v62 = vand.u32 %v927_v57, %v10144_v24  ;;  %v952_v7 = vand.u32 %v928_v2, %v10144_v24  ;;  %v946_v19 = vand.u32 %v926_v13, %v10144_v24 }
  0xab   : > { %v1217_v1 = vsel %vm1216_vm7, %v8845_v15, %v1215_v18  ;;  %v1219_v25 = vsel %vm1216_vm7, %v1215_v18, %v8844_v23  ;;  %v1218_v0 = vsel %vm1216_vm7, %v8844_v23, %v8845_v15  ;;  %v8878_v18 = vld [vmem:[%s12948_s2 + $0x70] sm:$0xff]  }
  0xac   : > { %v1221_v5 = vpack.c.bf16 %v1217_v1, %v1217_v1  ;;  %v8848_v28 = vpop.permute.xlu0 %8847  ;;  %v1222_v29 = vpack.c.bf16 %v1219_v25, %v1219_v25  ;;  %v1363_v35 = vpop.permute.xlu1 %1362  ;;  %v1220_v40 = vpack.c.bf16 %v1218_v0, %v1218_v0 }
  0xad   : > { %7992 = vmatmul.mubr.msk.bf16.gmra.mxu0 %vm515_vm0, %v8865_v45  ;;  %v8850_v31 = vunpack.i.h.bf16 %v8848_v28  ;;  %v8849_v32 = vunpack.i.l.bf16 %v8848_v28 }
  0xae   : > { %7997 = vmatmul.mubr.msk.bf16.vlgmr.msra.gmra.mxu1 %vm515_vm0, %v8866_v58  ;;  %8436 = vmatprep.mubr.msk.bf16.mxu0 %vm515_vm0, %v8866_v58  ;;  %v1243_v26 = vand.u32 %v1221_v5, %v10144_v24  ;;  %v1246_v34 = vand.u32 %v1222_v29, %v10144_v24  ;;  %v1240_v46 = vand.u32 %v1220_v40, %v10144_v24  ;;  %v8880_v5 = vld [vmem:[%s12948_s2 + $0x80] sm:$0xff]  }
  0xaf   : > { %704 = vmatprep.mubr.bf16.mxu1 %v12959_v3  ;;  %8441 = vmatpush3.bf16.msra.mxu1 %v800_v55  ;;  %v1369_v37 = vsel %vm13004_vm8, %v8849_v32, %v8850_v31  ;;  %v1371_v38 = vsel %vm13004_vm8, %v8850_v31, %v1363_v35  ;;  %v1370_v53 = vsel %vm13004_vm8, %v1363_v35, %v8849_v32 }
  0xb0   : > { %968 = vmatprep.subr.bf16.mxu1 %v949_v62  ;;  %v8853_v39 = vpop.permute.xlu0 %8852  ;;  %v1373_v41 = vpack.c.bf16 %v1369_v37, %v1369_v37  ;;  %v1374_v42 = vpack.c.bf16 %v1371_v38, %v1371_v38  ;;  %v1519_v45 = vpop.permute.xlu1 %1518  ;;  %v1372_v56 = vpack.c.bf16 %v1370_v53, %v1370_v53 }
  0xb1   : > { %v8855_v43 = vunpack.i.h.bf16 %v8853_v39  ;;  %v8854_v52 = vunpack.i.l.bf16 %v8853_v39 }
  0xb2   : > { %v1395_v47 = vand.u32 %v1373_v41, %v10144_v24  ;;  %v1398_v48 = vand.u32 %v1374_v42, %v10144_v24  ;;  %v1392_v62 = vand.u32 %v1372_v56, %v10144_v24 }
  0xb3   : > { %v1521_v49 = vsel %vm13003_vm9, %v8855_v43, %v1519_v45  ;;  %v1523_v54 = vsel %vm13003_vm9, %v1519_v45, %v8854_v52 }
  0xb4   : > { %v1525_v50 = vpack.c.bf16 %v1521_v49, %v1521_v49  ;;  %v8858_v57 = vpop.permute.xlu0 %8857  ;;  %v1526_v58 = vpack.c.bf16 %v1523_v54, %v1523_v54  ;;  %v1667_v2 = vpop.permute.xlu1 %1666 }
  0xb5   : > { %8437 = vmatmul.mubr.msk.bf16.vlgmr.msra.gmra.mxu0 %vm515_vm0, %v8867_v4  ;;  %v8860_v60 = vunpack.i.h.bf16 %v8858_v57  ;;  %v8859_v61 = vunpack.i.l.bf16 %v8858_v57 }
  0xb6   : > { %817 = vmatpush1.bf16.msra.mxu0 %v794_v6  ;;  %7998 = vmatmul.mubr.msk.bf16.gmra.mxu1 %vm515_vm0, %v8867_v4  ;;  %v1547_v55 = vand.u32 %v1525_v50, %v10144_v24  ;;  %v1550_v63 = vand.u32 %v1526_v58, %v10144_v24  ;;  %v1522_v4 = vsel %vm13003_vm9, %v8854_v52, %v8855_v43  ;;  %v8876_v6 = vld [vmem:[%s12948_s2 + $0x60] sm:$0xff]  }
  0xb7   : > { %834 = vmatprep.mubr.bf16.mxu0 %v12959_v3  ;;  %8446 = vmatprep.subr.bf16.mxu0 %v952_v7  ;;  %v1675_v8 = vsel %vm13002_vm10, %v8860_v60, %v1667_v2 }
  0xb8   : > { %8442 = vmatprep.mubr.msk.bf16.mxu1 %vm515_vm0, %v8868_v9  ;;  %v1678_v13 = vpack.c.bf16 %v1675_v8, %v1675_v8 }
  0xbd   : > { %8003 = vmatmul.mubr.msk.bf16.vlgmr.msra.gmra.mxu0 %vm515_vm0, %v8868_v9  ;;  %v1524_v9 = vpack.c.bf16 %v1522_v4, %v1522_v4 }
  0xbe   : > { %8447 = vmatpush3.bf16.msra.mxu0 %v952_v7  ;;  %8443 = vmatmul.mubr.msk.bf16.vlgmr.msra.gmra.mxu1 %vm515_vm0, %v8869_v17  ;;  %v1673_v7 = vsel %vm13002_vm10, %v8859_v61, %v8860_v60 }
  0xbf   : > { %969 = vmatpush1.bf16.msra.mxu1 %v946_v19  ;;  %844 = vmatprep.mubr.bf16.mxu0 %v12959_v3  ;;  %v1677_v10 = vpack.c.bf16 %v1673_v7, %v1673_v7  ;;  %v1544_v15 = vand.u32 %v1524_v9, %v10144_v24  ;;  %v1674_v19 = vsel %vm13002_vm10, %v1667_v2, %v8859_v61 }
  0xc0   : > { %986 = vmatprep.mubr.bf16.mxu1 %v12959_v3  ;;  %1110 = vmatprep.subr.bf16.mxu0 %v1091_v20  ;;  %v1676_v20 = vpack.c.bf16 %v1674_v19, %v1674_v19 }
  0xc1   : > { %8452 = vmatprep.subr.bf16.mxu1 %v1094_v21  ;;  %v1699_v16 = vand.u32 %v1677_v10, %v10144_v24 }
  0xc2   : > { %v1696_v1 = vand.u32 %v1676_v20, %v10144_v24 }
  0xc5   : > { %8004 = vmatmul.mubr.msk.bf16.gmra.mxu0 %vm515_vm0, %v8869_v17  ;;  %v1702_v17 = vand.u32 %v1678_v13, %v10144_v24 }
  0xc6   : > { %8009 = vmatmul.mubr.msk.bf16.vlgmr.msra.gmra.mxu1 %vm515_vm0, %v8870_v22  ;;  %8448 = vmatprep.mubr.msk.bf16.mxu0 %vm515_vm0, %v8870_v22  ;;  %v8881_v22 = vld [vmem:[%s12948_s2 + $0x88] sm:$0xff]  }
  0xc7   : > { %996 = vmatprep.mubr.bf16.mxu1 %v12959_v3  ;;  %8453 = vmatpush3.bf16.msra.mxu1 %v1094_v21  ;;  %v8879_v21 = vld [vmem:[%s12948_s2 + $0x78] sm:$0xff]  }
  0xc8   : > { %1262 = vmatprep.subr.bf16.mxu1 %v1243_v26 }
  0xcd   : > { %8449 = vmatmul.mubr.msk.bf16.vlgmr.msra.gmra.mxu0 %vm515_vm0, %v8871_v30 }
  0xce   : > { %8010 = vmatmul.mubr.msk.bf16.gmra.mxu1 %vm515_vm0, %v8871_v30  ;;  %1111 = vmatpush1.bf16.msra.mxu0 %v1088_v33 }
  0xcf   : > { %1128 = vmatprep.mubr.bf16.mxu0 %v12959_v3  ;;  %8458 = vmatprep.subr.bf16.mxu0 %v1246_v34 }
  0xd0   : > { %8454 = vmatprep.mubr.msk.bf16.mxu1 %vm515_vm0, %v8872_v36 }
  0xd5   : > { %8015 = vmatmul.mubr.msk.bf16.vlgmr.msra.gmra.mxu0 %vm515_vm0, %v8872_v36 }
  0xd6   : > { %8459 = vmatpush3.bf16.msra.mxu0 %v1246_v34  ;;  %8455 = vmatmul.mubr.msk.bf16.vlgmr.msra.gmra.mxu1 %vm515_vm0, %v8873_v44 }
  0xd7   : > { %1263 = vmatpush1.bf16.msra.mxu1 %v1240_v46  ;;  %1138 = vmatprep.mubr.bf16.mxu0 %v12959_v3 }
  0xd8   : > { %1280 = vmatprep.mubr.bf16.mxu1 %v12959_v3  ;;  %1414 = vmatprep.subr.bf16.mxu0 %v1395_v47 }
  0xd9   : > { %8464 = vmatprep.subr.bf16.mxu1 %v1398_v48 }
  0xdd   : > { %8016 = vmatmul.mubr.msk.bf16.gmra.mxu0 %vm515_vm0, %v8873_v44 }
  0xde   : > { %8021 = vmatmul.mubr.msk.bf16.vlgmr.msra.gmra.mxu1 %vm515_vm0, %v8874_v51  ;;  %8460 = vmatprep.mubr.msk.bf16.mxu0 %vm515_vm0, %v8874_v51 }
  0xdf   : > { %1290 = vmatprep.mubr.bf16.mxu1 %v12959_v3  ;;  %8465 = vmatpush3.bf16.msra.mxu1 %v1398_v48 }
  0xe0   : > { %1566 = vmatprep.subr.bf16.mxu1 %v1547_v55 }
  0xe5   : > { %8461 = vmatmul.mubr.msk.bf16.vlgmr.msra.gmra.mxu0 %vm515_vm0, %v8875_v59 }
  0xe6   : > { %1415 = vmatpush1.bf16.msra.mxu0 %v1392_v62  ;;  %8022 = vmatmul.mubr.msk.bf16.gmra.mxu1 %vm515_vm0, %v8875_v59 }
  0xe7   : > { %1432 = vmatprep.mubr.bf16.mxu0 %v12959_v3  ;;  %8470 = vmatprep.subr.bf16.mxu0 %v1550_v63 }
  0xe8   : > { %8466 = vmatprep.mubr.msk.bf16.mxu1 %vm515_vm0, %v8876_v6 }
  0xed   : > { %8027 = vmatmul.mubr.msk.bf16.vlgmr.msra.gmra.mxu0 %vm515_vm0, %v8876_v6 }
  0xee   : > { %8471 = vmatpush3.bf16.msra.mxu0 %v1550_v63  ;;  %8467 = vmatmul.mubr.msk.bf16.vlgmr.msra.gmra.mxu1 %vm515_vm0, %v8877_v14 }
  0xef   : > { %1567 = vmatpush1.bf16.msra.mxu1 %v1544_v15  ;;  %1442 = vmatprep.mubr.bf16.mxu0 %v12959_v3 }
  0xf0   : > { %1584 = vmatprep.mubr.bf16.mxu1 %v12959_v3  ;;  %1718 = vmatprep.subr.bf16.mxu0 %v1699_v16 }
  0xf1   : > { %8476 = vmatprep.subr.bf16.mxu1 %v1702_v17 }
  0xf5   : > { %8028 = vmatmul.mubr.msk.bf16.gmra.mxu0 %vm515_vm0, %v8877_v14 }
  0xf6   : > { %8033 = vmatmul.mubr.msk.bf16.vlgmr.msra.gmra.mxu1 %vm515_vm0, %v8878_v18  ;;  %8472 = vmatprep.mubr.msk.bf16.mxu0 %vm515_vm0, %v8878_v18 }
  0xf7   : > { %1594 = vmatprep.mubr.bf16.mxu1 %v12959_v3  ;;  %8477 = vmatpush3.bf16.msra.mxu1 %v1702_v17 }
  0xfd   : > { %8473 = vmatmul.mubr.msk.bf16.vlgmr.msra.gmra.mxu0 %vm515_vm0, %v8879_v21 }
  0xfe   : > { %1719 = vmatpush1.bf16.msra.mxu0 %v1696_v1  ;;  %8034 = vmatmul.mubr.msk.bf16.gmra.mxu1 %vm515_vm0, %v8879_v21 }
  0xff   : > { %1736 = vmatprep.mubr.bf16.mxu0 %v12959_v3  ;;  %8478 = vmatprep.mubr.msk.bf16.mxu1 %vm515_vm0, %v8880_v5 }
 0x105   : > { %8039 = vmatmul.mubr.msk.bf16.vlgmr.msra.gmra.mxu0 %vm515_vm0, %v8880_v5 }
 0x106   : > { %8479 = vmatmul.mubr.msk.bf16.vlgmr.msra.gmra.mxu1 %vm515_vm0, %v8881_v22  ;;  %1746 = vmatprep.mubr.bf16.mxu0 %v12959_v3  ;;  %v430_v3 = vld [vmem:[%s12946_s0] sm:$0x7] }
 0x107   : > { %vm431_vm11 = vcmp.ne.f32.partialorder %v430_v3, 0.0 }
 0x10d   : > { %8040 = vmatmul.mubr.msk.bf16.gmra.mxu0 %vm515_vm0, %v8881_v22 }
 0x165   : > { %v569_v24 = vpop.f32.mrf.mxu0 }
 0x166   : > { %v8432_v23 = vpop.f32.mrf.mxu1 }
 0x167   : > { %v571_v25 = vpop.f32.mrf.mxu0 }
 0x168   : > { %v622_v26 = vpop.f32.mrf.mxu1 }
 0x169   : > { %v573_v27 = vpop.f32.mrf.mxu0 }
 0x16a   : > { %v8433_v28 = vpop.f32.mrf.mxu1 }
 0x16b   : > { %v575_v29 = vpop.f32.mrf.mxu0 }
 0x16c   : > { %v625_v30 = vpop.f32.mrf.mxu1 }
 0x16d   : > { %v579_v31 = vpop.f32.mrf.mxu0 }
 0x16e   : > { %v696_v32 = vpop.f32.mrf.mxu1 }
 0x16f   : > { %v10333_v33 = vadd.f32 %v696_v32, %v569_v24  ;;  %v581_v34 = vpop.f32.mrf.mxu0 }
 0x170   : > { %v698_v35 = vpop.f32.mrf.mxu1 }
 0x171   : > { %v10335_v0 = vadd.f32 %v698_v35, %v571_v25  ;;  %v583_v36 = vpop.f32.mrf.mxu0 }
 0x172   : > { %v700_v37 = vpop.f32.mrf.mxu1 }
 0x173   : > { %v10337_v38 = vadd.f32 %v700_v37, %v573_v27  ;;  %v585_v39 = vpop.f32.mrf.mxu0 }
 0x174   : > { %v702_v40 = vpop.f32.mrf.mxu1 }
 0x175   : > { %v10339_v41 = vadd.f32 %v702_v40, %v575_v29  ;;  %v8438_v42 = vpop.f32.mrf.mxu0 }
 0x176   : > { %v10341_v43 = vadd.f32 %v8438_v42, %v8432_v23  ;;  %v706_v44 = vpop.f32.mrf.mxu1 }
 0x177   : > { %v10343_v45 = vadd.f32 %v706_v44, %v579_v31  ;;  %v749_v46 = vpop.f32.mrf.mxu0 }
 0x178   : > { %v10345_v47 = vadd.f32 %v749_v46, %v622_v26  ;;  %v708_v48 = vpop.f32.mrf.mxu1 }
 0x179   : > { %v10347_v49 = vadd.f32 %v708_v48, %v581_v34  ;;  %v8439_v50 = vpop.f32.mrf.mxu0 }
 0x17a   : > { %v10349_v51 = vadd.f32 %v8439_v50, %v8433_v28  ;;  %v710_v52 = vpop.f32.mrf.mxu1 }
 0x17b   : > { %v10351_v53 = vadd.f32 %v710_v52, %v583_v36  ;;  %v752_v54 = vpop.f32.mrf.mxu0 }
 0x17c   : > { %v10353_v55 = vadd.f32 %v752_v54, %v625_v30  ;;  %v712_v56 = vpop.f32.mrf.mxu1 }
 0x17d   : > { %v10355_v57 = vadd.f32 %v712_v56, %v585_v39  ;;  %v10357_v58 = vpop.f32.mrf.mxu0 }
 0x17e   : > { %v10359_v59 = vpop.f32.mrf.mxu1 }
 0x17f   : > { %v10361_v60 = vpop.f32.mrf.mxu0 }
 0x180   : > { %v10363_v61 = vpop.f32.mrf.mxu1 }
 0x181   : > { %v10365_v62 = vpop.f32.mrf.mxu0 }
 0x182   : > { %v10367_v63 = vpop.f32.mrf.mxu1 }
 0x183   : > { %v10369_v2 = vpop.f32.mrf.mxu0 }
 0x184   : > { %v10371_v4 = vpop.f32.mrf.mxu1 }
 0x185   : > { %v10373_v6 = vpop.f32.mrf.mxu0 }
 0x186   : > { %v10375_v7 = vpop.f32.mrf.mxu1 }
 0x187   : > { %v10377_v8 = vpop.f32.mrf.mxu0 }
 0x188   : > { %v10379_v9 = vpop.f32.mrf.mxu1 }
 0x189   : > { %v10381_v10 = vpop.f32.mrf.mxu0 }
 0x18a   : > { %v10383_v13 = vpop.f32.mrf.mxu1 }
 0x18b   : > { %v10385_v14 = vpop.f32.mrf.mxu0 }
 0x18c   : > { %v10387_v15 = vpop.f32.mrf.mxu1 }
 0x18d   : > { %v10389_v16 = vpop.f32.mrf.mxu0 }
 0x18e   : > { %v10391_v17 = vpop.f32.mrf.mxu1 }
 0x18f   : > { %v10393_v18 = vpop.f32.mrf.mxu0 }
 0x190   : > { %v10395_v19 = vpop.f32.mrf.mxu1 }
 0x191   : > { %v10397_v20 = vpop.f32.mrf.mxu0 }
 0x192   : > { %v10399_v21 = vpop.f32.mrf.mxu1 }
 0x193   : > { %v10401_v1 = vpop.f32.mrf.mxu0 }
 0x194   : > { %v10403_v5 = vpop.f32.mrf.mxu1 }
 0x195   : > { %v10405_v22 = vpop.f32.mrf.mxu0 }
 0x196   : > { %v10407_v24 = vpop.f32.mrf.mxu1 }
 0x197   : > { %v10409_v23 = vpop.f32.mrf.mxu0 }
 0x198   : > { %v10411_v25 = vpop.f32.mrf.mxu1 }
 0x199   : > { %v10413_v26 = vpop.f32.mrf.mxu0 }
 0x19a   : > { %v10415_v27 = vpop.f32.mrf.mxu1 }
 0x19b   : > { %v10417_v28 = vpop.f32.mrf.mxu0 }
 0x19c   : > { %v10419_v29 = vpop.f32.mrf.mxu1 }
 0x19d   : > { %v10421_v30 = vpop.f32.mrf.mxu0 }
 0x19e   : > { %v10423_v31 = vpop.f32.mrf.mxu1 }
 0x19f   : > { %v10425_v32 = vpop.f32.mrf.mxu0 }
 0x1a0   : > { %v10427_v34 = vpop.f32.mrf.mxu1 }
 0x1a1   : > { %v10429_v35 = vpop.f32.mrf.mxu0 }
 0x1a2   : > { %v10431_v36 = vpop.f32.mrf.mxu1 }
 0x1a3   : > { %13007 = vst [vmem:[#allocation7_spill] sm:$0xff] %v10431_v36  ;;  %v10433_v37 = vpop.f32.mrf.mxu0 }
 0x1a4   : > { %13008 = vst [vmem:[#allocation8_spill] sm:$0xff] %v10433_v37  ;;  %v10435_v39 = vpop.f32.mrf.mxu1 }
 0x1a5   : > { %13009 = vst [vmem:[#allocation9_spill] sm:$0xff] %v10435_v39  ;;  %v10437_v40 = vpop.f32.mrf.mxu0  ;;  %v13024_v39 = vmov 0  }
 0x1a6   : > { %13010 = vst [vmem:[#allocation10_spill] sm:$0xff] %v10437_v40  ;;  %v10439_v42 = vpop.f32.mrf.mxu1  ;;  %v1886_v37 = vsel %vm431_vm11, 1, %v13024_v39  ;;  %v905_v39 = vadd.f32 %v10361_v60, %v10335_v0  ;;  %v910_v0 = vadd.f32 %v10373_v6, %v10343_v45 }
 0x1a7   : > { %13011 = vst [vmem:[#allocation11_spill] sm:$0xff] %v10439_v42  ;;  %v10441_v44 = vpop.f32.mrf.mxu0 }
 0x1a8   : > { %13012 = vst [vmem:[#allocation12_spill] sm:$0xff] %v10441_v44  ;;  %v10443_v46 = vpop.f32.mrf.mxu1  ;;  %v1888_v44 = vshrl.u32 %v13020_v12, 7  ;;  %v904_v12 = vadd.f32 %v10357_v58, %v10333_v33  ;;  %v907_v33 = vadd.f32 %v10365_v62, %v10337_v38  ;;  %v911_v38 = vadd.f32 %v10377_v8, %v10347_v49 }
 0x1a9   : > { %13013 = vst [vmem:[#allocation13_spill] sm:$0xff] %v10443_v46  ;;  %v10445_v48 = vpop.f32.mrf.mxu0  ;;  %v1057_v60 = vadd.f32 %v10379_v9, %v905_v39 }
 0x1aa   : > { %13014 = vst [vmem:[#allocation14_spill] sm:$0xff] %v10445_v48  ;;  %v10447_v50 = vpop.f32.mrf.mxu1  ;;  %v1893_v48 = vsub.s32 1, %v1888_v44 }
 0x1ab   : > { %13015 = vst [vmem:[#allocation15_spill] sm:$0xff] %v10447_v50  ;;  %v10449_v52 = vpop.f32.mrf.mxu0 }
 0x1ac   : > { %13016 = vst [vmem:[#allocation16_spill] sm:$0xff] %v10449_v52  ;;  %v10451_v54 = vpop.f32.mrf.mxu1 }
 0x1ad   : > { %13017 = vst [vmem:[#allocation17_spill] sm:$0xff] %v10451_v54  ;;  %v10453_v56 = vpop.f32.mrf.mxu0  ;;  %v1889_v54 = vsub.s32 0, %v1888_v44 }
 0x1ae   : > { %13018 = vst [vmem:[#allocation18_spill] sm:$0xff] %v10453_v56  ;;  %v10458_v11 = vpop.f32.mrf.mxu1  ;;  %v1897_v56 = vsub.s32 2, %v1888_v44  ;;  %v912_v44 = vadd.f32 %v10359_v59, %v10341_v43  ;;  %v909_v43 = vadd.f32 %v10371_v4, %v10353_v55  ;;  %v914_v55 = vadd.f32 %v10385_v14, %v10355_v57  ;;  %v13033_v39 = vld [vmem:[#allocation11_spill] sm:$0xff] }
 0x1af   : > { %13019 = vst [vmem:[#allocation19_spill] sm:$0xff] %v10458_v11  ;;  %v10461_v42 = vpop.f32.mrf.mxu0  ;;  %v10480_v3 = vrot.slane %v1886_v37, %v1889_v54  ;;  %v1063_v4 = vadd.f32 %v10395_v19, %v911_v38  ;;  %v1199_v14 = vadd.f32 %v10409_v23, %v1057_v60  ;;  %v13030_v54 = vld [vmem:[#allocation8_spill] sm:$0xff] }
 0x1b0   : > { %v10463_v46 = vpop.f32.mrf.mxu1  ;;  %v1064_v62 = vadd.f32 %v10389_v16, %v912_v44  ;;  %v1061_v8 = vadd.f32 %v10401_v1, %v909_v43  ;;  %v1066_v57 = vadd.f32 %v10403_v5, %v914_v55 }
 0x1b1   : > { %13021 = vst [vmem:[#allocation20_spill] sm:$0xff] %v10463_v46  ;;  %v10465_v50 = vpop.f32.mrf.mxu0  ;;  %13026 = vst [vmem:[#allocation24_spill] sm:$0xff] %v10480_v3  ;;  %v1205_v5 = vadd.f32 %v10425_v32, %v1063_v4  ;;  %vm1899_vm12 = vcmp.eq.s32.totalorder %v10480_v3, 1 }
 0x1b2   : > { %13022 = vst [vmem:[#allocation21_spill] sm:$0xff] %v10465_v50  ;;  %v10467_v52 = vpop.f32.mrf.mxu1  ;;  %v10482_v50 = vrot.slane %v1886_v37, %v1893_v48  ;;  %v915_v48 = vadd.f32 %v10367_v63, %v10349_v51  ;;  %v913_v51 = vadd.f32 %v10381_v10, %v10351_v53  ;;  %v1203_v19 = vadd.f32 %v10419_v29, %v1061_v8 }
 0x1b3   : > { %13023 = vst [vmem:[#allocation22_spill] sm:$0xff] %v10467_v52  ;;  %v10469_v40 = vpop.f32.mrf.mxu0  ;;  %v10484_v52 = vrot.slane %v1886_v37, %v1897_v56  ;;  %v908_v37 = vadd.f32 %v10369_v2, %v10339_v41  ;;  %v1059_v41 = vadd.f32 %v10383_v13, %v907_v33  ;;  %v1062_v2 = vadd.f32 %v10391_v17, %v910_v0  ;;  %v13031_v56 = vld [vmem:[#allocation9_spill] sm:$0xff]  ;;  %v13034_v33 = vld [vmem:[#allocation12_spill] sm:$0xff]  ;;  %v13037_v0 = vld [vmem:[#allocation15_spill] sm:$0xff] }
 0x1b4   : > { %v10472_v36 = vpop.f32.mrf.mxu1  ;;  %13027 = vst [vmem:[#allocation25_spill] sm:$0xff] %v10482_v50  ;;  %v1067_v53 = vadd.f32 %v10397_v20, %v915_v48  ;;  %v1206_v13 = vadd.f32 %v10407_v24, %v1064_v62  ;;  %v13035_v48 = vld [vmem:[#allocation13_spill] sm:$0xff]  ;;  %v13038_v38 = vld [vmem:[#allocation16_spill] sm:$0xff]  ;;  %vm1900_vm14 = vcmp.eq.s32.totalorder %v10482_v50, 1 }
 0x1b5   : > { %v10474_v11 = vpop.f32.mrf.mxu0  ;;  %13028 = vst [vmem:[#allocation26_spill] sm:$0xff] %v10484_v52  ;;  %v1060_v45 = vadd.f32 %v10387_v15, %v908_v37  ;;  %v1201_v15 = vadd.f32 %v10413_v26, %v1059_v41  ;;  %v1204_v20 = vadd.f32 %v10421_v30, %v1062_v2  ;;  %v10543_v30 = vpop.permute.xlu1 %1825  ;;  %v13036_v37 = vld [vmem:[#allocation14_spill] sm:$0xff]  ;;  %v1355_v60 = vadd.f32 %v13038_v38, %v1203_v19 }
 0x1b6   : > { %13025 = vst [vmem:[#allocation23_spill] sm:$0xff] %v10474_v11  ;;  %v10478_v46 = vpop.f32.mrf.mxu1  ;;  %v906_v11 = vadd.f32 %v10363_v61, %v10345_v47  ;;  %v1056_v47 = vadd.f32 %v10375_v7, %v904_v12  ;;  %v1065_v7 = vadd.f32 %v10399_v21, %v913_v51  ;;  %v1209_v17 = vadd.f32 %v10415_v27, %v1067_v53  ;;  %v13032_v12 = vld [vmem:[#allocation10_spill] sm:$0xff]  ;;  %v13039_v51 = vld [vmem:[#allocation17_spill] sm:$0xff]  ;;  %v13041_v2 = vld [vmem:[#allocation19_spill] sm:$0xff] }
 0x1b7   : > { %v10494_v58 = vpop.f32.mrf.mxu0  ;;  %v1208_v27 = vadd.f32 %v13030_v54, %v1066_v57  ;;  %v1358_v29 = vadd.f32 %v13032_v12, %v1206_v13  ;;  %v13040_v55 = vld [vmem:[#allocation18_spill] sm:$0xff]  ;;  %vm1901_vm13 = vcmp.eq.s32.totalorder %v10484_v52, 1 }
 0x1b8   : > { %v10504_v59 = vpop.f32.mrf.mxu1  ;;  %v1058_v49 = vadd.f32 %v10393_v18, %v906_v11  ;;  %v1198_v9 = vadd.f32 %v10405_v22, %v1056_v47  ;;  %v1202_v18 = vadd.f32 %v10417_v28, %v1060_v45  ;;  %v1351_v22 = vadd.f32 %v10427_v34, %v1199_v14  ;;  %v13042_v53 = vld [vmem:[#allocation20_spill] sm:$0xff] }
 0x1b9   : > { %v10512_v61 = vpop.f32.mrf.mxu0  ;;  %v1207_v24 = vadd.f32 %v10429_v35, %v1065_v7  ;;  %v1357_v34 = vadd.f32 %v13035_v48, %v1205_v5  ;;  %v1361_v35 = vadd.f32 %v13036_v37, %v1209_v17  ;;  %v1360_v41 = vadd.f32 %v13039_v51, %v1208_v27  ;;  %v13043_v8 = vld [vmem:[#allocation21_spill] sm:$0xff]  ;;  %v10572_v54 = vpop.permute.xlu1 %1830 }
 0x1ba   : > { %v1590_v63 = vpop.f32.mrf.mxu1  ;;  %v1200_v11 = vadd.f32 %v10411_v25, %v1058_v49  ;;  %v1350_v1 = vadd.f32 %v10423_v31, %v1198_v9  ;;  %v13029_v25 = vld [vmem:[#allocation7_spill] sm:$0xff]  ;;  %v1354_v28 = vadd.f32 %v13031_v56, %v1202_v18  ;;  %v1356_v31 = vadd.f32 %v13033_v39, %v1204_v20  ;;  %v13044_v13 = vld [vmem:[#allocation22_spill] sm:$0xff] }
 0x1bb   : > { %v1450_v6 = vpop.f32.mrf.mxu0  ;;  %v1353_v26 = vadd.f32 %v13029_v25, %v1201_v15  ;;  %v1359_v47 = vadd.f32 %v13037_v0, %v1207_v24  ;;  %v1510_v49 = vadd.f32 %v13041_v2, %v1358_v29  ;;  %v1503_v4 = vadd.f32 %v10461_v42, %v1351_v22  ;;  %v1821_v24 = vpop.permute.xlu0 %1820 }
 0x1bc   : > { %v1592_v10 = vpop.f32.mrf.mxu1  ;;  %v1352_v32 = vadd.f32 %v13034_v33, %v1200_v11  ;;  %v1502_v45 = vadd.f32 %v13040_v55, %v1350_v1  ;;  %v1513_v14 = vadd.f32 %v13044_v13, %v1361_v35  ;;  %v1506_v11 = vadd.f32 %v10469_v40, %v1354_v28 }
 0x1bd   : > { %v8474_v16 = vpop.f32.mrf.mxu0  ;;  %v1505_v57 = vadd.f32 %v13043_v8, %v1353_v26  ;;  %v1507_v15 = vadd.f32 %v10472_v36, %v1355_v60  ;;  %v13045_v42 = vld [vmem:[#allocation23_spill] sm:$0xff]  ;;  %v1509_v20 = vadd.f32 %v10494_v58, %v1357_v34  ;;  %v1655_v1 = vadd.f32 %v10504_v59, %v1503_v4 }
 0x1be   : > { %v1596_v21 = vpop.f32.mrf.mxu1  ;;  %v1504_v7 = vadd.f32 %v13042_v53, %v1352_v32  ;;  %v1654_v17 = vadd.f32 %v10478_v46, %v1502_v45  ;;  %v1508_v19 = vadd.f32 %v13045_v42, %v1356_v31  ;;  %v1662_v5 = vadd.f32 %v8474_v16, %v1510_v49 }
 0x1bf   : > { %v1639_v23 = vpop.f32.mrf.mxu0  ;;  %v1511_v25 = vadd.f32 %v10512_v61, %v1359_v47  ;;  %v1657_v40 = vadd.f32 %v1590_v63, %v1505_v57  ;;  %v10570_v26 = vadd.f32 %v1450_v6, %v1360_v41  ;;  %v1658_v27 = vadd.f32 %v1592_v10, %v1506_v11  ;;  %v1836_v38 = vpop.permute.xlu0 %1835 }
 0x1c0   : > { %v1598_v44 = vpop.f32.mrf.mxu1  ;;  %v1660_v56 = vadd.f32 %v1596_v21, %v1508_v19  ;;  %v1656_v28 = vadd.f32 %v1639_v23, %v1504_v7 }
 0x1c1   : > { %v8475_v43 = vpop.f32.mrf.mxu0  ;;  %v1661_v58 = vadd.f32 %v1598_v44, %v1509_v20 }
 0x1c2   : > { %v1600_v62 = vpop.f32.mrf.mxu1  ;;  %v1665_v39 = vadd.f32 %v8475_v43, %v1513_v14 }
 0x1c3   : > { %v1642_v9 = vpop.f32.mrf.mxu0  ;;  %v1663_v33 = vadd.f32 %v1600_v62, %v1511_v25 }
 0x1c4   : > { %v10563_v18 = vpop.f32.mrf.mxu1  ;;  %v1659_v32 = vadd.f32 %v1642_v9, %v1507_v15 }
 0x1c5   : > { %v1738_v22 = vpop.f32.mrf.mxu0 }
 0x1c6   : > { %v1806_v36 = vadd.f32 %v1738_v22, %v1654_v17  ;;  %v8480_v46 = vpop.f32.mrf.mxu1 }
 0x1c7   : > { %v1814_v12 = vadd.f32 %v8480_v46, %v1662_v5  ;;  %v1740_v29 = vpop.f32.mrf.mxu0 }
 0x1c8   : > { %v1838_v59 = vadd.f32 %v1821_v24, %v1806_v36  ;;  %v1807_v16 = vadd.f32 %v1740_v29, %v1655_v1  ;;  %v1791_v31 = vpop.f32.mrf.mxu1 }
 0x1c9   : > { %v1846_v61 = vadd.f32 %v10572_v54, %v1814_v12  ;;  %v1808_v63 = vadd.f32 %v1791_v31, %v1656_v28  ;;  %v1742_v6 = vpop.f32.mrf.mxu0 }
 0x1ca   : > { %vm1850_vm15 = vcmp.ge.f32.partialorder %v1838_v59, 0.0  ;;  %v1862_v48 = vmul.f32 0.1, %v1838_v59  ;;  %v1839_v34 = vadd.f32 %v1821_v24, %v1807_v16  ;;  %v1809_v37 = vadd.f32 %v1742_v6, %v1657_v40  ;;  %v8481_v10 = vpop.f32.mrf.mxu1 }
 0x1cb   : > { %vm1858_vm0 = vcmp.ge.f32.partialorder %v1846_v61, 0.0  ;;  %v1870_v21 = vmul.f32 0.1, %v1846_v61  ;;  %v1840_v23 = vadd.f32 %v1821_v24, %v1808_v63  ;;  %v1817_v35 = vadd.f32 %v8481_v10, %v1665_v39  ;;  %v1744_v44 = vpop.f32.mrf.mxu0 }
 0x1cc   : > { %v1874_v43 = vsel %vm1850_vm15, %v1838_v59, %v1862_v48  ;;  %vm1851_vm1 = vcmp.ge.f32.partialorder %v1839_v34, 0.0  ;;  %v1863_v0 = vmul.f32 0.1, %v1839_v34  ;;  %v1841_v47 = vadd.f32 %v10543_v30, %v1809_v37  ;;  %v1794_v55 = vpop.f32.mrf.mxu1 }
 0x1cd   : > { %v1902_v60 = vsel %vm1899_vm12, %v1874_v43, 0.0  ;;  %v1882_v51 = vsel %vm1858_vm0, %v1846_v61, %v1870_v21  ;;  %vm1852_vm4 = vcmp.ge.f32.partialorder %v1840_v23, 0.0  ;;  %v1864_v41 = vmul.f32 0.1, %v1840_v23  ;;  %v1748_v45 = vpop.f32.mrf.mxu0 }
 0x1ce   : > { %1914 = vst [vmem:[#allocation2 + $0x30] sm:$0xff] %v1902_v60  ;;  %v1875_v62 = vsel %vm1851_vm1, %v1839_v34, %v1863_v0  ;;  %v1910_v2 = vsel %vm1901_vm13, %v1882_v51, 0.0  ;;  %vm1853_vm11 = vcmp.ge.f32.partialorder %v1841_v47, 0.0  ;;  %v1865_v49 = vmul.f32 0.1, %v1841_v47 }
 0x1cf   : > { %v1903_v4 = vsel %vm1900_vm14, %v1875_v62, 0.0  ;;  %1922 = vst [vmem:[#allocation2 + $0x28] sm:$0xff] %v1910_v2  ;;  %v1876_v53 = vsel %vm1852_vm4, %v1840_v23, %v1864_v41  ;;  %v1810_v7 = vadd.f32 %v1744_v44, %v1658_v27  ;;  %v1849_v8 = vadd.f32 %v1836_v38, %v1817_v35  ;;  %v1750_v57 = vpop.f32.mrf.mxu0 }
 0x1d0   : > { %1915 = vst [vmem:[#allocation2] sm:$0xff] %v1903_v4  ;;  %v1904_v9 = vsel %vm1901_vm13, %v1876_v53, 0.0  ;;  %v1877_v13 = vsel %vm1853_vm11, %v1841_v47, %v1865_v49  ;;  %v1811_v14 = vadd.f32 %v1794_v55, %v1659_v32  ;;  %v1812_v11 = vadd.f32 %v1748_v45, %v1660_v56 }
 0x1d1   : > { %1916 = vst [vmem:[#allocation2 + $0x58] sm:$0xff] %v1904_v9  ;;  %v1905_v15 = vsel %vm1899_vm12, %v1877_v13, 0.0  ;;  %v1842_v17 = vadd.f32 %v10543_v30, %v1810_v7  ;;  %vm1861_vm15 = vcmp.ge.f32.partialorder %v1849_v8, 0.0  ;;  %v1873_v42 = vmul.f32 0.1, %v1849_v8  ;;  %v1752_v19 = vpop.f32.mrf.mxu0 }
 0x1d2   : > { %1917 = vst [vmem:[#allocation2 + $0x18] sm:$0xff] %v1905_v15  ;;  %v1843_v20 = vadd.f32 %v10543_v30, %v1811_v14  ;;  %v1844_v1 = vadd.f32 %v10572_v54, %v1812_v11  ;;  %v1813_v5 = vadd.f32 %v1750_v57, %v1661_v58  ;;  %v1815_v22 = vadd.f32 %v1752_v19, %v1663_v33 }
 0x1d3   : > { %v1664_v24 = vadd.f32 %v10563_v18, %v10570_v26  ;;  %vm1854_vm0 = vcmp.ge.f32.partialorder %v1842_v17, 0.0  ;;  %v1866_v25 = vmul.f32 0.1, %v1842_v17  ;;  %v1885_v40 = vsel %vm1861_vm15, %v1849_v8, %v1873_v42  ;;  %v1754_v36 = vpop.f32.mrf.mxu0 }
 0x1d4   : > { %v1913_v46 = vsel %vm1901_vm13, %v1885_v40, 0.0  ;;  %vm1855_vm1 = vcmp.ge.f32.partialorder %v1843_v20, 0.0  ;;  %v1867_v27 = vmul.f32 0.1, %v1843_v20  ;;  %vm1856_vm4 = vcmp.ge.f32.partialorder %v1844_v1, 0.0 }
 0x1d5   : > { %v1878_v56 = vsel %vm1854_vm0, %v1842_v17, %v1866_v25  ;;  %1925 = vst [vmem:[#allocation2 + $0x40] sm:$0xff] %v1913_v46  ;;  %v1868_v30 = vmul.f32 0.1, %v1844_v1  ;;  %v1845_v28 = vadd.f32 %v10572_v54, %v1813_v5  ;;  %v1847_v12 = vadd.f32 %v1836_v38, %v1815_v22 }
 0x1d6   : > { %v1906_v29 = vsel %vm1900_vm14, %v1878_v56, 0.0  ;;  %v1879_v18 = vsel %vm1855_vm1, %v1843_v20, %v1867_v27  ;;  %v1816_v26 = vadd.f32 %v1754_v36, %v1664_v24 }
 0x1d7   : > { %1918 = vst [vmem:[#allocation2 + $0x50] sm:$0xff] %v1906_v29  ;;  %v1907_v58 = vsel %vm1901_vm13, %v1879_v18, 0.0  ;;  %v1880_v39 = vsel %vm1856_vm4, %v1844_v1, %v1868_v30  ;;  %vm1857_vm11 = vcmp.ge.f32.partialorder %v1845_v28, 0.0  ;;  %v1869_v59 = vmul.f32 0.1, %v1845_v28 }
 0x1d8   : > { %1919 = vst [vmem:[#allocation2 + $0x20] sm:$0xff] %v1907_v58  ;;  %v1908_v16 = vsel %vm1899_vm12, %v1880_v39, 0.0  ;;  %vm1859_vm15 = vcmp.ge.f32.partialorder %v1847_v12, 0.0  ;;  %v1871_v31 = vmul.f32 0.1, %v1847_v12  ;;  %v1848_v54 = vadd.f32 %v1836_v38, %v1816_v26 }
 0x1d9   : > { %1920 = vst [vmem:[#allocation2 + $0x8] sm:$0xff] %v1908_v16  ;;  %v1881_v33 = vsel %vm1857_vm11, %v1845_v28, %v1869_v59 }
 0x1da   : > { %v1909_v32 = vsel %vm1900_vm14, %v1881_v33, 0.0  ;;  %v1883_v61 = vsel %vm1859_vm15, %v1847_v12, %v1871_v31  ;;  %vm1860_vm0 = vcmp.ge.f32.partialorder %v1848_v54, 0.0  ;;  %v1872_v63 = vmul.f32 0.1, %v1848_v54 }
 0x1db   : > { %1921 = vst [vmem:[#allocation2 + $0x38] sm:$0xff] %v1909_v32  ;;  %v1911_v6 = vsel %vm1899_vm12, %v1883_v61, 0.0 }
 0x1dc   : > { %1923 = vst [vmem:[#allocation2 + $0x48] sm:$0xff] %v1911_v6  ;;  %v1884_v48 = vsel %vm1860_vm0, %v1848_v54, %v1872_v63 }
 0x1dd   : > { %v1912_v34 = vsel %vm1900_vm14, %v1884_v48, 0.0 }
 0x1de   : > { %1924 = vst [vmem:[#allocation2 + $0x10] sm:$0xff] %v1912_v34 }
 0x1df LB: >> { %v10611_v37 = vld [vmem:[#allocation2 + $0x28] sm:$0xff]  ;;  %v10613_v10 = vld [vmem:[#allocation2 + $0x40] sm:$0xff]  ;;  %v10631_v47 = vld [vmem:[#allocation2 + $0x30] sm:$0xff]  ;;  %s9971_s18 = smov 18   ;;  %s8264_s20 = smul.u32 144, %s9956_s17  ;;  %vm2083_vm1 = vcmask 261120   ;;  %s9956_s17 = sphi %s10606_s17, %s1931_s17  }
 0x1e0   : >> { %v10615_v21 = vld [vmem:[#allocation2 + $0x8] sm:$0xff]  ;;  %v10619_v23 = vpack.i.bf16 %v10613_v10, %v10611_v37  ;;  %v10633_v38 = vld [vmem:[#allocation2 + $0x18] sm:$0xff]  ;;  %v10649_v55 = vld [vmem:[#allocation2 + $0x20] sm:$0xff]  ;;  %v12979_v53 = vmov 0   ;;  %s9973_s15 = smov 19   ;;  %s9974_s22 = smov 17  }
 0x1e1   : >> { %v10639_v60 = vpack.i.bf16 %v10633_v38, %v10631_v47  ;;  %v10647_v41 = vld [vmem:[#allocation2 + $0x58] sm:$0xff]  ;;  %v10651_v45 = vld [vmem:[#allocation2] sm:$0xff]  ;;  %v10653_v62 = vld [vmem:[#allocation2 + $0x50] sm:$0xff]  ;;  %s10667_s14 = scalar_lea.vmem %s12950_s4, %s8264_s20  ;;  %2122 = vmatprep.mubr.bf16.mxu0 %v12979_v53  ;;  %9122 = vset.pattern.permute.xlu0 %v12979_v53  ;;  %s10686_s16 = scalar_lea.vmem [#allocation3], %s8264_s20 }
 0x1e2   : >> { %v10623_v44 = vld [vmem:[#allocation2 + $0x38] sm:$0xff]  ;;  %8893 = vrot.lane.b32.xlu1 %v10619_v23, %s9971_s18  ;;  %v8907_v2 = vpack.i.bf16 %v10649_v55, %v10647_v41  ;;  %v8902_v49 = vpack.i.bf16 %v10653_v62, %v10651_v45  ;;  %v10670_v4 = vld [vmem:[%s10667_s14 + $0x10] sm:$0xff]   ;;  %s9975_s20 = smov 1   ;;  %s9976_s13 = smov 127   ;;  %vm11382_vm4 = vmpackc.low %vm1900_vm14, %vm1900_vm14 }
 0x1e3   : >> { %v10621_v35 = vld [vmem:[#allocation2 + $0x48] sm:$0xff]  ;;  %8486 = vmatprep.mubr.msk.bf16.mxu1 %vm2083_vm1, %v10670_v4  ;;  %9123 = vset.pattern.permute.xlu1 %v12979_v53  ;;  %s9977_s30 = smov 111   ;;  %s9978_s29 = smov 110   ;;  %vm11392_vm11 = vmpackc.low %vm1901_vm13, %vm1901_vm13 }
 0x1e4   : >> { %v10629_v0 = vpack.i.bf16 %v10621_v35, %v10615_v21  ;;  %s9979_s28 = smov 109   ;;  %s8044_s27 = sshll.u32 %s9956_s17, 5  ;;  %vm11411_vm15 = vmpackc.low %vm1899_vm12, %vm1899_vm12 }
 0x1e5   : >> { %v10625_v43 = vld [vmem:[#allocation2 + $0x10] sm:$0xff]  ;;  %s1984_s24 = scalar_lea.vmem %s12951_s5, %s8044_s27  ;;  %s3572_s26 = scalar_lea.vmem %s12953_s7, %s8044_s27 }
 0x1e6   : >> { %8883 = vrot.lane.b32.xlu0 %v10629_v0, %s9971_s18  ;;  %v10645_v51 = vpack.i.bf16 %v10625_v43, %v10623_v44  ;;  %8898 = vrot.lane.b32.xlu1 %v10639_v60, %s9971_s18  ;;  %v1988_v7 = vld [vmem:[%s1984_s24 + $0x18] sm:$0xff]  ;;  %v1987_v8 = vld [vmem:[%s1984_s24 + $0x10] sm:$0xff]  ;;  %s1931_s17 = sadd.s32 1, %s9956_s17  }
 0x1e7   : >> { %v1985_v57 = vld [vmem:[%s1984_s24] sm:$0xff]  ;;  %v1986_v9 = vld [vmem:[%s1984_s24 + $0x8] sm:$0xff]  ;;  %p1928_p1 = scmp.ge.s32.totalorder %s1931_s17, 4  }
 0x1e8   : > { %s13119_s17 = smov (%p1928_p1), 1  }
 0x1ea   : >> { %8888 = vrot.lane.b32.xlu0 %v10645_v51, %s9971_s18  ;;  %8908 = vrot.lane.b32.xlu1 %v8907_v2, %s9971_s18 }
 0x1ee   : >> { %8903 = vrot.lane.b32.xlu0 %v8902_v49, %s9971_s18  ;;  %8918 = vrot.lane.b32.xlu1 %v10619_v23, %s9973_s15 }
 0x1f2   : >> { %8913 = vrot.lane.b32.xlu0 %v10645_v51, %s9973_s15  ;;  %8928 = vrot.lane.b32.xlu1 %v8902_v49, %s9973_s15 }
 0x1f6   : >> { %8923 = vrot.lane.b32.xlu0 %v10629_v0, %s9973_s15  ;;  %8938 = vrot.lane.b32.xlu1 %v10639_v60, %s9973_s15 }
 0x1fa   : >> { %8933 = vrot.lane.b32.xlu0 %v8907_v2, %s9973_s15  ;;  %8948 = vrot.lane.b32.xlu1 %v10645_v51, %s9974_s22 }
 0x1fe   : >> { %8943 = vrot.lane.b32.xlu0 %v10629_v0, %s9974_s22  ;;  %8958 = vrot.lane.b32.xlu1 %v10639_v60, %s9974_s22 }
 0x202   : >> { %8953 = vrot.lane.b32.xlu0 %v10619_v23, %s9974_s22  ;;  %8968 = vrot.lane.b32.xlu1 %v8907_v2, %s9974_s22 }
 0x206   : >> { %8963 = vrot.lane.b32.xlu0 %v8902_v49, %s9974_s22  ;;  %8978 = vrot.lane.b32.xlu1 %v10619_v23, %s9975_s20 }
 0x20a   : >> { %8973 = vrot.lane.b32.xlu0 %v10645_v51, %s9975_s20  ;;  %8988 = vrot.lane.b32.xlu1 %v8902_v49, %s9975_s20 }
 0x20e   : >> { %8983 = vrot.lane.b32.xlu0 %v10629_v0, %s9975_s20  ;;  %8998 = vrot.lane.b32.xlu1 %v10639_v60, %s9975_s20 }
 0x212   : >> { %8993 = vrot.lane.b32.xlu0 %v8907_v2, %s9975_s20  ;;  %9008 = vrot.lane.b32.xlu1 %v10619_v23, %s9976_s13 }
 0x216   : >> { %9003 = vrot.lane.b32.xlu0 %v10629_v0, %s9976_s13  ;;  %9018 = vrot.lane.b32.xlu1 %v10639_v60, %s9976_s13 }
 0x21a   : >> { %9013 = vrot.lane.b32.xlu0 %v10645_v51, %s9976_s13  ;;  %9028 = vrot.lane.b32.xlu1 %v8902_v49, %s9976_s13 }
 0x21e   : >> { %9023 = vrot.lane.b32.xlu0 %v8907_v2, %s9976_s13  ;;  %9038 = vrot.lane.b32.xlu1 %v10619_v23, %s9977_s30 }
 0x222   : >> { %9033 = vrot.lane.b32.xlu0 %v10645_v51, %s9977_s30  ;;  %9048 = vrot.lane.b32.xlu1 %v8902_v49, %s9977_s30 }
 0x226   : >> { %9043 = vrot.lane.b32.xlu0 %v10629_v0, %s9977_s30  ;;  %9058 = vrot.lane.b32.xlu1 %v10639_v60, %s9977_s30 }
 0x22a   : >> { %9053 = vrot.lane.b32.xlu0 %v8907_v2, %s9977_s30  ;;  %9068 = vrot.lane.b32.xlu1 %v10619_v23, %s9978_s29 }
 0x22e   : >> { %9063 = vrot.lane.b32.xlu0 %v10629_v0, %s9978_s29  ;;  %9078 = vrot.lane.b32.xlu1 %v10639_v60, %s9978_s29 }
 0x232   : >> { %9073 = vrot.lane.b32.xlu0 %v10645_v51, %s9978_s29  ;;  %9088 = vrot.lane.b32.xlu1 %v8902_v49, %s9978_s29 }
 0x236   : >> { %9083 = vrot.lane.b32.xlu0 %v8907_v2, %s9978_s29  ;;  %9098 = vrot.lane.b32.xlu1 %v10619_v23, %s9979_s28 }
 0x23a   : >> { %9093 = vrot.lane.b32.xlu0 %v10645_v51, %s9979_s28  ;;  %9108 = vrot.lane.b32.xlu1 %v8902_v49, %s9979_s28 }
 0x23e   : >> { %9103 = vrot.lane.b32.xlu0 %v10629_v0, %s9979_s28  ;;  %9118 = vrot.lane.b32.xlu1 %v10639_v60, %s9979_s28 }
 0x242   : >> { %9113 = vrot.lane.b32.xlu0 %v8907_v2, %s9979_s28  ;;  %3495 = vperm.xlu1 %9123, %v1988_v7  }
 0x246   : >> { %3490 = vperm.xlu0 %9122, %v1987_v8   ;;  %3480 = vperm.xlu1 %9123, %v1985_v57  }
 0x24a   : >> { %3485 = vperm.xlu0 %9122, %v1986_v9  }
 0x254   : >> { %v8894_v13 = vpop.permute.xlu1 %8893 }
 0x255   : >> { %v8896_v11 = vunpack.i.h.bf16 %v8894_v13  ;;  %v8895_v15 = vunpack.i.l.bf16 %v8894_v13 }
 0x258   : >> { %v8884_v14 = vpop.permute.xlu0 %8883  ;;  %v8899_v19 = vpop.permute.xlu1 %8898 }
 0x259   : >> { %v8886_v17 = vunpack.i.h.bf16 %v8884_v14  ;;  %v8885_v42 = vunpack.i.l.bf16 %v8884_v14  ;;  %v8901_v22 = vunpack.i.h.bf16 %v8899_v19  ;;  %v8900_v24 = vunpack.i.l.bf16 %v8899_v19  ;;  %v9365_v14 = vld [vmem:[%s10667_s14 + $0x18] sm:$0xff]  }
 0x25b   : >> { %v2065_v40 = vsel %vm498_vm2, %v8895_v15, %v8885_v42  ;;  %v2066_v36 = vsel %vm498_vm2, %v8896_v11, %v8886_v17 }
 0x25c   : >> { %v8889_v20 = vpop.permute.xlu0 %8888  ;;  %v8909_v46 = vpop.permute.xlu1 %8908  ;;  %v2070_v16 = vpack.c.bf16 %v2066_v36, %v2065_v40 }
 0x25d   : >> { %v8891_v1 = vunpack.i.h.bf16 %v8889_v20  ;;  %v8890_v5 = vunpack.i.l.bf16 %v8889_v20  ;;  %v8911_v29 = vunpack.i.h.bf16 %v8909_v46  ;;  %v8910_v18 = vunpack.i.l.bf16 %v8909_v46 }
 0x25f   : >> { %v2062_v27 = vsel %vm498_vm2, %v8886_v17, %v8891_v1  ;;  %v2061_v56 = vsel %vm498_vm2, %v8885_v42, %v8890_v5  ;;  %v2057_v30 = vsel %vm498_vm2, %v8890_v5, %v8895_v15  ;;  %v2058_v28 = vsel %vm498_vm2, %v8891_v1, %v8896_v11 }
 0x260   : >> { %v8904_v12 = vpop.permute.xlu0 %8903  ;;  %v2071_v26 = vpack.c.bf16 %v2062_v27, %v2061_v56  ;;  %v2072_v58 = vpack.c.bf16 %v2058_v28, %v2057_v30  ;;  %v2063_v31 = vsel %vm498_vm2, %v8910_v18, %v8900_v24  ;;  %v2064_v54 = vsel %vm498_vm2, %v8911_v29, %v8901_v22  ;;  %v8919_v33 = vpop.permute.xlu1 %8918 }
 0x261   : >> { %v8906_v39 = vunpack.i.h.bf16 %v8904_v12  ;;  %v8905_v59 = vunpack.i.l.bf16 %v8904_v12  ;;  %v8921_v48 = vunpack.i.h.bf16 %v8919_v33  ;;  %v8920_v34 = vunpack.i.l.bf16 %v8919_v33 }
 0x262   : >> { %2102 = vmatprep.subr.bf16.mxu0 %v2071_v26  ;;  %8482 = vmatprep.subr.bf16.mxu1 %v2072_v58  ;;  %v2067_v49 = vpack.c.bf16 %v2064_v54, %v2063_v31 }
 0x263   : >> { %2103 = vmatpush1.bf16.msra.mxu0 %v2070_v16  ;;  %8483 = vmatpush3.bf16.msra.mxu1 %v2072_v58  ;;  %v2059_v32 = vsel %vm498_vm2, %v8900_v24, %v8905_v59  ;;  %v2060_v61 = vsel %vm498_vm2, %v8901_v22, %v8906_v39  ;;  %v2055_v63 = vsel %vm498_vm2, %v8905_v59, %v8910_v18 }
 0x264   : >> { %v8914_v6 = vpop.permute.xlu0 %8913  ;;  %v2068_v23 = vpack.c.bf16 %v2060_v61, %v2059_v32  ;;  %v2056_v0 = vsel %vm498_vm2, %v8906_v39, %v8911_v29  ;;  %v8929_v57 = vpop.permute.xlu1 %8928 }
 0x265   : >> { %v8916_v60 = vunpack.i.h.bf16 %v8914_v6  ;;  %v8915_v51 = vunpack.i.l.bf16 %v8914_v6  ;;  %v2069_v2 = vpack.c.bf16 %v2056_v0, %v2055_v63  ;;  %v8931_v17 = vunpack.i.h.bf16 %v8929_v57  ;;  %v9366_v63 = vld [vmem:[%s10667_s14] sm:$0xff]  }
 0x266   : >> { %2104 = vmatprep.subr.bf16.mxu0 %v2068_v23  ;;  %v8930_v42 = vunpack.i.l.bf16 %v8929_v57 }
 0x267   : >> { %v2016_v7 = vsel %vm485_vm3, %v8916_v60, %v8921_v48  ;;  %v2015_v8 = vsel %vm485_vm3, %v8915_v51, %v8920_v34  ;;  %8484 = vmatprep.subr.bf16.mxu1 %v2069_v2  ;;  %2105 = vmatpush1.bf16.msra.mxu0 %v2067_v49 }
 0x268   : >> { %8485 = vmatpush3.bf16.msra.mxu1 %v2069_v2  ;;  %v8924_v9 = vpop.permute.xlu0 %8923  ;;  %v2030_v13 = vpack.c.bf16 %v2016_v7, %v2015_v8  ;;  %v8939_v22 = vpop.permute.xlu1 %8938  ;;  %v9367_v7 = vld [vmem:[%s10667_s14 + $0x8] sm:$0xff]  }
 0x269   : >> { %v8926_v11 = vunpack.i.h.bf16 %v8924_v9  ;;  %v8925_v15 = vunpack.i.l.bf16 %v8924_v9  ;;  %v8941_v36 = vunpack.i.h.bf16 %v8939_v22  ;;  %v8940_v46 = vunpack.i.l.bf16 %v8939_v22 }
 0x26a   : >> { %8047 = vmatmul.mubr.msk.bf16.vlgmr.msra.gmra.mxu0 %vm2083_vm1, %v10670_v4  ;;  %8490 = vmatprep.subr.bf16.mxu0 %v2030_v13 }
 0x26b   : >> { %v2019_v19 = vsel %vm485_vm3, %v8925_v15, %v8915_v51  ;;  %v2020_v20 = vsel %vm485_vm3, %v8926_v11, %v8916_v60  ;;  %v2023_v1 = vsel %vm485_vm3, %v8920_v34, %v8925_v15  ;;  %v2024_v5 = vsel %vm485_vm3, %v8921_v48, %v8926_v11  ;;  %8491 = vmatpush3.bf16.msra.mxu0 %v2030_v13 }
 0x26c   : >> { %v2028_v24 = vpack.c.bf16 %v2024_v5, %v2023_v1  ;;  %v8934_v40 = vpop.permute.xlu0 %8933  ;;  %8487 = vmatmul.mubr.msk.bf16.vlgmr.msra.gmra.mxu1 %vm2083_vm1, %v9365_v14  ;;  %v2029_v4 = vpack.c.bf16 %v2020_v20, %v2019_v19  ;;  %2132 = vmatprep.mubr.bf16.mxu0 %v12979_v53  ;;  %v2017_v30 = vsel %vm485_vm3, %v8940_v46, %v8930_v42  ;;  %v8949_v58 = vpop.permute.xlu1 %8948 }
 0x26d   : >> { %v8936_v27 = vunpack.i.h.bf16 %v8934_v40  ;;  %v8935_v56 = vunpack.i.l.bf16 %v8934_v40  ;;  %2240 = vmatprep.mubr.bf16.mxu1 %v12979_v53  ;;  %v2018_v28 = vsel %vm485_vm3, %v8941_v36, %v8931_v17  ;;  %v8951_v16 = vunpack.i.h.bf16 %v8949_v58 }
 0x26e   : >> { %2220 = vmatprep.subr.bf16.mxu1 %v2029_v4  ;;  %v8950_v31 = vunpack.i.l.bf16 %v8949_v58  ;;  %v2026_v54 = vpack.c.bf16 %v2018_v28, %v2017_v30  ;;  %v9368_v58 = vld [vmem:[%s10667_s14 + $0x20] sm:$0xff]  }
 0x26f   : >> { %v2013_v12 = vsel %vm485_vm3, %v8930_v42, %v8935_v56  ;;  %v2014_v29 = vsel %vm485_vm3, %v8931_v17, %v8936_v27  ;;  %v2022_v18 = vsel %vm485_vm3, %v8936_v27, %v8941_v36  ;;  %v2021_v26 = vsel %vm485_vm3, %v8935_v56, %v8940_v46  ;;  %2221 = vmatpush1.bf16.msra.mxu1 %v2028_v24 }
 0x270   : >> { %v2025_v39 = vpack.c.bf16 %v2022_v18, %v2021_v26  ;;  %v8944_v59 = vpop.permute.xlu0 %8943  ;;  %v2027_v61 = vpack.c.bf16 %v2014_v29, %v2013_v12  ;;  %2222 = vmatprep.subr.bf16.mxu1 %v2026_v54  ;;  %v8959_v34 = vpop.permute.xlu1 %8958 }
 0x271   : >> { %v8946_v33 = vunpack.i.h.bf16 %v8944_v59  ;;  %v8945_v32 = vunpack.i.l.bf16 %v8944_v59  ;;  %v8961_v2 = vunpack.i.h.bf16 %v8959_v34  ;;  %v8960_v49 = vunpack.i.l.bf16 %v8959_v34 }
 0x272   : >> { %8048 = vmatmul.mubr.msk.bf16.gmra.mxu0 %vm2083_vm1, %v9365_v14  ;;  %8492 = vmatprep.subr.bf16.mxu0 %v2027_v61 }
 0x273   : >> { %v2341_v6 = vsel %vm770_vm5, %v8946_v33, %v8951_v16  ;;  %v2340_v48 = vsel %vm770_vm5, %v8945_v32, %v8950_v31  ;;  %2223 = vmatpush1.bf16.msra.mxu1 %v2025_v39  ;;  %8493 = vmatpush3.bf16.msra.mxu0 %v2027_v61 }
 0x274   : >> { %v8954_v23 = vpop.permute.xlu0 %8953  ;;  %v2350_v0 = vpack.c.bf16 %v2341_v6, %v2340_v48  ;;  %8494 = vmatprep.mubr.msk.bf16.mxu0 %vm2083_vm1, %v9366_v63  ;;  %v8969_v14 = vpop.permute.xlu1 %8968  ;;  %v9369_v6 = vld [vmem:[%s10667_s14 + $0x28] sm:$0xff]  }
 0x275   : >> { %v8956_v60 = vunpack.i.h.bf16 %v8954_v23  ;;  %v8955_v51 = vunpack.i.l.bf16 %v8954_v23  ;;  %v8971_v17 = vunpack.i.h.bf16 %v8969_v14  ;;  %v8970_v42 = vunpack.i.l.bf16 %v8969_v14 }
 0x276   : >> { %8053 = vmatmul.mubr.msk.bf16.vlgmr.msra.gmra.mxu1 %vm2083_vm1, %v9366_v63  ;;  %2380 = vmatprep.subr.bf16.mxu0 %v2350_v0 }
 0x277   : >> { %v2336_v8 = vsel %vm770_vm5, %v8950_v31, %v8955_v51  ;;  %v2337_v57 = vsel %vm770_vm5, %v8951_v16, %v8956_v60  ;;  %v2344_v9 = vsel %vm770_vm5, %v8955_v51, %v8945_v32  ;;  %v2345_v13 = vsel %vm770_vm5, %v8956_v60, %v8946_v33  ;;  %2250 = vmatprep.mubr.bf16.mxu1 %v12979_v53 }
 0x278   : >> { %v2349_v11 = vpack.c.bf16 %v2345_v13, %v2344_v9  ;;  %v8964_v15 = vpop.permute.xlu0 %8963  ;;  %v2351_v19 = vpack.c.bf16 %v2337_v57, %v2336_v8  ;;  %v2342_v5 = vsel %vm770_vm5, %v8970_v42, %v8960_v49  ;;  %v2343_v22 = vsel %vm770_vm5, %v8971_v17, %v8961_v2  ;;  %v8979_v4 = vpop.permute.xlu1 %8978 }
 0x279   : >> { %v8966_v20 = vunpack.i.h.bf16 %v8964_v15  ;;  %v8965_v1 = vunpack.i.l.bf16 %v8964_v15  ;;  %v2346_v27 = vpack.c.bf16 %v2343_v22, %v2342_v5  ;;  %v8981_v30 = vunpack.i.h.bf16 %v8979_v4 }
 0x27a   : >> { %8495 = vmatmul.mubr.msk.bf16.vlgmr.msra.gmra.mxu0 %vm2083_vm1, %v9367_v7  ;;  %8498 = vmatprep.subr.bf16.mxu1 %v2351_v19  ;;  %v8980_v28 = vunpack.i.l.bf16 %v8979_v4 }
 0x27b   : >> { %v2338_v24 = vsel %vm770_vm5, %v8960_v49, %v8965_v1  ;;  %v2339_v40 = vsel %vm770_vm5, %v8961_v2, %v8966_v20  ;;  %v2335_v36 = vsel %vm770_vm5, %v8966_v20, %v8971_v17  ;;  %v2334_v46 = vsel %vm770_vm5, %v8965_v1, %v8970_v42  ;;  %2381 = vmatpush1.bf16.msra.mxu0 %v2349_v11 }
 0x27c   : >> { %8499 = vmatpush3.bf16.msra.mxu1 %v2351_v19  ;;  %v8974_v56 = vpop.permute.xlu0 %8973  ;;  %v2347_v12 = vpack.c.bf16 %v2339_v40, %v2338_v24  ;;  %2400 = vmatprep.mubr.bf16.mxu0 %v12979_v53  ;;  %v2348_v26 = vpack.c.bf16 %v2335_v36, %v2334_v46  ;;  %v8989_v16 = vpop.permute.xlu1 %8988  ;;  %v2658_v24 = vpack.c.bf16 %v10625_v43, %v10623_v44  ;;  %v9370_v36 = vld [vmem:[%s10667_s14 + $0x30] sm:$0xff]  }
 0x27d   : >> { %v8976_v29 = vunpack.i.h.bf16 %v8974_v56  ;;  %v8975_v18 = vunpack.i.l.bf16 %v8974_v56  ;;  %v8991_v61 = vunpack.i.h.bf16 %v8989_v16  ;;  %v8990_v63 = vunpack.i.l.bf16 %v8989_v16 }
 0x27e   : >> { %8054 = vmatmul.mubr.msk.bf16.gmra.mxu1 %vm2083_vm1, %v9367_v7  ;;  %2382 = vmatprep.subr.bf16.mxu0 %v2347_v12  ;;  %v2659_v40 = vpack.c.bf16 %v10613_v10, %v10611_v37  ;;  %v2656_v43 = vpack.c.bf16 %v10649_v55, %v10647_v41  ;;  %v2657_v12 = vpack.c.bf16 %v10621_v35, %v10615_v21 }
 0x27f   : >> { %v2509_v39 = vsel %vm922_vm6, %v8976_v29, %v8981_v30  ;;  %v2508_v59 = vsel %vm922_vm6, %v8975_v18, %v8980_v28  ;;  %8500 = vmatprep.subr.bf16.mxu1 %v2348_v26  ;;  %2383 = vmatpush1.bf16.msra.mxu0 %v2346_v27  ;;  %v2655_v55 = vpack.c.bf16 %v10653_v62, %v10651_v45 }
 0x280   : >> { %8501 = vmatpush3.bf16.msra.mxu1 %v2348_v26  ;;  %v8984_v31 = vpop.permute.xlu0 %8983  ;;  %8502 = vmatprep.mubr.msk.bf16.mxu1 %vm2083_vm1, %v9368_v58  ;;  %v2523_v54 = vpack.c.bf16 %v2509_v39, %v2508_v59  ;;  %v8999_v60 = vpop.permute.xlu1 %8998 }
 0x281   : >> { %v8986_v33 = vunpack.i.h.bf16 %v8984_v31  ;;  %v8985_v32 = vunpack.i.l.bf16 %v8984_v31  ;;  %v9001_v2 = vunpack.i.h.bf16 %v8999_v60  ;;  %v9000_v49 = vunpack.i.l.bf16 %v8999_v60 }
 0x282   : >> { %8059 = vmatmul.mubr.msk.bf16.vlgmr.msra.gmra.mxu0 %vm2083_vm1, %v9368_v58  ;;  %8506 = vmatprep.subr.bf16.mxu0 %v2523_v54 }
 0x283   : >> { %v2512_v48 = vsel %vm922_vm6, %v8985_v32, %v8975_v18  ;;  %v2513_v34 = vsel %vm922_vm6, %v8986_v33, %v8976_v29  ;;  %v2516_v23 = vsel %vm922_vm6, %v8980_v28, %v8985_v32  ;;  %v2517_v0 = vsel %vm922_vm6, %v8981_v30, %v8986_v33  ;;  %8507 = vmatpush3.bf16.msra.mxu0 %v2523_v54  ;;  %v9371_v28 = vld [vmem:[%s10667_s14 + $0x38] sm:$0xff]  }
 0x284   : >> { %v2521_v51 = vpack.c.bf16 %v2517_v0, %v2516_v23  ;;  %v8994_v7 = vpop.permute.xlu0 %8993  ;;  %v2522_v8 = vpack.c.bf16 %v2513_v34, %v2512_v48  ;;  %2410 = vmatprep.mubr.bf16.mxu0 %v12979_v53  ;;  %v2510_v13 = vsel %vm922_vm6, %v9000_v49, %v8990_v63  ;;  %v2511_v14 = vsel %vm922_vm6, %v9001_v2, %v8991_v61  ;;  %v9009_v19 = vpop.permute.xlu1 %9008 }
 0x285   : >> { %v8996_v57 = vunpack.i.h.bf16 %v8994_v7  ;;  %v8995_v9 = vunpack.i.l.bf16 %v8994_v7  ;;  %v2519_v1 = vpack.c.bf16 %v2511_v14, %v2510_v13  ;;  %v9011_v56 = vunpack.i.h.bf16 %v9009_v19 }
 0x286   : >> { %8503 = vmatmul.mubr.msk.bf16.vlgmr.msra.gmra.mxu1 %vm2083_vm1, %v9369_v6  ;;  %2552 = vmatprep.subr.bf16.mxu1 %v2522_v8  ;;  %v9010_v30 = vunpack.i.l.bf16 %v9009_v19  ;;  %v2654_v54 = vpack.c.bf16 %v10633_v38, %v10631_v47 }
 0x287   : >> { %v2506_v11 = vsel %vm922_vm6, %v8990_v63, %v8995_v9  ;;  %v2507_v15 = vsel %vm922_vm6, %v8991_v61, %v8996_v57  ;;  %v2514_v17 = vsel %vm922_vm6, %v8995_v9, %v9000_v49  ;;  %v2515_v42 = vsel %vm922_vm6, %v8996_v57, %v9001_v2  ;;  %2553 = vmatpush1.bf16.msra.mxu1 %v2521_v51  ;;  %v9372_v63 = vld [vmem:[%s10667_s14 + $0x40] sm:$0xff]  }
 0x288   : >> { %v2518_v20 = vpack.c.bf16 %v2515_v42, %v2514_v17  ;;  %v2520_v5 = vpack.c.bf16 %v2507_v15, %v2506_v11  ;;  %2572 = vmatprep.mubr.bf16.mxu1 %v12979_v53  ;;  %v10875_v22 = vpop.permute.xlu0 %9003  ;;  %2554 = vmatprep.subr.bf16.mxu1 %v2519_v1  ;;  %v10883_v46 = vpop.permute.xlu1 %9018  ;;  %v9373_v11 = vld [vmem:[%s10667_s14 + $0x48] sm:$0xff]  }
 0x289   : >> { %v9006_v4 = vunpack.i.h.bf16 %v10875_v22  ;;  %v9005_v27 = vunpack.i.l.bf16 %v10875_v22  ;;  %v9021_v35 = vunpack.i.h.bf16 %v10883_v46  ;;  %v9020_v39 = vunpack.i.l.bf16 %v10883_v46 }
 0x28a   : >> { %8060 = vmatmul.mubr.msk.bf16.gmra.mxu0 %vm2083_vm1, %v9369_v6  ;;  %8508 = vmatprep.subr.bf16.mxu0 %v2520_v5 }
 0x28b   : >> { %2555 = vmatpush1.bf16.msra.mxu1 %v2518_v20  ;;  %8509 = vmatpush3.bf16.msra.mxu0 %v2520_v5  ;;  %v2825_v58 = vsel %vm1216_vm7, %v9011_v56, %v9006_v4  ;;  %v2824_v41 = vsel %vm1216_vm7, %v9010_v30, %v9005_v27 }
 0x28c   : >> { %8510 = vmatprep.mubr.msk.bf16.mxu0 %vm2083_vm1, %v9370_v36  ;;  %v9014_v44 = vpop.permute.xlu0 %9013  ;;  %2688 = vmatprep.subr.bf16.mxu0 %v2658_v24  ;;  %v9029_v26 = vpop.permute.xlu1 %9028  ;;  %v2831_v45 = vpack.c.bf16 %v2825_v58, %v2824_v41 }
 0x28d   : >> { %v9016_v37 = vunpack.i.h.bf16 %v9014_v44  ;;  %v9015_v10 = vunpack.i.l.bf16 %v9014_v44  ;;  %8514 = vmatprep.subr.bf16.mxu1 %v2659_v40  ;;  %v9031_v34 = vunpack.i.h.bf16 %v9029_v26  ;;  %v9030_v23 = vunpack.i.l.bf16 %v9029_v26 }
 0x28e   : >> { %8065 = vmatmul.mubr.msk.bf16.vlgmr.msra.gmra.mxu1 %vm2083_vm1, %v9370_v36 }
 0x28f   : >> { %v2816_v29 = vsel %vm1216_vm7, %v9015_v10, %v9010_v30  ;;  %v2817_v18 = vsel %vm1216_vm7, %v9016_v37, %v9011_v56  ;;  %2582 = vmatprep.mubr.bf16.mxu1 %v12979_v53  ;;  %8515 = vmatpush3.bf16.msra.mxu1 %v2659_v40  ;;  %v2820_v60 = vsel %vm1216_vm7, %v9005_v27, %v9015_v10 }
 0x290   : >> { %v9024_v21 = vpop.permute.xlu0 %9023  ;;  %8516 = vmatprep.subr.bf16.mxu1 %v2656_v43  ;;  %v2830_v31 = vpack.c.bf16 %v2817_v18, %v2816_v29  ;;  %v9039_v33 = vpop.permute.xlu1 %9038  ;;  %v2821_v51 = vsel %vm1216_vm7, %v9006_v4, %v9016_v37  ;;  %v2818_v42 = vsel %vm1216_vm7, %v9020_v39, %v9030_v23  ;;  %v2819_v1 = vsel %vm1216_vm7, %v9021_v35, %v9031_v34 }
 0x291   : >> { %v9026_v59 = vunpack.i.h.bf16 %v9024_v21  ;;  %v9025_v16 = vunpack.i.l.bf16 %v9024_v21  ;;  %v9041_v6 = vunpack.i.h.bf16 %v9039_v33  ;;  %v9040_v48 = vunpack.i.l.bf16 %v9039_v33  ;;  %v9375_v33 = vld [vmem:[%s10667_s14 + $0x58] sm:$0xff]  }
 0x292   : >> { %8511 = vmatmul.mubr.msk.bf16.vlgmr.msra.gmra.mxu0 %vm2083_vm1, %v9371_v28  ;;  %v2829_v17 = vpack.c.bf16 %v2821_v51, %v2820_v60  ;;  %v2826_v56 = vpack.c.bf16 %v2819_v1, %v2818_v42 }
 0x293   : >> { %2689 = vmatpush1.bf16.msra.mxu0 %v2657_v12  ;;  %2708 = vmatprep.mubr.bf16.mxu0 %v12979_v53  ;;  %v2822_v32 = vsel %vm1216_vm7, %v9025_v16, %v9020_v39  ;;  %v2823_v61 = vsel %vm1216_vm7, %v9026_v59, %v9021_v35  ;;  %v2815_v7 = vsel %vm1216_vm7, %v9031_v34, %v9026_v59  ;;  %v9374_v12 = vld [vmem:[%s10667_s14 + $0x50] sm:$0xff]  }
 0x294   : >> { %2690 = vmatprep.subr.bf16.mxu0 %v2655_v55  ;;  %v10911_v62 = vpop.permute.xlu0 %9033  ;;  %8517 = vmatpush3.bf16.msra.mxu1 %v2656_v43  ;;  %v10922_v0 = vpop.permute.xlu1 %9048  ;;  %v2828_v2 = vpack.c.bf16 %v2823_v61, %v2822_v32  ;;  %v2814_v8 = vsel %vm1216_vm7, %v9030_v23, %v9025_v16 }
 0x295   : >> { %2860 = vmatprep.subr.bf16.mxu1 %v2830_v31  ;;  %v9036_v47 = vunpack.i.h.bf16 %v10911_v62  ;;  %v9035_v38 = vunpack.i.l.bf16 %v10911_v62  ;;  %v2827_v19 = vpack.c.bf16 %v2815_v7, %v2814_v8  ;;  %v9051_v37 = vunpack.i.h.bf16 %v10922_v0 }
 0x296   : >> { %8066 = vmatmul.mubr.msk.bf16.gmra.mxu1 %vm2083_vm1, %v9371_v28  ;;  %v9050_v10 = vunpack.i.l.bf16 %v10922_v0 }
 0x297   : >> { %2691 = vmatpush1.bf16.msra.mxu0 %v2654_v54  ;;  %8518 = vmatprep.mubr.msk.bf16.mxu1 %vm2083_vm1, %v9372_v63  ;;  %v2989_v13 = vsel %vm13004_vm8, %v9036_v47, %v9041_v6  ;;  %v2988_v14 = vsel %vm13004_vm8, %v9035_v38, %v9040_v48 }
 0x298   : >> { %8522 = vmatprep.subr.bf16.mxu0 %v2831_v45  ;;  %v9044_v49 = vpop.permute.xlu0 %9043  ;;  %v10938_v15 = vpop.permute.xlu1 %9058  ;;  %v3002_v24 = vpack.c.bf16 %v2989_v13, %v2988_v14  ;;  %v9376_v14 = vld [vmem:[%s10667_s14 + $0x60] sm:$0xff]  }
 0x299   : >> { %v9046_v57 = vunpack.i.h.bf16 %v9044_v49  ;;  %v9045_v9 = vunpack.i.l.bf16 %v9044_v49  ;;  %v9061_v46 = vunpack.i.h.bf16 %v10938_v15  ;;  %v9060_v4 = vunpack.i.l.bf16 %v10938_v15 }
 0x29a   : >> { %8071 = vmatmul.mubr.msk.bf16.vlgmr.msra.gmra.mxu0 %vm2083_vm1, %v9372_v63 }
 0x29b   : >> { %8523 = vmatpush3.bf16.msra.mxu0 %v2831_v45  ;;  %2718 = vmatprep.mubr.bf16.mxu0 %v12979_v53  ;;  %v2996_v5 = vsel %vm13004_vm8, %v9040_v48, %v9045_v9  ;;  %v2997_v22 = vsel %vm13004_vm8, %v9041_v6, %v9046_v57  ;;  %v2992_v29 = vsel %vm13004_vm8, %v9045_v9, %v9035_v38 }
 0x29c   : >> { %8524 = vmatprep.subr.bf16.mxu0 %v2828_v2  ;;  %v9054_v20 = vpop.permute.xlu0 %9053  ;;  %v9069_v27 = vpop.permute.xlu1 %9068  ;;  %v3003_v30 = vpack.c.bf16 %v2997_v22, %v2996_v5  ;;  %v2993_v18 = vsel %vm13004_vm8, %v9046_v57, %v9036_v47  ;;  %v2990_v51 = vsel %vm13004_vm8, %v9060_v4, %v9050_v10 }
 0x29d   : >> { %v9056_v40 = vunpack.i.h.bf16 %v9054_v20  ;;  %v9055_v36 = vunpack.i.l.bf16 %v9054_v20  ;;  %v9071_v26 = vunpack.i.h.bf16 %v9069_v27  ;;  %v9070_v21 = vunpack.i.l.bf16 %v9069_v27 }
 0x29e   : >> { %8519 = vmatmul.mubr.msk.bf16.vlgmr.msra.gmra.mxu1 %vm2083_vm1, %v9373_v11  ;;  %v3001_v45 = vpack.c.bf16 %v2993_v18, %v2992_v29 }
 0x29f   : >> { %2861 = vmatpush1.bf16.msra.mxu1 %v2829_v17  ;;  %8525 = vmatpush3.bf16.msra.mxu0 %v2828_v2  ;;  %v2995_v43 = vsel %vm13004_vm8, %v9056_v40, %v9061_v46  ;;  %v2994_v28 = vsel %vm13004_vm8, %v9055_v36, %v9060_v4  ;;  %v2986_v59 = vsel %vm13004_vm8, %v9050_v10, %v9055_v36 }
 0x2a0   : >> { %2862 = vmatprep.subr.bf16.mxu1 %v2827_v19  ;;  %2880 = vmatprep.mubr.bf16.mxu1 %v12979_v53  ;;  %v10953_v44 = vpop.permute.xlu0 %9063  ;;  %v10968_v58 = vpop.permute.xlu1 %9078  ;;  %v3000_v39 = vpack.c.bf16 %v2995_v43, %v2994_v28  ;;  %v2987_v16 = vsel %vm13004_vm8, %v9051_v37, %v9056_v40  ;;  %v2991_v2 = vsel %vm13004_vm8, %v9061_v46, %v9051_v37 }
 0x2a1   : >> { %3032 = vmatprep.subr.bf16.mxu0 %v3002_v24  ;;  %v9066_v41 = vunpack.i.h.bf16 %v10953_v44  ;;  %v9065_v55 = vunpack.i.l.bf16 %v10953_v44  ;;  %v2999_v38 = vpack.c.bf16 %v2987_v16, %v2986_v59  ;;  %v9081_v6 = vunpack.i.h.bf16 %v10968_v58  ;;  %v9377_v44 = vld [vmem:[%s10667_s14 + $0x68] sm:$0xff]  }
 0x2a2   : >> { %8072 = vmatmul.mubr.msk.bf16.gmra.mxu0 %vm2083_vm1, %v9373_v11  ;;  %v9080_v34 = vunpack.i.l.bf16 %v10968_v58  ;;  %v2998_v57 = vpack.c.bf16 %v2991_v2, %v2990_v51  ;;  %v9381_v51 = vld [vmem:[%s10667_s14 + $0x88] sm:$0xff]  }
 0x2a3   : >> { %2863 = vmatpush1.bf16.msra.mxu1 %v2826_v56  ;;  %8526 = vmatprep.mubr.msk.bf16.mxu0 %vm2083_vm1, %v9374_v12  ;;  %v3169_v63 = vsel %vm13003_vm9, %v9071_v26, %v9066_v41  ;;  %v3168_v47 = vsel %vm13003_vm9, %v9070_v21, %v9065_v55 }
 0x2a4   : >> { %8530 = vmatprep.subr.bf16.mxu1 %v3003_v30  ;;  %v9074_v35 = vpop.permute.xlu0 %9073  ;;  %v9089_v61 = vpop.permute.xlu1 %9088  ;;  %v3175_v7 = vpack.c.bf16 %v3169_v63, %v3168_v47 }
 0x2a5   : >> { %v9076_v31 = vunpack.i.h.bf16 %v9074_v35  ;;  %v9075_v54 = vunpack.i.l.bf16 %v9074_v35  ;;  %v9091_v19 = vunpack.i.h.bf16 %v9089_v61  ;;  %v9090_v20 = vunpack.i.l.bf16 %v9089_v61 }
 0x2a6   : >> { %8077 = vmatmul.mubr.msk.bf16.vlgmr.msra.gmra.mxu1 %vm2083_vm1, %v9374_v12 }
 0x2a7   : >> { %8531 = vmatpush3.bf16.msra.mxu1 %v3003_v30  ;;  %v3160_v62 = vsel %vm13003_vm9, %v9075_v54, %v9070_v21  ;;  %v3161_v32 = vsel %vm13003_vm9, %v9076_v31, %v9071_v26  ;;  %2890 = vmatprep.mubr.bf16.mxu1 %v12979_v53  ;;  %v3164_v5 = vsel %vm13003_vm9, %v9065_v55, %v9075_v54 }
 0x2a8   : >> { %8532 = vmatprep.subr.bf16.mxu1 %v3000_v39  ;;  %v9084_v48 = vpop.permute.xlu0 %9083  ;;  %v3174_v60 = vpack.c.bf16 %v3161_v32, %v3160_v62  ;;  %v9099_v49 = vpop.permute.xlu1 %9098  ;;  %v3165_v22 = vsel %vm13003_vm9, %v9066_v41, %v9076_v31  ;;  %v3162_v10 = vsel %vm13003_vm9, %v9080_v34, %v9090_v20  ;;  %v3163_v29 = vsel %vm13003_vm9, %v9081_v6, %v9091_v19 }
 0x2a9   : >> { %v9086_v23 = vunpack.i.h.bf16 %v9084_v48  ;;  %v9085_v0 = vunpack.i.l.bf16 %v9084_v48  ;;  %v9101_v17 = vunpack.i.h.bf16 %v9099_v49  ;;  %v9100_v42 = vunpack.i.l.bf16 %v9099_v49 }
 0x2aa   : >> { %8527 = vmatmul.mubr.msk.bf16.vlgmr.msra.gmra.mxu0 %vm2083_vm1, %v9375_v33  ;;  %v3173_v37 = vpack.c.bf16 %v3165_v22, %v3164_v5 }
 0x2ab   : >> { %3033 = vmatpush1.bf16.msra.mxu0 %v3001_v45  ;;  %8533 = vmatpush3.bf16.msra.mxu1 %v3000_v39  ;;  %v3166_v9 = vsel %vm13003_vm9, %v9085_v0, %v9080_v34  ;;  %v3167_v13 = vsel %vm13003_vm9, %v9086_v23, %v9081_v6  ;;  %v3159_v36 = vsel %vm13003_vm9, %v9091_v19, %v9086_v23  ;;  %v9378_v45 = vld [vmem:[%s10667_s14 + $0x70] sm:$0xff]  }
 0x2ac   : >> { %3034 = vmatprep.subr.bf16.mxu0 %v2999_v38  ;;  %3052 = vmatprep.mubr.bf16.mxu0 %v12979_v53  ;;  %v10995_v8 = vpop.permute.xlu0 %9093  ;;  %v9109_v1 = vpop.permute.xlu1 %9108  ;;  %v3172_v24 = vpack.c.bf16 %v3167_v13, %v3166_v9  ;;  %v3158_v46 = vsel %vm13003_vm9, %v9090_v20, %v9085_v0  ;;  %v3170_v39 = vpack.c.bf16 %v3163_v29, %v3162_v10  ;;  %v9379_v38 = vld [vmem:[%s10667_s14 + $0x78] sm:$0xff]  }
 0x2ad   : >> { %3204 = vmatprep.subr.bf16.mxu1 %v3174_v60  ;;  %v9096_v11 = vunpack.i.h.bf16 %v10995_v8  ;;  %v9095_v15 = vunpack.i.l.bf16 %v10995_v8  ;;  %v3171_v43 = vpack.c.bf16 %v3159_v36, %v3158_v46  ;;  %v9111_v16 = vunpack.i.h.bf16 %v9109_v1  ;;  %v9380_v60 = vld [vmem:[%s10667_s14 + $0x80] sm:$0xff]   ;;  %s13121_s14 = smov (%p1928_p1), 111  }
 0x2ae   : >> { %8078 = vmatmul.mubr.msk.bf16.gmra.mxu1 %vm2083_vm1, %v9375_v33  ;;  %v9110_v31 = vunpack.i.l.bf16 %v9109_v1 }
 0x2af   : >> { %3035 = vmatpush1.bf16.msra.mxu0 %v2998_v57  ;;  %8534 = vmatprep.mubr.msk.bf16.mxu1 %vm2083_vm1, %v9376_v14  ;;  %v3333_v56 = vsel %vm13002_vm10, %v9096_v11, %v9101_v17  ;;  %v3332_v30 = vsel %vm13002_vm10, %v9095_v15, %v9100_v42 }
 0x2b0   : >> { %8538 = vmatprep.subr.bf16.mxu0 %v3175_v7  ;;  %v9104_v40 = vpop.permute.xlu0 %9103  ;;  %v9119_v12 = vpop.permute.xlu1 %9118  ;;  %v3346_v58 = vpack.c.bf16 %v3333_v56, %v3332_v30 }
 0x2b1   : >> { %v9106_v4 = vunpack.i.h.bf16 %v9104_v40  ;;  %v9105_v27 = vunpack.i.l.bf16 %v9104_v40  ;;  %v9121_v21 = vunpack.i.h.bf16 %v9119_v12  ;;  %v9120_v35 = vunpack.i.l.bf16 %v9119_v12 }
 0x2b2   : >> { %8083 = vmatmul.mubr.msk.bf16.vlgmr.msra.gmra.mxu0 %vm2083_vm1, %v9376_v14 }
 0x2b3   : >> { %8539 = vmatpush3.bf16.msra.mxu0 %v3175_v7  ;;  %3062 = vmatprep.mubr.bf16.mxu0 %v12979_v53  ;;  %v3340_v18 = vsel %vm13002_vm10, %v9100_v42, %v9105_v27  ;;  %v3341_v26 = vsel %vm13002_vm10, %v9101_v17, %v9106_v4  ;;  %v3336_v63 = vsel %vm13002_vm10, %v9105_v27, %v9095_v15 }
 0x2b4   : >> { %8540 = vmatprep.subr.bf16.mxu0 %v3172_v24  ;;  %v9114_v28 = vpop.permute.xlu0 %9113  ;;  %v3347_v59 = vpack.c.bf16 %v3341_v26, %v3340_v18  ;;  %v3337_v47 = vsel %vm13002_vm10, %v9106_v4, %v9096_v11  ;;  %v3334_v34 = vsel %vm13002_vm10, %v9120_v35, %v9110_v31  ;;  %v3335_v23 = vsel %vm13002_vm10, %v9121_v21, %v9111_v16 }
 0x2b5   : >> { %v9116_v41 = vunpack.i.h.bf16 %v9114_v28  ;;  %v9115_v55 = vunpack.i.l.bf16 %v9114_v28  ;;  %v3345_v48 = vpack.c.bf16 %v3337_v47, %v3336_v63  ;;  %v3342_v0 = vpack.c.bf16 %v3335_v23, %v3334_v34 }
 0x2b6   : >> { %8535 = vmatmul.mubr.msk.bf16.vlgmr.msra.gmra.mxu1 %vm2083_vm1, %v9377_v44 }
 0x2b7   : >> { %3205 = vmatpush1.bf16.msra.mxu1 %v3173_v37  ;;  %8541 = vmatpush3.bf16.msra.mxu0 %v3172_v24  ;;  %v3339_v54 = vsel %vm13002_vm10, %v9116_v41, %v9121_v21  ;;  %v3338_v33 = vsel %vm13002_vm10, %v9115_v55, %v9120_v35  ;;  %v3330_v32 = vsel %vm13002_vm10, %v9110_v31, %v9115_v55 }
 0x2b8   : >> { %3206 = vmatprep.subr.bf16.mxu1 %v3171_v43  ;;  %3224 = vmatprep.mubr.bf16.mxu1 %v12979_v53  ;;  %v3344_v62 = vpack.c.bf16 %v3339_v54, %v3338_v33  ;;  %v3331_v61 = vsel %vm13002_vm10, %v9111_v16, %v9116_v41 }
 0x2b9   : >> { %3376 = vmatprep.subr.bf16.mxu0 %v3346_v58  ;;  %v3343_v6 = vpack.c.bf16 %v3331_v61, %v3330_v32 }
 0x2ba   : >> { %8084 = vmatmul.mubr.msk.bf16.gmra.mxu0 %vm2083_vm1, %v9377_v44 }
 0x2bb   : >> { %3207 = vmatpush1.bf16.msra.mxu1 %v3170_v39  ;;  %8542 = vmatprep.mubr.msk.bf16.mxu0 %vm2083_vm1, %v9378_v45 }
 0x2bc   : >> { %8546 = vmatprep.subr.bf16.mxu1 %v3347_v59 }
 0x2be   : >> { %8089 = vmatmul.mubr.msk.bf16.vlgmr.msra.gmra.mxu1 %vm2083_vm1, %v9378_v45 }
 0x2bf   : >> { %8547 = vmatpush3.bf16.msra.mxu1 %v3347_v59  ;;  %3234 = vmatprep.mubr.bf16.mxu1 %v12979_v53 }
 0x2c0   : >> { %8548 = vmatprep.subr.bf16.mxu1 %v3344_v62 }
 0x2c2   : >> { %8543 = vmatmul.mubr.msk.bf16.vlgmr.msra.gmra.mxu0 %vm2083_vm1, %v9379_v38 }
 0x2c3   : >> { %3377 = vmatpush1.bf16.msra.mxu0 %v3345_v48  ;;  %8549 = vmatpush3.bf16.msra.mxu1 %v3344_v62 }
 0x2c4   : >> { %3378 = vmatprep.subr.bf16.mxu0 %v3343_v6  ;;  %3396 = vmatprep.mubr.bf16.mxu0 %v12979_v53 }
 0x2c6   : >> { %8090 = vmatmul.mubr.msk.bf16.gmra.mxu1 %vm2083_vm1, %v9379_v38 }
 0x2c7   : >> { %3379 = vmatpush1.bf16.msra.mxu0 %v3342_v0  ;;  %8550 = vmatprep.mubr.msk.bf16.mxu1 %vm2083_vm1, %v9380_v60 }
 0x2ca   : >> { %8095 = vmatmul.mubr.msk.bf16.vlgmr.msra.gmra.mxu0 %vm2083_vm1, %v9380_v60 }
 0x2cb   : >> { %3406 = vmatprep.mubr.bf16.mxu0 %v12979_v53 }
 0x2ce   : >> { %8551 = vmatmul.mubr.msk.bf16.vlgmr.msra.gmra.mxu1 %vm2083_vm1, %v9381_v51 }
 0x2cf   : >> { %3709 = vmatprep.mubr.bf16.mxu1 %v12979_v53 }
 0x2d2   : >> { %8096 = vmatmul.mubr.msk.bf16.gmra.mxu0 %vm2083_vm1, %v9381_v51 }
 0x32a   : >> { %v2124_v2 = vpop.f32.mrf.mxu0 }
 0x32c   : >> { %v2126_v49 = vpop.f32.mrf.mxu0  ;;  %v8488_v7 = vpop.f32.mrf.mxu1 }
 0x32e   : >> { %v2128_v8 = vpop.f32.mrf.mxu0  ;;  %v2177_v57 = vpop.f32.mrf.mxu1 }
 0x330   : >> { %v2130_v9 = vpop.f32.mrf.mxu0  ;;  %v8489_v13 = vpop.f32.mrf.mxu1 }
 0x332   : >> { %v2134_v14 = vpop.f32.mrf.mxu0  ;;  %v2180_v11 = vpop.f32.mrf.mxu1 }
 0x334   : >> { %v2136_v15 = vpop.f32.mrf.mxu0 }
 0x336   : >> { %v2138_v17 = vpop.f32.mrf.mxu0  ;;  %v2242_v42 = vpop.f32.mrf.mxu1 }
 0x337   : >> { %v2243_v19 = vadd.f32 %v2242_v42, %v2124_v2 }
 0x338   : >> { %v2140_v20 = vpop.f32.mrf.mxu0  ;;  %v2244_v1 = vpop.f32.mrf.mxu1 }
 0x339   : >> { %v2245_v5 = vadd.f32 %v2244_v1, %v2126_v49 }
 0x33a   : >> { %v2246_v22 = vpop.f32.mrf.mxu1  ;;  %v8496_v24 = vpop.f32.mrf.mxu0 }
 0x33b   : >> { %v2247_v40 = vadd.f32 %v2246_v22, %v2128_v8  ;;  %v2304_v36 = vadd.f32 %v8496_v24, %v8488_v7 }
 0x33c   : >> { %v2248_v46 = vpop.f32.mrf.mxu1  ;;  %v2295_v4 = vpop.f32.mrf.mxu0 }
 0x33d   : >> { %v2249_v27 = vadd.f32 %v2248_v46, %v2130_v9  ;;  %v2296_v56 = vadd.f32 %v2295_v4, %v2177_v57 }
 0x33e   : >> { %v2252_v30 = vpop.f32.mrf.mxu1  ;;  %v8497_v44 = vpop.f32.mrf.mxu0 }
 0x33f   : >> { %v2253_v37 = vadd.f32 %v2252_v30, %v2134_v14  ;;  %v11064_v10 = vadd.f32 %v8497_v44, %v8489_v13 }
 0x340   : >> { %v2254_v43 = vpop.f32.mrf.mxu1  ;;  %v2298_v28 = vpop.f32.mrf.mxu0 }
 0x341   : >> { %v2255_v12 = vadd.f32 %v2254_v43, %v2136_v15  ;;  %v2299_v29 = vadd.f32 %v2298_v28, %v2180_v11 }
 0x342   : >> { %v2256_v18 = vpop.f32.mrf.mxu1  ;;  %v2402_v26 = vpop.f32.mrf.mxu0 }
 0x343   : >> { %v11066_v58 = vadd.f32 %v2256_v18, %v2138_v17  ;;  %v2470_v41 = vadd.f32 %v2402_v26, %v2243_v19 }
 0x344   : >> { %v2258_v55 = vpop.f32.mrf.mxu1  ;;  %v2404_v21 = vpop.f32.mrf.mxu0 }
 0x345   : >> { %v11068_v35 = vadd.f32 %v2258_v55, %v2140_v20  ;;  %v2471_v39 = vadd.f32 %v2404_v21, %v2245_v5 }
 0x346   : >> { %v2406_v59 = vpop.f32.mrf.mxu0  ;;  %v8504_v16 = vpop.f32.mrf.mxu1 }
 0x347   : >> { %v2473_v31 = vadd.f32 %v2406_v59, %v2247_v40  ;;  %v11070_v54 = vadd.f32 %v8504_v16, %v2304_v36 }
 0x348   : >> { %v2408_v33 = vpop.f32.mrf.mxu0  ;;  %v2455_v45 = vpop.f32.mrf.mxu1 }
 0x349   : >> { %v11072_v62 = vadd.f32 %v2408_v33, %v2249_v27  ;;  %v2472_v32 = vadd.f32 %v2455_v45, %v2296_v56 }
 0x34a   : >> { %v2412_v61 = vpop.f32.mrf.mxu0  ;;  %v8505_v63 = vpop.f32.mrf.mxu1 }
 0x34b   : >> { %v11074_v47 = vadd.f32 %v2412_v61, %v2253_v37  ;;  %v2481_v53 = vadd.f32 %v8505_v63, %v11064_v10 }
 0x34c   : >> { %v2414_v38 = vpop.f32.mrf.mxu0  ;;  %v2458_v6 = vpop.f32.mrf.mxu1 }
 0x34d   : >> { %v11076_v48 = vadd.f32 %v2414_v38, %v2255_v12  ;;  %v11078_v34 = vadd.f32 %v2458_v6, %v2299_v29 }
 0x34e   : >> { %v2416_v23 = vpop.f32.mrf.mxu0  ;;  %v2574_v0 = vpop.f32.mrf.mxu1 }
 0x34f   : >> { %v11080_v60 = vadd.f32 %v2574_v0, %v2470_v41  ;;  %v2479_v50 = vadd.f32 %v2416_v23, %v11066_v58 }
 0x350   : >> { %v2418_v51 = vpop.f32.mrf.mxu0  ;;  %v2576_v2 = vpop.f32.mrf.mxu1 }
 0x351   : >> { %v11082_v49 = vadd.f32 %v2576_v2, %v2471_v39  ;;  %v2480_v3 = vadd.f32 %v2418_v51, %v11068_v35 }
 0x352   : >> { %v2578_v7 = vpop.f32.mrf.mxu1  ;;  %v8512_v8 = vpop.f32.mrf.mxu0 }
 0x353   : >> { %v11084_v57 = vadd.f32 %v2578_v7, %v2473_v31 }
 0x354   : >> { %v2580_v9 = vpop.f32.mrf.mxu1  ;;  %v2627_v13 = vpop.f32.mrf.mxu0 }
 0x355   : >> { %v11086_v14 = vadd.f32 %v2627_v13, %v2472_v32 }
 0x356   : >> { %v2584_v11 = vpop.f32.mrf.mxu1  ;;  %v8513_v15 = vpop.f32.mrf.mxu0 }
 0x358   : >> { %v2586_v17 = vpop.f32.mrf.mxu1  ;;  %v2630_v42 = vpop.f32.mrf.mxu0 }
 0x359   : >> { %v2647_v10 = vadd.f32 %v2630_v42, %v11078_v34 }
 0x35a   : >> { %v2588_v19 = vpop.f32.mrf.mxu1  ;;  %v2710_v20 = vpop.f32.mrf.mxu0 }
 0x35b   : >> { %v2651_v63 = vadd.f32 %v2588_v19, %v2479_v50  ;;  %v11124_v19 = vpop.permute.xlu0 %3490 }
 0x35c   : >> { %v2590_v1 = vpop.f32.mrf.mxu1  ;;  %v2712_v5 = vpop.f32.mrf.mxu0 }
 0x35d   : >> { %v2652_v58 = vadd.f32 %v2590_v1, %v2480_v3  ;;  %v2779_v35 = vadd.f32 %v2712_v5, %v11082_v49 }
 0x35e   : >> { %v2714_v22 = vpop.f32.mrf.mxu0  ;;  %v8520_v24 = vpop.f32.mrf.mxu1 }
 0x360   : >> { %v2716_v40 = vpop.f32.mrf.mxu0  ;;  %v2763_v36 = vpop.f32.mrf.mxu1 }
 0x361   : >> { %v2780_v51 = vadd.f32 %v2763_v36, %v11086_v14 }
 0x362   : >> { %v2720_v46 = vpop.f32.mrf.mxu0  ;;  %v8521_v4 = vpop.f32.mrf.mxu1 }
 0x364   : >> { %v2722_v27 = vpop.f32.mrf.mxu0  ;;  %v2766_v56 = vpop.f32.mrf.mxu1 }
 0x365   : >> { %v2783_v50 = vadd.f32 %v2766_v56, %v2647_v10  ;;  %v3486_v10 = vpop.permute.xlu0 %3485 }
 0x366   : >> { %v2724_v30 = vpop.f32.mrf.mxu0  ;;  %v2882_v44 = vpop.f32.mrf.mxu1 }
 0x368   : >> { %v2726_v37 = vpop.f32.mrf.mxu0  ;;  %v2884_v43 = vpop.f32.mrf.mxu1 }
 0x369   : >> { %v2951_v3 = vadd.f32 %v2884_v43, %v2779_v35 }
 0x36a   : >> { %v2886_v28 = vpop.f32.mrf.mxu1  ;;  %v8528_v12 = vpop.f32.mrf.mxu0 }
 0x36c   : >> { %v2888_v29 = vpop.f32.mrf.mxu1  ;;  %v2935_v18 = vpop.f32.mrf.mxu0 }
 0x36d   : >> { %v2952_v1 = vadd.f32 %v2935_v18, %v2780_v51 }
 0x36e   : >> { %v2892_v26 = vpop.f32.mrf.mxu1  ;;  %v8529_v41 = vpop.f32.mrf.mxu0 }
 0x370   : >> { %v2894_v55 = vpop.f32.mrf.mxu1  ;;  %v11088_v21 = vpop.f32.mrf.mxu0 }
 0x372   : >> { %v11090_v39 = vpop.f32.mrf.mxu1  ;;  %v3054_v59 = vpop.f32.mrf.mxu0 }
 0x374   : >> { %v2898_v16 = vpop.f32.mrf.mxu1  ;;  %v3056_v31 = vpop.f32.mrf.mxu0 }
 0x376   : >> { %v3058_v33 = vpop.f32.mrf.mxu0  ;;  %v11092_v45 = vpop.f32.mrf.mxu1 }
 0x377   : >> { %13047 = vst [vmem:[#allocation27_spill] sm:$0xff] %v11092_v45  ;;  %v11119_v45 = vpop.permute.xlu1 %3495 }
 0x378   : >> { %v11094_v32 = vpop.f32.mrf.mxu0  ;;  %v11096_v61 = vpop.f32.mrf.mxu1 }
 0x379   : >> { %13048 = vst [vmem:[#allocation28_spill] sm:$0xff] %v11094_v32  ;;  %13049 = vst [vmem:[#allocation29_spill] sm:$0xff] %v11096_v61  ;;  %v2653_v61 = vadd.f32 %v8513_v15, %v2481_v53 }
 0x37a   : >> { %v11098_v38 = vpop.f32.mrf.mxu0  ;;  %v11100_v6 = vpop.f32.mrf.mxu1 }
 0x37b   : >> { %13050 = vst [vmem:[#allocation30_spill] sm:$0xff] %v11098_v38  ;;  %13051 = vst [vmem:[#allocation31_spill] sm:$0xff] %v11100_v6  ;;  %v2650_v38 = vadd.f32 %v8512_v8, %v11070_v54  ;;  %v2646_v6 = vadd.f32 %v2580_v9, %v11072_v62  ;;  %v2781_v54 = vadd.f32 %v2714_v22, %v11084_v57 }
 0x37c   : >> { %v11102_v0 = vpop.f32.mrf.mxu0  ;;  %v11104_v2 = vpop.f32.mrf.mxu1  ;;  %v2789_v9 = vadd.f32 %v8521_v4, %v2653_v61  ;;  %v2955_v4 = vadd.f32 %v11088_v21, %v2783_v50 }
 0x37d   : >> { %13052 = vst [vmem:[#allocation32_spill] sm:$0xff] %v11102_v0  ;;  %13053 = vst [vmem:[#allocation33_spill] sm:$0xff] %v11104_v2  ;;  %v2648_v0 = vadd.f32 %v2584_v11, %v11074_v47  ;;  %v2786_v62 = vadd.f32 %v8520_v24, %v2650_v38  ;;  %v2782_v53 = vadd.f32 %v2716_v40, %v2646_v6 }
 0x37e   : >> { %v11106_v7 = vpop.f32.mrf.mxu0  ;;  %v3226_v13 = vpop.f32.mrf.mxu1  ;;  %v2787_v11 = vadd.f32 %v2724_v30, %v2651_v63  ;;  %v2953_v42 = vadd.f32 %v2886_v28, %v2781_v54  ;;  %v2961_v24 = vadd.f32 %v8529_v41, %v2789_v9  ;;  %v3123_v40 = vadd.f32 %v3056_v31, %v2951_v3  ;;  %v13056_v43 = vld [vmem:[#allocation27_spill] sm:$0xff] }
 0x37f   : >> { %13054 = vst [vmem:[#allocation34_spill] sm:$0xff] %v11106_v7  ;;  %v2649_v7 = vadd.f32 %v2586_v17, %v11076_v48  ;;  %v2784_v8 = vadd.f32 %v2720_v46, %v2648_v0  ;;  %v2788_v17 = vadd.f32 %v2726_v37, %v2652_v58  ;;  %v2958_v57 = vadd.f32 %v8528_v12, %v2786_v62  ;;  %v3481_v46 = vpop.permute.xlu1 %3480 }
 0x380   : >> { %v11109_v25 = vpop.f32.mrf.mxu0  ;;  %v3228_v52 = vpop.f32.mrf.mxu1  ;;  %v3125_v30 = vadd.f32 %v3058_v33, %v2953_v42  ;;  %v13057_v12 = vld [vmem:[#allocation28_spill] sm:$0xff] }
 0x381   : >> { %13055 = vst [vmem:[#allocation35_spill] sm:$0xff] %v11109_v25  ;;  %v2778_v25 = vadd.f32 %v2710_v20, %v11080_v60  ;;  %v2785_v34 = vadd.f32 %v2722_v27, %v2649_v7  ;;  %v2954_v20 = vadd.f32 %v2888_v29, %v2782_v53  ;;  %v2956_v5 = vadd.f32 %v2892_v26, %v2784_v8 }
 0x382   : >> { %v3230_v2 = vpop.f32.mrf.mxu1  ;;  %v8544_v32 = vpop.f32.mrf.mxu0  ;;  %v2959_v27 = vadd.f32 %v11090_v39, %v2787_v11  ;;  %v2960_v56 = vadd.f32 %v2898_v16, %v2788_v17  ;;  %v3130_v28 = vadd.f32 %v13056_v43, %v2958_v57  ;;  %v3295_v18 = vadd.f32 %v3228_v52, %v3123_v40  ;;  %v13060_v61 = vld [vmem:[#allocation31_spill] sm:$0xff] }
 0x383   : >> { %v2950_v48 = vadd.f32 %v2882_v44, %v2778_v25  ;;  %v2957_v25 = vadd.f32 %v2894_v55, %v2785_v34  ;;  %v3126_v29 = vadd.f32 %v13057_v12, %v2954_v20  ;;  %v13059_v55 = vld [vmem:[#allocation30_spill] sm:$0xff]  ;;  %v3133_v38 = vadd.f32 %v13060_v61, %v2961_v24 }
 0x384   : >> { %v3232_v23 = vpop.f32.mrf.mxu1  ;;  %v3279_v47 = vpop.f32.mrf.mxu0  ;;  %v3128_v31 = vadd.f32 %v13059_v55, %v2956_v5  ;;  %v13061_v6 = vld [vmem:[#allocation32_spill] sm:$0xff]  ;;  %v3297_v16 = vadd.f32 %v3230_v2, %v3125_v30  ;;  %v3302_v33 = vadd.f32 %v8544_v32, %v3130_v28  ;;  %v13062_v63 = vld [vmem:[#allocation33_spill] sm:$0xff] }
 0x385   : >> { %v3122_v49 = vadd.f32 %v3054_v59, %v2950_v48  ;;  %v13058_v59 = vld [vmem:[#allocation29_spill] sm:$0xff]  ;;  %v3129_v21 = vadd.f32 %v13061_v6, %v2957_v25  ;;  %v3127_v58 = vadd.f32 %v13062_v63, %v2955_v4  ;;  %v3298_v53 = vadd.f32 %v3232_v23, %v3126_v29 }
 0x386   : >> { %v3236_v60 = vpop.f32.mrf.mxu1  ;;  %v8545_v15 = vpop.f32.mrf.mxu0  ;;  %v3124_v41 = vadd.f32 %v13058_v59, %v2952_v1  ;;  %v13063_v35 = vld [vmem:[#allocation34_spill] sm:$0xff] }
 0x387   : >> { %v3294_v36 = vadd.f32 %v3226_v13, %v3122_v49  ;;  %v3131_v52 = vadd.f32 %v13063_v35, %v2959_v27  ;;  %v3300_v17 = vadd.f32 %v3236_v60, %v3128_v31  ;;  %v3305_v2 = vadd.f32 %v8545_v15, %v3133_v38 }
 0x388   : >> { %v3238_v22 = vpop.f32.mrf.mxu1  ;;  %v3282_v14 = vpop.f32.mrf.mxu0  ;;  %v13064_v54 = vld [vmem:[#allocation35_spill] sm:$0xff]  ;;  %v3296_v11 = vadd.f32 %v3279_v47, %v3124_v41 }
 0x389   : >> { %v3132_v62 = vadd.f32 %v13064_v54, %v2960_v56  ;;  %v3301_v32 = vadd.f32 %v3238_v22, %v3129_v21  ;;  %v3299_v49 = vadd.f32 %v3282_v14, %v3127_v58 }
 0x38a   : >> { %v3240_v44 = vpop.f32.mrf.mxu1  ;;  %v3398_v37 = vpop.f32.mrf.mxu0 }
 0x38b   : >> { %v3466_v26 = vadd.f32 %v3398_v37, %v3294_v36  ;;  %v3303_v5 = vadd.f32 %v3240_v44, %v3131_v52 }
 0x38c   : >> { %v3242_v0 = vpop.f32.mrf.mxu1  ;;  %v3400_v39 = vpop.f32.mrf.mxu0 }
 0x38d   : >> { %v3498_v7 = vadd.f32 %v3481_v46, %v3466_v26  ;;  %v3467_v13 = vadd.f32 %v3400_v39, %v3295_v18  ;;  %v3304_v24 = vadd.f32 %v3242_v0, %v3132_v62 }
 0x38e   : >> { %v3402_v51 = vpop.f32.mrf.mxu0  ;;  %v8552_v8 = vpop.f32.mrf.mxu1 }
 0x38f   : >> { %v3510_v48 = vmax.f32 %v3498_v7, 0.0  ;;  %v3499_v9 = vadd.f32 %v3481_v46, %v3467_v13  ;;  %v3469_v34 = vadd.f32 %v3402_v51, %v3297_v16  ;;  %v3474_v50 = vadd.f32 %v8552_v8, %v3302_v33 }
 0x390   : >> { %v3404_v3 = vpop.f32.mrf.mxu0  ;;  %v3451_v42 = vpop.f32.mrf.mxu1 }
 0x391   : >> { %v3511_v57 = vmax.f32 %v3499_v9, 0.0  ;;  %v3506_v20 = vadd.f32 %v11124_v19, %v3474_v50  ;;  %v3501_v1 = vadd.f32 %v3486_v10, %v3469_v34  ;;  %v3470_v23 = vadd.f32 %v3404_v3, %v3298_v53 }
 0x392   : >> { %v3468_v25 = vadd.f32 %v3451_v42, %v3296_v11  ;;  %v3408_v40 = vpop.f32.mrf.mxu0  ;;  %v8553_v36 = vpop.f32.mrf.mxu1  ;;  %v3522_v27 = vsel %vm1899_vm12, %v3510_v48, 0.0 }
 0x393   : >> { %v3518_v47 = vmax.f32 %v3506_v20, 0.0  ;;  %v3513_v60 = vmax.f32 %v3501_v1, 0.0  ;;  %v3472_v15 = vadd.f32 %v3408_v40, %v3300_v17  ;;  %v3523_v56 = vsel %vm1900_vm14, %v3511_v57, 0.0  ;;  %v3573_v20 = vld [vmem:[%s3572_s26] sm:$0xff]  ;;  %v3575_v1 = vld [vmem:[%s3572_s26 + $0x10] sm:$0xff] }
 0x394   : >> { %v3502_v14 = vadd.f32 %v3486_v10, %v3470_v23  ;;  %v3500_v30 = vadd.f32 %v3481_v46, %v3468_v25  ;;  %v3477_v37 = vadd.f32 %v8553_v36, %v3305_v2  ;;  %v3410_v43 = vpop.f32.mrf.mxu0  ;;  %v3454_v28 = vpop.f32.mrf.mxu1 }
 0x395   : >> { %v3530_v12 = vsel %vm1901_vm13, %v3518_v47, 0.0  ;;  %v3525_v29 = vsel %vm1899_vm12, %v3513_v60, 0.0  ;;  %v11146_v18 = vpack.c.bf16 %v3513_v60, %v3510_v48  ;;  %v3504_v26 = vadd.f32 %v11124_v19, %v3472_v15  ;;  %v9399_v15 = vld [vmem:[%s10686_s16 + $0x88] sm:$0xff]  }
 0x396   : >> { %v3514_v59 = vmax.f32 %v3502_v14, 0.0  ;;  %v3512_v41 = vmax.f32 %v3500_v30, 0.0  ;;  %v3509_v55 = vadd.f32 %v11119_v45, %v3477_v37  ;;  %v3473_v31 = vadd.f32 %v3410_v43, %v3301_v32  ;;  %v3412_v61 = vpop.f32.mrf.mxu0 }
 0x397   : >> { %v3516_v46 = vmax.f32 %v3504_v26, 0.0  ;;  %v3471_v38 = vadd.f32 %v3454_v28, %v3299_v49  ;;  %v3475_v6 = vadd.f32 %v3412_v61, %v3303_v5  ;;  %v11150_v21 = vpack.i.bf16 %v3525_v29, %v3522_v27  ;;  %v3574_v5 = vld [vmem:[%s3572_s26 + $0x8] sm:$0xff] }
 0x398   : >> { %v3526_v0 = vsel %vm1900_vm14, %v3514_v59, 0.0  ;;  %v11154_v39 = vpack.c.bf16 %v3514_v59, %v3511_v57  ;;  %v3524_v16 = vsel %vm1901_vm13, %v3512_v41, 0.0  ;;  %v3521_v33 = vmax.f32 %v3509_v55, 0.0  ;;  %v3414_v7 = vpop.f32.mrf.mxu0  ;;  %v11191_v57 = vld [vmem:[%s10686_s16 + $0x10] sm:$0xff]  }
 0x399   : >> { %v3528_v13 = vsel %vm1899_vm12, %v3516_v46, 0.0  ;;  %v3505_v63 = vadd.f32 %v11124_v19, %v3473_v31  ;;  %v3503_v58 = vadd.f32 %v3486_v10, %v3471_v38  ;;  %v3507_v35 = vadd.f32 %v11119_v45, %v3475_v6  ;;  %8558 = vmatprep.mubr.msk.bf16.mxu0 %vm2083_vm1, %v11191_v57 }
 0x39a   : >> { %v3533_v52 = vsel %vm1901_vm13, %v3521_v33, 0.0  ;;  %v11164_v54 = vpack.c.bf16 %v3521_v33, %v3518_v47  ;;  %v3476_v62 = vadd.f32 %v3414_v7, %v3304_v24  ;;  %v11166_v53 = vpack.i.bf16 %v3526_v0, %v3523_v56  ;;  %v3576_v24 = vld [vmem:[%s3572_s26 + $0x18] sm:$0xff] }
 0x39b   : >> { %v3517_v51 = vmax.f32 %v3505_v63, 0.0  ;;  %v3515_v8 = vmax.f32 %v3503_v58, 0.0  ;;  %v3519_v48 = vmax.f32 %v3507_v35, 0.0  ;;  %v9124_v9 = vpack.i.bf16 %v3533_v52, %v3530_v12 }
 0x39c   : >> { %v3508_v34 = vadd.f32 %v11119_v45, %v3476_v62 }
 0x39d   : >> { %v3529_v19 = vsel %vm1900_vm14, %v3517_v51, 0.0  ;;  %v3527_v10 = vsel %vm1901_vm13, %v3515_v8, 0.0  ;;  %v11173_v50 = vpack.c.bf16 %v3515_v8, %v3512_v41  ;;  %v3531_v11 = vsel %vm1899_vm12, %v3519_v48, 0.0  ;;  %9125 = vrot.lane.b32.xlu1 %v9124_v9, %s9971_s18 }
 0x39e   : >> { %v11178_v17 = vpack.c.bf16 %v3519_v48, %v3516_v46  ;;  %v3520_v2 = vmax.f32 %v3508_v34, 0.0  ;;  %v9129_v32 = vpack.i.bf16 %v3531_v11, %v3528_v13  ;;  %v9149_v3 = vpack.i.bf16 %v3527_v10, %v3524_v16  ;;  %v9383_v10 = vld [vmem:[%s10686_s16 + $0x18] sm:$0xff]  }
 0x3a0   : >> { %v3532_v45 = vsel %vm1900_vm14, %v3520_v2, 0.0  ;;  %v11182_v42 = vpack.c.bf16 %v3520_v2, %v3517_v51 }
 0x3a1   : >> { %9130 = vrot.lane.b32.xlu1 %v9129_v32, %s9971_s18  ;;  %v9134_v49 = vpack.i.bf16 %v3532_v45, %v3529_v19 }
 0x3a3   : >> { %9135 = vrot.lane.b32.xlu0 %v9134_v49, %s9971_s18 }
 0x3a5   : >> { %9145 = vrot.lane.b32.xlu1 %v11166_v53, %s9971_s18 }
 0x3a7   : >> { %9140 = vrot.lane.b32.xlu0 %v11150_v21, %s9971_s18 }
 0x3a9   : >> { %9155 = vrot.lane.b32.xlu1 %v9129_v32, %s9973_s15 }
 0x3ab   : >> { %9150 = vrot.lane.b32.xlu0 %v9149_v3, %s9971_s18  ;;  %s13120_s18 = smov (%p1928_p1), 127  }
 0x3ad   : >> { %9160 = vrot.lane.b32.xlu1 %v9124_v9, %s9973_s15 }
 0x3af   : >> { %9165 = vrot.lane.b32.xlu0 %v11150_v21, %s9973_s15 }
 0x3b1   : >> { %9170 = vrot.lane.b32.xlu1 %v11166_v53, %s9973_s15 }
 0x3b3   : >> { %9175 = vrot.lane.b32.xlu0 %v9134_v49, %s9973_s15 }
 0x3b5   : >> { %9185 = vrot.lane.b32.xlu1 %v9129_v32, %s9974_s22 }
 0x3b7   : >> { %9180 = vrot.lane.b32.xlu0 %v9149_v3, %s9973_s15  ;;  %s13122_s15 = smov (%p1928_p1), 110  }
 0x3b9   : >> { %9190 = vrot.lane.b32.xlu1 %v9124_v9, %s9974_s22 }
 0x3bb   : >> { %9195 = vrot.lane.b32.xlu0 %v9134_v49, %s9974_s22 }
 0x3bd   : >> { %9205 = vrot.lane.b32.xlu1 %v11166_v53, %s9974_s22 }
 0x3bf   : >> { %9200 = vrot.lane.b32.xlu0 %v11150_v21, %s9974_s22 }
 0x3c1   : >> { %9215 = vrot.lane.b32.xlu1 %v9129_v32, %s9975_s20 }
 0x3c3   : >> { %9210 = vrot.lane.b32.xlu0 %v9149_v3, %s9974_s22 }
 0x3c5   : >> { %9220 = vrot.lane.b32.xlu1 %v9124_v9, %s9975_s20 }
 0x3c7   : >> { %9225 = vrot.lane.b32.xlu0 %v11150_v21, %s9975_s20 }
 0x3c9   : >> { %9230 = vrot.lane.b32.xlu1 %v11166_v53, %s9975_s20 }
 0x3cb   : >> { %9235 = vrot.lane.b32.xlu0 %v9134_v49, %s9975_s20 }
 0x3cd   : >> { %9245 = vrot.lane.b32.xlu1 %v9129_v32, %s9976_s13 }
 0x3cf   : >> { %9240 = vrot.lane.b32.xlu0 %v9149_v3, %s9975_s20 }
 0x3d1   : >> { %9250 = vrot.lane.b32.xlu1 %v9124_v9, %s9976_s13 }
 0x3d3   : >> { %9255 = vrot.lane.b32.xlu0 %v11150_v21, %s9976_s13 }
 0x3d5   : >> { %9260 = vrot.lane.b32.xlu1 %v11166_v53, %s9976_s13 }
 0x3d7   : >> { %9265 = vrot.lane.b32.xlu0 %v9134_v49, %s9976_s13 }
 0x3d9   : >> { %9280 = vrot.lane.b32.xlu1 %v9129_v32, %s9977_s30 }
 0x3db   : >> { %9270 = vrot.lane.b32.xlu0 %v9149_v3, %s9976_s13 }
 0x3dd   : >> { %9290 = vrot.lane.b32.xlu1 %v9134_v49, %s9977_s30 }
 0x3df   : >> { %9275 = vrot.lane.b32.xlu0 %v9124_v9, %s9977_s30 }
 0x3e1   : >> { %9295 = vrot.lane.b32.xlu1 %v9149_v3, %s9977_s30 }
 0x3e3   : >> { %9285 = vrot.lane.b32.xlu0 %v11166_v53, %s9977_s30 }
 0x3e5   : >> { %9305 = vrot.lane.b32.xlu1 %v9129_v32, %s9978_s29 }
 0x3e7   : >> { %9300 = vrot.lane.b32.xlu0 %v11150_v21, %s9977_s30  ;;  %s13118_s30 = smov (%p1928_p1), 17  }
 0x3e9   : >> { %9310 = vrot.lane.b32.xlu1 %v9124_v9, %s9978_s29 }
 0x3eb   : >> { %9315 = vrot.lane.b32.xlu0 %v11150_v21, %s9978_s29 }
 0x3ed   : >> { %9320 = vrot.lane.b32.xlu1 %v11166_v53, %s9978_s29 }
 0x3ef   : >> { %9325 = vrot.lane.b32.xlu0 %v9134_v49, %s9978_s29 }
 0x3f1   : >> { %9340 = vrot.lane.b32.xlu1 %v9129_v32, %s9979_s28 }
 0x3f3   : >> { %9330 = vrot.lane.b32.xlu0 %v9149_v3, %s9978_s29  ;;  %s13117_s29 = smov (%p1928_p1), 19  }
 0x3f5   : >> { %9350 = vrot.lane.b32.xlu1 %v9134_v49, %s9979_s28 }
 0x3f7   : >> { %9335 = vrot.lane.b32.xlu0 %v9124_v9, %s9979_s28 }
 0x3f9   : >> { %9355 = vrot.lane.b32.xlu1 %v9149_v3, %s9979_s28 }
 0x3fb   : >> { %9345 = vrot.lane.b32.xlu0 %v11166_v53, %s9979_s28 }
 0x3fd   : >> { %5067 = vperm.xlu1 %9123, %v3573_v20  }
 0x3ff   : >> { %9360 = vrot.lane.b32.xlu0 %v11150_v21, %s9979_s28 }
 0x401   : >> { %5077 = vperm.xlu1 %9123, %v3575_v1  }
 0x403   : >> { %5072 = vperm.xlu0 %9122, %v3574_v5  }
 0x407   : >> { %5082 = vperm.xlu0 %9122, %v3576_v24  }
 0x40f   : >> { %v9126_v23 = vpop.permute.xlu1 %9125 }
 0x410   : >> { %v9128_v40 = vunpack.i.h.bf16 %v9126_v23  ;;  %v9127_v36 = vunpack.i.l.bf16 %v9126_v23 }
 0x413   : >> { %v9131_v25 = vpop.permute.xlu1 %9130 }
 0x414   : >> { %v9133_v27 = vunpack.i.h.bf16 %v9131_v25  ;;  %v9132_v47 = vunpack.i.l.bf16 %v9131_v25 }
 0x415   : >> { %v9136_v60 = vpop.permute.xlu0 %9135 }
 0x416   : >> { %v3654_v56 = vsel %vm498_vm2, %v9128_v40, %v9133_v27  ;;  %v3653_v14 = vsel %vm498_vm2, %v9127_v36, %v9132_v47  ;;  %v9138_v30 = vunpack.i.h.bf16 %v9136_v60  ;;  %v9137_v37 = vunpack.i.l.bf16 %v9136_v60 }
 0x417   : >> { %v9146_v43 = vpop.permute.xlu1 %9145  ;;  %v3658_v59 = vpack.c.bf16 %v3654_v56, %v3653_v14 }
 0x418   : >> { %v3646_v28 = vsel %vm498_vm2, %v9138_v30, %v9128_v40  ;;  %v3645_v12 = vsel %vm498_vm2, %v9137_v37, %v9127_v36  ;;  %v3649_v29 = vsel %vm498_vm2, %v9132_v47, %v9137_v37  ;;  %v3650_v26 = vsel %vm498_vm2, %v9133_v27, %v9138_v30 }
 0x419   : >> { %v9141_v41 = vpop.permute.xlu0 %9140  ;;  %v3659_v55 = vpack.c.bf16 %v3650_v26, %v3649_v29  ;;  %v3660_v31 = vpack.c.bf16 %v3646_v28, %v3645_v12  ;;  %v9148_v61 = vunpack.i.h.bf16 %v9146_v43  ;;  %v9147_v46 = vunpack.i.l.bf16 %v9146_v43 }
 0x41a   : >> { %v9143_v38 = vunpack.i.h.bf16 %v9141_v41  ;;  %v9142_v6 = vunpack.i.l.bf16 %v9141_v41  ;;  %v13069_v27 = vmov 0  }
 0x41b   : >> { %3689 = vmatprep.subr.bf16.mxu1 %v3659_v55  ;;  %8554 = vmatprep.subr.bf16.mxu0 %v3660_v31  ;;  %v9156_v21 = vpop.permute.xlu1 %9155 }
 0x41c   : >> { %v3648_v0 = vsel %vm498_vm2, %v9143_v38, %v9148_v61  ;;  %v3647_v16 = vsel %vm498_vm2, %v9142_v6, %v9147_v46  ;;  %3690 = vmatpush1.bf16.msra.mxu1 %v3658_v59  ;;  %8555 = vmatpush3.bf16.msra.mxu0 %v3660_v31  ;;  %v9157_v11 = vunpack.i.l.bf16 %v9156_v21  ;;  %v9158_v3 = vunpack.i.h.bf16 %v9156_v21 }
 0x41d   : >> { %v9151_v33 = vpop.permute.xlu0 %9150  ;;  %v3656_v7 = vpack.c.bf16 %v3648_v0, %v3647_v16  ;;  %v9384_v0 = vld [vmem:[%s10686_s16] sm:$0xff]  }
 0x41e   : >> { %v9153_v13 = vunpack.i.h.bf16 %v9151_v33  ;;  %v9152_v63 = vunpack.i.l.bf16 %v9151_v33 }
 0x41f   : >> { %v9161_v58 = vpop.permute.xlu1 %9160  ;;  %3691 = vmatprep.subr.bf16.mxu1 %v3656_v7 }
 0x420   : >> { %v3644_v35 = vsel %vm498_vm2, %v9148_v61, %v9153_v13  ;;  %v3643_v52 = vsel %vm498_vm2, %v9147_v46, %v9152_v63  ;;  %v3651_v62 = vsel %vm498_vm2, %v9152_v63, %v9142_v6  ;;  %v3652_v53 = vsel %vm498_vm2, %v9153_v13, %v9143_v38 }
 0x421   : >> { %v3655_v51 = vpack.c.bf16 %v3652_v53, %v3651_v62  ;;  %v9166_v8 = vpop.permute.xlu0 %9165  ;;  %v3657_v48 = vpack.c.bf16 %v3644_v35, %v3643_v52  ;;  %v9162_v9 = vunpack.i.l.bf16 %v9161_v58  ;;  %v9163_v34 = vunpack.i.h.bf16 %v9161_v58 }
 0x422   : >> { %v9168_v45 = vunpack.i.h.bf16 %v9166_v8  ;;  %v9167_v49 = vunpack.i.l.bf16 %v9166_v8 }
 0x423   : >> { %v9171_v19 = vpop.permute.xlu1 %9170  ;;  %3692 = vmatpush1.bf16.msra.mxu1 %v3655_v51  ;;  %8556 = vmatprep.subr.bf16.mxu0 %v3657_v48  ;;  %v3611_v1 = vsel %vm485_vm3, %v9162_v9, %v9157_v11  ;;  %v3612_v23 = vsel %vm485_vm3, %v9163_v34, %v9158_v3 }
 0x424   : >> { %v9173_v2 = vunpack.i.h.bf16 %v9171_v19  ;;  %v9172_v32 = vunpack.i.l.bf16 %v9171_v19  ;;  %8557 = vmatpush3.bf16.msra.mxu0 %v3657_v48  ;;  %v3616_v43 = vpack.c.bf16 %v3612_v23, %v3611_v1 }
 0x425   : >> { %v9176_v20 = vpop.permute.xlu0 %9175 }
 0x426   : >> { %v9178_v5 = vunpack.i.h.bf16 %v9176_v20  ;;  %v9177_v24 = vunpack.i.l.bf16 %v9176_v20  ;;  %8102 = vmatmul.mubr.msk.bf16.vlgmr.msra.gmra.mxu1 %vm2083_vm1, %v11191_v57  ;;  %v3605_v25 = vsel %vm485_vm3, %v9167_v49, %v9172_v32  ;;  %v3606_v40 = vsel %vm485_vm3, %v9168_v45, %v9173_v2 }
 0x427   : >> { %v9186_v36 = vpop.permute.xlu1 %9185  ;;  %8559 = vmatmul.mubr.msk.bf16.vlgmr.msra.gmra.mxu0 %vm2083_vm1, %v9383_v10  ;;  %3719 = vmatprep.mubr.bf16.mxu1 %v13069_v27  ;;  %v3614_v26 = vpack.c.bf16 %v3606_v40, %v3605_v25 }
 0x428   : >> { %v3604_v47 = vsel %vm485_vm3, %v9178_v5, %v9163_v34  ;;  %v3608_v57 = vsel %vm485_vm3, %v9158_v3, %v9178_v5  ;;  %v3603_v60 = vsel %vm485_vm3, %v9177_v24, %v9162_v9  ;;  %v3607_v56 = vsel %vm485_vm3, %v9157_v11, %v9177_v24  ;;  %3827 = vmatprep.mubr.bf16.mxu0 %v13069_v27 }
 0x429   : >> { %v9181_v14 = vpop.permute.xlu0 %9180  ;;  %v3617_v30 = vpack.c.bf16 %v3608_v57, %v3607_v56  ;;  %v3618_v37 = vpack.c.bf16 %v3604_v47, %v3603_v60  ;;  %v9188_v16 = vunpack.i.h.bf16 %v9186_v36  ;;  %v9187_v33 = vunpack.i.l.bf16 %v9186_v36 }
 0x42a   : >> { %v9183_v28 = vunpack.i.h.bf16 %v9181_v14  ;;  %v9182_v12 = vunpack.i.l.bf16 %v9181_v14  ;;  %v9386_v14 = vld [vmem:[%s10686_s16 + $0x20] sm:$0xff]  }
 0x42b   : >> { %v9191_v29 = vpop.permute.xlu1 %9190  ;;  %3807 = vmatprep.subr.bf16.mxu0 %v3617_v30  ;;  %8562 = vmatprep.subr.bf16.mxu1 %v3618_v37 }
 0x42c   : >> { %v3602_v59 = vsel %vm485_vm3, %v9173_v2, %v9183_v28  ;;  %v3601_v41 = vsel %vm485_vm3, %v9172_v32, %v9182_v12  ;;  %v3609_v55 = vsel %vm485_vm3, %v9182_v12, %v9167_v49  ;;  %v3610_v31 = vsel %vm485_vm3, %v9183_v28, %v9168_v45  ;;  %3808 = vmatpush1.bf16.msra.mxu0 %v3616_v43  ;;  %v9385_v2 = vld [vmem:[%s10686_s16 + $0x8] sm:$0xff]  }
 0x42d   : >> { %v3613_v61 = vpack.c.bf16 %v3610_v31, %v3609_v55  ;;  %v9193_v46 = vunpack.i.h.bf16 %v9191_v29  ;;  %v9192_v38 = vunpack.i.l.bf16 %v9191_v29  ;;  %8563 = vmatpush3.bf16.msra.mxu1 %v3618_v37  ;;  %v9196_v6 = vpop.permute.xlu0 %9195  ;;  %3809 = vmatprep.subr.bf16.mxu0 %v3614_v26  ;;  %v3615_v21 = vpack.c.bf16 %v3602_v59, %v3601_v41 }
 0x42e   : >> { %v9198_v7 = vunpack.i.h.bf16 %v9196_v6  ;;  %v9197_v13 = vunpack.i.l.bf16 %v9196_v6  ;;  %8103 = vmatmul.mubr.msk.bf16.gmra.mxu1 %vm2083_vm1, %v9383_v10 }
 0x42f   : >> { %v9206_v63 = vpop.permute.xlu1 %9205  ;;  %8564 = vmatprep.subr.bf16.mxu1 %v3615_v21  ;;  %8566 = vmatprep.mubr.msk.bf16.mxu1 %vm2083_vm1, %v9384_v0  ;;  %v3931_v58 = vsel %vm770_vm5, %v9192_v38, %v9187_v33  ;;  %v3932_v53 = vsel %vm770_vm5, %v9193_v46, %v9188_v16 }
 0x430   : >> { %v3924_v35 = vsel %vm770_vm5, %v9198_v7, %v9193_v46  ;;  %v3928_v52 = vsel %vm770_vm5, %v9188_v16, %v9198_v7  ;;  %v3923_v62 = vsel %vm770_vm5, %v9197_v13, %v9192_v38  ;;  %3810 = vmatpush1.bf16.msra.mxu0 %v3613_v61  ;;  %v3927_v51 = vsel %vm770_vm5, %v9187_v33, %v9197_v13  ;;  %v9387_v16 = vld [vmem:[%s10686_s16 + $0x28] sm:$0xff]  }
 0x431   : >> { %v9208_v8 = vunpack.i.h.bf16 %v9206_v63  ;;  %8565 = vmatpush3.bf16.msra.mxu1 %v3615_v21  ;;  %v9201_v48 = vpop.permute.xlu0 %9200  ;;  %v3938_v9 = vpack.c.bf16 %v3924_v35, %v3923_v62  ;;  %v9207_v34 = vunpack.i.l.bf16 %v9206_v63  ;;  %v3937_v11 = vpack.c.bf16 %v3928_v52, %v3927_v51 }
 0x432   : >> { %v9203_v19 = vunpack.i.h.bf16 %v9201_v48  ;;  %v9202_v10 = vunpack.i.l.bf16 %v9201_v48  ;;  %v3936_v49 = vpack.c.bf16 %v3932_v53, %v3931_v58 }
 0x433   : >> { %v9216_v32 = vpop.permute.xlu1 %9215  ;;  %8108 = vmatmul.mubr.msk.bf16.vlgmr.msra.gmra.mxu0 %vm2083_vm1, %v9384_v0  ;;  %8570 = vmatprep.subr.bf16.mxu0 %v3938_v9 }
 0x434   : >> { %v3926_v3 = vsel %vm770_vm5, %v9203_v19, %v9208_v8  ;;  %v3925_v45 = vsel %vm770_vm5, %v9202_v10, %v9207_v34  ;;  %3967 = vmatprep.subr.bf16.mxu1 %v3937_v11  ;;  %8571 = vmatpush3.bf16.msra.mxu0 %v3938_v9  ;;  %v9218_v29 = vunpack.i.h.bf16 %v9216_v32  ;;  %v9217_v26 = vunpack.i.l.bf16 %v9216_v32 }
 0x435   : >> { %v9211_v20 = vpop.permute.xlu0 %9210  ;;  %v3934_v1 = vpack.c.bf16 %v3926_v3, %v3925_v45  ;;  %3837 = vmatprep.mubr.bf16.mxu0 %v13069_v27  ;;  %v13070_v3 = vmov 0  ;;  %v9388_v45 = vld [vmem:[%s10686_s16 + $0x30] sm:$0xff]  }
 0x436   : >> { %v9213_v5 = vunpack.i.h.bf16 %v9211_v20  ;;  %v9212_v24 = vunpack.i.l.bf16 %v9211_v20  ;;  %8567 = vmatmul.mubr.msk.bf16.vlgmr.msra.gmra.mxu1 %vm2083_vm1, %v9385_v2  ;;  %v13071_v3 = vsel %vm11382_vm4, 4294967295, %v13070_v3  ;;  %v13073_v20 = vmov 0 }
 0x437   : >> { %3968 = vmatpush1.bf16.msra.mxu1 %v3936_v49  ;;  %v9221_v23 = vpop.permute.xlu1 %9220  ;;  %3987 = vmatprep.mubr.bf16.mxu1 %v13069_v27  ;;  %13072 = vst [vmem:[#allocation7_spill] sm:$0xff] %v13071_v3  ;;  %v13074_v20 = vsel %vm11392_vm11, 4294967295, %v13073_v20 }
 0x438   : >> { %v3922_v25 = vsel %vm770_vm5, %v9208_v8, %v9213_v5  ;;  %v3921_v40 = vsel %vm770_vm5, %v9207_v34, %v9212_v24  ;;  %v3929_v36 = vsel %vm770_vm5, %v9212_v24, %v9202_v10  ;;  %v3930_v47 = vsel %vm770_vm5, %v9213_v5, %v9203_v19  ;;  %3969 = vmatprep.subr.bf16.mxu1 %v3934_v1 }
 0x439   : >> { %v3933_v57 = vpack.c.bf16 %v3930_v47, %v3929_v36  ;;  %v9226_v60 = vpop.permute.xlu0 %9225  ;;  %v3935_v56 = vpack.c.bf16 %v3922_v25, %v3921_v40  ;;  %v9223_v30 = vunpack.i.h.bf16 %v9221_v23  ;;  %v9222_v37 = vunpack.i.l.bf16 %v9221_v23  ;;  %13075 = vst [vmem:[#allocation8_spill] sm:$0xff] %v13074_v20  ;;  %v9389_v23 = vld [vmem:[%s10686_s16 + $0x38] sm:$0xff]  }
 0x43a   : >> { %v9228_v59 = vunpack.i.h.bf16 %v9226_v60  ;;  %v9227_v41 = vunpack.i.l.bf16 %v9226_v60  ;;  %v13076_v47 = vmov 0 }
 0x43b   : >> { %v9231_v43 = vpop.permute.xlu1 %9230  ;;  %8109 = vmatmul.mubr.msk.bf16.gmra.mxu0 %vm2083_vm1, %v9385_v2  ;;  %3970 = vmatpush1.bf16.msra.mxu1 %v3933_v57  ;;  %v4103_v46 = vsel %vm922_vm6, %v9222_v37, %v9217_v26  ;;  %v4104_v38 = vsel %vm922_vm6, %v9223_v30, %v9218_v29  ;;  %v13077_v47 = vsel %vm11411_vm15, 4294967295, %v13076_v47 }
 0x43c   : >> { %v9233_v28 = vunpack.i.h.bf16 %v9231_v43  ;;  %v9232_v12 = vunpack.i.l.bf16 %v9231_v43  ;;  %8572 = vmatprep.subr.bf16.mxu0 %v3935_v56  ;;  %8574 = vmatprep.mubr.msk.bf16.mxu0 %vm2083_vm1, %v9386_v14  ;;  %v4108_v51 = vpack.c.bf16 %v4104_v38, %v4103_v46  ;;  %13078 = vst [vmem:[#allocation9_spill] sm:$0xff] %v13077_v47 }
 0x43d   : >> { %8573 = vmatpush3.bf16.msra.mxu0 %v3935_v56  ;;  %v9236_v55 = vpop.permute.xlu0 %9235 }
 0x43e   : >> { %v9238_v31 = vunpack.i.h.bf16 %v9236_v55  ;;  %v9237_v61 = vunpack.i.l.bf16 %v9236_v55  ;;  %8114 = vmatmul.mubr.msk.bf16.vlgmr.msra.gmra.mxu1 %vm2083_vm1, %v9386_v14  ;;  %v4097_v6 = vsel %vm922_vm6, %v9227_v41, %v9232_v12  ;;  %v4098_v21 = vsel %vm922_vm6, %v9228_v59, %v9233_v28 }
 0x43f   : >> { %v11355_v0 = vpop.permute.xlu1 %9245  ;;  %3997 = vmatprep.mubr.bf16.mxu1 %v13069_v27  ;;  %v4106_v48 = vpack.c.bf16 %v4098_v21, %v4097_v6 }
 0x440   : >> { %v4096_v33 = vsel %vm922_vm6, %v9238_v31, %v9223_v30  ;;  %v4100_v7 = vsel %vm922_vm6, %v9218_v29, %v9238_v31  ;;  %v4095_v13 = vsel %vm922_vm6, %v9237_v61, %v9222_v37  ;;  %v4099_v63 = vsel %vm922_vm6, %v9217_v26, %v9237_v61 }
 0x441   : >> { %v9241_v58 = vpop.permute.xlu0 %9240  ;;  %v4109_v35 = vpack.c.bf16 %v4100_v7, %v4099_v63  ;;  %v4110_v52 = vpack.c.bf16 %v4096_v33, %v4095_v13  ;;  %v9248_v56 = vunpack.i.h.bf16 %v11355_v0  ;;  %v9247_v14 = vunpack.i.l.bf16 %v11355_v0 }
 0x442   : >> { %v9243_v62 = vunpack.i.h.bf16 %v9241_v58  ;;  %v9242_v53 = vunpack.i.l.bf16 %v9241_v58  ;;  %v9391_v58 = vld [vmem:[%s10686_s16 + $0x48] sm:$0xff]  }
 0x443   : >> { %v9251_v8 = vpop.permute.xlu1 %9250  ;;  %8575 = vmatmul.mubr.msk.bf16.vlgmr.msra.gmra.mxu0 %vm2083_vm1, %v9387_v16  ;;  %4139 = vmatprep.subr.bf16.mxu0 %v4109_v35 }
 0x444   : >> { %v4094_v9 = vsel %vm922_vm6, %v9233_v28, %v9243_v62  ;;  %v4093_v34 = vsel %vm922_vm6, %v9232_v12, %v9242_v53  ;;  %v4101_v19 = vsel %vm922_vm6, %v9242_v53, %v9227_v41  ;;  %v4102_v10 = vsel %vm922_vm6, %v9243_v62, %v9228_v59  ;;  %8578 = vmatprep.subr.bf16.mxu1 %v4110_v52  ;;  %v9390_v59 = vld [vmem:[%s10686_s16 + $0x40] sm:$0xff]  }
 0x445   : >> { %v4105_v11 = vpack.c.bf16 %v4102_v10, %v4101_v19  ;;  %4140 = vmatpush1.bf16.msra.mxu0 %v4108_v51  ;;  %8579 = vmatpush3.bf16.msra.mxu1 %v4110_v52  ;;  %v11376_v2 = vpop.permute.xlu0 %9255  ;;  %v4107_v32 = vpack.c.bf16 %v4094_v9, %v4093_v34  ;;  %v9253_v25 = vunpack.i.h.bf16 %v9251_v8  ;;  %v9252_v40 = vunpack.i.l.bf16 %v9251_v8 }
 0x446   : >> { %4141 = vmatprep.subr.bf16.mxu0 %v4106_v48  ;;  %8115 = vmatmul.mubr.msk.bf16.gmra.mxu1 %vm2083_vm1, %v9387_v16  ;;  %v9258_v29 = vunpack.i.h.bf16 %v11376_v2  ;;  %v9257_v26 = vunpack.i.l.bf16 %v11376_v2 }
 0x447   : >> { %v11387_v49 = vpop.permute.xlu1 %9260  ;;  %8580 = vmatprep.subr.bf16.mxu1 %v4107_v32  ;;  %4159 = vmatprep.mubr.bf16.mxu0 %v13069_v27  ;;  %v4411_v43 = vsel %vm1216_vm7, %v9252_v40, %v9247_v14  ;;  %v4412_v28 = vsel %vm1216_vm7, %v9253_v25, %v9248_v56 }
 0x448   : >> { %8582 = vmatprep.mubr.msk.bf16.mxu1 %vm2083_vm1, %v9388_v45  ;;  %v4418_v31 = vpack.c.bf16 %v4412_v28, %v4411_v43  ;;  %v9262_v0 = vunpack.i.l.bf16 %v11387_v49 }
 0x449   : >> { %4142 = vmatpush1.bf16.msra.mxu0 %v4105_v11  ;;  %8581 = vmatpush3.bf16.msra.mxu1 %v4107_v32  ;;  %v9266_v1 = vpop.permute.xlu0 %9265 }
 0x44a   : >> { %v9268_v5 = vunpack.i.h.bf16 %v9266_v1  ;;  %v9267_v24 = vunpack.i.l.bf16 %v9266_v1  ;;  %8128 = vmatprep.subr.msk.bf16.mxu1 %vm11382_vm4, %v11182_v42  ;;  %8586 = vmatprep.subr.msk.bf16.mxu0 %vm11392_vm11, %v11164_v54  ;;  %v4405_v8 = vsel %vm1216_vm7, %v9257_v26, %v9262_v0 }
 0x44b   : >> { %v11405_v36 = vpop.permute.xlu1 %9280 }
 0x44c   : >> { %8120 = vmatmul.mubr.msk.bf16.vlgmr.msra.gmra.mxu0 %vm2083_vm1, %v9388_v45  ;;  %v4404_v42 = vsel %vm1216_vm7, %v9268_v5, %v9253_v25  ;;  %v4403_v57 = vsel %vm1216_vm7, %v9267_v24, %v9252_v40  ;;  %v4408_v33 = vsel %vm1216_vm7, %v9248_v56, %v9268_v5  ;;  %v4407_v7 = vsel %vm1216_vm7, %v9247_v14, %v9267_v24  ;;  %v9392_v24 = vld [vmem:[%s10686_s16 + $0x50] sm:$0xff]  }
 0x44d   : >> { %8587 = vmatpush3.bf16.msk.msra.mxu0 %vm11392_vm11, %v11164_v54  ;;  %v9271_v60 = vpop.permute.xlu0 %9270  ;;  %4169 = vmatprep.mubr.bf16.mxu0 %v13069_v27  ;;  %v4417_v12 = vpack.c.bf16 %v4404_v42, %v4403_v57  ;;  %v9283_v53 = vunpack.i.h.bf16 %v11405_v36  ;;  %v9282_v51 = vunpack.i.l.bf16 %v11405_v36  ;;  %v4416_v48 = vpack.c.bf16 %v4408_v33, %v4407_v7 }
 0x44e   : >> { %8588 = vmatprep.subr.msk.bf16.mxu0 %vm11392_vm11, %v11173_v50  ;;  %8583 = vmatmul.mubr.msk.bf16.vlgmr.msra.gmra.mxu1 %vm2083_vm1, %v9389_v23  ;;  %v9273_v30 = vunpack.i.h.bf16 %v9271_v60  ;;  %v9272_v37 = vunpack.i.l.bf16 %v9271_v60 }
 0x44f   : >> { %8131 = vmatpush1.bf16.msk.msra.mxu1 %vm11411_vm15, %v11178_v17  ;;  %v11432_v54 = vpop.permute.xlu1 %9290  ;;  %4295 = vmatprep.mubr.bf16.mxu1 %v13069_v27 }
 0x450   : >> { %8134 = vmatprep.subr.msk.bf16.mxu1 %vm11382_vm4, %v11154_v39  ;;  %v4409_v41 = vsel %vm1216_vm7, %v9272_v37, %v9257_v26  ;;  %v4410_v55 = vsel %vm1216_vm7, %v9273_v30, %v9258_v29  ;;  %v9293_v38 = vunpack.i.h.bf16 %v11432_v54  ;;  %v9292_v6 = vunpack.i.l.bf16 %v11432_v54  ;;  %v9393_v26 = vld [vmem:[%s10686_s16 + $0x58] sm:$0xff]  }
 0x451   : >> { %8589 = vmatpush3.bf16.msk.msra.mxu0 %vm11392_vm11, %v11173_v50  ;;  %v9276_v17 = vpop.permute.xlu0 %9275  ;;  %v4415_v21 = vpack.c.bf16 %v4410_v55, %v4409_v41  ;;  %v4401_v52 = vsel %vm1216_vm7, %v9262_v0, %v9272_v37 }
 0x452   : >> { %4447 = vmatprep.subr.bf16.mxu0 %v4417_v12  ;;  %v9278_v61 = vunpack.i.h.bf16 %v9276_v17  ;;  %v9277_v46 = vunpack.i.l.bf16 %v9276_v17  ;;  %v4579_v42 = vsel %vm13004_vm8, %v9282_v51, %v9292_v6  ;;  %v4580_v57 = vsel %vm13004_vm8, %v9283_v53, %v9293_v38 }
 0x453   : >> { %8137 = vmatpush1.bf16.msk.msra.mxu1 %vm11411_vm15, %v11146_v18  ;;  %v9296_v39 = vpop.permute.xlu1 %9295  ;;  %v9263_v18 = vunpack.i.h.bf16 %v11387_v49  ;;  %v4588_v55 = vpack.c.bf16 %v4580_v57, %v4579_v42 }
 0x454   : >> { %8121 = vmatmul.mubr.msk.bf16.gmra.mxu0 %vm2083_vm1, %v9389_v23  ;;  %8594 = vmatprep.subr.bf16.mxu1 %v4418_v31  ;;  %v4576_v13 = vsel %vm13004_vm8, %v9293_v38, %v9278_v61  ;;  %v4575_v63 = vsel %vm13004_vm8, %v9292_v6, %v9277_v46  ;;  %v4584_v10 = vsel %vm13004_vm8, %v9278_v61, %v9283_v53  ;;  %v9298_v25 = vunpack.i.h.bf16 %v9296_v39 }
 0x455   : >> { %v11456_v50 = vpop.permute.xlu0 %9285  ;;  %8590 = vmatprep.mubr.msk.bf16.mxu0 %vm2083_vm1, %v9390_v59  ;;  %v4402_v35 = vsel %vm1216_vm7, %v9263_v18, %v9273_v30  ;;  %v4589_v34 = vpack.c.bf16 %v4576_v13, %v4575_v63  ;;  %v4406_v19 = vsel %vm1216_vm7, %v9258_v29, %v9263_v18  ;;  %v4583_v11 = vsel %vm13004_vm8, %v9277_v46, %v9282_v51 }
 0x456   : >> { %8138 = vmatmul.mubr.msk.bf16.vlgmr.msra.gmra.mxu1 %vm2083_vm1, %v9390_v59  ;;  %v4414_v2 = vpack.c.bf16 %v4402_v35, %v4401_v52  ;;  %v9288_v32 = vunpack.i.h.bf16 %v11456_v50  ;;  %v9287_v45 = vunpack.i.l.bf16 %v11456_v50  ;;  %v4413_v23 = vpack.c.bf16 %v4406_v19, %v4405_v8  ;;  %v9394_v35 = vld [vmem:[%s10686_s16 + $0x60] sm:$0xff]  }
 0x457   : >> { %8595 = vmatpush3.bf16.msra.mxu1 %v4418_v31  ;;  %v11464_v16 = vpop.permute.xlu1 %9305  ;;  %4305 = vmatprep.mubr.bf16.mxu1 %v13069_v27  ;;  %v9297_v40 = vunpack.i.l.bf16 %v9296_v39  ;;  %v4590_v60 = vpack.c.bf16 %v4584_v10, %v4583_v11 }
 0x458   : >> { %8596 = vmatprep.subr.bf16.mxu1 %v4415_v21  ;;  %v4574_v56 = vsel %vm13004_vm8, %v9288_v32, %v9298_v25  ;;  %v9308_v39 = vunpack.i.h.bf16 %v11464_v16  ;;  %v9307_v50 = vunpack.i.l.bf16 %v11464_v16 }
 0x459   : >> { %v9301_v62 = vpop.permute.xlu0 %9300  ;;  %v4573_v14 = vsel %vm13004_vm8, %v9287_v45, %v9297_v40 }
 0x45a   : >> { %v9303_v49 = vunpack.i.h.bf16 %v9301_v62  ;;  %v9302_v1 = vunpack.i.l.bf16 %v9301_v62  ;;  %v4586_v46 = vpack.c.bf16 %v4574_v56, %v4573_v14 }
 0x45b   : >> { %8597 = vmatpush3.bf16.msra.mxu1 %v4415_v21  ;;  %v9311_v9 = vpop.permute.xlu1 %9310 }
 0x45c   : >> { %8591 = vmatmul.mubr.msk.bf16.vlgmr.msra.gmra.mxu0 %vm2083_vm1, %v9391_v58  ;;  %4619 = vmatprep.subr.bf16.mxu1 %v4589_v34  ;;  %v4582_v30 = vsel %vm13004_vm8, %v9298_v25, %v9303_v49  ;;  %v4581_v37 = vsel %vm13004_vm8, %v9297_v40, %v9302_v1  ;;  %v9313_v43 = vunpack.i.h.bf16 %v9311_v9  ;;  %v9312_v28 = vunpack.i.l.bf16 %v9311_v9 }
 0x45d   : >> { %4448 = vmatpush1.bf16.msra.mxu0 %v4416_v48  ;;  %v11493_v5 = vpop.permute.xlu0 %9315  ;;  %4467 = vmatprep.mubr.bf16.mxu0 %v13069_v27  ;;  %v4587_v41 = vpack.c.bf16 %v4582_v30, %v4581_v37  ;;  %v4577_v38 = vsel %vm13004_vm8, %v9302_v1, %v9287_v45  ;;  %v4578_v6 = vsel %vm13004_vm8, %v9303_v49, %v9288_v32 }
 0x45e   : >> { %4449 = vmatprep.subr.bf16.mxu0 %v4414_v2  ;;  %8139 = vmatmul.mubr.msk.bf16.gmra.mxu1 %vm2083_vm1, %v9391_v58  ;;  %v4755_v33 = vsel %vm13003_vm9, %v9312_v28, %v9307_v50  ;;  %v4756_v16 = vsel %vm13003_vm9, %v9313_v43, %v9308_v39  ;;  %v4585_v7 = vpack.c.bf16 %v4578_v6, %v4577_v38  ;;  %v9318_v13 = vunpack.i.h.bf16 %v11493_v5 }
 0x45f   : >> { %v11497_v36 = vpop.permute.xlu1 %9320  ;;  %8598 = vmatprep.mubr.msk.bf16.mxu1 %vm2083_vm1, %v9392_v24  ;;  %v9317_v63 = vunpack.i.l.bf16 %v11493_v5  ;;  %v4762_v51 = vpack.c.bf16 %v4756_v16, %v4755_v33  ;;  %v9395_v5 = vld [vmem:[%s10686_s16 + $0x68] sm:$0xff]  }
 0x460   : >> { %v9323_v9 = vunpack.i.h.bf16 %v11497_v36  ;;  %v9322_v19 = vunpack.i.l.bf16 %v11497_v36 }
 0x461   : >> { %4450 = vmatpush1.bf16.msra.mxu0 %v4413_v23  ;;  %v9326_v54 = vpop.permute.xlu0 %9325 }
 0x462   : >> { %8602 = vmatprep.subr.bf16.mxu0 %v4590_v60  ;;  %v9328_v12 = vunpack.i.h.bf16 %v9326_v54  ;;  %v9327_v29 = vunpack.i.l.bf16 %v9326_v54  ;;  %v4749_v25 = vsel %vm13003_vm9, %v9317_v63, %v9322_v19  ;;  %v4750_v40 = vsel %vm13003_vm9, %v9318_v13, %v9323_v9 }
 0x463   : >> { %v11520_v31 = vpop.permute.xlu1 %9340 }
 0x464   : >> { %v4748_v17 = vsel %vm13003_vm9, %v9328_v12, %v9313_v43  ;;  %v4747_v59 = vsel %vm13003_vm9, %v9327_v29, %v9312_v28  ;;  %8150 = vmatmul.mubr.msk.bf16.vlgmr.msra.gmra.mxu0 %vm2083_vm1, %v9392_v24  ;;  %v4752_v32 = vsel %vm13003_vm9, %v9308_v39, %v9328_v12  ;;  %v4751_v45 = vsel %vm13003_vm9, %v9307_v50, %v9327_v29  ;;  %v9396_v12 = vld [vmem:[%s10686_s16 + $0x70] sm:$0xff]   ;;  %v9397_v50 = vld [vmem:[%s10686_s16 + $0x78] sm:$0xff]  }
 0x465   : >> { %8603 = vmatpush3.bf16.msra.mxu0 %v4590_v60  ;;  %v9331_v61 = vpop.permute.xlu0 %9330  ;;  %4477 = vmatprep.mubr.bf16.mxu0 %v13069_v27  ;;  %v4761_v21 = vpack.c.bf16 %v4748_v17, %v4747_v59  ;;  %v4760_v42 = vpack.c.bf16 %v4752_v32, %v4751_v45  ;;  %v9343_v57 = vunpack.i.h.bf16 %v11520_v31  ;;  %v9342_v60 = vunpack.i.l.bf16 %v11520_v31 }
 0x466   : >> { %8604 = vmatprep.subr.bf16.mxu0 %v4587_v41  ;;  %8599 = vmatmul.mubr.msk.bf16.vlgmr.msra.gmra.mxu1 %vm2083_vm1, %v9393_v26  ;;  %v9333_v18 = vunpack.i.h.bf16 %v9331_v61  ;;  %v9332_v0 = vunpack.i.l.bf16 %v9331_v61  ;;  %v4757_v29 = vpack.c.bf16 %v4750_v40, %v4749_v25 }
 0x467   : >> { %4620 = vmatpush1.bf16.msra.mxu1 %v4588_v55  ;;  %4639 = vmatprep.mubr.bf16.mxu1 %v13069_v27  ;;  %v9351_v53 = vpop.permute.xlu1 %9350 }
 0x468   : >> { %4621 = vmatprep.subr.bf16.mxu1 %v4586_v46  ;;  %v4753_v52 = vsel %vm13003_vm9, %v9332_v0, %v9317_v63  ;;  %v4754_v62 = vsel %vm13003_vm9, %v9333_v18, %v9318_v13  ;;  %v9353_v10 = vunpack.i.h.bf16 %v9351_v53  ;;  %v9352_v11 = vunpack.i.l.bf16 %v9351_v53  ;;  %v9398_v13 = vld [vmem:[%s10686_s16 + $0x80] sm:$0xff]   ;;  %s13123_s16 = smov (%p1928_p1), 109  }
 0x469   : >> { %8605 = vmatpush3.bf16.msra.mxu0 %v4587_v41  ;;  %v9336_v58 = vpop.permute.xlu0 %9335  ;;  %v4759_v2 = vpack.c.bf16 %v4754_v62, %v4753_v52  ;;  %v4746_v24 = vsel %vm13003_vm9, %v9323_v9, %v9333_v18  ;;  %v4745_v23 = vsel %vm13003_vm9, %v9322_v19, %v9332_v0 }
 0x46a   : >> { %4791 = vmatprep.subr.bf16.mxu0 %v4761_v21  ;;  %v9338_v8 = vunpack.i.h.bf16 %v9336_v58  ;;  %v9337_v48 = vunpack.i.l.bf16 %v9336_v58  ;;  %v4758_v30 = vpack.c.bf16 %v4746_v24, %v4745_v23  ;;  %v4923_v61 = vsel %vm13002_vm10, %v9342_v60, %v9352_v11 }
 0x46b   : >> { %4622 = vmatpush1.bf16.msra.mxu1 %v4585_v7  ;;  %v9356_v14 = vpop.permute.xlu1 %9355  ;;  %v4924_v46 = vsel %vm13002_vm10, %v9343_v57, %v9353_v10 }
 0x46c   : >> { %8151 = vmatmul.mubr.msk.bf16.gmra.mxu0 %vm2083_vm1, %v9393_v26  ;;  %8610 = vmatprep.subr.bf16.mxu1 %v4762_v51  ;;  %v4920_v49 = vsel %vm13002_vm10, %v9353_v10, %v9338_v8  ;;  %v4919_v1 = vsel %vm13002_vm10, %v9352_v11, %v9337_v48  ;;  %v4928_v37 = vsel %vm13002_vm10, %v9338_v8, %v9343_v57  ;;  %v9358_v26 = vunpack.i.h.bf16 %v9356_v14 }
 0x46d   : >> { %v9346_v34 = vpop.permute.xlu0 %9345  ;;  %8606 = vmatprep.mubr.msk.bf16.mxu0 %vm2083_vm1, %v9394_v35  ;;  %v4933_v56 = vpack.c.bf16 %v4920_v49, %v4919_v1  ;;  %v4927_v54 = vsel %vm13002_vm10, %v9337_v48, %v9342_v60  ;;  %v9357_v17 = vunpack.i.l.bf16 %v9356_v14  ;;  %v4932_v18 = vpack.c.bf16 %v4924_v46, %v4923_v61 }
 0x46e   : >> { %8156 = vmatmul.mubr.msk.bf16.vlgmr.msra.gmra.mxu1 %vm2083_vm1, %v9394_v35  ;;  %v9348_v59 = vunpack.i.h.bf16 %v9346_v34  ;;  %v9347_v41 = vunpack.i.l.bf16 %v9346_v34  ;;  %v4934_v55 = vpack.c.bf16 %v4928_v37, %v4927_v54 }
 0x46f   : >> { %8611 = vmatpush3.bf16.msra.mxu1 %v4762_v51  ;;  %4649 = vmatprep.mubr.bf16.mxu1 %v13069_v27 }
 0x470   : >> { %8612 = vmatprep.subr.bf16.mxu1 %v4759_v2  ;;  %v4918_v38 = vsel %vm13002_vm10, %v9348_v59, %v9358_v26  ;;  %v4917_v6 = vsel %vm13002_vm10, %v9347_v41, %v9357_v17 }
 0x471   : >> { %v9361_v36 = vpop.permute.xlu0 %9360  ;;  %v4930_v16 = vpack.c.bf16 %v4918_v38, %v4917_v6 }
 0x472   : >> { %v9363_v43 = vunpack.i.h.bf16 %v9361_v36  ;;  %v9362_v28 = vunpack.i.l.bf16 %v9361_v36 }
 0x473   : >> { %8613 = vmatpush3.bf16.msra.mxu1 %v4759_v2 }
 0x474   : >> { %8607 = vmatmul.mubr.msk.bf16.vlgmr.msra.gmra.mxu0 %vm2083_vm1, %v9395_v5  ;;  %4963 = vmatprep.subr.bf16.mxu1 %v4933_v56  ;;  %v4926_v39 = vsel %vm13002_vm10, %v9358_v26, %v9363_v43  ;;  %v4925_v31 = vsel %vm13002_vm10, %v9357_v17, %v9362_v28  ;;  %v4921_v0 = vsel %vm13002_vm10, %v9362_v28, %v9347_v41 }
 0x475   : >> { %4792 = vmatpush1.bf16.msra.mxu0 %v4760_v42  ;;  %4811 = vmatprep.mubr.bf16.mxu0 %v13069_v27  ;;  %v4931_v21 = vpack.c.bf16 %v4926_v39, %v4925_v31  ;;  %v4922_v33 = vsel %vm13002_vm10, %v9363_v43, %v9348_v59 }
 0x476   : >> { %4793 = vmatprep.subr.bf16.mxu0 %v4758_v30  ;;  %8157 = vmatmul.mubr.msk.bf16.gmra.mxu1 %vm2083_vm1, %v9395_v5  ;;  %v4929_v7 = vpack.c.bf16 %v4922_v33, %v4921_v0 }
 0x477   : >> { %8614 = vmatprep.mubr.msk.bf16.mxu1 %vm2083_vm1, %v9396_v12 }
 0x479   : >> { %4794 = vmatpush1.bf16.msra.mxu0 %v4757_v29 }
 0x47a   : >> { %8618 = vmatprep.subr.bf16.mxu0 %v4934_v55 }
 0x47c   : >> { %8162 = vmatmul.mubr.msk.bf16.vlgmr.msra.gmra.mxu0 %vm2083_vm1, %v9396_v12 }
 0x47d   : >> { %8619 = vmatpush3.bf16.msra.mxu0 %v4934_v55  ;;  %4821 = vmatprep.mubr.bf16.mxu0 %v13069_v27 }
 0x47e   : >> { %8620 = vmatprep.subr.bf16.mxu0 %v4931_v21  ;;  %8615 = vmatmul.mubr.msk.bf16.vlgmr.msra.gmra.mxu1 %vm2083_vm1, %v9397_v50 }
 0x47f   : >> { %4964 = vmatpush1.bf16.msra.mxu1 %v4932_v18  ;;  %4983 = vmatprep.mubr.bf16.mxu1 %v13069_v27 }
 0x480   : >> { %4965 = vmatprep.subr.bf16.mxu1 %v4930_v16 }
 0x481   : >> { %8621 = vmatpush3.bf16.msra.mxu0 %v4931_v21 }
 0x483   : >> { %4966 = vmatpush1.bf16.msra.mxu1 %v4929_v7 }
 0x484   : >> { %8163 = vmatmul.mubr.msk.bf16.gmra.mxu0 %vm2083_vm1, %v9397_v50 }
 0x485   : >> { %8622 = vmatprep.mubr.msk.bf16.mxu0 %vm2083_vm1, %v9398_v13 }
 0x486   : >> { %8168 = vmatmul.mubr.msk.bf16.vlgmr.msra.gmra.mxu1 %vm2083_vm1, %v9398_v13 }
 0x487   : >> { %4993 = vmatprep.mubr.bf16.mxu1 %v13069_v27 }
 0x48c   : >> { %8623 = vmatmul.mubr.msk.bf16.vlgmr.msra.gmra.mxu0 %vm2083_vm1, %v9399_v15 }
 0x48e   : >> { %8169 = vmatmul.mubr.msk.bf16.gmra.mxu1 %vm2083_vm1, %v9399_v15 }
 0x4e6   : >> { %v3711_v63 = vpop.f32.mrf.mxu1 }
 0x4e7   : >> { %v8560_v58 = vpop.f32.mrf.mxu0 }
 0x4e8   : >> { %v3713_v35 = vpop.f32.mrf.mxu1 }
 0x4e9   : >> { %v3764_v52 = vpop.f32.mrf.mxu0 }
 0x4ea   : >> { %v3715_v62 = vpop.f32.mrf.mxu1 }
 0x4eb   : >> { %v8561_v51 = vpop.f32.mrf.mxu0 }
 0x4ec   : >> { %v3717_v53 = vpop.f32.mrf.mxu1 }
 0x4ed   : >> { %v3767_v9 = vpop.f32.mrf.mxu0 }
 0x4ee   : >> { %v3721_v8 = vpop.f32.mrf.mxu1 }
 0x4f0   : >> { %v3723_v48 = vpop.f32.mrf.mxu1 }
 0x4f2   : >> { %v3725_v34 = vpop.f32.mrf.mxu1 }
 0x4f3   : >> { %v3829_v19 = vpop.f32.mrf.mxu0 }
 0x4f4   : >> { %v11604_v10 = vadd.f32 %v3829_v19, %v3711_v63  ;;  %v3727_v27 = vpop.f32.mrf.mxu1 }
 0x4f5   : >> { %v3831_v11 = vpop.f32.mrf.mxu0 }
 0x4f6   : >> { %v11606_v2 = vadd.f32 %v3831_v11, %v3713_v35  ;;  %v8568_v32 = vpop.f32.mrf.mxu1 }
 0x4f7   : >> { %v11608_v45 = vadd.f32 %v8568_v32, %v8560_v58  ;;  %v3833_v49 = vpop.f32.mrf.mxu0 }
 0x4f8   : >> { %v11610_v1 = vadd.f32 %v3833_v49, %v3715_v62  ;;  %v3882_v5 = vpop.f32.mrf.mxu1 }
 0x4f9   : >> { %v11612_v24 = vadd.f32 %v3882_v5, %v3764_v52  ;;  %v3835_v23 = vpop.f32.mrf.mxu0 }
 0x4fa   : >> { %v11614_v25 = vadd.f32 %v3835_v23, %v3717_v53  ;;  %v8569_v40 = vpop.f32.mrf.mxu1 }
 0x4fb   : >> { %v11616_v36 = vadd.f32 %v8569_v40, %v8561_v51  ;;  %v3839_v42 = vpop.f32.mrf.mxu0 }
 0x4fc   : >> { %v11618_v57 = vadd.f32 %v3839_v42, %v3721_v8  ;;  %v3885_v60 = vpop.f32.mrf.mxu1 }
 0x4fd   : >> { %v11620_v56 = vadd.f32 %v3885_v60, %v3767_v9  ;;  %v3841_v14 = vpop.f32.mrf.mxu0 }
 0x4fe   : >> { %v11622_v30 = vadd.f32 %v3841_v14, %v3723_v48  ;;  %v3989_v37 = vpop.f32.mrf.mxu1 }
 0x4ff   : >> { %v3843_v54 = vpop.f32.mrf.mxu0 }
 0x500   : >> { %v11624_v43 = vadd.f32 %v3843_v54, %v3725_v34  ;;  %v3991_v28 = vpop.f32.mrf.mxu1 }
 0x501   : >> { %v3845_v12 = vpop.f32.mrf.mxu0 }
 0x502   : >> { %v11626_v29 = vadd.f32 %v3845_v12, %v3727_v27  ;;  %v3993_v26 = vpop.f32.mrf.mxu1 }
 0x503   : >> { %v8576_v17 = vpop.f32.mrf.mxu0 }
 0x504   : >> { %v3995_v59 = vpop.f32.mrf.mxu1 }
 0x505   : >> { %v4042_v41 = vpop.f32.mrf.mxu0 }
 0x506   : >> { %v3999_v55 = vpop.f32.mrf.mxu1 }
 0x507   : >> { %v8577_v39 = vpop.f32.mrf.mxu0 }
 0x508   : >> { %v4001_v31 = vpop.f32.mrf.mxu1 }
 0x509   : >> { %v4045_v61 = vpop.f32.mrf.mxu0 }
 0x50a   : >> { %v4003_v46 = vpop.f32.mrf.mxu1 }
 0x50c   : >> { %v4161_v50 = vpop.f32.mrf.mxu0  ;;  %v4005_v38 = vpop.f32.mrf.mxu1 }
 0x50e   : >> { %v4163_v6 = vpop.f32.mrf.mxu0  ;;  %v8584_v21 = vpop.f32.mrf.mxu1 }
 0x510   : >> { %v4165_v18 = vpop.f32.mrf.mxu0  ;;  %v4214_v0 = vpop.f32.mrf.mxu1 }
 0x512   : >> { %v11628_v33 = vpop.f32.mrf.mxu0  ;;  %v11630_v16 = vpop.f32.mrf.mxu1 }
 0x514   : >> { %v11632_v7 = vpop.f32.mrf.mxu0  ;;  %v11634_v13 = vpop.f32.mrf.mxu1 }
 0x516   : >> { %v11636_v15 = vpop.f32.mrf.mxu0  ;;  %v4297_v63 = vpop.f32.mrf.mxu1 }
 0x518   : >> { %v11638_v58 = vpop.f32.mrf.mxu0  ;;  %v11640_v35 = vpop.f32.mrf.mxu1 }
 0x51a   : >> { %v11642_v52 = vpop.f32.mrf.mxu0  ;;  %v11644_v62 = vpop.f32.mrf.mxu1 }
 0x51c   : >> { %v11646_v53 = vpop.f32.mrf.mxu0  ;;  %v11648_v51 = vpop.f32.mrf.mxu1 }
 0x51e   : >> { %v11650_v8 = vpop.f32.mrf.mxu0  ;;  %v11652_v48 = vpop.f32.mrf.mxu1 }
 0x520   : >> { %v11654_v9 = vpop.f32.mrf.mxu0  ;;  %v11656_v34 = vpop.f32.mrf.mxu1 }
 0x522   : >> { %v11658_v19 = vpop.f32.mrf.mxu0  ;;  %v11660_v27 = vpop.f32.mrf.mxu1 }
 0x524   : >> { %v4469_v11 = vpop.f32.mrf.mxu0  ;;  %v11662_v32 = vpop.f32.mrf.mxu1 }
 0x526   : >> { %v11664_v49 = vpop.f32.mrf.mxu0  ;;  %v11666_v5 = vpop.f32.mrf.mxu1 }
 0x528   : >> { %v11668_v23 = vpop.f32.mrf.mxu0  ;;  %v11670_v40 = vpop.f32.mrf.mxu1 }
 0x529   : >> { %13079 = vst [vmem:[#allocation27_spill] sm:$0xff] %v11670_v40 }
 0x52a   : >> { %v11672_v42 = vpop.f32.mrf.mxu0  ;;  %v11674_v60 = vpop.f32.mrf.mxu1 }
 0x52b   : >> { %13080 = vst [vmem:[#allocation28_spill] sm:$0xff] %v11672_v42  ;;  %13081 = vst [vmem:[#allocation29_spill] sm:$0xff] %v11674_v60 }
 0x52c   : >> { %v11676_v14 = vpop.f32.mrf.mxu0  ;;  %v11678_v54 = vpop.f32.mrf.mxu1 }
 0x52d   : >> { %13082 = vst [vmem:[#allocation30_spill] sm:$0xff] %v11676_v14  ;;  %13083 = vst [vmem:[#allocation31_spill] sm:$0xff] %v11678_v54 }
 0x52e   : >> { %v11680_v12 = vpop.f32.mrf.mxu0  ;;  %v4641_v47 = vpop.f32.mrf.mxu1 }
 0x52f   : >> { %13084 = vst [vmem:[#allocation32_spill] sm:$0xff] %v11680_v12 }
 0x530   : >> { %v11682_v3 = vpop.f32.mrf.mxu0  ;;  %v11684_v20 = vpop.f32.mrf.mxu1 }
 0x531   : >> { %13085 = vst [vmem:[#allocation33_spill] sm:$0xff] %v11682_v3  ;;  %13086 = vst [vmem:[#allocation34_spill] sm:$0xff] %v11684_v20  ;;  %v4057_v3 = vadd.f32 %v3989_v37, %v11604_v10  ;;  %v4064_v10 = vadd.f32 %v4001_v31, %v11622_v30 }
 0x532   : >> { %v11686_v44 = vpop.f32.mrf.mxu0  ;;  %v11688_v22 = vpop.f32.mrf.mxu1 }
 0x533   : >> { %13087 = vst [vmem:[#allocation35_spill] sm:$0xff] %v11686_v44  ;;  %v4058_v44 = vadd.f32 %v3991_v28, %v11606_v2  ;;  %v4066_v2 = vadd.f32 %v4003_v46, %v11624_v43  ;;  %v4236_v43 = vadd.f32 %v11636_v15, %v4064_v10 }
 0x534   : >> { %v11690_v4 = vpop.f32.mrf.mxu0  ;;  %v11692_v42 = vpop.f32.mrf.mxu1 }
 0x535   : >> { %13088 = vst [vmem:[#allocation36_spill] sm:$0xff] %v11690_v4  ;;  %13089 = vst [vmem:[#allocation37_spill] sm:$0xff] %v11692_v42  ;;  %v4060_v4 = vadd.f32 %v3993_v26, %v11610_v1  ;;  %v4065_v42 = vadd.f32 %v8576_v17, %v11608_v45  ;;  %v4229_v1 = vadd.f32 %v4161_v50, %v4057_v3 }
 0x536   : >> { %v11694_v60 = vpop.f32.mrf.mxu0  ;;  %v11696_v14 = vpop.f32.mrf.mxu1  ;;  %v4067_v45 = vadd.f32 %v4005_v38, %v11626_v29  ;;  %v4230_v28 = vadd.f32 %v4163_v6, %v4058_v44  ;;  %v4238_v3 = vadd.f32 %v11638_v58, %v4066_v2 }
 0x537   : >> { %13090 = vst [vmem:[#allocation38_spill] sm:$0xff] %v11694_v60  ;;  %13091 = vst [vmem:[#allocation39_spill] sm:$0xff] %v11696_v14  ;;  %v4061_v60 = vadd.f32 %v3995_v59, %v11614_v25  ;;  %v4059_v14 = vadd.f32 %v4042_v41, %v11612_v24  ;;  %v4237_v25 = vadd.f32 %v8584_v21, %v4065_v42 }
 0x538   : >> { %v11698_v54 = vpop.f32.mrf.mxu0  ;;  %v11700_v12 = vpop.f32.mrf.mxu1  ;;  %v4232_v26 = vadd.f32 %v4165_v18, %v4060_v4  ;;  %v4365_v41 = vadd.f32 %v4297_v63, %v4229_v1  ;;  %v4366_v44 = vadd.f32 %v11640_v35, %v4230_v28  ;;  %v4372_v18 = vadd.f32 %v11656_v34, %v4236_v43  ;;  %v13099_v34 = vld [vmem:[#allocation29_spill] sm:$0xff] }
 0x539   : >> { %13092 = vst [vmem:[#allocation40_spill] sm:$0xff] %v11698_v54  ;;  %13093 = vst [vmem:[#allocation41_spill] sm:$0xff] %v11700_v12  ;;  %v4063_v54 = vadd.f32 %v3999_v55, %v11618_v57  ;;  %v4068_v12 = vadd.f32 %v8577_v39, %v11616_v36  ;;  %v4231_v24 = vadd.f32 %v4214_v0, %v4059_v14  ;;  %v13103_v14 = vld [vmem:[#allocation33_spill] sm:$0xff] }
 0x53a   : >> { %v11703_v40 = vpop.f32.mrf.mxu0  ;;  %v11705_v20 = vpop.f32.mrf.mxu1  ;;  %v4233_v36 = vadd.f32 %v11628_v33, %v4061_v60  ;;  %v4239_v55 = vadd.f32 %v11642_v52, %v4067_v45  ;;  %v4368_v39 = vadd.f32 %v11644_v62, %v4232_v26  ;;  %v4373_v31 = vadd.f32 %v11646_v53, %v4237_v25  ;;  %v13096_v52 = vld [vmem:[#allocation27_spill] sm:$0xff]  ;;  %v13097_v53 = vld [vmem:[#allocation28_spill] sm:$0xff] }
 0x53b   : >> { %13094 = vst [vmem:[#allocation42_spill] sm:$0xff] %v11703_v40  ;;  %13095 = vst [vmem:[#allocation43_spill] sm:$0xff] %v11705_v20  ;;  %v4062_v20 = vadd.f32 %v4045_v61, %v11620_v56  ;;  %v4240_v30 = vadd.f32 %v11630_v16, %v4068_v12  ;;  %v4235_v59 = vadd.f32 %v11632_v7, %v4063_v54  ;;  %v13104_v1 = vld [vmem:[#allocation35_spill] sm:$0xff] }
 0x53c   : >> { %v4813_v37 = vpop.f32.mrf.mxu0  ;;  %v11715_v40 = vpop.f32.mrf.mxu1  ;;  %v4537_v61 = vadd.f32 %v4469_v11, %v4365_v41  ;;  %v4369_v46 = vadd.f32 %v11648_v51, %v4233_v36  ;;  %v4367_v50 = vadd.f32 %v11650_v8, %v4231_v24  ;;  %v4538_v33 = vadd.f32 %v11664_v49, %v4366_v44  ;;  %v13098_v8 = vld [vmem:[#allocation34_spill] sm:$0xff]  ;;  %v13106_v25 = vld [vmem:[#allocation37_spill] sm:$0xff] }
 0x53d   : >> { %v4234_v56 = vadd.f32 %v11634_v13, %v4062_v20  ;;  %v4371_v20 = vadd.f32 %v11652_v48, %v4235_v59  ;;  %v4376_v38 = vadd.f32 %v11654_v9, %v4240_v30  ;;  %v4374_v7 = vadd.f32 %v11660_v27, %v4238_v3  ;;  %v13101_v27 = vld [vmem:[#allocation31_spill] sm:$0xff] }
 0x53e   : >> { %v4815_v17 = vpop.f32.mrf.mxu0  ;;  %v8616_v57 = vpop.f32.mrf.mxu1  ;;  %v4709_v16 = vadd.f32 %v4641_v47, %v4537_v61  ;;  %v4375_v13 = vadd.f32 %v11662_v32, %v4239_v55  ;;  %v4545_v15 = vadd.f32 %v11666_v5, %v4373_v31  ;;  %v4540_v63 = vadd.f32 %v11668_v23, %v4368_v39  ;;  %v13100_v47 = vld [vmem:[#allocation30_spill] sm:$0xff]  ;;  %v13102_v32 = vld [vmem:[#allocation32_spill] sm:$0xff]  ;;  %v13108_v41 = vld [vmem:[#allocation39_spill] sm:$0xff] }
 0x53f   : >> { %v4370_v0 = vadd.f32 %v11658_v19, %v4234_v56  ;;  %v4539_v62 = vadd.f32 %v13096_v52, %v4367_v50  ;;  %v4541_v51 = vadd.f32 %v13097_v53, %v4369_v46  ;;  %v4710_v48 = vadd.f32 %v13098_v8, %v4538_v33  ;;  %v5068_v23 = vpop.permute.xlu1 %5067  ;;  %v13107_v24 = vld [vmem:[#allocation38_spill] sm:$0xff]  ;;  %v9400_v52 = vld [vmem:[#allocation2 + $0x30] sm:$0xff] }
 0x540   : >> { %v4817_v29 = vpop.f32.mrf.mxu0  ;;  %v4866_v4 = vpop.f32.mrf.mxu1  ;;  %v4881_v9 = vadd.f32 %v4813_v37, %v4709_v16  ;;  %v4548_v19 = vadd.f32 %v13099_v34, %v4376_v38  ;;  %v4543_v11 = vadd.f32 %v13100_v47, %v4371_v20  ;;  %v4544_v42 = vadd.f32 %v13102_v32, %v4372_v18  ;;  %v13105_v37 = vld [vmem:[#allocation36_spill] sm:$0xff] }
 0x541   : >> { %v4542_v49 = vadd.f32 %v13101_v27, %v4370_v0  ;;  %v4546_v54 = vadd.f32 %v13103_v14, %v4374_v7  ;;  %v4712_v12 = vadd.f32 %v11688_v22, %v4540_v63  ;;  %v4882_v10 = vadd.f32 %v4815_v17, %v4710_v48  ;;  %v13109_v55 = vld [vmem:[#allocation40_spill] sm:$0xff]  ;;  %v13110_v22 = vld [vmem:[#allocation41_spill] sm:$0xff]  ;;  %v11758_v38 = vpop.permute.xlu0 %5072  ;;  %v9401_v27 = vld [vmem:[#allocation2] sm:$0xff] }
 0x542   : >> { %v4819_v6 = vpop.f32.mrf.mxu0  ;;  %v8617_v21 = vpop.f32.mrf.mxu1  ;;  %v4547_v45 = vadd.f32 %v13104_v1, %v4375_v13  ;;  %v4717_v28 = vadd.f32 %v13105_v37, %v4545_v15  ;;  %v4713_v26 = vadd.f32 %v13106_v25, %v4541_v51  ;;  %v4711_v36 = vadd.f32 %v13107_v24, %v4539_v62  ;;  %v13111_v31 = vld [vmem:[#allocation42_spill] sm:$0xff]  ;;  %v9403_v24 = vld [vmem:[#allocation2 + $0x28] sm:$0xff] }
 0x543   : >> { %v4715_v56 = vadd.f32 %v13108_v41, %v4543_v11  ;;  %v4884_v43 = vadd.f32 %v4817_v29, %v4712_v12  ;;  %v4720_v39 = vadd.f32 %v13109_v55, %v4548_v19  ;;  %v4716_v17 = vadd.f32 %v13110_v22, %v4544_v42  ;;  %v13113_v29 = vld [vmem:[#allocation43_spill] sm:$0xff] }
 0x544   : >> { %v4823_v58 = vpop.f32.mrf.mxu0  ;;  %v4869_v35 = vpop.f32.mrf.mxu1  ;;  %v4714_v61 = vadd.f32 %v13111_v31, %v4542_v49  ;;  %v4889_v46 = vadd.f32 %v8616_v57, %v4717_v28  ;;  %v4885_v18 = vadd.f32 %v4819_v6, %v4713_v26  ;;  %v4718_v13 = vadd.f32 %v13113_v29, %v4546_v54  ;;  %v9407_v29 = vld [vmem:[#allocation2 + $0x40] sm:$0xff] }
 0x545   : >> { %v4719_v15 = vadd.f32 %v11715_v40, %v4547_v45  ;;  %v4883_v63 = vadd.f32 %v4866_v4, %v4711_v36  ;;  %v5078_v57 = vpop.permute.xlu1 %5077  ;;  %v4892_v19 = vadd.f32 %v8617_v21, %v4720_v39  ;;  %v4887_v47 = vadd.f32 %v4823_v58, %v4715_v56  ;;  %v5083_v1 = vpop.permute.xlu0 %5082 }
 0x546   : >> { %v4825_v5 = vpop.f32.mrf.mxu0  ;;  %v4985_v60 = vpop.f32.mrf.mxu1  ;;  %v4886_v11 = vadd.f32 %v4869_v35, %v4714_v61 }
 0x547   : >> { %v5053_v2 = vadd.f32 %v4985_v60, %v4881_v9  ;;  %v4888_v54 = vadd.f32 %v4825_v5, %v4716_v17  ;;  %v9404_v5 = vld [vmem:[#allocation2 + $0x50] sm:$0xff] }
 0x548   : >> { %v4827_v30 = vpop.f32.mrf.mxu0  ;;  %v4987_v59 = vpop.f32.mrf.mxu1 }
 0x549   : >> { %v5085_v3 = vadd.f32 %v5068_v23, %v5053_v2  ;;  %v5054_v44 = vadd.f32 %v4987_v59, %v4882_v10  ;;  %v4890_v12 = vadd.f32 %v4827_v30, %v4718_v13  ;;  %v9402_v10 = vld [vmem:[#allocation2 + $0x18] sm:$0xff] }
 0x54a   : >> { %v4829_v50 = vpop.f32.mrf.mxu0  ;;  %v4989_v20 = vpop.f32.mrf.mxu1 }
 0x54b   : >> { %v5097_v33 = vsel %vm1899_vm12, %v5085_v3, 0.0  ;;  %v5086_v16 = vadd.f32 %v5068_v23, %v5054_v44  ;;  %v5056_v7 = vadd.f32 %v4989_v20, %v4884_v43  ;;  %v4891_v22 = vadd.f32 %v4829_v50, %v4719_v15  ;;  %v9406_v20 = vld [vmem:[#allocation2 + $0x8] sm:$0xff] }
 0x54c   : >> { %v5109_v62 = vadd.f32 %v9400_v52, %v5097_v33  ;;  %v8624_v53 = vpop.f32.mrf.mxu0  ;;  %v4991_v51 = vpop.f32.mrf.mxu1 }
 0x54d   : >> { %v5098_v48 = vsel %vm1900_vm14, %v5086_v16, 0.0  ;;  %v5088_v6 = vadd.f32 %v11758_v38, %v5056_v7  ;;  %v5061_v9 = vadd.f32 %v8624_v53, %v4889_v46  ;;  %v5057_v34 = vadd.f32 %v4991_v51, %v4885_v18  ;;  %v9409_v51 = vld [vmem:[#allocation2 + $0x20] sm:$0xff] }
 0x54e   : >> { %5121 = vst [vmem:[#allocation2 + $0x30] sm:$0xff] %v5109_v62  ;;  %v5110_v49 = vadd.f32 %v9401_v27, %v5098_v48  ;;  %v5038_v40 = vpop.f32.mrf.mxu0  ;;  %v4995_v4 = vpop.f32.mrf.mxu1  ;;  %v13116_v27 = vmov (%p1928_p1), 0  }
 0x54f   : >> { %v5100_v32 = vsel %vm1899_vm12, %v5088_v6, 0.0  ;;  %v5093_v42 = vadd.f32 %v5078_v57, %v5061_v9  ;;  %v5089_v60 = vadd.f32 %v11758_v38, %v5057_v34  ;;  %v5055_v14 = vadd.f32 %v5038_v40, %v4883_v63  ;;  %v9408_v63 = vld [vmem:[#allocation2 + $0x38] sm:$0xff]  ;;  %v9411_v34 = vld [vmem:[#allocation2 + $0x10] sm:$0xff]  ;;  %5318 = vmatprep.mubr.bf16.mxu0 (%p1928_p1), %v13116_v27  ;;  %9653 = vset.pattern.permute.xlu1 (%p1928_p1), %v13116_v27 }
 0x550   : >> { %5122 = vst [vmem:[#allocation2] sm:$0xff] %v5110_v49  ;;  %v5112_v2 = vadd.f32 %v9402_v10, %v5100_v32  ;;  %v5059_v21 = vadd.f32 %v4995_v4, %v4887_v47  ;;  %v8625_v58 = vpop.f32.mrf.mxu0  ;;  %v4997_v35 = vpop.f32.mrf.mxu1  ;;  %9652 = vset.pattern.permute.xlu0 (%p1928_p1), %v13116_v27 }
 0x551   : >> { %v5105_v37 = vsel %vm1901_vm13, %v5093_v42, 0.0  ;;  %v5101_v28 = vsel %vm1900_vm14, %v5089_v60, 0.0  ;;  %v5087_v25 = vadd.f32 %v5068_v23, %v5055_v14  ;;  %v5064_v26 = vadd.f32 %v8625_v58, %v4892_v19  ;;  %v9405_v23 = vld [vmem:[#allocation2 + $0x58] sm:$0xff]  ;;  %v11828_v58 = vld [vmem:[%s12954_s8 + $0x10] sm:$0xff] (%p1928_p1)  }
 0x552   : >> { %5124 = vst [vmem:[#allocation2 + $0x18] sm:$0xff] %v5112_v2  ;;  %v5117_v36 = vadd.f32 %v9403_v24, %v5105_v37  ;;  %v5113_v30 = vadd.f32 %v9404_v5, %v5101_v28  ;;  %v5091_v59 = vadd.f32 %v5078_v57, %v5059_v21  ;;  %v5060_v41 = vadd.f32 %v4997_v35, %v4888_v54  ;;  %v5041_v56 = vpop.f32.mrf.mxu0  ;;  %v4999_v43 = vpop.f32.mrf.mxu1  ;;  %v5183_v5 = vld [vmem:[%s12955_s9 + $0x10] sm:$0xff] (%p1928_p1) }
 0x553   : >> { %v5099_v3 = vsel %vm1901_vm13, %v5087_v25, 0.0  ;;  %v5096_v44 = vadd.f32 %v5083_v1, %v5064_v26  ;;  %v5058_v55 = vadd.f32 %v5041_v56, %v4886_v11  ;;  %v5062_v39 = vadd.f32 %v4999_v43, %v4890_v12  ;;  %8630 = vmatprep.mubr.msk.bf16.mxu1 (%p1928_p1), %vm2083_vm1, %v11828_v58 }
 0x554   : >> { %5129 = vst [vmem:[#allocation2 + $0x28] sm:$0xff] %v5117_v36  ;;  %5125 = vst [vmem:[#allocation2 + $0x50] sm:$0xff] %v5113_v30  ;;  %v5111_v17 = vadd.f32 %v9405_v23, %v5099_v3  ;;  %v5103_v31 = vsel %vm1899_vm12, %v5091_v59, 0.0  ;;  %v5092_v61 = vadd.f32 %v5078_v57, %v5060_v41  ;;  %v5001_v46 = vpop.f32.mrf.mxu1  ;;  %v9410_v57 = vld [vmem:[#allocation2 + $0x48] sm:$0xff]  ;;  %v5184_v36 = vld [vmem:[%s12955_s9 + $0x18] sm:$0xff] (%p1928_p1) }
 0x555   : >> { %v5115_v18 = vadd.f32 %v9406_v20, %v5103_v31  ;;  %v5108_v33 = vsel %vm1901_vm13, %v5096_v44, 0.0  ;;  %v5090_v16 = vadd.f32 %v11758_v38, %v5058_v55  ;;  %v5094_v7 = vadd.f32 %v5083_v1, %v5062_v39  ;;  %v11809_v42 = vld [vmem:[#allocation2 + $0x30] sm:$0xff] (%p1928_p1)  ;;  %v5181_v30 = vld [vmem:[%s12955_s9] sm:$0xff] (%p1928_p1)  ;;  %v5182_v59 = vld [vmem:[%s12955_s9 + $0x8] sm:$0xff] (%p1928_p1) }
 0x556   : >> { %5123 = vst [vmem:[#allocation2 + $0x58] sm:$0xff] %v5111_v17  ;;  %v5120_v50 = vadd.f32 %v9407_v29, %v5108_v33  ;;  %v5104_v13 = vsel %vm1900_vm14, %v5092_v61, 0.0  ;;  %v5063_v15 = vadd.f32 %v5001_v46, %v4891_v22 }
 0x557   : >> { %5127 = vst [vmem:[#allocation2 + $0x8] sm:$0xff] %v5115_v18  ;;  %v5116_v52 = vadd.f32 %v9408_v63, %v5104_v13  ;;  %v5102_v62 = vsel %vm1901_vm13, %v5090_v16, 0.0  ;;  %v5106_v53 = vsel %vm1899_vm12, %v5094_v7, 0.0  ;;  %v11817_v54 = vld [vmem:[#allocation2] sm:$0xff] (%p1928_p1) }
 0x558   : >> { %5132 = vst [vmem:[#allocation2 + $0x40] sm:$0xff] %v5120_v50  ;;  %v5114_v38 = vadd.f32 %v9409_v51, %v5102_v62  ;;  %v5118_v48 = vadd.f32 %v9410_v57, %v5106_v53  ;;  %v5095_v6 = vadd.f32 %v5083_v1, %v5063_v15 }
 0x559   : >> { %5128 = vst [vmem:[#allocation2 + $0x38] sm:$0xff] %v5116_v52  ;;  %v11811_v60 = vld [vmem:[#allocation2 + $0x18] sm:$0xff] (%p1928_p1) }
 0x55a   : >> { %5126 = vst [vmem:[#allocation2 + $0x20] sm:$0xff] %v5114_v38  ;;  %5130 = vst [vmem:[#allocation2 + $0x48] sm:$0xff] %v5118_v48  ;;  %v5107_v9 = vsel %vm1900_vm14, %v5095_v6, 0.0  ;;  %v9427_v14 = vpack.i.bf16 (%p1928_p1), %v11811_v60, %v11809_v42  ;;  %v5850_v26 = vpack.c.bf16 (%p1928_p1), %v11811_v60, %v11809_v42 }
 0x55b   : >> { %v5119_v19 = vadd.f32 %v9411_v34, %v5107_v9  ;;  %v5141_v0 = vld [vmem:[#allocation2 + $0x28] sm:$0xff] (%p1928_p1)  ;;  %v11819_v12 = vld [vmem:[#allocation2 + $0x50] sm:$0xff] (%p1928_p1) }
 0x55c   : > { %v9432_v1 = vpack.i.bf16 (%p1928_p1), %v11819_v12, %v11817_v54  ;;  %v5851_v25 = vpack.c.bf16 (%p1928_p1), %v11819_v12, %v11817_v54 }
 0x55d   : >> { %5131 = vst [vmem:[#allocation2 + $0x10] sm:$0xff] %v5119_v19  ;;  %v5135_v10 = vld [vmem:[#allocation2 + $0x58] sm:$0xff] (%p1928_p1) }
 0x55e   : > { %1930 = sbr.rel (!%p1928_p1) target bundleno = 479 (0x1df), region = 114  ;;  %v11792_v11 = vld [vmem:[#allocation2 + $0x8] sm:$0xff] (%p1928_p1) }
 0x55f   : > { %v5144_v47 = vld [vmem:[#allocation2 + $0x40] sm:$0xff] (%p1928_p1) }
 0x560   : > { %v11796_v49 = vpack.i.bf16 (%p1928_p1), %v5144_v47, %v5141_v0  ;;  %v11800_v40 = vld [vmem:[#allocation2 + $0x38] sm:$0xff] (%p1928_p1)  ;;  %v11866_v28 = vpack.c.bf16 (%p1928_p1), %v5144_v47, %v5141_v0 }
 0x561   : > { %v11798_v8 = vld [vmem:[#allocation2 + $0x48] sm:$0xff] (%p1928_p1)  ;;  %v5138_v2 = vld [vmem:[#allocation2 + $0x20] sm:$0xff] (%p1928_p1) }
 0x562   : > { %v11807_v32 = vpack.i.bf16 (%p1928_p1), %v11798_v8, %v11792_v11  ;;  %9423 = vrot.lane.b32.xlu1 (%p1928_p1), %v11796_v49, %s9962_s23  ;;  %v9437_v35 = vpack.i.bf16 (%p1928_p1), %v5138_v2, %v5135_v10  ;;  %v5853_v37 = vpack.c.bf16 (%p1928_p1), %v11798_v8, %v11792_v11  ;;  %v11876_v24 = vpack.c.bf16 (%p1928_p1), %v5138_v2, %v5135_v10  ;;  %v9902_v11 = vld [vmem:[%s12954_s8 + $0x40] sm:$0xff] (%p1928_p1)  }
 0x564   : > { %v11802_v4 = vld [vmem:[#allocation2 + $0x10] sm:$0xff]  ;;  %9413 = vrot.lane.b32.xlu0 %v11807_v32, %s9962_s23 }
 0x565   : > { %v9417_v21 = vpack.i.bf16 %v11802_v4, %v11800_v40  ;;  %v5854_v45 = vpack.c.bf16 %v11802_v4, %v11800_v40 }
 0x566   : > { %9428 = vrot.lane.b32.xlu1 %v9427_v14, %s9962_s23 }
 0x568   : > { %9418 = vrot.lane.b32.xlu0 %v9417_v21, %s9962_s23 }
 0x56a   : > { %9438 = vrot.lane.b32.xlu1 %v9437_v35, %s9962_s23 }
 0x56c   : > { %9433 = vrot.lane.b32.xlu0 %v9432_v1, %s9962_s23 }
 0x56e   : > { %9448 = vrot.lane.b32.xlu1 %v11796_v49, %s13117_s29 }
 0x570   : > { %9443 = vrot.lane.b32.xlu0 %v9417_v21, %s13117_s29 }
 0x572   : > { %9458 = vrot.lane.b32.xlu1 %v9432_v1, %s13117_s29 }
 0x574   : > { %9453 = vrot.lane.b32.xlu0 %v11807_v32, %s13117_s29 }
 0x576   : > { %9468 = vrot.lane.b32.xlu1 %v9427_v14, %s13117_s29 }
 0x578   : > { %9463 = vrot.lane.b32.xlu0 %v9437_v35, %s13117_s29 }
 0x57a   : > { %9478 = vrot.lane.b32.xlu1 %v9417_v21, %s13118_s30 }
 0x57c   : > { %9473 = vrot.lane.b32.xlu0 %v11807_v32, %s13118_s30 }
 0x57e   : > { %9488 = vrot.lane.b32.xlu1 %v9427_v14, %s13118_s30 }
 0x580   : > { %9483 = vrot.lane.b32.xlu0 %v11796_v49, %s13118_s30 }
 0x582   : > { %9498 = vrot.lane.b32.xlu1 %v9437_v35, %s13118_s30 }
 0x584   : > { %9493 = vrot.lane.b32.xlu0 %v9432_v1, %s13118_s30 }
 0x586   : > { %9508 = vrot.lane.b32.xlu1 %v11796_v49, %s13119_s17 }
 0x588   : > { %9503 = vrot.lane.b32.xlu0 %v9417_v21, %s13119_s17 }
 0x58a   : > { %9518 = vrot.lane.b32.xlu1 %v9432_v1, %s13119_s17 }
 0x58c   : > { %9513 = vrot.lane.b32.xlu0 %v11807_v32, %s13119_s17 }
 0x58e   : > { %9528 = vrot.lane.b32.xlu1 %v9427_v14, %s13119_s17 }
 0x590   : > { %9523 = vrot.lane.b32.xlu0 %v9437_v35, %s13119_s17 }
 0x592   : > { %9538 = vrot.lane.b32.xlu1 %v11796_v49, %s13120_s18 }
 0x594   : > { %9533 = vrot.lane.b32.xlu0 %v11807_v32, %s13120_s18 }
 0x596   : > { %9548 = vrot.lane.b32.xlu1 %v9427_v14, %s13120_s18 }
 0x598   : > { %9543 = vrot.lane.b32.xlu0 %v9417_v21, %s13120_s18 }
 0x59a   : > { %9558 = vrot.lane.b32.xlu1 %v9432_v1, %s13120_s18 }
 0x59c   : > { %9553 = vrot.lane.b32.xlu0 %v9437_v35, %s13120_s18 }
 0x59e   : > { %9568 = vrot.lane.b32.xlu1 %v11796_v49, %s13121_s14 }
 0x5a0   : > { %9563 = vrot.lane.b32.xlu0 %v9417_v21, %s13121_s14 }
 0x5a2   : > { %9578 = vrot.lane.b32.xlu1 %v9432_v1, %s13121_s14 }
 0x5a4   : > { %9573 = vrot.lane.b32.xlu0 %v11807_v32, %s13121_s14 }
 0x5a6   : > { %9588 = vrot.lane.b32.xlu1 %v9427_v14, %s13121_s14 }
 0x5a8   : > { %9583 = vrot.lane.b32.xlu0 %v9437_v35, %s13121_s14 }
 0x5aa   : > { %9598 = vrot.lane.b32.xlu1 %v11796_v49, %s13122_s15 }
 0x5ac   : > { %9593 = vrot.lane.b32.xlu0 %v11807_v32, %s13122_s15 }
 0x5ae   : > { %9608 = vrot.lane.b32.xlu1 %v9427_v14, %s13122_s15 }
 0x5b0   : > { %9603 = vrot.lane.b32.xlu0 %v9417_v21, %s13122_s15 }
 0x5b2   : > { %9618 = vrot.lane.b32.xlu1 %v9432_v1, %s13122_s15 }
 0x5b4   : > { %9613 = vrot.lane.b32.xlu0 %v9437_v35, %s13122_s15 }
 0x5b6   : > { %9628 = vrot.lane.b32.xlu1 %v11796_v49, %s13123_s16 }
 0x5b8   : > { %9623 = vrot.lane.b32.xlu0 %v9417_v21, %s13123_s16 }
 0x5ba   : > { %9638 = vrot.lane.b32.xlu1 %v9432_v1, %s13123_s16 }
 0x5bc   : > { %9633 = vrot.lane.b32.xlu0 %v11807_v32, %s13123_s16 }
 0x5be   : > { %9648 = vrot.lane.b32.xlu1 %v9427_v14, %s13123_s16 }
 0x5c0   : > { %9643 = vrot.lane.b32.xlu0 %v9437_v35, %s13123_s16 }
 0x5c2   : > { %6691 = vperm.xlu1 %9653, %v5184_v36  }
 0x5c4   : > { %6686 = vperm.xlu0 %9652, %v5183_v5  }
 0x5c6   : > { %6676 = vperm.xlu1 %9653, %v5181_v30  }
 0x5c8   : > { %6681 = vperm.xlu0 %9652, %v5182_v59  }
 0x5d4   : > { %v9424_v41 = vpop.permute.xlu1 %9423 }
 0x5d5   : > { %v9426_v43 = vunpack.i.h.bf16 %v9424_v41  ;;  %v9425_v3 = vunpack.i.l.bf16 %v9424_v41  ;;  %v9895_v41 = vld [vmem:[%s12954_s8 + $0x18] sm:$0xff]  }
 0x5d6   : > { %v9414_v56 = vpop.permute.xlu0 %9413 }
 0x5d7   : > { %v9416_v44 = vunpack.i.h.bf16 %v9414_v56  ;;  %v9415_v55 = vunpack.i.l.bf16 %v9414_v56 }
 0x5d8   : > { %v9429_v39 = vpop.permute.xlu1 %9428 }
 0x5d9   : > { %v9431_v31 = vunpack.i.h.bf16 %v9429_v39  ;;  %v9430_v61 = vunpack.i.l.bf16 %v9429_v39  ;;  %v5261_v20 = vsel %vm498_vm2, %v9425_v3, %v9415_v55  ;;  %v5262_v18 = vsel %vm498_vm2, %v9426_v43, %v9416_v44 }
 0x5da   : > { %v9419_v22 = vpop.permute.xlu0 %9418  ;;  %v5266_v38 = vpack.c.bf16 %v5262_v18, %v5261_v20 }
 0x5db   : > { %v9421_v23 = vunpack.i.h.bf16 %v9419_v22  ;;  %v9420_v17 = vunpack.i.l.bf16 %v9419_v22 }
 0x5dc   : > { %v9439_v33 = vpop.permute.xlu1 %9438 }
 0x5dd   : > { %v5258_v16 = vsel %vm498_vm2, %v9416_v44, %v9421_v23  ;;  %v5257_v7 = vsel %vm498_vm2, %v9415_v55, %v9420_v17  ;;  %v5253_v29 = vsel %vm498_vm2, %v9420_v17, %v9425_v3  ;;  %v5254_v50 = vsel %vm498_vm2, %v9421_v23, %v9426_v43 }
 0x5de   : > { %v9434_v13 = vpop.permute.xlu0 %9433  ;;  %v9441_v15 = vunpack.i.h.bf16 %v9439_v33  ;;  %v9440_v63 = vunpack.i.l.bf16 %v9439_v33  ;;  %v5267_v52 = vpack.c.bf16 %v5258_v16, %v5257_v7  ;;  %v5268_v62 = vpack.c.bf16 %v5254_v50, %v5253_v29 }
 0x5df   : > { %v9436_v53 = vunpack.i.h.bf16 %v9434_v13  ;;  %v9435_v51 = vunpack.i.l.bf16 %v9434_v13 }
 0x5e0   : > { %v5259_v57 = vsel %vm498_vm2, %v9440_v63, %v9430_v61  ;;  %v5260_v48 = vsel %vm498_vm2, %v9441_v15, %v9431_v31  ;;  %5298 = vmatprep.subr.bf16.mxu0 %v5267_v52  ;;  %8626 = vmatprep.subr.bf16.mxu1 %v5268_v62  ;;  %v9449_v0 = vpop.permute.xlu1 %9448 }
 0x5e1   : > { %v5255_v6 = vsel %vm498_vm2, %v9430_v61, %v9435_v51  ;;  %v5256_v9 = vsel %vm498_vm2, %v9431_v31, %v9436_v53  ;;  %v5252_v34 = vsel %vm498_vm2, %v9436_v53, %v9441_v15  ;;  %v5251_v19 = vsel %vm498_vm2, %v9435_v51, %v9440_v63  ;;  %5299 = vmatpush1.bf16.msra.mxu0 %v5266_v38 }
 0x5e2   : > { %8627 = vmatpush3.bf16.msra.mxu1 %v5268_v62  ;;  %v9444_v47 = vpop.permute.xlu0 %9443  ;;  %v9451_v49 = vunpack.i.h.bf16 %v9449_v0  ;;  %v9450_v32 = vunpack.i.l.bf16 %v9449_v0  ;;  %v5264_v14 = vpack.c.bf16 %v5256_v9, %v5255_v6  ;;  %v5265_v10 = vpack.c.bf16 %v5252_v34, %v5251_v19  ;;  %v9896_v34 = vld [vmem:[%s12954_s8] sm:$0xff]  }
 0x5e3   : > { %v9446_v2 = vunpack.i.h.bf16 %v9444_v47  ;;  %v9445_v21 = vunpack.i.l.bf16 %v9444_v47  ;;  %v5263_v35 = vpack.c.bf16 %v5260_v48, %v5259_v57 }
 0x5e4   : > { %5300 = vmatprep.subr.bf16.mxu0 %v5264_v14  ;;  %8628 = vmatprep.subr.bf16.mxu1 %v5265_v10  ;;  %v9459_v5 = vpop.permute.xlu1 %9458 }
 0x5e5   : > { %v5212_v1 = vsel %vm485_vm3, %v9446_v2, %v9451_v49  ;;  %v5211_v36 = vsel %vm485_vm3, %v9445_v21, %v9450_v32  ;;  %5301 = vmatpush1.bf16.msra.mxu0 %v5263_v35  ;;  %v9461_v3 = vunpack.i.h.bf16 %v9459_v5  ;;  %v9460_v44 = vunpack.i.l.bf16 %v9459_v5  ;;  %v9897_v35 = vld [vmem:[%s12954_s8 + $0x8] sm:$0xff]  }
 0x5e6   : > { %8629 = vmatpush3.bf16.msra.mxu1 %v5265_v10  ;;  %v9454_v30 = vpop.permute.xlu0 %9453  ;;  %v5226_v59 = vpack.c.bf16 %v5212_v1, %v5211_v36 }
 0x5e7   : > { %v9456_v56 = vunpack.i.h.bf16 %v9454_v30  ;;  %v9455_v43 = vunpack.i.l.bf16 %v9454_v30 }
 0x5e8   : > { %8174 = vmatmul.mubr.msk.bf16.vlgmr.msra.gmra.mxu0 %vm2083_vm1, %v11828_v58  ;;  %8634 = vmatprep.subr.bf16.mxu0 %v5226_v59  ;;  %v9469_v17 = vpop.permute.xlu1 %9468 }
 0x5e9   : > { %v5215_v55 = vsel %vm485_vm3, %v9455_v43, %v9445_v21  ;;  %v5216_v39 = vsel %vm485_vm3, %v9456_v56, %v9446_v2  ;;  %v5219_v22 = vsel %vm485_vm3, %v9450_v32, %v9455_v43  ;;  %v5220_v23 = vsel %vm485_vm3, %v9451_v49, %v9456_v56  ;;  %8635 = vmatpush3.bf16.msra.mxu0 %v5226_v59 }
 0x5ea   : > { %v5224_v31 = vpack.c.bf16 %v5220_v23, %v5219_v22  ;;  %v9464_v61 = vpop.permute.xlu0 %9463  ;;  %v9471_v20 = vunpack.i.h.bf16 %v9469_v17  ;;  %v9470_v18 = vunpack.i.l.bf16 %v9469_v17  ;;  %8631 = vmatmul.mubr.msk.bf16.vlgmr.msra.gmra.mxu1 %vm2083_vm1, %v9895_v41  ;;  %v5225_v58 = vpack.c.bf16 %v5216_v39, %v5215_v55  ;;  %5328 = vmatprep.mubr.bf16.mxu0 %v13116_v27 }
 0x5eb   : > { %v9466_v33 = vunpack.i.h.bf16 %v9464_v61  ;;  %v9465_v16 = vunpack.i.l.bf16 %v9464_v61  ;;  %5436 = vmatprep.mubr.bf16.mxu1 %v13116_v27 }
 0x5ec   : > { %v5213_v7 = vsel %vm485_vm3, %v9470_v18, %v9460_v44  ;;  %v5214_v29 = vsel %vm485_vm3, %v9471_v20, %v9461_v3  ;;  %5416 = vmatprep.subr.bf16.mxu1 %v5225_v58  ;;  %v9479_v52 = vpop.permute.xlu1 %9478 }
 0x5ed   : > { %v5209_v50 = vsel %vm485_vm3, %v9460_v44, %v9465_v16  ;;  %v5210_v13 = vsel %vm485_vm3, %v9461_v3, %v9466_v33  ;;  %v5218_v15 = vsel %vm485_vm3, %v9466_v33, %v9471_v20  ;;  %v5217_v63 = vsel %vm485_vm3, %v9465_v16, %v9470_v18  ;;  %5417 = vmatpush1.bf16.msra.mxu1 %v5224_v31 }
 0x5ee   : > { %v5221_v62 = vpack.c.bf16 %v5218_v15, %v5217_v63  ;;  %v9474_v53 = vpop.permute.xlu0 %9473  ;;  %v9481_v51 = vunpack.i.h.bf16 %v9479_v52  ;;  %v9480_v38 = vunpack.i.l.bf16 %v9479_v52  ;;  %v5222_v57 = vpack.c.bf16 %v5214_v29, %v5213_v7  ;;  %v9898_v63 = vld [vmem:[%s12954_s8 + $0x20] sm:$0xff]  }
 0x5ef   : > { %v9476_v48 = vunpack.i.h.bf16 %v9474_v53  ;;  %v9475_v6 = vunpack.i.l.bf16 %v9474_v53  ;;  %v5223_v9 = vpack.c.bf16 %v5210_v13, %v5209_v50 }
 0x5f0   : > { %8175 = vmatmul.mubr.msk.bf16.gmra.mxu0 %vm2083_vm1, %v9895_v41  ;;  %5418 = vmatprep.subr.bf16.mxu1 %v5222_v57  ;;  %v9489_v47 = vpop.permute.xlu1 %9488 }
 0x5f1   : > { %v5537_v19 = vsel %vm770_vm5, %v9476_v48, %v9481_v51  ;;  %v5536_v0 = vsel %vm770_vm5, %v9475_v6, %v9480_v38  ;;  %8636 = vmatprep.subr.bf16.mxu0 %v5223_v9  ;;  %5419 = vmatpush1.bf16.msra.mxu1 %v5221_v62  ;;  %v9491_v2 = vunpack.i.h.bf16 %v9489_v47  ;;  %v9490_v21 = vunpack.i.l.bf16 %v9489_v47 }
 0x5f2   : > { %8637 = vmatpush3.bf16.msra.mxu0 %v5223_v9  ;;  %v9484_v49 = vpop.permute.xlu0 %9483  ;;  %v5546_v32 = vpack.c.bf16 %v5537_v19, %v5536_v0  ;;  %8638 = vmatprep.mubr.msk.bf16.mxu0 %vm2083_vm1, %v9896_v34 }
 0x5f3   : > { %v9486_v14 = vunpack.i.h.bf16 %v9484_v49  ;;  %v9485_v10 = vunpack.i.l.bf16 %v9484_v49 }
 0x5f4   : > { %8180 = vmatmul.mubr.msk.bf16.vlgmr.msra.gmra.mxu1 %vm2083_vm1, %v9896_v34  ;;  %5576 = vmatprep.subr.bf16.mxu0 %v5546_v32  ;;  %v9499_v59 = vpop.permute.xlu1 %9498  ;;  %v9899_v34 = vld [vmem:[%s12954_s8 + $0x28] sm:$0xff]  }
 0x5f5   : > { %v5532_v1 = vsel %vm770_vm5, %v9480_v38, %v9485_v10  ;;  %v5533_v36 = vsel %vm770_vm5, %v9481_v51, %v9486_v14  ;;  %v5540_v5 = vsel %vm770_vm5, %v9485_v10, %v9475_v6  ;;  %v5541_v30 = vsel %vm770_vm5, %v9486_v14, %v9476_v48  ;;  %5446 = vmatprep.mubr.bf16.mxu1 %v13116_v27 }
 0x5f6   : > { %v5545_v41 = vpack.c.bf16 %v5541_v30, %v5540_v5  ;;  %v9494_v56 = vpop.permute.xlu0 %9493  ;;  %v9501_v43 = vunpack.i.h.bf16 %v9499_v59  ;;  %v9500_v3 = vunpack.i.l.bf16 %v9499_v59  ;;  %v5547_v44 = vpack.c.bf16 %v5533_v36, %v5532_v1 }
 0x5f7   : > { %v9496_v55 = vunpack.i.h.bf16 %v9494_v56  ;;  %v9495_v39 = vunpack.i.l.bf16 %v9494_v56 }
 0x5f8   : > { %v5538_v22 = vsel %vm770_vm5, %v9500_v3, %v9490_v21  ;;  %v5539_v23 = vsel %vm770_vm5, %v9501_v43, %v9491_v2  ;;  %8639 = vmatmul.mubr.msk.bf16.vlgmr.msra.gmra.mxu0 %vm2083_vm1, %v9897_v35  ;;  %8642 = vmatprep.subr.bf16.mxu1 %v5547_v44  ;;  %v9509_v18 = vpop.permute.xlu1 %9508 }
 0x5f9   : > { %v5534_v17 = vsel %vm770_vm5, %v9490_v21, %v9495_v39  ;;  %v5535_v31 = vsel %vm770_vm5, %v9491_v2, %v9496_v55  ;;  %v5531_v61 = vsel %vm770_vm5, %v9496_v55, %v9501_v43  ;;  %v5530_v20 = vsel %vm770_vm5, %v9495_v39, %v9500_v3  ;;  %5577 = vmatpush1.bf16.msra.mxu0 %v5545_v41 }
 0x5fa   : > { %v5542_v58 = vpack.c.bf16 %v5539_v23, %v5538_v22  ;;  %8643 = vmatpush3.bf16.msra.mxu1 %v5547_v44  ;;  %v9504_v33 = vpop.permute.xlu0 %9503  ;;  %v9511_v16 = vunpack.i.h.bf16 %v9509_v18  ;;  %v9510_v7 = vunpack.i.l.bf16 %v9509_v18  ;;  %v5543_v29 = vpack.c.bf16 %v5535_v31, %v5534_v17  ;;  %5596 = vmatprep.mubr.bf16.mxu0 %v13116_v27  ;;  %v9900_v23 = vld [vmem:[%s12954_s8 + $0x30] sm:$0xff]  }
 0x5fb   : > { %v9506_v50 = vunpack.i.h.bf16 %v9504_v33  ;;  %v9505_v13 = vunpack.i.l.bf16 %v9504_v33  ;;  %v5544_v15 = vpack.c.bf16 %v5531_v61, %v5530_v20 }
 0x5fc   : > { %8181 = vmatmul.mubr.msk.bf16.gmra.mxu1 %vm2083_vm1, %v9897_v35  ;;  %5578 = vmatprep.subr.bf16.mxu0 %v5543_v29  ;;  %v9519_v53 = vpop.permute.xlu1 %9518 }
 0x5fd   : > { %v5705_v52 = vsel %vm922_vm6, %v9506_v50, %v9511_v16  ;;  %v5704_v62 = vsel %vm922_vm6, %v9505_v13, %v9510_v7  ;;  %5579 = vmatpush1.bf16.msra.mxu0 %v5542_v58  ;;  %8644 = vmatprep.subr.bf16.mxu1 %v5544_v15  ;;  %v9521_v6 = vunpack.i.h.bf16 %v9519_v53  ;;  %v9520_v9 = vunpack.i.l.bf16 %v9519_v53 }
 0x5fe   : > { %v9514_v51 = vpop.permute.xlu0 %9513  ;;  %8645 = vmatpush3.bf16.msra.mxu1 %v5544_v15  ;;  %8646 = vmatprep.mubr.msk.bf16.mxu1 %vm2083_vm1, %v9898_v63  ;;  %v5719_v38 = vpack.c.bf16 %v5705_v52, %v5704_v62 }
 0x5ff   : > { %v9516_v57 = vunpack.i.h.bf16 %v9514_v51  ;;  %v9515_v48 = vunpack.i.l.bf16 %v9514_v51 }
 0x600   : > { %8186 = vmatmul.mubr.msk.bf16.vlgmr.msra.gmra.mxu0 %vm2083_vm1, %v9898_v63  ;;  %8650 = vmatprep.subr.bf16.mxu0 %v5719_v38  ;;  %v9529_v32 = vpop.permute.xlu1 %9528 }
 0x601   : > { %v5708_v19 = vsel %vm922_vm6, %v9515_v48, %v9505_v13  ;;  %v5709_v0 = vsel %vm922_vm6, %v9516_v57, %v9506_v50  ;;  %v5712_v47 = vsel %vm922_vm6, %v9510_v7, %v9515_v48  ;;  %v5713_v49 = vsel %vm922_vm6, %v9511_v16, %v9516_v57  ;;  %8651 = vmatpush3.bf16.msra.mxu0 %v5719_v38  ;;  %v9901_v7 = vld [vmem:[%s12954_s8 + $0x38] sm:$0xff]  }
 0x602   : > { %v5717_v14 = vpack.c.bf16 %v5713_v49, %v5712_v47  ;;  %v9524_v10 = vpop.permute.xlu0 %9523  ;;  %v9531_v2 = vunpack.i.h.bf16 %v9529_v32  ;;  %v9530_v21 = vunpack.i.l.bf16 %v9529_v32  ;;  %v5718_v35 = vpack.c.bf16 %v5709_v0, %v5708_v19  ;;  %5606 = vmatprep.mubr.bf16.mxu0 %v13116_v27  ;;  %v9903_v49 = vld [vmem:[%s12954_s8 + $0x48] sm:$0xff]  }
 0x603   : > { %v9526_v1 = vunpack.i.h.bf16 %v9524_v10  ;;  %v9525_v36 = vunpack.i.l.bf16 %v9524_v10 }
 0x604   : > { %v5706_v5 = vsel %vm922_vm6, %v9530_v21, %v9520_v9  ;;  %v5707_v30 = vsel %vm922_vm6, %v9531_v2, %v9521_v6  ;;  %8647 = vmatmul.mubr.msk.bf16.vlgmr.msra.gmra.mxu1 %vm2083_vm1, %v9899_v34  ;;  %5748 = vmatprep.subr.bf16.mxu1 %v5718_v35  ;;  %v9539_v3 = vpop.permute.xlu1 %9538 }
 0x605   : > { %v5702_v59 = vsel %vm922_vm6, %v9520_v9, %v9525_v36  ;;  %v5703_v41 = vsel %vm922_vm6, %v9521_v6, %v9526_v1  ;;  %v5711_v56 = vsel %vm922_vm6, %v9526_v1, %v9531_v2  ;;  %v5710_v43 = vsel %vm922_vm6, %v9525_v36, %v9530_v21  ;;  %5749 = vmatpush1.bf16.msra.mxu1 %v5717_v14 }
 0x606   : > { %v5714_v44 = vpack.c.bf16 %v5711_v56, %v5710_v43  ;;  %v5715_v55 = vpack.c.bf16 %v5707_v30, %v5706_v5  ;;  %v5716_v39 = vpack.c.bf16 %v5703_v41, %v5702_v59  ;;  %5768 = vmatprep.mubr.bf16.mxu1 %v13116_v27  ;;  %v9534_v22 = vpop.permute.xlu0 %9533  ;;  %v9541_v17 = vunpack.i.h.bf16 %v9539_v3 }
 0x607   : > { %v9540_v31 = vunpack.i.l.bf16 %v9539_v3  ;;  %v9536_v20 = vunpack.i.h.bf16 %v9534_v22  ;;  %v9535_v18 = vunpack.i.l.bf16 %v9534_v22 }
 0x608   : > { %8187 = vmatmul.mubr.msk.bf16.gmra.mxu0 %vm2083_vm1, %v9899_v34  ;;  %5750 = vmatprep.subr.bf16.mxu1 %v5715_v55  ;;  %v12050_v61 = vpop.permute.xlu1 %9548 }
 0x609   : > { %8652 = vmatprep.subr.bf16.mxu0 %v5716_v39  ;;  %5751 = vmatpush1.bf16.msra.mxu1 %v5714_v44  ;;  %v6021_v4 = vsel %vm1216_vm7, %v9541_v17, %v9536_v20  ;;  %v9551_v13 = vunpack.i.h.bf16 %v12050_v61 }
 0x60a   : > { %8653 = vmatpush3.bf16.msra.mxu0 %v5716_v39  ;;  %8654 = vmatprep.mubr.msk.bf16.mxu0 %vm2083_vm1, %v9900_v23  ;;  %v9544_v58 = vpop.permute.xlu0 %9543 }
 0x60b   : > { %5884 = vmatprep.subr.bf16.mxu0 %v5854_v45  ;;  %8658 = vmatprep.subr.bf16.mxu1 %v11866_v28  ;;  %v9546_v33 = vunpack.i.h.bf16 %v9544_v58  ;;  %v9545_v16 = vunpack.i.l.bf16 %v9544_v58  ;;  %v6020_v45 = vsel %vm1216_vm7, %v9540_v31, %v9535_v18 }
 0x60c   : > { %8192 = vmatmul.mubr.msk.bf16.vlgmr.msra.gmra.mxu1 %vm2083_vm1, %v9900_v23  ;;  %v9559_v40 = vpop.permute.xlu1 %9558  ;;  %v6027_v51 = vpack.c.bf16 %v6021_v4, %v6020_v45 }
 0x60d   : > { %8659 = vmatpush3.bf16.msra.mxu1 %v11866_v28  ;;  %v6012_v29 = vsel %vm1216_vm7, %v9545_v16, %v9540_v31  ;;  %v6013_v50 = vsel %vm1216_vm7, %v9546_v33, %v9541_v17  ;;  %5778 = vmatprep.mubr.bf16.mxu1 %v13116_v27  ;;  %v9550_v28 = vunpack.i.l.bf16 %v12050_v61  ;;  %v6016_v9 = vsel %vm1216_vm7, %v9535_v18, %v9545_v16  ;;  %v9904_v31 = vld [vmem:[%s12954_s8 + $0x50] sm:$0xff]  }
 0x60e   : > { %v9554_v15 = vpop.permute.xlu0 %9553  ;;  %8660 = vmatprep.subr.bf16.mxu1 %v11876_v24  ;;  %v6026_v62 = vpack.c.bf16 %v6013_v50, %v6012_v29  ;;  %v6017_v34 = vsel %vm1216_vm7, %v9536_v20, %v9546_v33 }
 0x60f   : > { %v9556_v63 = vunpack.i.h.bf16 %v9554_v15  ;;  %v9555_v52 = vunpack.i.l.bf16 %v9554_v15  ;;  %v6025_v2 = vpack.c.bf16 %v6017_v34, %v6016_v9 }
 0x610   : > { %8655 = vmatmul.mubr.msk.bf16.vlgmr.msra.gmra.mxu0 %vm2083_vm1, %v9901_v7  ;;  %v9569_v53 = vpop.permute.xlu1 %9568 }
 0x611   : > { %5885 = vmatpush1.bf16.msra.mxu0 %v5853_v37  ;;  %5904 = vmatprep.mubr.bf16.mxu0 %v13116_v27  ;;  %v6018_v57 = vsel %vm1216_vm7, %v9555_v52, %v9550_v28  ;;  %v6019_v48 = vsel %vm1216_vm7, %v9556_v63, %v9551_v13  ;;  %v9571_v12 = vunpack.i.h.bf16 %v9569_v53  ;;  %v9570_v37 = vunpack.i.l.bf16 %v9569_v53 }
 0x612   : > { %5886 = vmatprep.subr.bf16.mxu0 %v5851_v25  ;;  %8661 = vmatpush3.bf16.msra.mxu1 %v11876_v24  ;;  %v12083_v38 = vpop.permute.xlu0 %9563  ;;  %v9561_v25 = vunpack.i.h.bf16 %v9559_v40  ;;  %v9560_v24 = vunpack.i.l.bf16 %v9559_v40  ;;  %v6024_v0 = vpack.c.bf16 %v6019_v48, %v6018_v57 }
 0x613   : > { %6056 = vmatprep.subr.bf16.mxu1 %v6026_v62  ;;  %v9566_v8 = vunpack.i.h.bf16 %v12083_v38  ;;  %v9565_v54 = vunpack.i.l.bf16 %v12083_v38 }
 0x614   : > { %8193 = vmatmul.mubr.msk.bf16.gmra.mxu1 %vm2083_vm1, %v9901_v7  ;;  %v12099_v6 = vpop.permute.xlu1 %9578  ;;  %v6011_v47 = vsel %vm1216_vm7, %v9561_v25, %v9556_v63  ;;  %v6010_v42 = vsel %vm1216_vm7, %v9560_v24, %v9555_v52  ;;  %v6014_v21 = vsel %vm1216_vm7, %v9550_v28, %v9560_v24  ;;  %v6015_v36 = vsel %vm1216_vm7, %v9551_v13, %v9561_v25  ;;  %v9905_v63 = vld [vmem:[%s12954_s8 + $0x58] sm:$0xff]  }
 0x615   : > { %5887 = vmatpush1.bf16.msra.mxu0 %v5850_v26  ;;  %8662 = vmatprep.mubr.msk.bf16.mxu1 %vm2083_vm1, %v9902_v11  ;;  %v6185_v32 = vsel %vm13004_vm8, %v9566_v8, %v9571_v12  ;;  %v6184_v14 = vsel %vm13004_vm8, %v9565_v54, %v9570_v37  ;;  %v6023_v35 = vpack.c.bf16 %v6011_v47, %v6010_v42  ;;  %v9581_v23 = vunpack.i.h.bf16 %v12099_v6 }
 0x616   : > { %8666 = vmatprep.subr.bf16.mxu0 %v6027_v51  ;;  %v9574_v19 = vpop.permute.xlu0 %9573  ;;  %v6198_v59 = vpack.c.bf16 %v6185_v32, %v6184_v14  ;;  %v6022_v55 = vpack.c.bf16 %v6015_v36, %v6014_v21  ;;  %v9580_v17 = vunpack.i.l.bf16 %v12099_v6 }
 0x617   : > { %v9576_v60 = vunpack.i.h.bf16 %v9574_v19  ;;  %v9575_v26 = vunpack.i.l.bf16 %v9574_v19 }
 0x618   : > { %8198 = vmatmul.mubr.msk.bf16.vlgmr.msra.gmra.mxu0 %vm2083_vm1, %v9902_v11  ;;  %v12117_v10 = vpop.permute.xlu1 %9588 }
 0x619   : > { %8667 = vmatpush3.bf16.msra.mxu0 %v6027_v51  ;;  %5914 = vmatprep.mubr.bf16.mxu0 %v13116_v27  ;;  %v6192_v5 = vsel %vm13004_vm8, %v9570_v37, %v9575_v26  ;;  %v6193_v30 = vsel %vm13004_vm8, %v9571_v12, %v9576_v60  ;;  %v9591_v43 = vunpack.i.h.bf16 %v12117_v10  ;;  %v9590_v3 = vunpack.i.l.bf16 %v12117_v10 }
 0x61a   : > { %8668 = vmatprep.subr.bf16.mxu0 %v6024_v0  ;;  %v9584_v1 = vpop.permute.xlu0 %9583  ;;  %v6199_v22 = vpack.c.bf16 %v6193_v30, %v6192_v5  ;;  %v6188_v18 = vsel %vm13004_vm8, %v9575_v26, %v9565_v54  ;;  %v6189_v7 = vsel %vm13004_vm8, %v9576_v60, %v9566_v8  ;;  %v9906_v60 = vld [vmem:[%s12954_s8 + $0x60] sm:$0xff]  }
 0x61b   : > { %v9586_v41 = vunpack.i.h.bf16 %v9584_v1  ;;  %v9585_v56 = vunpack.i.l.bf16 %v9584_v1  ;;  %v6197_v52 = vpack.c.bf16 %v6189_v7, %v6188_v18  ;;  %v6186_v24 = vsel %vm13004_vm8, %v9590_v3, %v9580_v17 }
 0x61c   : > { %8663 = vmatmul.mubr.msk.bf16.vlgmr.msra.gmra.mxu1 %vm2083_vm1, %v9903_v49  ;;  %v9599_v44 = vpop.permute.xlu1 %9598  ;;  %v6187_v6 = vsel %vm13004_vm8, %v9591_v43, %v9581_v23 }
 0x61d   : > { %6057 = vmatpush1.bf16.msra.mxu1 %v6025_v2  ;;  %8669 = vmatpush3.bf16.msra.mxu0 %v6024_v0  ;;  %v6191_v61 = vsel %vm13004_vm8, %v9586_v41, %v9591_v43  ;;  %v6190_v20 = vsel %vm13004_vm8, %v9585_v56, %v9590_v3  ;;  %v9601_v58 = vunpack.i.h.bf16 %v9599_v44  ;;  %v9600_v33 = vunpack.i.l.bf16 %v9599_v44  ;;  %v9907_v43 = vld [vmem:[%s12954_s8 + $0x68] sm:$0xff]  }
 0x61e   : > { %6058 = vmatprep.subr.bf16.mxu1 %v6023_v35  ;;  %6076 = vmatprep.mubr.bf16.mxu1 %v13116_v27  ;;  %v12132_v39 = vpop.permute.xlu0 %9593  ;;  %v6196_v4 = vpack.c.bf16 %v6191_v61, %v6190_v20  ;;  %v6182_v45 = vsel %vm13004_vm8, %v9580_v17, %v9585_v56  ;;  %v6183_v13 = vsel %vm13004_vm8, %v9581_v23, %v9586_v41 }
 0x61f   : > { %6228 = vmatprep.subr.bf16.mxu0 %v6198_v59  ;;  %v9596_v29 = vunpack.i.h.bf16 %v12132_v39  ;;  %v9595_v50 = vunpack.i.l.bf16 %v12132_v39  ;;  %v6195_v48 = vpack.c.bf16 %v6183_v13, %v6182_v45  ;;  %v6194_v0 = vpack.c.bf16 %v6187_v6, %v6186_v24  ;;  %v9908_v45 = vld [vmem:[%s12954_s8 + $0x70] sm:$0xff]  }
 0x620   : > { %8199 = vmatmul.mubr.msk.bf16.gmra.mxu0 %vm2083_vm1, %v9903_v49  ;;  %v12147_v16 = vpop.permute.xlu1 %9608 }
 0x621   : > { %6059 = vmatpush1.bf16.msra.mxu1 %v6022_v55  ;;  %8670 = vmatprep.mubr.msk.bf16.mxu0 %vm2083_vm1, %v9904_v31  ;;  %v6365_v38 = vsel %vm13003_vm9, %v9601_v58, %v9596_v29  ;;  %v6364_v57 = vsel %vm13003_vm9, %v9600_v33, %v9595_v50  ;;  %v9611_v11 = vunpack.i.h.bf16 %v12147_v16  ;;  %v9610_v54 = vunpack.i.l.bf16 %v12147_v16 }
 0x622   : > { %8674 = vmatprep.subr.bf16.mxu1 %v6199_v22  ;;  %v9604_v40 = vpop.permute.xlu0 %9603  ;;  %v6371_v34 = vpack.c.bf16 %v6365_v38, %v6364_v57 }
 0x623   : > { %v9606_v15 = vunpack.i.h.bf16 %v9604_v40  ;;  %v9605_v28 = vunpack.i.l.bf16 %v9604_v40 }
 0x624   : > { %8204 = vmatmul.mubr.msk.bf16.vlgmr.msra.gmra.mxu1 %vm2083_vm1, %v9904_v31  ;;  %v9619_v51 = vpop.permute.xlu1 %9618 }
 0x625   : > { %8675 = vmatpush3.bf16.msra.mxu1 %v6199_v22  ;;  %v6356_v62 = vsel %vm13003_vm9, %v9605_v28, %v9600_v33  ;;  %v6357_v53 = vsel %vm13003_vm9, %v9606_v15, %v9601_v58  ;;  %6086 = vmatprep.mubr.bf16.mxu1 %v13116_v27  ;;  %v9621_v10 = vunpack.i.h.bf16 %v9619_v51  ;;  %v9620_v2 = vunpack.i.l.bf16 %v9619_v51  ;;  %v9909_v51 = vld [vmem:[%s12954_s8 + $0x78] sm:$0xff]  }
 0x626   : > { %8676 = vmatprep.subr.bf16.mxu1 %v6196_v4  ;;  %v9614_v8 = vpop.permute.xlu0 %9613  ;;  %v6370_v25 = vpack.c.bf16 %v6357_v53, %v6356_v62  ;;  %v6360_v35 = vsel %vm13003_vm9, %v9595_v50, %v9605_v28  ;;  %v6361_v1 = vsel %vm13003_vm9, %v9596_v29, %v9606_v15 }
 0x627   : > { %v9616_v12 = vunpack.i.h.bf16 %v9614_v8  ;;  %v9615_v37 = vunpack.i.l.bf16 %v9614_v8  ;;  %v6369_v55 = vpack.c.bf16 %v6361_v1, %v6360_v35  ;;  %v6358_v39 = vsel %vm13003_vm9, %v9610_v54, %v9620_v2 }
 0x628   : > { %8671 = vmatmul.mubr.msk.bf16.vlgmr.msra.gmra.mxu0 %vm2083_vm1, %v9905_v63  ;;  %v9629_v9 = vpop.permute.xlu1 %9628  ;;  %v6359_v31 = vsel %vm13003_vm9, %v9611_v11, %v9621_v10 }
 0x629   : > { %6229 = vmatpush1.bf16.msra.mxu0 %v6197_v52  ;;  %8677 = vmatpush3.bf16.msra.mxu1 %v6196_v4  ;;  %v6362_v47 = vsel %vm13003_vm9, %v9615_v37, %v9610_v54  ;;  %v6363_v42 = vsel %vm13003_vm9, %v9616_v12, %v9611_v11  ;;  %v9631_v32 = vunpack.i.h.bf16 %v9629_v9  ;;  %v9630_v14 = vunpack.i.l.bf16 %v9629_v9  ;;  %v9910_v54 = vld [vmem:[%s12954_s8 + $0x80] sm:$0xff]  }
 0x62a   : > { %6230 = vmatprep.subr.bf16.mxu0 %v6195_v48  ;;  %6248 = vmatprep.mubr.bf16.mxu0 %v13116_v27  ;;  %v12178_v19 = vpop.permute.xlu0 %9623  ;;  %v6368_v5 = vpack.c.bf16 %v6363_v42, %v6362_v47  ;;  %v6355_v30 = vsel %vm13003_vm9, %v9621_v10, %v9616_v12  ;;  %v6354_v59 = vsel %vm13003_vm9, %v9620_v2, %v9615_v37  ;;  %v9911_v12 = vld [vmem:[%s12954_s8 + $0x88] sm:$0xff]  }
 0x62b   : > { %6400 = vmatprep.subr.bf16.mxu1 %v6370_v25  ;;  %v9626_v26 = vunpack.i.h.bf16 %v12178_v19  ;;  %v9625_v49 = vunpack.i.l.bf16 %v12178_v19  ;;  %v6367_v22 = vpack.c.bf16 %v6355_v30, %v6354_v59  ;;  %v6366_v29 = vpack.c.bf16 %v6359_v31, %v6358_v39 }
 0x62c   : > { %8205 = vmatmul.mubr.msk.bf16.gmra.mxu1 %vm2083_vm1, %v9905_v63  ;;  %v9639_v21 = vpop.permute.xlu1 %9638 }
 0x62d   : > { %6231 = vmatpush1.bf16.msra.mxu0 %v6194_v0  ;;  %8678 = vmatprep.mubr.msk.bf16.mxu1 %vm2083_vm1, %v9906_v60  ;;  %v6529_v3 = vsel %vm13002_vm10, %v9626_v26, %v9631_v32  ;;  %v6528_v44 = vsel %vm13002_vm10, %v9625_v49, %v9630_v14  ;;  %v9641_v40 = vunpack.i.h.bf16 %v9639_v21  ;;  %v9640_v4 = vunpack.i.l.bf16 %v9639_v21 }
 0x62e   : > { %8682 = vmatprep.subr.bf16.mxu0 %v6371_v34  ;;  %v9634_v36 = vpop.permute.xlu0 %9633  ;;  %v6542_v18 = vpack.c.bf16 %v6529_v3, %v6528_v44 }
 0x62f   : > { %v9636_v41 = vunpack.i.h.bf16 %v9634_v36  ;;  %v9635_v56 = vunpack.i.l.bf16 %v9634_v36 }
 0x630   : > { %8210 = vmatmul.mubr.msk.bf16.vlgmr.msra.gmra.mxu0 %vm2083_vm1, %v9906_v60  ;;  %v9649_v17 = vpop.permute.xlu1 %9648 }
 0x631   : > { %8683 = vmatpush3.bf16.msra.mxu0 %v6371_v34  ;;  %6258 = vmatprep.mubr.bf16.mxu0 %v13116_v27  ;;  %v6537_v61 = vsel %vm13002_vm10, %v9631_v32, %v9636_v41  ;;  %v6536_v20 = vsel %vm13002_vm10, %v9630_v14, %v9635_v56  ;;  %v9651_v16 = vunpack.i.h.bf16 %v9649_v17  ;;  %v9650_v7 = vunpack.i.l.bf16 %v9649_v17 }
 0x632   : > { %8684 = vmatprep.subr.bf16.mxu0 %v6368_v5  ;;  %v9644_v23 = vpop.permute.xlu0 %9643  ;;  %v6543_v50 = vpack.c.bf16 %v6537_v61, %v6536_v20  ;;  %v6532_v28 = vsel %vm13002_vm10, %v9635_v56, %v9625_v49  ;;  %v6533_v63 = vsel %vm13002_vm10, %v9636_v41, %v9626_v26 }
 0x633   : > { %v9646_v58 = vunpack.i.h.bf16 %v9644_v23  ;;  %v9645_v33 = vunpack.i.l.bf16 %v9644_v23  ;;  %v6541_v38 = vpack.c.bf16 %v6533_v63, %v6532_v28  ;;  %v6530_v57 = vsel %vm13002_vm10, %v9650_v7, %v9640_v4 }
 0x634   : > { %8679 = vmatmul.mubr.msk.bf16.vlgmr.msra.gmra.mxu1 %vm2083_vm1, %v9907_v43  ;;  %v6531_v48 = vsel %vm13002_vm10, %v9651_v16, %v9641_v40 }
 0x635   : > { %6401 = vmatpush1.bf16.msra.mxu1 %v6369_v55  ;;  %8685 = vmatpush3.bf16.msra.mxu0 %v6368_v5  ;;  %v6535_v13 = vsel %vm13002_vm10, %v9646_v58, %v9651_v16  ;;  %v6534_v15 = vsel %vm13002_vm10, %v9645_v33, %v9650_v7  ;;  %v6526_v62 = vsel %vm13002_vm10, %v9640_v4, %v9645_v33 }
 0x636   : > { %6402 = vmatprep.subr.bf16.mxu1 %v6367_v22  ;;  %6420 = vmatprep.mubr.bf16.mxu1 %v13116_v27  ;;  %v6540_v52 = vpack.c.bf16 %v6535_v13, %v6534_v15  ;;  %v6527_v53 = vsel %vm13002_vm10, %v9641_v40, %v9646_v58  ;;  %v6538_v8 = vpack.c.bf16 %v6531_v48, %v6530_v57 }
 0x637   : > { %6572 = vmatprep.subr.bf16.mxu0 %v6542_v18  ;;  %v6539_v11 = vpack.c.bf16 %v6527_v53, %v6526_v62 }
 0x638   : > { %8211 = vmatmul.mubr.msk.bf16.gmra.mxu0 %vm2083_vm1, %v9907_v43 }
 0x639   : > { %6403 = vmatpush1.bf16.msra.mxu1 %v6366_v29  ;;  %8686 = vmatprep.mubr.msk.bf16.mxu0 %vm2083_vm1, %v9908_v45 }
 0x63a   : > { %8690 = vmatprep.subr.bf16.mxu1 %v6543_v50 }
 0x63c   : > { %8216 = vmatmul.mubr.msk.bf16.vlgmr.msra.gmra.mxu1 %vm2083_vm1, %v9908_v45 }
 0x63d   : > { %8691 = vmatpush3.bf16.msra.mxu1 %v6543_v50  ;;  %6430 = vmatprep.mubr.bf16.mxu1 %v13116_v27 }
 0x63e   : > { %8692 = vmatprep.subr.bf16.mxu1 %v6540_v52 }
 0x640   : > { %8687 = vmatmul.mubr.msk.bf16.vlgmr.msra.gmra.mxu0 %vm2083_vm1, %v9909_v51 }
 0x641   : > { %6573 = vmatpush1.bf16.msra.mxu0 %v6541_v38  ;;  %6592 = vmatprep.mubr.bf16.mxu0 %v13116_v27 }
 0x642   : > { %6574 = vmatprep.subr.bf16.mxu0 %v6539_v11  ;;  %8693 = vmatpush3.bf16.msra.mxu1 %v6540_v52 }
 0x644   : > { %8217 = vmatmul.mubr.msk.bf16.gmra.mxu1 %vm2083_vm1, %v9909_v51 }
 0x645   : > { %6575 = vmatpush1.bf16.msra.mxu0 %v6538_v8  ;;  %8694 = vmatprep.mubr.msk.bf16.mxu1 %vm2083_vm1, %v9910_v54 }
 0x648   : > { %8222 = vmatmul.mubr.msk.bf16.vlgmr.msra.gmra.mxu0 %vm2083_vm1, %v9910_v54 }
 0x649   : > { %6602 = vmatprep.mubr.bf16.mxu0 %v13116_v27 }
 0x64c   : > { %8695 = vmatmul.mubr.msk.bf16.vlgmr.msra.gmra.mxu1 %vm2083_vm1, %v9911_v12 }
 0x64d   : > { %6883 = vmatprep.mubr.bf16.mxu1 %v13116_v27 }
 0x650   : > { %8223 = vmatmul.mubr.msk.bf16.gmra.mxu0 %vm2083_vm1, %v9911_v12 }
 0x6a8   : > { %v5320_v37 = vpop.f32.mrf.mxu0 }
 0x6aa   : > { %v5322_v25 = vpop.f32.mrf.mxu0  ;;  %v8632_v24 = vpop.f32.mrf.mxu1 }
 0x6ac   : > { %v5324_v6 = vpop.f32.mrf.mxu0  ;;  %v5373_v9 = vpop.f32.mrf.mxu1 }
 0x6ae   : > { %v5326_v34 = vpop.f32.mrf.mxu0  ;;  %v8633_v19 = vpop.f32.mrf.mxu1 }
 0x6b0   : > { %v5330_v0 = vpop.f32.mrf.mxu0  ;;  %v5376_v47 = vpop.f32.mrf.mxu1 }
 0x6b2   : > { %v5332_v42 = vpop.f32.mrf.mxu0 }
 0x6b4   : > { %v5334_v60 = vpop.f32.mrf.mxu0  ;;  %v5438_v26 = vpop.f32.mrf.mxu1 }
 0x6b5   : > { %v5439_v49 = vadd.f32 %v5438_v26, %v5320_v37 }
 0x6b6   : > { %v5336_v32 = vpop.f32.mrf.mxu0  ;;  %v5440_v14 = vpop.f32.mrf.mxu1 }
 0x6b7   : > { %v5441_v10 = vadd.f32 %v5440_v14, %v5322_v25 }
 0x6b8   : > { %v5442_v2 = vpop.f32.mrf.mxu1  ;;  %v8640_v21 = vpop.f32.mrf.mxu0 }
 0x6b9   : > { %v12259_v35 = vadd.f32 %v5442_v2, %v5324_v6  ;;  %v5500_v1 = vadd.f32 %v8640_v21, %v8632_v24 }
 0x6ba   : > { %v5444_v36 = vpop.f32.mrf.mxu1  ;;  %v5491_v5 = vpop.f32.mrf.mxu0 }
 0x6bb   : > { %v5445_v30 = vadd.f32 %v5444_v36, %v5326_v34  ;;  %v5492_v59 = vadd.f32 %v5491_v5, %v5373_v9 }
 0x6bc   : > { %v5448_v41 = vpop.f32.mrf.mxu1  ;;  %v8641_v56 = vpop.f32.mrf.mxu0 }
 0x6bd   : > { %v5449_v43 = vadd.f32 %v5448_v41, %v5330_v0  ;;  %v12261_v3 = vadd.f32 %v8641_v56, %v8633_v19 }
 0x6be   : > { %v5450_v44 = vpop.f32.mrf.mxu1  ;;  %v5494_v55 = vpop.f32.mrf.mxu0 }
 0x6bf   : > { %v5451_v39 = vadd.f32 %v5450_v44, %v5332_v42  ;;  %v5495_v22 = vadd.f32 %v5494_v55, %v5376_v47 }
 0x6c0   : > { %v5452_v23 = vpop.f32.mrf.mxu1  ;;  %v5598_v17 = vpop.f32.mrf.mxu0 }
 0x6c1   : > { %v5453_v31 = vadd.f32 %v5452_v23, %v5334_v60  ;;  %v12263_v61 = vadd.f32 %v5598_v17, %v5439_v49 }
 0x6c2   : > { %v5454_v20 = vpop.f32.mrf.mxu1  ;;  %v5600_v18 = vpop.f32.mrf.mxu0 }
 0x6c3   : > { %v5455_v58 = vadd.f32 %v5454_v20, %v5336_v32  ;;  %v5667_v33 = vadd.f32 %v5600_v18, %v5441_v10 }
 0x6c4   : > { %v12265_v16 = vpop.f32.mrf.mxu0  ;;  %v8648_v7 = vpop.f32.mrf.mxu1 }
 0x6c5   : > { %v12267_v29 = vadd.f32 %v8648_v7, %v5500_v1 }
 0x6c6   : > { %v5604_v50 = vpop.f32.mrf.mxu0  ;;  %v5651_v40 = vpop.f32.mrf.mxu1 }
 0x6c7   : > { %v5670_v4 = vadd.f32 %v5604_v50, %v5445_v30  ;;  %v12269_v45 = vadd.f32 %v5651_v40, %v5492_v59 }
 0x6c8   : > { %v5608_v13 = vpop.f32.mrf.mxu0  ;;  %v12271_v15 = vpop.f32.mrf.mxu1 }
 0x6c9   : > { %v5672_v28 = vadd.f32 %v5608_v13, %v5449_v43 }
 0x6ca   : > { %v5610_v63 = vpop.f32.mrf.mxu0  ;;  %v5654_v52 = vpop.f32.mrf.mxu1 }
 0x6cb   : > { %v5673_v62 = vadd.f32 %v5610_v63, %v5451_v39  ;;  %v12273_v53 = vadd.f32 %v5654_v52, %v5495_v22 }
 0x6cc   : > { %v5612_v51 = vpop.f32.mrf.mxu0  ;;  %v5770_v38 = vpop.f32.mrf.mxu1 }
 0x6cd   : > { %v5675_v57 = vadd.f32 %v5612_v51, %v5453_v31 }
 0x6ce   : > { %v5614_v48 = vpop.f32.mrf.mxu0  ;;  %v5772_v11 = vpop.f32.mrf.mxu1 }
 0x6cf   : > { %v12275_v8 = vadd.f32 %v5614_v48, %v5455_v58  ;;  %v12277_v54 = vadd.f32 %v5772_v11, %v5667_v33  ;;  %v5669_v11 = vadd.f32 %v12265_v16, %v12259_v35 }
 0x6d0   : > { %v5774_v12 = vpop.f32.mrf.mxu1  ;;  %v8656_v37 = vpop.f32.mrf.mxu0 }
 0x6d1   : > { %v5841_v27 = vadd.f32 %v5774_v12, %v5669_v11  ;;  %v5846_v46 = vadd.f32 %v8656_v37, %v12267_v29 }
 0x6d2   : > { %v5776_v25 = vpop.f32.mrf.mxu1  ;;  %v5823_v24 = vpop.f32.mrf.mxu0 }
 0x6d3   : > { %v12279_v6 = vadd.f32 %v5776_v25, %v5670_v4  ;;  %v5677_v25 = vadd.f32 %v12271_v15, %v12261_v3 }
 0x6d4   : > { %v5780_v9 = vpop.f32.mrf.mxu1  ;;  %v8657_v34 = vpop.f32.mrf.mxu0 }
 0x6d5   : > { %13125 = vst [vmem:[#allocation10_spill] sm:$0xff] %v12279_v6  ;;  %v12281_v19 = vadd.f32 %v5780_v9, %v5672_v28  ;;  %v5838_v9 = vadd.f32 %v5770_v38, %v12263_v61  ;;  %v12301_v61 = vpop.permute.xlu1 %6691 }
 0x6d6   : > { %v5782_v0 = vpop.f32.mrf.mxu1  ;;  %v5826_v47 = vpop.f32.mrf.mxu0 }
 0x6d7   : > { %13126 = vst [vmem:[#allocation11_spill] sm:$0xff] %v12281_v19  ;;  %v12283_v42 = vadd.f32 %v5782_v0, %v5673_v62 }
 0x6d8   : > { %v5784_v60 = vpop.f32.mrf.mxu1  ;;  %v5906_v26 = vpop.f32.mrf.mxu0 }
 0x6d9   : > { %13127 = vst [vmem:[#allocation12_spill] sm:$0xff] %v12283_v42  ;;  %v12285_v49 = vadd.f32 %v5784_v60, %v5675_v57  ;;  %v5849_v42 = vadd.f32 %v8657_v34, %v5677_v25 }
 0x6da   : > { %v5786_v32 = vpop.f32.mrf.mxu1  ;;  %v5908_v14 = vpop.f32.mrf.mxu0 }
 0x6db   : > { %13128 = vst [vmem:[#allocation13_spill] sm:$0xff] %v12285_v49  ;;  %v5840_v49 = vadd.f32 %v5823_v24, %v12269_v45  ;;  %v5848_v35 = vadd.f32 %v5786_v32, %v12275_v8  ;;  %v5975_v16 = vadd.f32 %v5908_v14, %v12277_v54 }
 0x6dc   : > { %v5910_v10 = vpop.f32.mrf.mxu0  ;;  %v8664_v2 = vpop.f32.mrf.mxu1  ;;  %v13131_v38 = vld [vmem:[#allocation10_spill] sm:$0xff] }
 0x6dd   : > { %v5977_v3 = vadd.f32 %v5910_v10, %v5841_v27  ;;  %v5982_v15 = vadd.f32 %v8664_v2, %v5846_v46 }
 0x6de   : > { %v5912_v21 = vpop.f32.mrf.mxu0  ;;  %v5959_v1 = vpop.f32.mrf.mxu1  ;;  %v13132_v29 = vld [vmem:[#allocation11_spill] sm:$0xff] }
 0x6df   : > { %v5978_v12 = vadd.f32 %v5912_v21, %v13131_v38  ;;  %v5976_v11 = vadd.f32 %v5959_v1, %v5840_v49 }
 0x6e0   : > { %v5916_v36 = vpop.f32.mrf.mxu0  ;;  %v8665_v5 = vpop.f32.mrf.mxu1 }
 0x6e1   : > { %v5980_v37 = vadd.f32 %v5916_v36, %v13132_v29  ;;  %v5985_v45 = vadd.f32 %v8665_v5, %v5849_v42  ;;  %v12307_v36 = vpop.permute.xlu0 %6686 }
 0x6e2   : > { %v5918_v30 = vpop.f32.mrf.mxu0  ;;  %v5962_v59 = vpop.f32.mrf.mxu1  ;;  %v13134_v25 = vld [vmem:[#allocation13_spill] sm:$0xff] }
 0x6e4   : > { %v5920_v41 = vpop.f32.mrf.mxu0  ;;  %v6078_v56 = vpop.f32.mrf.mxu1 }
 0x6e6   : > { %v5922_v43 = vpop.f32.mrf.mxu0  ;;  %v6080_v44 = vpop.f32.mrf.mxu1 }
 0x6e7   : > { %v5984_v32 = vadd.f32 %v5922_v43, %v5848_v35  ;;  %v6147_v54 = vadd.f32 %v6080_v44, %v5975_v16 }
 0x6e8   : > { %v6082_v55 = vpop.f32.mrf.mxu1  ;;  %v8672_v39 = vpop.f32.mrf.mxu0 }
 0x6e9   : > { %v6149_v27 = vadd.f32 %v6082_v55, %v5977_v3  ;;  %v6154_v46 = vadd.f32 %v8672_v39, %v5982_v15  ;;  %v6677_v55 = vpop.permute.xlu1 %6676 }
 0x6ea   : > { %v6084_v22 = vpop.f32.mrf.mxu1  ;;  %v6131_v23 = vpop.f32.mrf.mxu0 }
 0x6eb   : > { %v6150_v2 = vadd.f32 %v6084_v22, %v5978_v12  ;;  %v6148_v21 = vadd.f32 %v6131_v23, %v5976_v11 }
 0x6ec   : > { %v6088_v17 = vpop.f32.mrf.mxu1  ;;  %v8673_v31 = vpop.f32.mrf.mxu0 }
 0x6ed   : > { %v6152_v49 = vadd.f32 %v6088_v17, %v5980_v37  ;;  %v6157_v42 = vadd.f32 %v8673_v31, %v5985_v45 }
 0x6ee   : > { %v6090_v20 = vpop.f32.mrf.mxu1  ;;  %v6134_v18 = vpop.f32.mrf.mxu0 }
 0x6f0   : > { %v6092_v58 = vpop.f32.mrf.mxu1  ;;  %v6250_v33 = vpop.f32.mrf.mxu0 }
 0x6f2   : > { %v6094_v7 = vpop.f32.mrf.mxu1  ;;  %v6252_v50 = vpop.f32.mrf.mxu0 }
 0x6f4   : > { %v6254_v40 = vpop.f32.mrf.mxu0  ;;  %v8680_v4 = vpop.f32.mrf.mxu1 }
 0x6f5   : > { %v6321_v43 = vadd.f32 %v6254_v40, %v6149_v27  ;;  %v6326_v39 = vadd.f32 %v8680_v4, %v6154_v46 }
 0x6f6   : > { %v6256_v13 = vpop.f32.mrf.mxu0  ;;  %v6303_v28 = vpop.f32.mrf.mxu1 }
 0x6f7   : > { %v6320_v35 = vadd.f32 %v6303_v28, %v6148_v21  ;;  %v12311_v28 = vpop.permute.xlu0 %6681 }
 0x6f8   : > { %v6260_v63 = vpop.f32.mrf.mxu0  ;;  %v8681_v52 = vpop.f32.mrf.mxu1 }
 0x6f9   : > { %v6324_v22 = vadd.f32 %v6260_v63, %v6152_v49 }
 0x6fa   : > { %v6262_v62 = vpop.f32.mrf.mxu0  ;;  %v12287_v51 = vpop.f32.mrf.mxu1 }
 0x6fb   : > { %13129 = vst [vmem:[#allocation14_spill] sm:$0xff] %v12287_v51  ;;  %v5843_v51 = vadd.f32 %v5826_v47, %v12273_v53  ;;  %v13133_v53 = vld [vmem:[#allocation12_spill] sm:$0xff] }
 0x6fc   : > { %v12289_v57 = vpop.f32.mrf.mxu0  ;;  %v6422_v48 = vpop.f32.mrf.mxu1  ;;  %v5981_v47 = vadd.f32 %v5918_v30, %v13133_v53 }
 0x6fd   : > { %13130 = vst [vmem:[#allocation15_spill] sm:$0xff] %v12289_v57  ;;  %v5974_v57 = vadd.f32 %v5906_v26, %v5838_v9  ;;  %v5979_v26 = vadd.f32 %v5962_v59, %v5843_v51  ;;  %v5983_v9 = vadd.f32 %v5920_v41, %v13134_v25  ;;  %v6156_v41 = vadd.f32 %v6094_v7, %v5984_v32 }
 0x6fe   : > { %v6266_v0 = vpop.f32.mrf.mxu0  ;;  %v6424_v60 = vpop.f32.mrf.mxu1  ;;  %v6153_v5 = vadd.f32 %v6090_v20, %v5981_v47 }
 0x6ff   : > { %v6146_v8 = vadd.f32 %v6078_v56, %v5974_v57  ;;  %v6151_v38 = vadd.f32 %v6134_v18, %v5979_v26  ;;  %v6155_v30 = vadd.f32 %v6092_v58, %v5983_v9  ;;  %v6319_v56 = vadd.f32 %v6252_v50, %v6147_v54 }
 0x700   : > { %v6426_v19 = vpop.f32.mrf.mxu1  ;;  %v8688_v6 = vpop.f32.mrf.mxu0  ;;  %v6322_v57 = vadd.f32 %v6256_v13, %v6150_v2  ;;  %v6325_v16 = vadd.f32 %v6262_v62, %v6153_v5  ;;  %v6328_v12 = vadd.f32 %v6266_v0, %v6156_v41 }
 0x701   : > { %v6318_v1 = vadd.f32 %v6250_v33, %v6146_v8  ;;  %v6329_v33 = vadd.f32 %v8681_v52, %v6157_v42  ;;  %v6491_v3 = vadd.f32 %v6424_v60, %v6319_v56  ;;  %v6493_v7 = vadd.f32 %v6426_v19, %v6321_v43 }
 0x702   : > { %v6428_v24 = vpop.f32.mrf.mxu1  ;;  %v6475_v34 = vpop.f32.mrf.mxu0  ;;  %v13135_v20 = vld [vmem:[#allocation14_spill] sm:$0xff] }
 0x703   : > { %v6490_v44 = vadd.f32 %v6422_v48, %v6318_v1  ;;  %v6323_v18 = vadd.f32 %v13135_v20, %v6151_v38  ;;  %v6498_v48 = vadd.f32 %v8688_v6, %v6326_v39  ;;  %v6494_v11 = vadd.f32 %v6428_v24, %v6322_v57 }
 0x704   : > { %v6432_v14 = vpop.f32.mrf.mxu1  ;;  %v8689_v10 = vpop.f32.mrf.mxu0  ;;  %v13136_v58 = vld [vmem:[#allocation15_spill] sm:$0xff]  ;;  %v6492_v63 = vadd.f32 %v6475_v34, %v6320_v35 }
 0x705   : > { %v6327_v15 = vadd.f32 %v13136_v58, %v6155_v30  ;;  %v6496_v29 = vadd.f32 %v6432_v14, %v6324_v22  ;;  %v6501_v52 = vadd.f32 %v8689_v10, %v6329_v33 }
 0x706   : > { %v6434_v59 = vpop.f32.mrf.mxu1  ;;  %v6478_v51 = vpop.f32.mrf.mxu0 }
 0x707   : > { %v6497_v62 = vadd.f32 %v6434_v59, %v6325_v16  ;;  %v6495_v0 = vadd.f32 %v6478_v51, %v6323_v18 }
 0x708   : > { %v6436_v23 = vpop.f32.mrf.mxu1  ;;  %v6594_v17 = vpop.f32.mrf.mxu0 }
 0x709   : > { %v6662_v31 = vadd.f32 %v6594_v17, %v6490_v44  ;;  %v6499_v19 = vadd.f32 %v6436_v23, %v6327_v15 }
 0x70a   : > { %v6438_v50 = vpop.f32.mrf.mxu1  ;;  %v6596_v40 = vpop.f32.mrf.mxu0 }
 0x70b   : > { %v6694_v4 = vadd.f32 %v6677_v55, %v6662_v31  ;;  %v6663_v13 = vadd.f32 %v6596_v40, %v6491_v3  ;;  %v6500_v26 = vadd.f32 %v6438_v50, %v6328_v12 }
 0x70c   : > { %v6598_v60 = vpop.f32.mrf.mxu0  ;;  %v8696_v37 = vpop.f32.mrf.mxu1 }
 0x70d   : > { %vm6706_vm0 = vcmp.ge.f32.partialorder %v6694_v4, 0.0  ;;  %v6718_v45 = vmul.f32 0.1, %v6694_v4  ;;  %v6695_v53 = vadd.f32 %v6677_v55, %v6663_v13  ;;  %v6665_v47 = vadd.f32 %v6598_v60, %v6493_v7 }
 0x70e   : > { %v6670_v25 = vadd.f32 %v8696_v37, %v6498_v48  ;;  %v6600_v6 = vpop.f32.mrf.mxu0  ;;  %v6647_v24 = vpop.f32.mrf.mxu1 }
 0x70f   : > { %v12313_v9 = vsel %vm6706_vm0, %v6694_v4, %v6718_v45  ;;  %vm6707_vm10 = vcmp.ge.f32.partialorder %v6695_v53, 0.0  ;;  %v6719_v8 = vmul.f32 0.1, %v6695_v53  ;;  %v6697_v34 = vadd.f32 %v12311_v28, %v6665_v47 }
 0x710   : > { %v6742_v54 = vsel %vm1899_vm12, %v12313_v9, 0.0  ;;  %v6702_v27 = vadd.f32 %v12307_v36, %v6670_v25  ;;  %v6666_v46 = vadd.f32 %v6600_v6, %v6494_v11  ;;  %v6664_v14 = vadd.f32 %v6647_v24, %v6492_v63  ;;  %v6604_v10 = vpop.f32.mrf.mxu0  ;;  %v8697_v2 = vpop.f32.mrf.mxu1 }
 0x711   : > { %v12320_v21 = vsel %vm6707_vm10, %v6695_v53, %v6719_v8  ;;  %vm6709_vm9 = vcmp.ge.f32.partialorder %v6697_v34, 0.0  ;;  %v6721_v49 = vmul.f32 0.1, %v6697_v34  ;;  %v6668_v1 = vadd.f32 %v6604_v10, %v6496_v29 }
 0x712   : > { %v6743_v5 = vsel %vm1900_vm14, %v12320_v21, 0.0  ;;  %vm6714_vm0 = vcmp.ge.f32.partialorder %v6702_v27, 0.0  ;;  %v6726_v38 = vmul.f32 0.1, %v6702_v27  ;;  %v6698_v30 = vadd.f32 %v12311_v28, %v6666_v46  ;;  %v6606_v59 = vpop.f32.mrf.mxu0  ;;  %v6650_v35 = vpop.f32.mrf.mxu1 }
 0x713   : > { %v12326_v51 = vsel %vm6709_vm9, %v6697_v34, %v6721_v49  ;;  %v6696_v41 = vadd.f32 %v6677_v55, %v6664_v14  ;;  %v6700_v56 = vadd.f32 %v12307_v36, %v6668_v1  ;;  %v6673_v43 = vadd.f32 %v8697_v2, %v6501_v52 }
 0x714   : > { %v12329_v44 = vsel %vm6714_vm0, %v6702_v27, %v6726_v38  ;;  %v6745_v39 = vsel %vm1899_vm12, %v12326_v51, 0.0  ;;  %vm6710_vm10 = vcmp.ge.f32.partialorder %v6698_v30, 0.0  ;;  %v6722_v57 = vmul.f32 0.1, %v6698_v30  ;;  %v6608_v22 = vpop.f32.mrf.mxu0  ;;  %v6763_v38 = vld [vmem:[%s12957_s11] sm:$0x7] }
 0x715   : > { %v6750_v17 = vsel %vm1901_vm13, %v12329_v44, 0.0  ;;  %vm6708_vm9 = vcmp.ge.f32.partialorder %v6696_v41, 0.0  ;;  %v6720_v33 = vmul.f32 0.1, %v6696_v41  ;;  %vm6712_vm8 = vcmp.ge.f32.partialorder %v6700_v56, 0.0 }
 0x716   : > { %v12337_v55 = vsel %vm6710_vm10, %v6698_v30, %v6722_v57  ;;  %v6724_v16 = vmul.f32 0.1, %v6700_v56  ;;  %v6705_v3 = vadd.f32 %v12301_v61, %v6673_v43  ;;  %v6669_v31 = vadd.f32 %v6606_v59, %v6497_v62  ;;  %v6610_v12 = vpop.f32.mrf.mxu0 }
 0x717   : > { %v6746_v20 = vsel %vm1900_vm14, %v12337_v55, 0.0  ;;  %v12343_v18 = vsel %vm6708_vm9, %v6696_v41, %v6720_v33  ;;  %v6667_v58 = vadd.f32 %v6650_v35, %v6495_v0  ;;  %v6671_v15 = vadd.f32 %v6608_v22, %v6499_v19 }
 0x718   : > { %v6744_v7 = vsel %vm1901_vm13, %v12343_v18, 0.0  ;;  %v12348_v50 = vsel %vm6712_vm8, %v6700_v56, %v6724_v16  ;;  %vm6717_vm0 = vcmp.ge.f32.partialorder %v6705_v3, 0.0  ;;  %v6729_v40 = vmul.f32 0.1, %v6705_v3 }
 0x719   : > { %v6748_v48 = vsel %vm1899_vm12, %v12348_v50, 0.0  ;;  %v6701_v11 = vadd.f32 %v12307_v36, %v6669_v31  ;;  %v6699_v4 = vadd.f32 %v12311_v28, %v6667_v58  ;;  %v6703_v13 = vadd.f32 %v12301_v61, %v6671_v15 }
 0x71a   : > { %v12356_v63 = vsel %vm6717_vm0, %v6705_v3, %v6729_v40  ;;  %v6672_v29 = vadd.f32 %v6610_v12, %v6500_v26  ;;  %v12358_v52 = vpack.i.bf16 %v6745_v39, %v6742_v54  ;;  %v9684_v24 = vpack.i.bf16 %v6746_v20, %v6743_v5  ;;  %v13140_v40 = vld [vmem:[#allocation6_spill] sm:$0xff] }
 0x71b   : > { %v6753_v62 = vsel %vm1901_vm13, %v12356_v63, 0.0  ;;  %vm6713_vm8 = vcmp.ge.f32.partialorder %v6701_v11, 0.0  ;;  %v6725_v60 = vmul.f32 0.1, %v6701_v11  ;;  %vm6711_vm10 = vcmp.ge.f32.partialorder %v6699_v4, 0.0 }
 0x71c   : > { %v6723_v37 = vmul.f32 0.1, %v6699_v4  ;;  %vm6715_vm9 = vcmp.ge.f32.partialorder %v6703_v13, 0.0  ;;  %v6727_v45 = vmul.f32 0.1, %v6703_v13  ;;  %v6704_v36 = vadd.f32 %v12301_v61, %v6672_v29  ;;  %9660 = vrot.lane.b32.xlu0 %v12358_v52, %s9962_s23 }
 0x71d   : > { %v12366_v28 = vsel %vm6713_vm8, %v6701_v11, %v6725_v60  ;;  %v12368_v53 = vpack.i.bf16 %v6753_v62, %v6750_v17  ;;  %v8248_v46 = vpack.c.bf16 %v12356_v63, %v12329_v44  ;;  %v9980_v2 = vmov 0.0  }
 0x71e   : > { %v6749_v47 = vsel %vm1900_vm14, %v12366_v28, 0.0  ;;  %v12373_v0 = vsel %vm6711_vm10, %v6699_v4, %v6723_v37  ;;  %v12375_v19 = vsel %vm6715_vm9, %v6703_v13, %v6727_v45  ;;  %vm6716_vm0 = vcmp.ge.f32.partialorder %v6704_v36, 0.0  ;;  %8698 = vmatprep.subr.bf16.mxu0 %v9980_v2 }
 0x71f   : > { %v6747_v61 = vsel %vm1901_vm13, %v12373_v0, 0.0  ;;  %v6751_v26 = vsel %vm1899_vm12, %v12375_v19, 0.0  ;;  %v6728_v25 = vmul.f32 0.1, %v6704_v36  ;;  %9655 = vrot.lane.b32.xlu1 %v12368_v53, %s9962_s23  ;;  %v8251_v14 = vpack.c.bf16 %v12373_v0, %v12343_v18 }
 0x720   : > { %9670 = vrot.lane.b32.xlu0 %v12358_v52, %s13117_s29  ;;  %v9689_v6 = vpack.i.bf16 %v6747_v61, %v6744_v7  ;;  %v9709_v34 = vpack.i.bf16 %v6751_v26, %v6748_v48  ;;  %v8238_v49 = vpack.c.bf16 %v12375_v19, %v12348_v50  ;;  %v8241_v1 = vpack.c.bf16 %v12337_v55, %v12320_v21 }
 0x721   : > { %v12387_v8 = vsel %vm6716_vm0, %v6704_v36, %v6728_v25  ;;  %v8244_v5 = vpack.c.bf16 %v12326_v51, %v12313_v9  ;;  %vm9981_vm8 = vmmov 0   ;;  %vm13153_vm10 = vcmp.lt.s32.totalorder %v13140_v40, 110 }
 0x722   : > { %v6752_v54 = vsel %vm1900_vm14, %v12387_v8, 0.0  ;;  %v8235_v10 = vpack.c.bf16 %v12387_v8, %v12366_v28  ;;  %8702 = vmatprep.mubr.msk.bf16.mxu0 %vm9981_vm8, %v9980_v2  ;;  %vm13154_vm9 = vmmov %vm13153_vm10 }
 0x723   : > { %9665 = vrot.lane.b32.xlu1 %v12368_v53, %s13117_s29  ;;  %v9724_v27 = vpack.i.bf16 %v6752_v54, %v6749_v47 }
 0x724   : > { %9680 = vrot.lane.b32.xlu0 %v12358_v52, %s13118_s30 }
 0x727   : > { %9675 = vrot.lane.b32.xlu1 %v12368_v53, %s13118_s30 }
 0x728   : > { %9690 = vrot.lane.b32.xlu0 %v9689_v6, %s9962_s23 }
 0x72b   : > { %9685 = vrot.lane.b32.xlu1 %v9684_v24, %s9962_s23 }
 0x72c   : > { %9700 = vrot.lane.b32.xlu0 %v9689_v6, %s13117_s29 }
 0x72f   : > { %9695 = vrot.lane.b32.xlu1 %v9684_v24, %s13117_s29 }
 0x730   : > { %9725 = vrot.lane.b32.xlu0 %v9724_v27, %s9962_s23 }
 0x733   : > { %9705 = vrot.lane.b32.xlu1 %v9684_v24, %s13118_s30 }
 0x734   : > { %9730 = vrot.lane.b32.xlu0 %v9689_v6, %s13118_s30 }
 0x737   : > { %9710 = vrot.lane.b32.xlu1 %v9709_v34, %s9962_s23 }
 0x738   : > { %9745 = vrot.lane.b32.xlu0 %v9724_v27, %s13117_s29 }
 0x73b   : > { %9715 = vrot.lane.b32.xlu1 %v9709_v34, %s13117_s29 }
 0x73c   : > { %9750 = vrot.lane.b32.xlu0 %v12358_v52, %s13119_s17 }
 0x73f   : > { %9720 = vrot.lane.b32.xlu1 %v9709_v34, %s13118_s30 }
 0x740   : > { %9760 = vrot.lane.b32.xlu0 %v9724_v27, %s13118_s30 }
 0x743   : > { %9735 = vrot.lane.b32.xlu1 %v9709_v34, %s13119_s17 }
 0x744   : > { %9765 = vrot.lane.b32.xlu0 %v9689_v6, %s13119_s17 }
 0x747   : > { %9740 = vrot.lane.b32.xlu1 %v12368_v53, %s13119_s17 }
 0x748   : > { %9770 = vrot.lane.b32.xlu0 %v9724_v27, %s13119_s17 }
 0x74b   : > { %9755 = vrot.lane.b32.xlu1 %v9684_v24, %s13119_s17 }
 0x74c   : > { %9775 = vrot.lane.b32.xlu0 %v12368_v53, %s13120_s18 }
 0x74f   : > { %9780 = vrot.lane.b32.xlu1 %v9709_v34, %s13120_s18 }
 0x750   : > { %9785 = vrot.lane.b32.xlu0 %v9684_v24, %s13120_s18 }
 0x753   : > { %9790 = vrot.lane.b32.xlu1 %v9689_v6, %s13120_s18 }
 0x754   : > { %9795 = vrot.lane.b32.xlu0 %v12358_v52, %s13120_s18 }
 0x757   : > { %9805 = vrot.lane.b32.xlu1 %v9709_v34, %s13121_s14 }
 0x758   : > { %9800 = vrot.lane.b32.xlu0 %v12368_v53, %s13121_s14 }
 0x75b   : > { %9815 = vrot.lane.b32.xlu1 %v9689_v6, %s13121_s14 }
 0x75c   : > { %9810 = vrot.lane.b32.xlu0 %v9684_v24, %s13121_s14 }
 0x75f   : > { %9830 = vrot.lane.b32.xlu1 %v9724_v27, %s13120_s18 }
 0x760   : > { %9820 = vrot.lane.b32.xlu0 %v12358_v52, %s13121_s14 }
 0x763   : > { %9835 = vrot.lane.b32.xlu1 %v9709_v34, %s13122_s15 }
 0x764   : > { %9825 = vrot.lane.b32.xlu0 %v12368_v53, %s13122_s15 }
 0x767   : > { %9845 = vrot.lane.b32.xlu1 %v9724_v27, %s13121_s14 }
 0x768   : > { %9840 = vrot.lane.b32.xlu0 %v9684_v24, %s13122_s15 }
 0x76b   : > { %9850 = vrot.lane.b32.xlu1 %v9689_v6, %s13122_s15 }
 0x76c   : > { %9855 = vrot.lane.b32.xlu0 %v12358_v52, %s13122_s15 }
 0x76f   : > { %9865 = vrot.lane.b32.xlu1 %v9724_v27, %s13122_s15 }
 0x770   : > { %9860 = vrot.lane.b32.xlu0 %v12368_v53, %s13123_s16 }
 0x773   : > { %9870 = vrot.lane.b32.xlu1 %v9709_v34, %s13123_s16 }
 0x774   : > { %9875 = vrot.lane.b32.xlu0 %v9684_v24, %s13123_s16 }
 0x777   : > { %9880 = vrot.lane.b32.xlu1 %v9724_v27, %s13123_s16 }
 0x778   : > { %9890 = vrot.lane.b32.xlu0 %v12358_v52, %s13123_s16 }
 0x77b   : > { %9885 = vrot.lane.b32.xlu1 %v9689_v6, %s13123_s16 }
 0x77f   : > { %7885 = vperm.xlu1 %9653, %v6763_v38  }
 0x78e   : > { %v9661_v30 = vpop.permute.xlu0 %9660 }
 0x78f   : > { %v9663_v52 = vunpack.i.h.bf16 %v9661_v30  ;;  %v9662_v37 = vunpack.i.l.bf16 %v9661_v30 }
 0x791   : > { %v9656_v59 = vpop.permute.xlu1 %9655 }
 0x792   : > { %v12468_v41 = vpop.permute.xlu0 %9670  ;;  %v9658_v33 = vunpack.i.h.bf16 %v9656_v59  ;;  %v9657_v16 = vunpack.i.l.bf16 %v9656_v59 }
 0x795   : > { %v12470_v56 = vpop.permute.xlu1 %9665 }
 0x796   : > { %v12472_v43 = vpop.permute.xlu0 %9680  ;;  %v9668_v45 = vunpack.i.h.bf16 %v12470_v56  ;;  %v9667_v36 = vunpack.i.l.bf16 %v12470_v56 }
 0x799   : > { %v12474_v39 = vpop.permute.xlu1 %9675 }
 0x79a   : > { %v9691_v57 = vpop.permute.xlu0 %9690 }
 0x79b   : > { %v9693_v12 = vunpack.i.h.bf16 %v9691_v57  ;;  %v9692_v7 = vunpack.i.l.bf16 %v9691_v57 }
 0x79d   : > { %v9686_v35 = vpop.permute.xlu1 %9685  ;;  %v12496_v53 = vsel %vm498_vm2, %v9693_v12, %v9663_v52 }
 0x79e   : > { %v12476_v22 = vpop.permute.xlu0 %9700  ;;  %v9688_v31 = vunpack.i.h.bf16 %v9686_v35  ;;  %v9687_v20 = vunpack.i.l.bf16 %v9686_v35 }
 0x79f   : > { %v9703_v61 = vunpack.i.h.bf16 %v12476_v22  ;;  %v9702_v26 = vunpack.i.l.bf16 %v12476_v22 }
 0x7a0   : > { %v6830_v62 = vsel %vm498_vm2, %v9687_v20, %v9692_v7  ;;  %v6831_v60 = vsel %vm498_vm2, %v9688_v31, %v9693_v12  ;;  %v6835_v47 = vsel %vm498_vm2, %v9663_v52, %v9688_v31  ;;  %v6834_v6 = vsel %vm498_vm2, %v9662_v37, %v9687_v20  ;;  %v6755_v12 = vld [vmem:[%s12956_s10 + $0x2] sm:$0x3] }
 0x7a1   : > { %v12478_v17 = vpop.permute.xlu1 %9695  ;;  %v6844_v24 = vpack.c.bf16 %v6831_v60, %v6830_v62 }
 0x7a2   : > { %v9726_v3 = vpop.permute.xlu0 %9725  ;;  %v9698_v38 = vunpack.i.h.bf16 %v12478_v17  ;;  %v9697_v30 = vunpack.i.l.bf16 %v12478_v17 }
 0x7a3   : > { %v9728_v58 = vunpack.i.h.bf16 %v9726_v3  ;;  %v9727_v15 = vunpack.i.l.bf16 %v9726_v3 }
 0x7a4   : > { %v6788_v60 = vsel %vm485_vm3, %v9697_v30, %v9702_v26 }
 0x7a5   : > { %v6833_v48 = vsel %vm498_vm2, %v9728_v58, %v9658_v33  ;;  %v6832_v11 = vsel %vm498_vm2, %v9727_v15, %v9657_v16  ;;  %v12484_v4 = vpop.permute.xlu1 %9705 }
 0x7a6   : > { %v6847_v13 = vpack.c.bf16 %v6833_v48, %v6832_v11  ;;  %v12486_v29 = vpop.permute.xlu0 %9730  ;;  %v6838_v48 = vsel %vm498_vm2, %v9692_v7, %v9662_v37  ;;  %v9673_v7 = vunpack.i.h.bf16 %v12468_v41  ;;  %v9672_v37 = vunpack.i.l.bf16 %v12468_v41 }
 0x7a8   : > { %8699 = vmatpush3.bf16.msra.mxu0 %v6847_v13  ;;  %v6793_v41 = vsel %vm485_vm3, %v9673_v7, %v9698_v38 }
 0x7a9   : > { %v9711_v25 = vpop.permute.xlu1 %9710  ;;  %8700 = vmatprep.subr.bf16.mxu0 %v9980_v2 }
 0x7aa   : > { %v9713_v34 = vunpack.i.h.bf16 %v9711_v25  ;;  %v9712_v54 = vunpack.i.l.bf16 %v9711_v25  ;;  %v9746_v27 = vpop.permute.xlu0 %9745  ;;  %v6789_v25 = vsel %vm485_vm3, %v9698_v38, %v9703_v61 }
 0x7ab   : > { %v9748_v59 = vunpack.i.h.bf16 %v9746_v27  ;;  %v9747_v57 = vunpack.i.l.bf16 %v9746_v27  ;;  %v6842_v27 = vpack.c.bf16 %v12496_v53, %v6838_v48  ;;  %v9733_v53 = vunpack.i.h.bf16 %v12486_v29 }
 0x7ac   : > { %v6841_v35 = vsel %vm498_vm2, %v9658_v33, %v9713_v34  ;;  %v6836_v3 = vsel %vm498_vm2, %v9712_v54, %v9727_v15  ;;  %v6837_v31 = vsel %vm498_vm2, %v9713_v34, %v9728_v58  ;;  %v6840_v20 = vsel %vm498_vm2, %v9657_v16, %v9712_v54  ;;  %8701 = vmatpush3.bf16.msra.mxu0 %v6844_v24 }
 0x7ad   : > { %v6845_v17 = vpack.c.bf16 %v6841_v35, %v6840_v20  ;;  %v6791_v33 = vsel %vm485_vm3, %v9748_v59, %v9668_v45  ;;  %v6790_v15 = vsel %vm485_vm3, %v9747_v57, %v9667_v36  ;;  %v9716_v58 = vpop.permute.xlu1 %9715  ;;  %8706 = vmatprep.subr.bf16.mxu0 %v9980_v2  ;;  %v6846_v16 = vpack.c.bf16 %v6837_v31, %v6836_v3 }
 0x7ae   : > { %v6805_v11 = vpack.c.bf16 %v6791_v33, %v6790_v15  ;;  %v9718_v13 = vunpack.i.h.bf16 %v9716_v58  ;;  %v9717_v52 = vunpack.i.l.bf16 %v9716_v58  ;;  %v12529_v62 = vpop.permute.xlu0 %9750  ;;  %v9678_v24 = vunpack.i.h.bf16 %v12474_v39 }
 0x7af   : > { %8703 = vmatmul.mubr.msk.bf16.vlgmr.msra.gmra.mxu0 %vm2083_vm1, %v6755_v12  ;;  %6863 = vmatprep.subr.bf16.mxu1 %v6846_v16  ;;  %v6843_v34 = vpack.c.bf16 %v6835_v47, %v6834_v6  ;;  %v9677_v54 = vunpack.i.l.bf16 %v12474_v39  ;;  %v6802_v20 = vpack.c.bf16 %v6789_v25, %v6788_v60  ;;  %v9708_v47 = vunpack.i.h.bf16 %v12484_v4  ;;  %v12571_v16 = vld [vmem:[%s12956_s10] sm:$0x3] }
 0x7b0   : > { %8707 = vmatpush3.bf16.msra.mxu0 %v6805_v11  ;;  %v6794_v35 = vsel %vm485_vm3, %v9717_v52, %v9747_v57  ;;  %v6795_v3 = vsel %vm485_vm3, %v9718_v13, %v9748_v59  ;;  %6864 = vmatpush1.bf16.msra.mxu1 %v6845_v17  ;;  %v9707_v6 = vunpack.i.l.bf16 %v12484_v4  ;;  %v9732_v59 = vunpack.i.l.bf16 %v12486_v29 }
 0x7b1   : > { %v9721_v31 = vpop.permute.xlu1 %9720  ;;  %8708 = vmatprep.subr.bf16.mxu0 %v9980_v2  ;;  %6865 = vmatprep.subr.bf16.mxu1 %v6843_v34  ;;  %v6792_v15 = vsel %vm485_vm3, %v9672_v37, %v9697_v30  ;;  %v6799_v38 = vsel %vm485_vm3, %v9668_v45, %v9718_v13  ;;  %v6798_v4 = vsel %vm485_vm3, %v9667_v36, %v9717_v52  ;;  %vm13145_vm2 = vcmp.lt.s32.totalorder %v13140_v40, 111 }
 0x7b2   : > { %v9761_v33 = vpop.permute.xlu0 %9760  ;;  %8710 = vmatprep.mubr.msk.bf16.mxu0 %vm9981_vm8, %v9980_v2  ;;  %v6804_v58 = vpack.c.bf16 %v6795_v3, %v6794_v35  ;;  %v9723_v48 = vunpack.i.h.bf16 %v9721_v31  ;;  %v9722_v11 = vunpack.i.l.bf16 %v9721_v31  ;;  %v7041_v52 = vsel %vm770_vm5, %v9708_v47, %v9733_v53  ;;  %vm13155_vm0 = vmmov %vm13145_vm2 }
 0x7b3   : > { %v9763_v57 = vunpack.i.h.bf16 %v9761_v33  ;;  %v9762_v17 = vunpack.i.l.bf16 %v9761_v33  ;;  %v7040_v60 = vsel %vm770_vm5, %v9707_v6, %v9732_v59  ;;  %v6803_v25 = vpack.c.bf16 %v6799_v38, %v6798_v4 }
 0x7b4   : > { %8709 = vmatpush3.bf16.msra.mxu0 %v6802_v20  ;;  %6866 = vmatpush1.bf16.msra.mxu1 %v6842_v27  ;;  %v6797_v34 = vsel %vm485_vm3, %v9703_v61, %v9673_v7  ;;  %v6796_v27 = vsel %vm485_vm3, %v9702_v26, %v9672_v37  ;;  %v6801_v35 = vpack.c.bf16 %v6793_v41, %v6792_v15  ;;  %v9683_v61 = vunpack.i.h.bf16 %v12472_v43  ;;  %vm13146_vm3 = vmmov %vm13145_vm2 }
 0x7b5   : > { %v7043_v30 = vsel %vm770_vm5, %v9763_v57, %v9678_v24  ;;  %v7042_v56 = vsel %vm770_vm5, %v9762_v17, %v9677_v54  ;;  %v12581_v45 = vpop.permute.xlu1 %9735  ;;  %6947 = vmatprep.subr.bf16.mxu1 %v6804_v58  ;;  %8714 = vmatprep.subr.bf16.mxu0 %v9980_v2  ;;  %v7047_v3 = vsel %vm770_vm5, %v9723_v48, %v9763_v57  ;;  %v6756_v58 = vld [vmem:[%s12956_s10 + $0x4] sm:$0x3] }
 0x7b6   : > { %v7057_v36 = vpack.c.bf16 %v7043_v30, %v7042_v56  ;;  %v12583_v13 = vpop.permute.xlu0 %9765  ;;  %v7046_v31 = vsel %vm770_vm5, %v9722_v11, %v9762_v17  ;;  %v7054_v22 = vpack.c.bf16 %v7041_v52, %v7040_v60  ;;  %v6800_v37 = vpack.c.bf16 %v6797_v34, %v6796_v27 }
 0x7b7   : > { %8711 = vmatmul.mubr.msk.bf16.vlgmr.msra.gmra.mxu0 %vm2083_vm1, %v12571_v16  ;;  %8226 = vmatmul.mubr.msk.bf16.vlgmr.msra.gmra.mxu1 %vm2083_vm1, %v6755_v12  ;;  %v9682_v12 = vunpack.i.l.bf16 %v12472_v43  ;;  %v13141_v17 = vmov 0   ;;  %v7045_v15 = vsel %vm770_vm5, %v9683_v61, %v9708_v47  ;;  %v7051_v38 = vsel %vm770_vm5, %v9678_v24, %v9723_v48 }
 0x7b8   : > { %8715 = vmatpush3.bf16.msra.mxu0 %v7057_v36  ;;  %6948 = vmatpush1.bf16.msra.mxu1 %v6803_v25  ;;  %v7050_v4 = vsel %vm770_vm5, %v9677_v54, %v9722_v11  ;;  %v7056_v43 = vpack.c.bf16 %v7047_v3, %v7046_v31  ;;  %v9768_v47 = vunpack.i.h.bf16 %v12583_v13  ;;  %v9767_v54 = vunpack.i.l.bf16 %v12583_v13 }
 0x7b9   : > { %v9741_v20 = vpop.permute.xlu1 %9740  ;;  %8716 = vmatprep.subr.bf16.mxu0 %v9980_v2  ;;  %6949 = vmatprep.subr.bf16.mxu1 %v6801_v35  ;;  %v7044_v30 = vsel %vm770_vm5, %v9682_v12, %v9707_v6  ;;  %v7049_v6 = vsel %vm770_vm5, %v9733_v53, %v9683_v61  ;;  %v7055_v60 = vpack.c.bf16 %v7051_v38, %v7050_v4  ;;  %v9738_v25 = vunpack.i.h.bf16 %v12581_v45 }
 0x7ba   : > { %v9743_v7 = vunpack.i.h.bf16 %v9741_v20  ;;  %v9742_v33 = vunpack.i.l.bf16 %v9741_v20  ;;  %v9771_v26 = vpop.permute.xlu0 %9770  ;;  %8718 = vmatprep.mubr.msk.bf16.mxu0 %vm9981_vm8, %v9980_v2  ;;  %6967 = vmatprep.mubr.bf16.mxu1 %v13141_v17  ;;  %v9737_v34 = vunpack.i.l.bf16 %v12581_v45  ;;  %v7048_v13 = vsel %vm770_vm5, %v9732_v59, %v9682_v12  ;;  %vm13147_vm5 = vmmov %vm13145_vm2 }
 0x7bb   : > { %v9773_v41 = vunpack.i.h.bf16 %v9771_v26  ;;  %v9772_v57 = vunpack.i.l.bf16 %v9771_v26  ;;  %v7053_v53 = vpack.c.bf16 %v7045_v15, %v7044_v30  ;;  %v7052_v20 = vpack.c.bf16 %v7049_v6, %v7048_v13  ;;  %v6758_v6 = vld [vmem:[%s12956_s10 + $0x8] sm:$0x3] }
 0x7bc   : > { %8717 = vmatpush3.bf16.msra.mxu0 %v7054_v22  ;;  %6950 = vmatpush1.bf16.msra.mxu1 %v6800_v37  ;;  %v9752_v61 = vunpack.i.l.bf16 %v12529_v62  ;;  %v7179_v26 = vsel %vm922_vm6, %v9742_v33, %v9737_v34  ;;  %v7180_v12 = vsel %vm922_vm6, %v9743_v7, %v9738_v25 }
 0x7bd   : > { %v7172_v56 = vsel %vm922_vm6, %v9773_v41, %v9743_v7  ;;  %v7171_v39 = vsel %vm922_vm6, %v9772_v57, %v9742_v33  ;;  %v9756_v24 = vpop.permute.xlu1 %9755  ;;  %7073 = vmatprep.subr.bf16.mxu1 %v7056_v43  ;;  %8722 = vmatprep.subr.bf16.mxu0 %v9980_v2  ;;  %v7176_v45 = vsel %vm922_vm6, %v9738_v25, %v9773_v41  ;;  %v6757_v41 = vld [vmem:[%s12956_s10 + $0x6] sm:$0x3] }
 0x7be   : > { %v7186_v48 = vpack.c.bf16 %v7172_v56, %v7171_v39  ;;  %v9758_v11 = vunpack.i.h.bf16 %v9756_v24  ;;  %v9757_v36 = vunpack.i.l.bf16 %v9756_v24  ;;  %v12636_v52 = vpop.permute.xlu0 %9775  ;;  %v7175_v3 = vsel %vm922_vm6, %v9737_v34, %v9772_v57 }
 0x7bf   : > { %8719 = vmatmul.mubr.msk.bf16.vlgmr.msra.gmra.mxu0 %vm2083_vm1, %v6756_v58  ;;  %8228 = vmatmul.mubr.msk.bf16.vlgmr.msra.gmra.mxu1 %vm2083_vm1, %v12571_v16  ;;  %v9753_v16 = vunpack.i.h.bf16 %v12529_v62  ;;  %v7185_v22 = vpack.c.bf16 %v7176_v45, %v7175_v3  ;;  %v7177_v38 = vsel %vm922_vm6, %v9767_v54, %v9752_v61  ;;  %v7184_v43 = vpack.c.bf16 %v7180_v12, %v7179_v26  ;;  %v12792_v26 = vld [vmem:[%s12956_s10 + $0xa] sm:$0x3] }
 0x7c0   : > { %v7169_v27 = vsel %vm922_vm6, %v9757_v36, %v9767_v54  ;;  %v7170_v35 = vsel %vm922_vm6, %v9758_v11, %v9768_v47  ;;  %8723 = vmatpush3.bf16.msra.mxu0 %v7186_v48  ;;  %7074 = vmatpush1.bf16.msra.mxu1 %v7055_v60  ;;  %v7173_v57 = vsel %vm922_vm6, %v9752_v61, %v9757_v36  ;;  %v9778_v30 = vunpack.i.h.bf16 %v12636_v52 }
 0x7c1   : > { %v7183_v29 = vpack.c.bf16 %v7170_v35, %v7169_v27  ;;  %v12660_v59 = vpop.permute.xlu1 %9780  ;;  %7075 = vmatprep.subr.bf16.mxu1 %v7053_v53  ;;  %8724 = vmatprep.subr.bf16.mxu0 %v9980_v2  ;;  %v7174_v62 = vsel %vm922_vm6, %v9753_v16, %v9758_v11  ;;  %v7178_v4 = vsel %vm922_vm6, %v9768_v47, %v9753_v16  ;;  %v9777_v56 = vunpack.i.l.bf16 %v12636_v52  ;;  %vm13148_vm6 = vmmov %vm13145_vm2 }
 0x7c2   : > { %v12662_v31 = vpop.permute.xlu0 %9785  ;;  %8726 = vmatprep.mubr.msk.bf16.mxu0 %vm9981_vm8, %v9980_v2  ;;  %7093 = vmatprep.mubr.bf16.mxu1 %v13141_v17  ;;  %v9783_v7 = vunpack.i.h.bf16 %v12660_v59  ;;  %v9782_v33 = vunpack.i.l.bf16 %v12660_v59  ;;  %v7182_v54 = vpack.c.bf16 %v7174_v62, %v7173_v57  ;;  %v7181_v48 = vpack.c.bf16 %v7178_v4, %v7177_v38 }
 0x7c3   : > { %v9788_v8 = vunpack.i.h.bf16 %v12662_v31 }
 0x7c4   : > { %8725 = vmatpush3.bf16.msra.mxu0 %v7183_v29  ;;  %7076 = vmatpush1.bf16.msra.mxu1 %v7052_v20  ;;  %v7402_v11 = vsel %vm1216_vm7, %v9778_v30, %v9783_v7  ;;  %v9787_v29 = vunpack.i.l.bf16 %v12662_v31 }
 0x7c5   : > { %v12674_v37 = vpop.permute.xlu1 %9790  ;;  %7202 = vmatprep.subr.bf16.mxu1 %v7185_v22  ;;  %8730 = vmatprep.subr.bf16.mxu0 %v9980_v2 }
 0x7c6   : > { %v12683_v15 = vpop.permute.xlu0 %9795  ;;  %v9793_v44 = vunpack.i.h.bf16 %v12674_v37  ;;  %v9792_v63 = vunpack.i.l.bf16 %v12674_v37 }
 0x7c7   : > { %8727 = vmatmul.mubr.msk.bf16.vlgmr.msra.gmra.mxu0 %vm2083_vm1, %v6757_v41  ;;  %8230 = vmatmul.mubr.msk.bf16.vlgmr.msra.gmra.mxu1 %vm2083_vm1, %v6756_v58  ;;  %v7401_v58 = vsel %vm1216_vm7, %v9777_v56, %v9782_v33  ;;  %v9797_v36 = vunpack.i.l.bf16 %v12683_v15 }
 0x7c8   : > { %8731 = vmatpush3.bf16.msk.msra.mxu0 %vm11392_vm11, %v8248_v46  ;;  %7203 = vmatpush1.bf16.msra.mxu1 %v7184_v43  ;;  %v9798_v46 = vunpack.i.h.bf16 %v12683_v15  ;;  %v7408_v25 = vpack.c.bf16 %v7402_v11, %v7401_v58  ;;  %v7391_v21 = vsel %vm1216_vm7, %v9787_v29, %v9792_v63  ;;  %v7392_v55 = vsel %vm1216_vm7, %v9788_v8, %v9793_v44 }
 0x7c9   : > { %v12701_v24 = vpop.permute.xlu1 %9805  ;;  %8732 = vmatprep.subr.bf16.mxu0 %v9980_v2  ;;  %7204 = vmatprep.subr.bf16.mxu1 %v7182_v54  ;;  %v7399_v0 = vsel %vm1216_vm7, %v9792_v63, %v9797_v36  ;;  %v7395_v62 = vsel %vm1216_vm7, %v9797_v36, %v9787_v29 }
 0x7ca   : > { %v12703_v47 = vpop.permute.xlu0 %9800  ;;  %8734 = vmatprep.mubr.msk.bf16.mxu0 %vm9981_vm8, %v9980_v2  ;;  %7222 = vmatprep.mubr.bf16.mxu1 %v13141_v17  ;;  %v7400_v18 = vsel %vm1216_vm7, %v9793_v44, %v9798_v46  ;;  %v9807_v13 = vunpack.i.l.bf16 %v12701_v24  ;;  %v7396_v15 = vsel %vm1216_vm7, %v9798_v46, %v9788_v8 }
 0x7cb   : > { %v9803_v27 = vunpack.i.h.bf16 %v12703_v47  ;;  %v9802_v35 = vunpack.i.l.bf16 %v12703_v47  ;;  %v7405_v59 = vpack.c.bf16 %v7400_v18, %v7399_v0  ;;  %v7403_v44 = vpack.c.bf16 %v7396_v15, %v7395_v62 }
 0x7cc   : > { %8733 = vmatpush3.bf16.msk.msra.mxu0 %vm11392_vm11, %v8251_v14  ;;  %7205 = vmatpush1.bf16.msra.mxu1 %v7181_v48  ;;  %v9808_v14 = vunpack.i.h.bf16 %v12701_v24  ;;  %vm13151_vm11 = vmmov %vm13145_vm2 }
 0x7cd   : > { %v12722_v52 = vpop.permute.xlu1 %9815  ;;  %8738 = vmatprep.subr.bf16.mxu0 %v9980_v2  ;;  %8236 = vmatprep.subr.msk.bf16.mxu1 %vm11382_vm4, %v8235_v10  ;;  %v7530_v61 = vsel %vm13146_vm3, %v9802_v35, %v9807_v13  ;;  %vm13157_vm3 = vmmov %vm13155_vm0 }
 0x7ce   : > { %v12727_v60 = vpop.permute.xlu0 %9810  ;;  %v9818_v12 = vunpack.i.h.bf16 %v12722_v52  ;;  %v9817_v37 = vunpack.i.l.bf16 %v12722_v52 }
 0x7cf   : > { %8735 = vmatmul.mubr.msk.bf16.vlgmr.msra.gmra.mxu0 %vm2083_vm1, %v6758_v6  ;;  %8232 = vmatmul.mubr.msk.bf16.vlgmr.msra.gmra.mxu1 %vm2083_vm1, %v6757_v41  ;;  %v9813_v39 = vunpack.i.h.bf16 %v12727_v60  ;;  %v9812_v54 = vunpack.i.l.bf16 %v12727_v60 }
 0x7d0   : > { %8739 = vmatpush3.bf16.msra.mxu0 %v7408_v25  ;;  %8239 = vmatpush1.bf16.msk.msra.mxu1 %vm11411_vm15, %v8238_v49 }
 0x7d1   : > { %v9831_v28 = vpop.permute.xlu1 %9830  ;;  %8740 = vmatprep.subr.bf16.mxu0 %v9980_v2  ;;  %8242 = vmatprep.subr.msk.bf16.mxu1 %vm11382_vm4, %v8241_v1  ;;  %v7531_v1 = vsel %vm13145_vm2, %v9803_v27, %v9808_v14  ;;  %vm13150_vm4 = vmmov %vm13145_vm2  ;;  %v7521_v18 = vsel %vm13155_vm0, %v9813_v39, %v9818_v12 }
 0x7d2   : > { %v9833_v53 = vunpack.i.h.bf16 %v9831_v28  ;;  %v9832_v45 = vunpack.i.l.bf16 %v9831_v28  ;;  %v12751_v3 = vpop.permute.xlu0 %9820  ;;  %8742 = vmatprep.mubr.msk.bf16.mxu0 %vm9981_vm8, %v9980_v2  ;;  %7315 = vmatprep.mubr.bf16.mxu1 %v13141_v17 }
 0x7d3   : > { %v9823_v20 = vunpack.i.h.bf16 %v12751_v3  ;;  %v9822_v16 = vunpack.i.l.bf16 %v12751_v3 }
 0x7d4   : > { %v7398_v50 = vsel %vm1216_vm7, %v9783_v7, %v9833_v53  ;;  %v7393_v19 = vsel %vm1216_vm7, %v9832_v45, %v9777_v56  ;;  %v7394_v49 = vsel %vm1216_vm7, %v9833_v53, %v9778_v30  ;;  %v7397_v31 = vsel %vm1216_vm7, %v9782_v33, %v9832_v45  ;;  %8741 = vmatpush3.bf16.msra.mxu0 %v7405_v59  ;;  %vm13149_vm7 = vmmov %vm13145_vm2 }
 0x7d5   : > { %v12787_v22 = vpop.permute.xlu1 %9835  ;;  %v7406_v41 = vpack.c.bf16 %v7398_v50, %v7397_v31  ;;  %8245 = vmatpush1.bf16.msk.msra.mxu1 %vm11411_vm15, %v8244_v5  ;;  %8746 = vmatprep.subr.bf16.mxu0 %v9980_v2  ;;  %v7407_v7 = vpack.c.bf16 %v7394_v49, %v7393_v19  ;;  %v7537_v33 = vpack.c.bf16 %v7531_v1, %v7530_v61  ;;  %vm13152_vm15 = vmmov %vm13145_vm2 }
 0x7d6   : > { %v12801_v57 = vpop.permute.xlu0 %9825  ;;  %v7529_v9 = vsel %vm13147_vm5, %v9818_v12, %v9823_v20  ;;  %v7528_v51 = vsel %vm13148_vm6, %v9817_v37, %v9822_v16  ;;  %v7404_v5 = vpack.c.bf16 %v7392_v55, %v7391_v21  ;;  %v9838_v38 = vunpack.i.h.bf16 %v12787_v22  ;;  %vm13156_vm2 = vmmov %vm13155_vm0 }
 0x7d7   : > { %8743 = vmatmul.mubr.msk.bf16.vlgmr.msra.gmra.mxu0 %vm2083_vm1, %v12792_v26  ;;  %v9837_v4 = vunpack.i.l.bf16 %v12787_v22  ;;  %v9828_v43 = vunpack.i.h.bf16 %v12801_v57  ;;  %v9827_v30 = vunpack.i.l.bf16 %v12801_v57  ;;  %7424 = vmatprep.subr.bf16.mxu1 %v7407_v7  ;;  %v7534_v63 = vpack.c.bf16 %v7529_v9, %v7528_v51  ;;  %vm13158_vm5 = vmmov %vm13154_vm9 }
 0x7d8   : > { %8246 = vmatmul.mubr.msk.bf16.vlgmr.msra.gmra.mxu1 %vm2083_vm1, %v6758_v6  ;;  %8747 = vmatpush3.bf16.msra.mxu0 %v7537_v33  ;;  %v7520_v24 = vsel %vm13156_vm2, %v9812_v54, %v9817_v37  ;;  %v7524_v53 = vsel %vm13157_vm3, %v9822_v16, %v9812_v54  ;;  %vm13159_vm6 = vmmov %vm13158_vm5  ;;  %v6761_v33 = vld [vmem:[%s12956_s10 + $0xe] sm:$0x3]  ;;  %vm13167_vm2 = vcmp.lt.s32.totalorder %v13140_v40, 109 }
 0x7d9   : > { %v9846_v56 = vpop.permute.xlu1 %9845  ;;  %7425 = vmatpush1.bf16.msra.mxu1 %v7406_v41  ;;  %8748 = vmatprep.subr.bf16.mxu0 %v9980_v2  ;;  %v7660_v60 = vsel %vm13153_vm10, %v9828_v43, %v9838_v38  ;;  %v7659_v25 = vsel %vm13154_vm9, %v9827_v30, %v9837_v4  ;;  %v7533_v50 = vpack.c.bf16 %v7521_v18, %v7520_v24  ;;  %vm13168_vm3 = vmmov %vm13167_vm2 }
 0x7da   : > { %v9848_v48 = vunpack.i.h.bf16 %v9846_v56  ;;  %v9847_v58 = vunpack.i.l.bf16 %v9846_v56  ;;  %v12825_v11 = vpop.permute.xlu0 %9840  ;;  %7426 = vmatprep.subr.bf16.mxu1 %v7404_v5  ;;  %8750 = vmatprep.mubr.msk.bf16.mxu0 %vm9981_vm8, %v9980_v2  ;;  %v7666_v10 = vpack.c.bf16 %v7660_v60, %v7659_v25 }
 0x7db   : > { %7444 = vmatprep.mubr.bf16.mxu1 %v13141_v17  ;;  %v9843_v22 = vunpack.i.h.bf16 %v12825_v11 }
 0x7dc   : > { %v7527_v46 = vsel %vm13149_vm7, %v9808_v14, %v9848_v48  ;;  %v7522_v36 = vsel %vm13150_vm4, %v9847_v58, %v9802_v35  ;;  %v7523_v52 = vsel %vm13151_vm11, %v9848_v48, %v9803_v27  ;;  %v7526_v6 = vsel %vm13152_vm15, %v9807_v13, %v9847_v58  ;;  %8749 = vmatpush3.bf16.msra.mxu0 %v7534_v63  ;;  %v6760_v27 = vld [vmem:[%s12956_s10 + $0xc] sm:$0x3]  ;;  %vm13160_vm7 = vmmov %vm13155_vm0 }
 0x7dd   : > { %v9851_v34 = vpop.permute.xlu1 %9850  ;;  %v7536_v47 = vpack.c.bf16 %v7523_v52, %v7522_v36  ;;  %7427 = vmatpush1.bf16.msra.mxu1 %v7403_v44  ;;  %v7535_v35 = vpack.c.bf16 %v7527_v46, %v7526_v6  ;;  %8754 = vmatprep.subr.bf16.mxu0 %v9980_v2  ;;  %v7525_v19 = vsel %vm13160_vm7, %v9823_v20, %v9813_v39  ;;  %vm13161_vm4 = vmmov %vm13158_vm5 }
 0x7de   : > { %v9853_v0 = vunpack.i.h.bf16 %v9851_v34  ;;  %v9852_v14 = vunpack.i.l.bf16 %v9851_v34  ;;  %v9856_v13 = vpop.permute.xlu0 %9855  ;;  %vm13162_vm11 = vmmov %vm13161_vm4  ;;  %v7532_v61 = vpack.c.bf16 %v7525_v19, %v7524_v53 }
 0x7df   : > { %v9858_v28 = vunpack.i.h.bf16 %v9856_v13  ;;  %v9857_v8 = vunpack.i.l.bf16 %v9856_v13  ;;  %7553 = vmatprep.subr.bf16.mxu1 %v7536_v47  ;;  %8751 = vmatmul.mubr.msk.bf16.vlgmr.msra.gmra.mxu0 %vm2083_vm1, %v6760_v27  ;;  %vm13163_vm15 = vmmov %vm13161_vm4 }
 0x7e0   : > { %8254 = vmatmul.mubr.msk.bf16.vlgmr.msra.gmra.mxu1 %vm2083_vm1, %v12792_v26  ;;  %8755 = vmatpush3.bf16.msra.mxu0 %v7666_v10  ;;  %vm13164_vm10 = vmmov %vm13161_vm4  ;;  %v9842_v26 = vunpack.i.l.bf16 %v12825_v11 }
 0x7e1   : > { %v7658_v45 = vsel %vm13158_vm5, %v9853_v0, %v9858_v28  ;;  %v7657_v29 = vsel %vm13159_vm6, %v9852_v14, %v9857_v8  ;;  %v9866_v59 = vpop.permute.xlu1 %9865  ;;  %7554 = vmatpush1.bf16.msra.mxu1 %v7535_v35  ;;  %8756 = vmatprep.subr.bf16.mxu0 %v9980_v2  ;;  %vm13165_vm9 = vmmov %vm13161_vm4 }
 0x7e2   : > { %v7663_v49 = vpack.c.bf16 %v7658_v45, %v7657_v29  ;;  %v9868_v16 = vunpack.i.h.bf16 %v9866_v59  ;;  %v9867_v31 = vunpack.i.l.bf16 %v9866_v59  ;;  %v9861_v21 = vpop.permute.xlu0 %9860  ;;  %7555 = vmatprep.subr.bf16.mxu1 %v7533_v50  ;;  %8758 = vmatprep.mubr.msk.bf16.mxu0 %vm9981_vm8, %v9980_v2  ;;  %v7649_v9 = vsel %vm13165_vm9, %v9842_v26, %v9852_v14  ;;  %vm13166_vm0 = vmmov %vm13161_vm4  ;;  %v6762_v45 = vld [vmem:[%s12956_s10 + $0x10] sm:$0x3] }
 0x7e3   : > { %7573 = vmatprep.mubr.bf16.mxu1 %v13141_v17  ;;  %v9863_v41 = vunpack.i.h.bf16 %v9861_v21  ;;  %v9862_v57 = vunpack.i.l.bf16 %v9861_v21  ;;  %v7650_v51 = vsel %vm13166_vm0, %v9843_v22, %v9853_v0  ;;  %vm13169_vm5 = vmmov %vm13166_vm0 }
 0x7e4   : > { %v7651_v55 = vsel %vm13161_vm4, %v9867_v31, %v9827_v30  ;;  %v7652_v3 = vsel %vm13162_vm11, %v9868_v16, %v9828_v43  ;;  %v7655_v20 = vsel %vm13163_vm15, %v9837_v4, %v9867_v31  ;;  %v7656_v1 = vsel %vm13164_vm10, %v9838_v38, %v9868_v16  ;;  %8757 = vmatpush3.bf16.msra.mxu0 %v7663_v49  ;;  %vm13170_vm6 = vmmov %vm13166_vm0 }
 0x7e5   : > { %v9871_v12 = vpop.permute.xlu1 %9870  ;;  %v7665_v37 = vpack.c.bf16 %v7652_v3, %v7651_v55  ;;  %v7664_v5 = vpack.c.bf16 %v7656_v1, %v7655_v20  ;;  %7556 = vmatpush1.bf16.msra.mxu1 %v7532_v61  ;;  %8762 = vmatprep.subr.bf16.mxu0 %v9980_v2  ;;  %v7653_v43 = vsel %vm13169_vm5, %v9857_v8, %v9842_v26  ;;  %vm13171_vm7 = vmmov %vm13167_vm2 }
 0x7e6   : > { %v9873_v62 = vunpack.i.h.bf16 %v9871_v12  ;;  %v9872_v15 = vunpack.i.l.bf16 %v9871_v12  ;;  %v9876_v7 = vpop.permute.xlu0 %9875  ;;  %v7654_v39 = vsel %vm13170_vm6, %v9858_v28, %v9843_v22  ;;  %v7662_v58 = vpack.c.bf16 %v7650_v51, %v7649_v9  ;;  %vm13172_vm4 = vmmov %vm13167_vm2 }
 0x7e7   : > { %7682 = vmatprep.subr.bf16.mxu1 %v7665_v37  ;;  %8759 = vmatmul.mubr.msk.bf16.vlgmr.msra.gmra.mxu0 %vm2083_vm1, %v6761_v33  ;;  %vm13173_vm11 = vmmov %vm13167_vm2  ;;  %v7661_v52 = vpack.c.bf16 %v7654_v39, %v7653_v43  ;;  %v9878_v6 = vunpack.i.h.bf16 %v9876_v7  ;;  %v9877_v60 = vunpack.i.l.bf16 %v9876_v7 }
 0x7e8   : > { %v7788_v38 = vsel %vm13167_vm2, %v9862_v57, %v9872_v15  ;;  %v7789_v4 = vsel %vm13168_vm3, %v9863_v41, %v9873_v62  ;;  %8256 = vmatmul.mubr.msk.bf16.vlgmr.msra.gmra.mxu1 %vm2083_vm1, %v6760_v27  ;;  %8766 = vmatprep.mubr.msk.bf16.mxu0 %vm9981_vm8, %v9980_v2  ;;  %vm13174_vm15 = vmmov %vm13167_vm2 }
 0x7e9   : > { %v7795_v30 = vpack.c.bf16 %v7789_v4, %v7788_v38  ;;  %v9881_v56 = vpop.permute.xlu1 %9880  ;;  %7683 = vmatpush1.bf16.msra.mxu1 %v7664_v5  ;;  %7702 = vmatprep.mubr.bf16.mxu1 %v13141_v17  ;;  %vm13175_vm8 = vmmov %vm13167_vm2 }
 0x7ea   : > { %v9883_v54 = vunpack.i.h.bf16 %v9881_v56  ;;  %v9882_v48 = vunpack.i.l.bf16 %v9881_v56  ;;  %v9891_v11 = vpop.permute.xlu0 %9890  ;;  %7684 = vmatprep.subr.bf16.mxu1 %v7662_v58  ;;  %vm13176_vm10 = vmmov %vm13167_vm2 }
 0x7eb   : > { %8763 = vmatpush3.bf16.msra.mxu0 %v7795_v30  ;;  %v9893_v47 = vunpack.i.h.bf16 %v9891_v11  ;;  %v9892_v18 = vunpack.i.l.bf16 %v9891_v11  ;;  %vm13177_vm9 = vmmov %vm13167_vm2 }
 0x7ec   : > { %v7780_v44 = vsel %vm13171_vm7, %v9882_v48, %v9862_v57  ;;  %v7781_v63 = vsel %vm13172_vm4, %v9883_v54, %v9863_v41  ;;  %v7784_v46 = vsel %vm13173_vm11, %v9872_v15, %v9882_v48  ;;  %v7785_v36 = vsel %vm13174_vm15, %v9873_v62, %v9883_v54  ;;  %8764 = vmatprep.subr.bf16.mxu0 %v9980_v2  ;;  %vm13178_vm0 = vmmov %vm13167_vm2 }
 0x7ed   : > { %v9886_v25 = vpop.permute.xlu1 %9885  ;;  %v7794_v34 = vpack.c.bf16 %v7781_v63, %v7780_v44  ;;  %v7793_v14 = vpack.c.bf16 %v7785_v36, %v7784_v46  ;;  %7685 = vmatpush1.bf16.msra.mxu1 %v7661_v52  ;;  %vm13179_vm2 = vmmov %vm13178_vm0 }
 0x7ee   : > { %v9888_v24 = vunpack.i.h.bf16 %v9886_v25  ;;  %v9887_v0 = vunpack.i.l.bf16 %v9886_v25  ;;  %v7782_v2 = vsel %vm13179_vm2, %v9892_v18, %v9877_v60  ;;  %vm13180_vm3 = vmmov %vm13178_vm0 }
 0x7ef   : > { %7811 = vmatprep.subr.bf16.mxu1 %v7794_v34  ;;  %v7783_v53 = vsel %vm13180_vm3, %v9893_v47, %v9878_v6 }
 0x7f0   : > { %v7778_v13 = vsel %vm13175_vm8, %v9877_v60, %v9887_v0  ;;  %v7779_v27 = vsel %vm13176_vm10, %v9878_v6, %v9888_v24  ;;  %v7786_v35 = vsel %vm13177_vm9, %v9887_v0, %v9892_v18  ;;  %v7787_v28 = vsel %vm13178_vm0, %v9888_v24, %v9893_v47  ;;  %8258 = vmatmul.mubr.msk.bf16.vlgmr.msra.gmra.mxu1 %vm2083_vm1, %v6761_v33 }
 0x7f1   : > { %v7792_v8 = vpack.c.bf16 %v7787_v28, %v7786_v35  ;;  %v7791_v10 = vpack.c.bf16 %v7779_v27, %v7778_v13  ;;  %7812 = vmatpush1.bf16.msra.mxu1 %v7793_v14  ;;  %7831 = vmatprep.mubr.bf16.mxu1 %v13141_v17  ;;  %v7790_v29 = vpack.c.bf16 %v7783_v53, %v7782_v2 }
 0x7f3   : > { %8765 = vmatpush3.bf16.msra.mxu0 %v7792_v8  ;;  %7813 = vmatprep.subr.bf16.mxu1 %v7791_v10 }
 0x7f5   : > { %7814 = vmatpush1.bf16.msra.mxu1 %v7790_v29 }
 0x7f6   : > { %8767 = vmatmul.mubr.msk.bf16.vlgmr.msra.gmra.mxu0 %vm2083_vm1, %v6762_v45 }
 0x7f8   : > { %8260 = vmatmul.mubr.msk.bf16.vlgmr.msra.gmra.mxu1 %vm2083_vm1, %v6762_v45 }
 0x86f   : > { %v6926_v59 = vpop.f32.mrf.mxu0 }
 0x871   : > { %v8704_v40 = vpop.f32.mrf.mxu0 }
 0x873   : > { %v6929_v50 = vpop.f32.mrf.mxu0 }
 0x875   : > { %v8705_v19 = vpop.f32.mrf.mxu0 }
 0x877   : > { %v7010_v49 = vpop.f32.mrf.mxu0  ;;  %v6885_v16 = vpop.f32.mrf.mxu1 }
 0x878   : > { %v7011_v14 = vadd.f32 %v7010_v49, %v6926_v59 }
 0x879   : > { %v8712_v31 = vpop.f32.mrf.mxu0  ;;  %v6887_v21 = vpop.f32.mrf.mxu1 }
 0x87b   : > { %v7013_v55 = vpop.f32.mrf.mxu0  ;;  %v6889_v3 = vpop.f32.mrf.mxu1 }
 0x87d   : > { %v8713_v20 = vpop.f32.mrf.mxu0  ;;  %v6890_v1 = vpop.f32.mrf.mxu1 }
 0x87f   : > { %v7136_v61 = vpop.f32.mrf.mxu0  ;;  %v6969_v17 = vpop.f32.mrf.mxu1 }
 0x880   : > { %v7144_v8 = vadd.f32 %v7136_v61, %v7011_v14  ;;  %v6970_v53 = vadd.f32 %v6969_v17, %v6885_v16 }
 0x881   : > { %v8720_v22 = vpop.f32.mrf.mxu0  ;;  %v6971_v26 = vpop.f32.mrf.mxu1 }
 0x882   : > { %v6972_v50 = vadd.f32 %v6971_v26, %v6887_v21 }
 0x883   : > { %v7139_v12 = vpop.f32.mrf.mxu0  ;;  %v6973_v37 = vpop.f32.mrf.mxu1 }
 0x885   : > { %v8721_v41 = vpop.f32.mrf.mxu0  ;;  %v6974_v57 = vpop.f32.mrf.mxu1 }
 0x887   : > { %v7265_v62 = vpop.f32.mrf.mxu0  ;;  %v7095_v15 = vpop.f32.mrf.mxu1 }
 0x888   : > { %v7273_v45 = vadd.f32 %v7265_v62, %v7144_v8  ;;  %v7142_v19 = vadd.f32 %v7095_v15, %v6970_v53  ;;  %v7886_v62 = vpop.permute.xlu1 %7885 }
 0x889   : > { %v8728_v7 = vpop.f32.mrf.mxu0  ;;  %v7097_v33 = vpop.f32.mrf.mxu1 }
 0x88a   : > { %v7143_v20 = vadd.f32 %v7097_v33, %v6972_v50 }
 0x88b   : > { %v7268_v9 = vpop.f32.mrf.mxu0  ;;  %v7099_v51 = vpop.f32.mrf.mxu1 }
 0x88d   : > { %v8729_v5 = vpop.f32.mrf.mxu0  ;;  %v7100_v38 = vpop.f32.mrf.mxu1 }
 0x88f   : > { %v7358_v4 = vpop.f32.mrf.mxu0  ;;  %v7224_v43 = vpop.f32.mrf.mxu1 }
 0x890   : > { %v7366_v31 = vadd.f32 %v7358_v4, %v7273_v45  ;;  %v7271_v1 = vadd.f32 %v7224_v43, %v7142_v19 }
 0x891   : > { %v8736_v30 = vpop.f32.mrf.mxu0  ;;  %v7226_v56 = vpop.f32.mrf.mxu1 }
 0x892   : > { %v7272_v49 = vadd.f32 %v7226_v56, %v7143_v20 }
 0x893   : > { %v7361_v39 = vpop.f32.mrf.mxu0  ;;  %v7228_v54 = vpop.f32.mrf.mxu1 }
 0x895   : > { %v8737_v48 = vpop.f32.mrf.mxu0  ;;  %v7229_v58 = vpop.f32.mrf.mxu1 }
 0x897   : > { %v7487_v11 = vpop.f32.mrf.mxu0 }
 0x898   : > { %v7317_v44 = vpop.f32.mrf.mxu1  ;;  %v7495_v22 = vadd.f32 %v7487_v11, %v7366_v31 }
 0x899   : > { %v8744_v63 = vpop.f32.mrf.mxu0  ;;  %v7364_v12 = vadd.f32 %v7317_v44, %v7271_v1 }
 0x89a   : > { %v7319_v46 = vpop.f32.mrf.mxu1 }
 0x89b   : > { %v7490_v36 = vpop.f32.mrf.mxu0  ;;  %v7365_v61 = vadd.f32 %v7319_v46, %v7272_v49 }
 0x89c   : > { %v7321_v52 = vpop.f32.mrf.mxu1 }
 0x89d   : > { %v8745_v6 = vpop.f32.mrf.mxu0 }
 0x89e   : > { %v7322_v60 = vpop.f32.mrf.mxu1 }
 0x89f   : > { %v7616_v25 = vpop.f32.mrf.mxu0 }
 0x8a0   : > { %v7446_v34 = vpop.f32.mrf.mxu1  ;;  %v7624_v37 = vadd.f32 %v7616_v25, %v7495_v22 }
 0x8a1   : > { %v8752_v47 = vpop.f32.mrf.mxu0  ;;  %v7493_v57 = vadd.f32 %v7446_v34, %v7364_v12 }
 0x8a2   : > { %v7448_v18 = vpop.f32.mrf.mxu1 }
 0x8a3   : > { %v7619_v24 = vpop.f32.mrf.mxu0  ;;  %v7494_v21 = vadd.f32 %v7448_v18, %v7365_v61 }
 0x8a4   : > { %v7450_v0 = vpop.f32.mrf.mxu1 }
 0x8a5   : > { %v8753_v13 = vpop.f32.mrf.mxu0 }
 0x8a6   : > { %v7451_v27 = vpop.f32.mrf.mxu1 }
 0x8a7   : > { %v7745_v35 = vpop.f32.mrf.mxu0 }
 0x8a8   : > { %v7575_v28 = vpop.f32.mrf.mxu1  ;;  %v7753_v7 = vadd.f32 %v7745_v35, %v7624_v37 }
 0x8a9   : > { %v8760_v10 = vpop.f32.mrf.mxu0  ;;  %v7622_v26 = vadd.f32 %v7575_v28, %v7493_v57 }
 0x8aa   : > { %v7577_v2 = vpop.f32.mrf.mxu1 }
 0x8ab   : > { %v7748_v29 = vpop.f32.mrf.mxu0  ;;  %v7623_v33 = vadd.f32 %v7577_v2, %v7494_v21 }
 0x8ac   : > { %v7579_v40 = vpop.f32.mrf.mxu1 }
 0x8ad   : > { %v8761_v55 = vpop.f32.mrf.mxu0 }
 0x8ae   : > { %v7580_v3 = vpop.f32.mrf.mxu1 }
 0x8b0   : > { %v7704_v59 = vpop.f32.mrf.mxu1 }
 0x8b1   : > { %v7751_v5 = vadd.f32 %v7704_v59, %v7622_v26 }
 0x8b2   : > { %v7706_v41 = vpop.f32.mrf.mxu1 }
 0x8b3   : > { %v7752_v30 = vadd.f32 %v7706_v41, %v7623_v33 }
 0x8b4   : > { %v7708_v16 = vpop.f32.mrf.mxu1 }
 0x8b6   : > { %v7874_v17 = vpop.f32.mrf.mxu0  ;;  %v7709_v9 = vpop.f32.mrf.mxu1 }
 0x8b7   : > { %v7882_v15 = vadd.f32 %v7874_v17, %v7753_v7 }
 0x8b8   : > { %v8768_v51 = vpop.f32.mrf.mxu0  ;;  %v7833_v4 = vpop.f32.mrf.mxu1 }
 0x8b9   : > { %v7890_v38 = vadd.f32 %v7886_v62, %v7882_v15  ;;  %v7880_v39 = vadd.f32 %v7833_v4, %v7751_v5 }
 0x8ba   : > { %v7877_v43 = vpop.f32.mrf.mxu0  ;;  %v7835_v54 = vpop.f32.mrf.mxu1 }
 0x8bb   : > { %v7893_v56 = vsel %vm1901_vm13, %v7890_v38, 0.0  ;;  %v7888_v58 = vadd.f32 %v7886_v62, %v7880_v39  ;;  %v7881_v11 = vadd.f32 %v7835_v54, %v7752_v30 }
 0x8bc   : > { %7899 = vst [vmem:[%s10075_s19 + $0x8] sm:$0x7] %v7893_v56  ;;  %v8769_v48 = vpop.f32.mrf.mxu0  ;;  %v7837_v44 = vpop.f32.mrf.mxu1 }
 0x8bd   : > { %v7889_v63 = vadd.f32 %v7886_v62, %v7881_v11  ;;  %v7891_v36 = vsel %vm1899_vm12, %v7888_v58, 0.0 }
 0x8be   : > { %v7838_v46 = vpop.f32.mrf.mxu1 }
 0x8bf   : > { %v7892_v52 = vsel %vm1900_vm14, %v7889_v63, 0.0 }
 0x8c0   : > { %v7896_v6 = vcombine.low %v7891_v36, %v7892_v52 }
 0x8c2   : > { %7898 = vst [vmem:[%s10075_s19] sm:$0x77] %v7896_v6 }
 0x8c3 PF: > { %s23_s21 = sadd.s32 1, %s9952_s21  }
 0x8c4   : > { %p20_p2 = scmp.ge.s32.totalorder %s23_s21, 4  }
 0x8c6   :  { %22 = sbr.rel (!%p20_p2) target bundleno = 1 (0x1), region = 125 }
 0x8cb   :  { %7921 = vsyncpa [#allocation4], 1 }
 0x8cc   :  { %7923 = vsyncpa [#allocation4 + $0x1], 1 }

</bundles_post_ra>
